<compile_context>
chip_gen: v7x
topology: tpu7x:2x2x1
jax: 0.10.0
libtpu: 0.0.40
codegen_flags: <defaults>
</compile_context>

<pallas_src>
import functools

import numpy as np

import jax
import jax.numpy as jnp
from jax import lax
from jax.experimental import pallas as pl
from jax.experimental.pallas import tpu as pltpu


# ----------------------------------------------------------------------------
# Host-built (tiny) constants
# ----------------------------------------------------------------------------
def _make_border_masks(H_sp, W_sp):
    """(9, S, 1) 0/1 masks: for tap (dh, dw), mask[s]=1 iff the 3x3 neighbour
    (r+dh-1, c+dw-1) of token s=(r, c) lies inside the window (zero pad)."""
    S = H_sp * W_sp
    s = np.arange(S)
    r, c = s // W_sp, s % W_sp
    m = np.zeros((9, S, 1), np.float32)
    for tap in range(9):
        dh, dw = tap // 3, tap % 3
        rr, cc = r + dh - 1, c + dw - 1
        valid = (rr >= 0) & (rr < H_sp) & (cc >= 0) & (cc < W_sp)
        m[tap, valid, 0] = 1.0
    return jnp.asarray(m)


def _is_v7x():
    try:
        kind = jax.devices()[0].device_kind.lower()
    except Exception:
        kind = ""
    return ("v7" in kind) or ("7x" in kind)


def _plan_blocks(NW, nh, S, hd):
    """Pick windows-per-block and VMEM limit per TPU generation."""
    if _is_v7x():
        # 64 MiB physical VMEM per TC, 2 TensorCores -> keep >=4 grid steps
        # so each core still gets >=2 pipelined steps.
        budget, vmem_limit, min_steps = 28 << 20, 48 << 20, 4
    else:
        # v5e / v6e: 128 MiB physical VMEM, single TC -> fewer, larger steps.
        budget, vmem_limit, min_steps = 72 << 20, 100 << 20, 2

    def footprint(wb):
        g = wb * nh
        io = 2 * 4 * g * S * hd * 4       # double-buffered q, k, v, out blocks
        attn = 3 * g * S * S * 4          # scores / exp / p temporaries
        work = 6 * g * S * hd * 4         # scratch acc, pv, bf16 casts, rolls
        return io + attn + work + (1 << 20)

    best = 1
    for wb in range(1, NW + 1):
        if NW % wb:
            continue
        if NW // wb < min_steps:
            break
        if footprint(wb) <= budget:
            best = wb
    return best, vmem_limit


# ----------------------------------------------------------------------------
# Fused Pallas kernel: LePE depthwise conv + windowed multi-head attention
# ----------------------------------------------------------------------------
def _fused_lepe_attn_kernel(q_ref, k_ref, v_ref, w_ref, b_ref, m_ref,
                            o_ref, acc_ref, *, w_sp, mxu_dtype):
    f32 = jnp.float32
    WB, nh, S, hd = q_ref.shape
    G = WB * nh

    # ---- LePE: 3x3 depthwise conv on V = 9 shifted VPU FMAs (XLU rolls). ----
    v = v_ref[...].astype(f32)                      # (WB, nh, S, hd)
    v3 = v.reshape(G, S, hd)                        # free leading-dim merge
    w = w_ref[...].astype(f32)                      # (9, nh, hd) tap weights
    bias = b_ref[...].astype(f32)                   # (nh, hd)
    border = m_ref[...]                             # (9, S, 1) in-window masks

    # f32 VMEM scratch accumulator bounds live ranges across the 9-tap loop.
    acc_ref[...] = jnp.broadcast_to(bias[None, :, None, :], (WB, nh, S, hd))
    for tap in range(9):
        dh, dw = tap // 3, tap % 3
        off = (dh - 1) * w_sp + (dw - 1)            # token-space shift
        if off == 0:
            shifted = v3
        else:
            # shifted[s] = v[s + off]; wrapped entries are zeroed by `border`.
            shifted = pltpu.roll(v3, shift=(-off) % S, axis=1)
        shifted = shifted.reshape(WB, nh, S, hd)
        bw = border[tap][None, :, :] * w[tap][:, None, :]   # (nh, S, hd), tiny
        acc_ref[...] += shifted * bw[None, :, :, :]

    # ---- Attention: head-batched bf16 MXU dots, f32 accumulation. ----------
    q3 = q_ref[...].astype(mxu_dtype).reshape(G, S, hd)   # qk scale already in q
    k3 = k_ref[...].astype(mxu_dtype).reshape(G, S, hd)
    s = lax.dot_general(q3, k3, (((2,), (2,)), ((0,), (0,))),
                        preferred_element_type=f32)        # (G, S, S)
    s = s - jnp.max(s, axis=-1, keepdims=True)
    p = jnp.exp(s)                                         # f32 numerator
    denom = jnp.sum(p, axis=-1, keepdims=True)             # (G, S, 1) f32
    pv = lax.dot_general(p.astype(mxu_dtype), v3.astype(mxu_dtype),
                         (((2,), (1,)), ((0,), (0,))),
                         preferred_element_type=f32)       # (G, S, hd)
    # Normalise the narrow (hd-wide) PV result with the EUP reciprocal.
    pv = pv * pl.reciprocal(denom, approx=True)

    o_ref[...] = (acc_ref[...] + pv.reshape(WB, nh, S, hd)).astype(o_ref.dtype)


def _fused_lepe_attention(q, k, v, conv_w9, conv_b2, border, *, w_sp,
                          windows_per_block=None, mxu_dtype=jnp.bfloat16):
    NW, nh, S, hd = q.shape
    wb_auto, vmem_limit = _plan_blocks(NW, nh, S, hd)
    WB = windows_per_block if windows_per_block is not None else wb_auto
    assert NW % WB == 0

    blk = pl.BlockSpec((WB, nh, S, hd), lambda i: (i, 0, 0, 0))
    # NOTE: for hd < 128 (e.g. the demo hd=8) the lane width is only partially
    # used; realistic CSWin configs (hd>=32) and head packing would improve it.
    cost = pl.CostEstimate(
        flops=4 * NW * nh * S * S * hd + 18 * NW * nh * S * hd,
        transcendentals=NW * nh * S * S,
        bytes_accessed=4 * NW * nh * S * hd * q.dtype.itemsize,
    )
    return pl.pallas_call(
        functools.partial(_fused_lepe_attn_kernel, w_sp=w_sp,
                          mxu_dtype=mxu_dtype),
        out_shape=jax.ShapeDtypeStruct((NW, nh, S, hd), q.dtype),
        grid=(NW // WB,),
        in_specs=[
            blk, blk, blk,
            pl.BlockSpec((9, nh, hd), lambda i: (0, 0, 0)),
            pl.BlockSpec((nh, hd), lambda i: (0, 0)),
            pl.BlockSpec((9, S, 1), lambda i: (0, 0, 0)),
        ],
        out_specs=blk,
        scratch_shapes=[pltpu.VMEM((WB, nh, S, hd), jnp.float32)],
        compiler_params=pltpu.CompilerParams(
            dimension_semantics=("parallel",),
            vmem_limit_bytes=vmem_limit),
        cost_estimate=cost,
    )(q, k, v, conv_w9, conv_b2, border)


# ----------------------------------------------------------------------------
# LePEAttention forward (minimal XLA glue, hot path fully fused in Pallas)
# ----------------------------------------------------------------------------
def lepe_attention_forward(qkv, hw_shape, params, *, mode, split_size,
                           num_heads, qk_scale=None, windows_per_block=None):
    H, W = hw_shape
    _, B, L, C = qkv.shape
    assert L == H * W, "flatten img_tokens has wrong size"
    assert C % num_heads == 0
    if mode == 0:
        H_sp, W_sp = H, split_size
    else:
        H_sp, W_sp = split_size, W
    assert H % H_sp == 0 and W % W_sp == 0
    n_h, n_w = H // H_sp, W // W_sp
    S = H_sp * W_sp
    NW = B * n_h * n_w
    nh = num_heads
    hd = C // nh
    scale = qk_scale if qk_scale is not None else hd ** (-0.5)

    # img2windows + head split: a single XLA transpose (pure reshape when the
    # corresponding split count is 1).  qk scale is folded into q here so it
    # fuses with the transpose instead of burning in-kernel VPU muls.
    x = qkv.reshape(3, B, n_h, H_sp, n_w, W_sp, nh, hd)
    x = x.transpose(0, 1, 2, 4, 6, 3, 5, 7)        # (3,B,n_h,n_w,nh,H_sp,W_sp,hd)
    x = x.reshape(3, NW, nh, S, hd)
    q, k, v = x[0] * jnp.asarray(scale, x.dtype), x[1], x[2]

    conv_w9 = params["conv_w"].reshape(9, nh, hd)   # (3,3,C) channels-last
    conv_b2 = params["conv_b"].reshape(nh, hd)
    border = _make_border_masks(H_sp, W_sp)         # (9, S, 1)

    out_w = _fused_lepe_attention(q, k, v, conv_w9, conv_b2, border,
                                  w_sp=W_sp,
                                  windows_per_block=windows_per_block)
    # TODO(synk): attn_drop omitted (drop prob 0.0 / eval mode).

    # windows2img + head merge (inverse of the transpose above).
    y = out_w.reshape(B, n_h, n_w, nh, H_sp, W_sp, hd)
    y = y.transpose(0, 1, 4, 2, 5, 3, 6)            # (B,n_h,H_sp,n_w,W_sp,nh,hd)
    return y.reshape(B, L, C)


# ----------------------------------------------------------------------------
# Pure-JAX reference (mirrors the PyTorch module) for correctness checking
# ----------------------------------------------------------------------------
def lepe_attention_reference(qkv, hw_shape, params, *, mode, split_size,
                             num_heads, simulate_bf16_dots=False):
    q, k, v = qkv[0], qkv[1], qkv[2]
    H, W = hw_shape
    B, L, C = q.shape
    if mode == 0:
        H_sp, W_sp = H, split_size
    else:
        H_sp, W_sp = split_size, W
    S = H_sp * W_sp
    nh = num_heads
    hd = C // nh
    scale = hd ** (-0.5)

    def rnd(x):
        if simulate_bf16_dots:
            return x.astype(jnp.bfloat16).astype(jnp.float32)
        return x

    def to_windows(x):
        xw = x.reshape(B, H // H_sp, H_sp, W // W_sp, W_sp, C)
        return xw.transpose(0, 1, 3, 2, 4, 5).reshape(-1, S, C)

    qw, kw, vw = to_windows(q), to_windows(k), to_windows(v)
    NW = qw.shape[0]

    v_img = vw.reshape(NW, H_sp, W_sp, C)
    xp = jnp.pad(v_img, ((0, 0), (1, 1), (1, 1), (0, 0)))
    acc = jnp.zeros_like(v_img)
    for dh in range(3):
        for dw in range(3):
            acc = acc + xp[:, dh:dh + H_sp, dw:dw + W_sp, :] * \
                params["conv_w"][dh, dw, :][None, None, None, :]
    lepe_img = acc + params["conv_b"][None, None, None, :]
    lepe = lepe_img.reshape(NW, S, nh, hd).transpose(0, 2, 1, 3)

    def to_heads(xw):
        return xw.reshape(NW, S, nh, hd).transpose(0, 2, 1, 3)

    qh, kh, vh = to_heads(qw), to_heads(kw), to_heads(vw)
    qs, ks, vs = rnd(qh * scale), rnd(kh), rnd(vh)
    s = jnp.einsum("whqd,whkd->whqk", qs, ks,
                   precision=jax.lax.Precision.HIGHEST)
    if simulate_bf16_dots:
        m = jnp.max(s, axis=-1, keepdims=True)
        p_un = jnp.exp(s - m)
        denom = jnp.sum(p_un, axis=-1, keepdims=True)
        out = jnp.einsum("whqk,whkd->whqd", rnd(p_un), vs,
                         precision=jax.lax.Precision.HIGHEST) / denom + lepe
    else:
        p = jax.nn.softmax(s, axis=-1)
        out = jnp.einsum("whqk,whkd->whqd", p, vs,
                         precision=jax.lax.Precision.HIGHEST) + lepe
    x = out.transpose(0, 2, 1, 3).reshape(NW, S, C)
    x = x.reshape(B, H // H_sp, W // W_sp, H_sp, W_sp, C)
    x = x.transpose(0, 1, 3, 2, 4, 5).reshape(B, H * W, C)
    return x


# ----------------------------------------------------------------------------
# Main
# ----------------------------------------------------------------------------
if __name__ == "__main__":
    # Small config consistent with the module: dim=32, 4 heads, split_size=4.
    B, H, W, C = 2, 8, 8, 32
    num_heads, split_size = 4, 4
    L = H * W

    key = jax.random.PRNGKey(0)
    k_qkv, k_w, k_b = jax.random.split(key, 3)

    qkv = jax.random.normal(k_qkv, (3, B, L, C), dtype=jnp.float32)

    # Params of get_v = Conv2d(dim, dim, 3, padding=1, groups=dim);
    # PyTorch weight (C, 1, 3, 3) stored channels-last as (3, 3, C).
    conv_w_torch = 0.05 * jax.random.normal(k_w, (C, 3, 3), dtype=jnp.float32)
    conv_w = jnp.transpose(conv_w_torch, (1, 2, 0))
    conv_b = 0.05 * jax.random.normal(k_b, (C,), dtype=jnp.float32)
    params = {"conv_w": conv_w, "conv_b": conv_b}

    for mode in (0, 1):
        out = lepe_attention_forward(qkv, (H, W), params, mode=mode,
                                     split_size=split_size,
                                     num_heads=num_heads)
        out = jax.block_until_ready(out)
        assert out.shape == (B, L, C), out.shape

        # Strict check against a reference that applies the same bf16 operand
        # rounding at the two dots (validates windowing / LePE / softmax).
        ref_bf = lepe_attention_reference(qkv, (H, W), params, mode=mode,
                                          split_size=split_size,
                                          num_heads=num_heads,
                                          simulate_bf16_dots=True)
        ref_bf = jax.block_until_ready(ref_bf)
        err_bf = float(jnp.max(jnp.abs(out - ref_bf)))
        assert jnp.allclose(out, ref_bf, rtol=5e-3, atol=5e-3), (mode, err_bf)

        # Loose check against the exact f32 reference (covers the bf16 MXU
        # operand rounding adopted for throughput).
        ref = lepe_attention_reference(qkv, (H, W), params, mode=mode,
                                       split_size=split_size,
                                       num_heads=num_heads)
        ref = jax.block_until_ready(ref)
        err = float(jnp.max(jnp.abs(out - ref)))
        assert jnp.allclose(out, ref, rtol=1e-2, atol=7e-2), (mode, err)

    print("KERNEL_OK")
</pallas_src>

<mosaic_0001>
module attributes {stable_mosaic.version = 11 : i64} {
  func.func @_fused_lepe_attn_kernel(%arg0: i32, %arg1: memref<2x4x32x8xf32, #tpu.memory_space<vmem>>, %arg2: memref<2x4x32x8xf32, #tpu.memory_space<vmem>>, %arg3: memref<2x4x32x8xf32, #tpu.memory_space<vmem>>, %arg4: memref<9x4x8xf32, #tpu.memory_space<vmem>>, %arg5: memref<4x8xf32, #tpu.memory_space<vmem>>, %arg6: memref<9x32x1xf32, #tpu.memory_space<vmem>>, %arg7: memref<2x4x32x8xf32, #tpu.memory_space<vmem>>, %arg8: memref<2x4x32x8xf32, #tpu.memory_space<vmem>>) attributes {dimension_semantics = [#tpu.dimension_semantics<parallel>], iteration_bounds = array<i64: 2>, scalar_prefetch = 0 : i64, scratch_operands = 1 : i64, tpu.core_type = #tpu.core_type<tc>, window_params = [{transform_indices = @transform_0, window_bounds = array<i64: 2, 4, 32, 8>}, {transform_indices = @transform_1, window_bounds = array<i64: 2, 4, 32, 8>}, {transform_indices = @transform_2, window_bounds = array<i64: 2, 4, 32, 8>}, {pipeline_mode = #tpu.pipeline_mode<synchronous>, transform_indices = @transform_3, window_bounds = array<i64: 9, 4, 8>}, {pipeline_mode = #tpu.pipeline_mode<synchronous>, transform_indices = @transform_4, window_bounds = array<i64: 4, 8>}, {pipeline_mode = #tpu.pipeline_mode<synchronous>, transform_indices = @transform_5, window_bounds = array<i64: 9, 32, 1>}, {transform_indices = @transform_6, window_bounds = array<i64: 2, 4, 32, 8>}]} {
    %c0 = arith.constant 0 : index
    %c0_0 = arith.constant 0 : index
    %c0_1 = arith.constant 0 : index
    %c0_2 = arith.constant 0 : index
    %0 = vector.load %arg3[%c0, %c0_0, %c0_1, %c0_2] : memref<2x4x32x8xf32, #tpu.memory_space<vmem>>, vector<2x4x32x8xf32>
    %1 = vector.shape_cast %0 : vector<2x4x32x8xf32> to vector<8x32x8xf32>
    %c0_3 = arith.constant 0 : index
    %c0_4 = arith.constant 0 : index
    %c0_5 = arith.constant 0 : index
    %2 = vector.load %arg4[%c0_3, %c0_4, %c0_5] : memref<9x4x8xf32, #tpu.memory_space<vmem>>, vector<9x4x8xf32>
    %c0_6 = arith.constant 0 : index
    %c0_7 = arith.constant 0 : index
    %3 = vector.load %arg5[%c0_6, %c0_7] : memref<4x8xf32, #tpu.memory_space<vmem>>, vector<4x8xf32>
    %c0_8 = arith.constant 0 : index
    %c0_9 = arith.constant 0 : index
    %c0_10 = arith.constant 0 : index
    %4 = vector.load %arg6[%c0_8, %c0_9, %c0_10] : memref<9x32x1xf32, #tpu.memory_space<vmem>>, vector<9x32x1xf32>
    %5 = vector.shape_cast %3 : vector<4x8xf32> to vector<1x4x1x8xf32>
    %6 = vector.shape_cast %5 : vector<1x4x1x8xf32> to vector<1x4x1x8xf32>
    %7 = vector.broadcast %6 : vector<1x4x1x8xf32> to vector<2x4x32x8xf32>
    %c0_11 = arith.constant 0 : index
    %c0_12 = arith.constant 0 : index
    %c0_13 = arith.constant 0 : index
    %c0_14 = arith.constant 0 : index
    %8 = vector.load %arg8[%c0_11, %c0_12, %c0_13, %c0_14] : memref<2x4x32x8xf32, #tpu.memory_space<vmem>>, vector<2x4x32x8xf32>
    tpu.vector_store %arg8[%c0_11, %c0_12, %c0_13, %c0_14], %7 {strides = array<i32>} : memref<2x4x32x8xf32, #tpu.memory_space<vmem>>, vector<2x4x32x8xf32>,
    %c5_i32 = arith.constant 5 : i32
    %9 = tpu.dynamic_rotate %1 by %c5_i32 dim 1 : vector<8x32x8xf32>, i32 -> vector<8x32x8xf32>
    %10 = vector.shape_cast %9 : vector<8x32x8xf32> to vector<2x4x32x8xf32>
    %11 = vector.extract_strided_slice %4 {offsets = [0, 0, 0], sizes = [1, 32, 1], strides = [1, 1, 1]} : vector<9x32x1xf32> to vector<1x32x1xf32>
    %12 = vector.shape_cast %11 : vector<1x32x1xf32> to vector<32x1xf32>
    %13 = vector.shape_cast %12 : vector<32x1xf32> to vector<1x32x1xf32>
    %14 = vector.extract_strided_slice %2 {offsets = [0, 0, 0], sizes = [1, 4, 8], strides = [1, 1, 1]} : vector<9x4x8xf32> to vector<1x4x8xf32>
    %15 = vector.shape_cast %14 : vector<1x4x8xf32> to vector<4x8xf32>
    %16 = vector.shape_cast %15 : vector<4x8xf32> to vector<4x1x8xf32>
    %17 = vector.broadcast %13 : vector<1x32x1xf32> to vector<4x32x8xf32>
    %18 = vector.broadcast %16 : vector<4x1x8xf32> to vector<4x32x8xf32>
    %19 = arith.mulf %17, %18 : vector<4x32x8xf32>
    %c0_15 = arith.constant 0 : index
    %c0_16 = arith.constant 0 : index
    %c0_17 = arith.constant 0 : index
    %c0_18 = arith.constant 0 : index
    %20 = vector.load %arg8[%c0_15, %c0_16, %c0_17, %c0_18] : memref<2x4x32x8xf32, #tpu.memory_space<vmem>>, vector<2x4x32x8xf32>
    %21 = vector.shape_cast %19 : vector<4x32x8xf32> to vector<1x4x32x8xf32>
    %22 = vector.broadcast %21 : vector<1x4x32x8xf32> to vector<2x4x32x8xf32>
    %23 = arith.mulf %10, %22 : vector<2x4x32x8xf32>
    %24 = arith.addf %20, %23 : vector<2x4x32x8xf32>
    %c0_19 = arith.constant 0 : index
    %c0_20 = arith.constant 0 : index
    %c0_21 = arith.constant 0 : index
    %c0_22 = arith.constant 0 : index
    %25 = vector.load %arg8[%c0_19, %c0_20, %c0_21, %c0_22] : memref<2x4x32x8xf32, #tpu.memory_space<vmem>>, vector<2x4x32x8xf32>
    tpu.vector_store %arg8[%c0_19, %c0_20, %c0_21, %c0_22], %24 {strides = array<i32>} : memref<2x4x32x8xf32, #tpu.memory_space<vmem>>, vector<2x4x32x8xf32>,
    %c4_i32 = arith.constant 4 : i32
    %26 = tpu.dynamic_rotate %1 by %c4_i32 dim 1 : vector<8x32x8xf32>, i32 -> vector<8x32x8xf32>
    %27 = vector.shape_cast %26 : vector<8x32x8xf32> to vector<2x4x32x8xf32>
    %28 = vector.extract_strided_slice %4 {offsets = [1, 0, 0], sizes = [1, 32, 1], strides = [1, 1, 1]} : vector<9x32x1xf32> to vector<1x32x1xf32>
    %29 = vector.shape_cast %28 : vector<1x32x1xf32> to vector<32x1xf32>
    %30 = vector.shape_cast %29 : vector<32x1xf32> to vector<1x32x1xf32>
    %31 = vector.extract_strided_slice %2 {offsets = [1, 0, 0], sizes = [1, 4, 8], strides = [1, 1, 1]} : vector<9x4x8xf32> to vector<1x4x8xf32>
    %32 = vector.shape_cast %31 : vector<1x4x8xf32> to vector<4x8xf32>
    %33 = vector.shape_cast %32 : vector<4x8xf32> to vector<4x1x8xf32>
    %34 = vector.broadcast %30 : vector<1x32x1xf32> to vector<4x32x8xf32>
    %35 = vector.broadcast %33 : vector<4x1x8xf32> to vector<4x32x8xf32>
    %36 = arith.mulf %34, %35 : vector<4x32x8xf32>
    %c0_23 = arith.constant 0 : index
    %c0_24 = arith.constant 0 : index
    %c0_25 = arith.constant 0 : index
    %c0_26 = arith.constant 0 : index
    %37 = vector.load %arg8[%c0_23, %c0_24, %c0_25, %c0_26] : memref<2x4x32x8xf32, #tpu.memory_space<vmem>>, vector<2x4x32x8xf32>
    %38 = vector.shape_cast %36 : vector<4x32x8xf32> to vector<1x4x32x8xf32>
    %39 = vector.broadcast %38 : vector<1x4x32x8xf32> to vector<2x4x32x8xf32>
    %40 = arith.mulf %27, %39 : vector<2x4x32x8xf32>
    %41 = arith.addf %37, %40 : vector<2x4x32x8xf32>
    %c0_27 = arith.constant 0 : index
    %c0_28 = arith.constant 0 : index
    %c0_29 = arith.constant 0 : index
    %c0_30 = arith.constant 0 : index
    %42 = vector.load %arg8[%c0_27, %c0_28, %c0_29, %c0_30] : memref<2x4x32x8xf32, #tpu.memory_space<vmem>>, vector<2x4x32x8xf32>
    tpu.vector_store %arg8[%c0_27, %c0_28, %c0_29, %c0_30], %41 {strides = array<i32>} : memref<2x4x32x8xf32, #tpu.memory_space<vmem>>, vector<2x4x32x8xf32>,
    %c3_i32 = arith.constant 3 : i32
    %43 = tpu.dynamic_rotate %1 by %c3_i32 dim 1 : vector<8x32x8xf32>, i32 -> vector<8x32x8xf32>
    %44 = vector.shape_cast %43 : vector<8x32x8xf32> to vector<2x4x32x8xf32>
    %45 = vector.extract_strided_slice %4 {offsets = [2, 0, 0], sizes = [1, 32, 1], strides = [1, 1, 1]} : vector<9x32x1xf32> to vector<1x32x1xf32>
    %46 = vector.shape_cast %45 : vector<1x32x1xf32> to vector<32x1xf32>
    %47 = vector.shape_cast %46 : vector<32x1xf32> to vector<1x32x1xf32>
    %48 = vector.extract_strided_slice %2 {offsets = [2, 0, 0], sizes = [1, 4, 8], strides = [1, 1, 1]} : vector<9x4x8xf32> to vector<1x4x8xf32>
    %49 = vector.shape_cast %48 : vector<1x4x8xf32> to vector<4x8xf32>
    %50 = vector.shape_cast %49 : vector<4x8xf32> to vector<4x1x8xf32>
    %51 = vector.broadcast %47 : vector<1x32x1xf32> to vector<4x32x8xf32>
    %52 = vector.broadcast %50 : vector<4x1x8xf32> to vector<4x32x8xf32>
    %53 = arith.mulf %51, %52 : vector<4x32x8xf32>
    %c0_31 = arith.constant 0 : index
    %c0_32 = arith.constant 0 : index
    %c0_33 = arith.constant 0 : index
    %c0_34 = arith.constant 0 : index
    %54 = vector.load %arg8[%c0_31, %c0_32, %c0_33, %c0_34] : memref<2x4x32x8xf32, #tpu.memory_space<vmem>>, vector<2x4x32x8xf32>
    %55 = vector.shape_cast %53 : vector<4x32x8xf32> to vector<1x4x32x8xf32>
    %56 = vector.broadcast %55 : vector<1x4x32x8xf32> to vector<2x4x32x8xf32>
    %57 = arith.mulf %44, %56 : vector<2x4x32x8xf32>
    %58 = arith.addf %54, %57 : vector<2x4x32x8xf32>
    %c0_35 = arith.constant 0 : index
    %c0_36 = arith.constant 0 : index
    %c0_37 = arith.constant 0 : index
    %c0_38 = arith.constant 0 : index
    %59 = vector.load %arg8[%c0_35, %c0_36, %c0_37, %c0_38] : memref<2x4x32x8xf32, #tpu.memory_space<vmem>>, vector<2x4x32x8xf32>
    tpu.vector_store %arg8[%c0_35, %c0_36, %c0_37, %c0_38], %58 {strides = array<i32>} : memref<2x4x32x8xf32, #tpu.memory_space<vmem>>, vector<2x4x32x8xf32>,
    %c1_i32 = arith.constant 1 : i32
    %60 = tpu.dynamic_rotate %1 by %c1_i32 dim 1 : vector<8x32x8xf32>, i32 -> vector<8x32x8xf32>
    %61 = vector.shape_cast %60 : vector<8x32x8xf32> to vector<2x4x32x8xf32>
    %62 = vector.extract_strided_slice %4 {offsets = [3, 0, 0], sizes = [1, 32, 1], strides = [1, 1, 1]} : vector<9x32x1xf32> to vector<1x32x1xf32>
    %63 = vector.shape_cast %62 : vector<1x32x1xf32> to vector<32x1xf32>
    %64 = vector.shape_cast %63 : vector<32x1xf32> to vector<1x32x1xf32>
    %65 = vector.extract_strided_slice %2 {offsets = [3, 0, 0], sizes = [1, 4, 8], strides = [1, 1, 1]} : vector<9x4x8xf32> to vector<1x4x8xf32>
    %66 = vector.shape_cast %65 : vector<1x4x8xf32> to vector<4x8xf32>
    %67 = vector.shape_cast %66 : vector<4x8xf32> to vector<4x1x8xf32>
    %68 = vector.broadcast %64 : vector<1x32x1xf32> to vector<4x32x8xf32>
    %69 = vector.broadcast %67 : vector<4x1x8xf32> to vector<4x32x8xf32>
    %70 = arith.mulf %68, %69 : vector<4x32x8xf32>
    %c0_39 = arith.constant 0 : index
    %c0_40 = arith.constant 0 : index
    %c0_41 = arith.constant 0 : index
    %c0_42 = arith.constant 0 : index
    %71 = vector.load %arg8[%c0_39, %c0_40, %c0_41, %c0_42] : memref<2x4x32x8xf32, #tpu.memory_space<vmem>>, vector<2x4x32x8xf32>
    %72 = vector.shape_cast %70 : vector<4x32x8xf32> to vector<1x4x32x8xf32>
    %73 = vector.broadcast %72 : vector<1x4x32x8xf32> to vector<2x4x32x8xf32>
    %74 = arith.mulf %61, %73 : vector<2x4x32x8xf32>
    %75 = arith.addf %71, %74 : vector<2x4x32x8xf32>
    %c0_43 = arith.constant 0 : index
    %c0_44 = arith.constant 0 : index
    %c0_45 = arith.constant 0 : index
    %c0_46 = arith.constant 0 : index
    %76 = vector.load %arg8[%c0_43, %c0_44, %c0_45, %c0_46] : memref<2x4x32x8xf32, #tpu.memory_space<vmem>>, vector<2x4x32x8xf32>
    tpu.vector_store %arg8[%c0_43, %c0_44, %c0_45, %c0_46], %75 {strides = array<i32>} : memref<2x4x32x8xf32, #tpu.memory_space<vmem>>, vector<2x4x32x8xf32>,
    %77 = vector.shape_cast %1 : vector<8x32x8xf32> to vector<2x4x32x8xf32>
    %78 = vector.extract_strided_slice %4 {offsets = [4, 0, 0], sizes = [1, 32, 1], strides = [1, 1, 1]} : vector<9x32x1xf32> to vector<1x32x1xf32>
    %79 = vector.shape_cast %78 : vector<1x32x1xf32> to vector<32x1xf32>
    %80 = vector.shape_cast %79 : vector<32x1xf32> to vector<1x32x1xf32>
    %81 = vector.extract_strided_slice %2 {offsets = [4, 0, 0], sizes = [1, 4, 8], strides = [1, 1, 1]} : vector<9x4x8xf32> to vector<1x4x8xf32>
    %82 = vector.shape_cast %81 : vector<1x4x8xf32> to vector<4x8xf32>
    %83 = vector.shape_cast %82 : vector<4x8xf32> to vector<4x1x8xf32>
    %84 = vector.broadcast %80 : vector<1x32x1xf32> to vector<4x32x8xf32>
    %85 = vector.broadcast %83 : vector<4x1x8xf32> to vector<4x32x8xf32>
    %86 = arith.mulf %84, %85 : vector<4x32x8xf32>
    %c0_47 = arith.constant 0 : index
    %c0_48 = arith.constant 0 : index
    %c0_49 = arith.constant 0 : index
    %c0_50 = arith.constant 0 : index
    %87 = vector.load %arg8[%c0_47, %c0_48, %c0_49, %c0_50] : memref<2x4x32x8xf32, #tpu.memory_space<vmem>>, vector<2x4x32x8xf32>
    %88 = vector.shape_cast %86 : vector<4x32x8xf32> to vector<1x4x32x8xf32>
    %89 = vector.broadcast %88 : vector<1x4x32x8xf32> to vector<2x4x32x8xf32>
    %90 = arith.mulf %77, %89 : vector<2x4x32x8xf32>
    %91 = arith.addf %87, %90 : vector<2x4x32x8xf32>
    %c0_51 = arith.constant 0 : index
    %c0_52 = arith.constant 0 : index
    %c0_53 = arith.constant 0 : index
    %c0_54 = arith.constant 0 : index
    %92 = vector.load %arg8[%c0_51, %c0_52, %c0_53, %c0_54] : memref<2x4x32x8xf32, #tpu.memory_space<vmem>>, vector<2x4x32x8xf32>
    tpu.vector_store %arg8[%c0_51, %c0_52, %c0_53, %c0_54], %91 {strides = array<i32>} : memref<2x4x32x8xf32, #tpu.memory_space<vmem>>, vector<2x4x32x8xf32>,
    %c31_i32 = arith.constant 31 : i32
    %93 = tpu.dynamic_rotate %1 by %c31_i32 dim 1 : vector<8x32x8xf32>, i32 -> vector<8x32x8xf32>
    %94 = vector.shape_cast %93 : vector<8x32x8xf32> to vector<2x4x32x8xf32>
    %95 = vector.extract_strided_slice %4 {offsets = [5, 0, 0], sizes = [1, 32, 1], strides = [1, 1, 1]} : vector<9x32x1xf32> to vector<1x32x1xf32>
    %96 = vector.shape_cast %95 : vector<1x32x1xf32> to vector<32x1xf32>
    %97 = vector.shape_cast %96 : vector<32x1xf32> to vector<1x32x1xf32>
    %98 = vector.extract_strided_slice %2 {offsets = [5, 0, 0], sizes = [1, 4, 8], strides = [1, 1, 1]} : vector<9x4x8xf32> to vector<1x4x8xf32>
    %99 = vector.shape_cast %98 : vector<1x4x8xf32> to vector<4x8xf32>
    %100 = vector.shape_cast %99 : vector<4x8xf32> to vector<4x1x8xf32>
    %101 = vector.broadcast %97 : vector<1x32x1xf32> to vector<4x32x8xf32>
    %102 = vector.broadcast %100 : vector<4x1x8xf32> to vector<4x32x8xf32>
    %103 = arith.mulf %101, %102 : vector<4x32x8xf32>
    %c0_55 = arith.constant 0 : index
    %c0_56 = arith.constant 0 : index
    %c0_57 = arith.constant 0 : index
    %c0_58 = arith.constant 0 : index
    %104 = vector.load %arg8[%c0_55, %c0_56, %c0_57, %c0_58] : memref<2x4x32x8xf32, #tpu.memory_space<vmem>>, vector<2x4x32x8xf32>
    %105 = vector.shape_cast %103 : vector<4x32x8xf32> to vector<1x4x32x8xf32>
    %106 = vector.broadcast %105 : vector<1x4x32x8xf32> to vector<2x4x32x8xf32>
    %107 = arith.mulf %94, %106 : vector<2x4x32x8xf32>
    %108 = arith.addf %104, %107 : vector<2x4x32x8xf32>
    %c0_59 = arith.constant 0 : index
    %c0_60 = arith.constant 0 : index
    %c0_61 = arith.constant 0 : index
    %c0_62 = arith.constant 0 : index
    %109 = vector.load %arg8[%c0_59, %c0_60, %c0_61, %c0_62] : memref<2x4x32x8xf32, #tpu.memory_space<vmem>>, vector<2x4x32x8xf32>
    tpu.vector_store %arg8[%c0_59, %c0_60, %c0_61, %c0_62], %108 {strides = array<i32>} : memref<2x4x32x8xf32, #tpu.memory_space<vmem>>, vector<2x4x32x8xf32>,
    %c29_i32 = arith.constant 29 : i32
    %110 = tpu.dynamic_rotate %1 by %c29_i32 dim 1 : vector<8x32x8xf32>, i32 -> vector<8x32x8xf32>
    %111 = vector.shape_cast %110 : vector<8x32x8xf32> to vector<2x4x32x8xf32>
    %112 = vector.extract_strided_slice %4 {offsets = [6, 0, 0], sizes = [1, 32, 1], strides = [1, 1, 1]} : vector<9x32x1xf32> to vector<1x32x1xf32>
    %113 = vector.shape_cast %112 : vector<1x32x1xf32> to vector<32x1xf32>
    %114 = vector.shape_cast %113 : vector<32x1xf32> to vector<1x32x1xf32>
    %115 = vector.extract_strided_slice %2 {offsets = [6, 0, 0], sizes = [1, 4, 8], strides = [1, 1, 1]} : vector<9x4x8xf32> to vector<1x4x8xf32>
    %116 = vector.shape_cast %115 : vector<1x4x8xf32> to vector<4x8xf32>
    %117 = vector.shape_cast %116 : vector<4x8xf32> to vector<4x1x8xf32>
    %118 = vector.broadcast %114 : vector<1x32x1xf32> to vector<4x32x8xf32>
    %119 = vector.broadcast %117 : vector<4x1x8xf32> to vector<4x32x8xf32>
    %120 = arith.mulf %118, %119 : vector<4x32x8xf32>
    %c0_63 = arith.constant 0 : index
    %c0_64 = arith.constant 0 : index
    %c0_65 = arith.constant 0 : index
    %c0_66 = arith.constant 0 : index
    %121 = vector.load %arg8[%c0_63, %c0_64, %c0_65, %c0_66] : memref<2x4x32x8xf32, #tpu.memory_space<vmem>>, vector<2x4x32x8xf32>
    %122 = vector.shape_cast %120 : vector<4x32x8xf32> to vector<1x4x32x8xf32>
    %123 = vector.broadcast %122 : vector<1x4x32x8xf32> to vector<2x4x32x8xf32>
    %124 = arith.mulf %111, %123 : vector<2x4x32x8xf32>
    %125 = arith.addf %121, %124 : vector<2x4x32x8xf32>
    %c0_67 = arith.constant 0 : index
    %c0_68 = arith.constant 0 : index
    %c0_69 = arith.constant 0 : index
    %c0_70 = arith.constant 0 : index
    %126 = vector.load %arg8[%c0_67, %c0_68, %c0_69, %c0_70] : memref<2x4x32x8xf32, #tpu.memory_space<vmem>>, vector<2x4x32x8xf32>
    tpu.vector_store %arg8[%c0_67, %c0_68, %c0_69, %c0_70], %125 {strides = array<i32>} : memref<2x4x32x8xf32, #tpu.memory_space<vmem>>, vector<2x4x32x8xf32>,
    %c28_i32 = arith.constant 28 : i32
    %127 = tpu.dynamic_rotate %1 by %c28_i32 dim 1 : vector<8x32x8xf32>, i32 -> vector<8x32x8xf32>
    %128 = vector.shape_cast %127 : vector<8x32x8xf32> to vector<2x4x32x8xf32>
    %129 = vector.extract_strided_slice %4 {offsets = [7, 0, 0], sizes = [1, 32, 1], strides = [1, 1, 1]} : vector<9x32x1xf32> to vector<1x32x1xf32>
    %130 = vector.shape_cast %129 : vector<1x32x1xf32> to vector<32x1xf32>
    %131 = vector.shape_cast %130 : vector<32x1xf32> to vector<1x32x1xf32>
    %132 = vector.extract_strided_slice %2 {offsets = [7, 0, 0], sizes = [1, 4, 8], strides = [1, 1, 1]} : vector<9x4x8xf32> to vector<1x4x8xf32>
    %133 = vector.shape_cast %132 : vector<1x4x8xf32> to vector<4x8xf32>
    %134 = vector.shape_cast %133 : vector<4x8xf32> to vector<4x1x8xf32>
    %135 = vector.broadcast %131 : vector<1x32x1xf32> to vector<4x32x8xf32>
    %136 = vector.broadcast %134 : vector<4x1x8xf32> to vector<4x32x8xf32>
    %137 = arith.mulf %135, %136 : vector<4x32x8xf32>
    %c0_71 = arith.constant 0 : index
    %c0_72 = arith.constant 0 : index
    %c0_73 = arith.constant 0 : index
    %c0_74 = arith.constant 0 : index
    %138 = vector.load %arg8[%c0_71, %c0_72, %c0_73, %c0_74] : memref<2x4x32x8xf32, #tpu.memory_space<vmem>>, vector<2x4x32x8xf32>
    %139 = vector.shape_cast %137 : vector<4x32x8xf32> to vector<1x4x32x8xf32>
    %140 = vector.broadcast %139 : vector<1x4x32x8xf32> to vector<2x4x32x8xf32>
    %141 = arith.mulf %128, %140 : vector<2x4x32x8xf32>
    %142 = arith.addf %138, %141 : vector<2x4x32x8xf32>
    %c0_75 = arith.constant 0 : index
    %c0_76 = arith.constant 0 : index
    %c0_77 = arith.constant 0 : index
    %c0_78 = arith.constant 0 : index
    %143 = vector.load %arg8[%c0_75, %c0_76, %c0_77, %c0_78] : memref<2x4x32x8xf32, #tpu.memory_space<vmem>>, vector<2x4x32x8xf32>
    tpu.vector_store %arg8[%c0_75, %c0_76, %c0_77, %c0_78], %142 {strides = array<i32>} : memref<2x4x32x8xf32, #tpu.memory_space<vmem>>, vector<2x4x32x8xf32>,
    %c27_i32 = arith.constant 27 : i32
    %144 = tpu.dynamic_rotate %1 by %c27_i32 dim 1 : vector<8x32x8xf32>, i32 -> vector<8x32x8xf32>
    %145 = vector.shape_cast %144 : vector<8x32x8xf32> to vector<2x4x32x8xf32>
    %146 = vector.extract_strided_slice %4 {offsets = [8, 0, 0], sizes = [1, 32, 1], strides = [1, 1, 1]} : vector<9x32x1xf32> to vector<1x32x1xf32>
    %147 = vector.shape_cast %146 : vector<1x32x1xf32> to vector<32x1xf32>
    %148 = vector.shape_cast %147 : vector<32x1xf32> to vector<1x32x1xf32>
    %149 = vector.extract_strided_slice %2 {offsets = [8, 0, 0], sizes = [1, 4, 8], strides = [1, 1, 1]} : vector<9x4x8xf32> to vector<1x4x8xf32>
    %150 = vector.shape_cast %149 : vector<1x4x8xf32> to vector<4x8xf32>
    %151 = vector.shape_cast %150 : vector<4x8xf32> to vector<4x1x8xf32>
    %152 = vector.broadcast %148 : vector<1x32x1xf32> to vector<4x32x8xf32>
    %153 = vector.broadcast %151 : vector<4x1x8xf32> to vector<4x32x8xf32>
    %154 = arith.mulf %152, %153 : vector<4x32x8xf32>
    %c0_79 = arith.constant 0 : index
    %c0_80 = arith.constant 0 : index
    %c0_81 = arith.constant 0 : index
    %c0_82 = arith.constant 0 : index
    %155 = vector.load %arg8[%c0_79, %c0_80, %c0_81, %c0_82] : memref<2x4x32x8xf32, #tpu.memory_space<vmem>>, vector<2x4x32x8xf32>
    %156 = vector.shape_cast %154 : vector<4x32x8xf32> to vector<1x4x32x8xf32>
    %157 = vector.broadcast %156 : vector<1x4x32x8xf32> to vector<2x4x32x8xf32>
    %158 = arith.mulf %145, %157 : vector<2x4x32x8xf32>
    %159 = arith.addf %155, %158 : vector<2x4x32x8xf32>
    %c0_83 = arith.constant 0 : index
    %c0_84 = arith.constant 0 : index
    %c0_85 = arith.constant 0 : index
    %c0_86 = arith.constant 0 : index
    %160 = vector.load %arg8[%c0_83, %c0_84, %c0_85, %c0_86] : memref<2x4x32x8xf32, #tpu.memory_space<vmem>>, vector<2x4x32x8xf32>
    tpu.vector_store %arg8[%c0_83, %c0_84, %c0_85, %c0_86], %159 {strides = array<i32>} : memref<2x4x32x8xf32, #tpu.memory_space<vmem>>, vector<2x4x32x8xf32>,
    %c0_87 = arith.constant 0 : index
    %c0_88 = arith.constant 0 : index
    %c0_89 = arith.constant 0 : index
    %c0_90 = arith.constant 0 : index
    %161 = vector.load %arg1[%c0_87, %c0_88, %c0_89, %c0_90] : memref<2x4x32x8xf32, #tpu.memory_space<vmem>>, vector<2x4x32x8xf32>
    %162 = arith.truncf %161 : vector<2x4x32x8xf32> to vector<2x4x32x8xbf16>
    %163 = vector.shape_cast %162 : vector<2x4x32x8xbf16> to vector<8x32x8xbf16>
    %c0_91 = arith.constant 0 : index
    %c0_92 = arith.constant 0 : index
    %c0_93 = arith.constant 0 : index
    %c0_94 = arith.constant 0 : index
    %164 = vector.load %arg2[%c0_91, %c0_92, %c0_93, %c0_94] : memref<2x4x32x8xf32, #tpu.memory_space<vmem>>, vector<2x4x32x8xf32>
    %165 = arith.truncf %164 : vector<2x4x32x8xf32> to vector<2x4x32x8xbf16>
    %166 = vector.shape_cast %165 : vector<2x4x32x8xbf16> to vector<8x32x8xbf16>
    %cst = arith.constant dense<0.000000e+00> : vector<8x32x32xf32>
    %167 = tpu.matmul %163, %166, %cst {dimension_numbers = #tpu.dot_dimension_numbers<[2], [2], [1], [1], [0, 0, 0, 1, 1, 1], [0], [0]>} : vector<8x32x8xbf16>, vector<8x32x8xbf16>, vector<8x32x32xf32> -> vector<8x32x32xf32>
    %cst_95 = arith.constant dense<0xFF800000> : vector<8x32xf32>
    %168 = vector.multi_reduction <maximumf>, %167, %cst_95 [2] : vector<8x32x32xf32> to vector<8x32xf32>
    %169 = vector.shape_cast %168 : vector<8x32xf32> to vector<8x32x1xf32>
    %170 = vector.broadcast %169 : vector<8x32x1xf32> to vector<8x32x32xf32>
    %171 = arith.subf %167, %170 : vector<8x32x32xf32>
    %172 = math.exp %171 : vector<8x32x32xf32>
    %cst_96 = arith.constant dense<0.000000e+00> : vector<8x32xf32>
    %173 = vector.multi_reduction <add>, %172, %cst_96 [2] : vector<8x32x32xf32> to vector<8x32xf32>
    %174 = vector.shape_cast %173 : vector<8x32xf32> to vector<8x32x1xf32>
    %175 = arith.truncf %172 : vector<8x32x32xf32> to vector<8x32x32xbf16>
    %176 = arith.truncf %1 : vector<8x32x8xf32> to vector<8x32x8xbf16>
    %cst_97 = arith.constant dense<0.000000e+00> : vector<8x32x8xf32>
    %177 = tpu.matmul %175, %176, %cst_97 {dimension_numbers = #tpu.dot_dimension_numbers<[2], [1], [1], [2], [0, 0, 0, 1, 1, 2], [0], [0]>} : vector<8x32x32xbf16>, vector<8x32x8xbf16>, vector<8x32x8xf32> -> vector<8x32x8xf32>
    %178 = tpu.reciprocal %174 {approx = true} : vector<8x32x1xf32> -> vector<8x32x1xf32>
    %179 = vector.broadcast %178 : vector<8x32x1xf32> to vector<8x32x8xf32>
    %180 = arith.mulf %177, %179 : vector<8x32x8xf32>
    %c0_98 = arith.constant 0 : index
    %c0_99 = arith.constant 0 : index
    %c0_100 = arith.constant 0 : index
    %c0_101 = arith.constant 0 : index
    %181 = vector.load %arg8[%c0_98, %c0_99, %c0_100, %c0_101] : memref<2x4x32x8xf32, #tpu.memory_space<vmem>>, vector<2x4x32x8xf32>
    %182 = vector.shape_cast %180 : vector<8x32x8xf32> to vector<2x4x32x8xf32>
    %183 = arith.addf %181, %182 : vector<2x4x32x8xf32>
    %c0_102 = arith.constant 0 : index
    %c0_103 = arith.constant 0 : index
    %c0_104 = arith.constant 0 : index
    %c0_105 = arith.constant 0 : index
    %184 = vector.load %arg7[%c0_102, %c0_103, %c0_104, %c0_105] : memref<2x4x32x8xf32, #tpu.memory_space<vmem>>, vector<2x4x32x8xf32>
    tpu.vector_store %arg7[%c0_102, %c0_103, %c0_104, %c0_105], %183 {strides = array<i32>} : memref<2x4x32x8xf32, #tpu.memory_space<vmem>>, vector<2x4x32x8xf32>,
    return
  }
  func.func @transform_0(%arg0: i32) -> (i32, i32, i32, i32) {
    %c0_i32 = arith.constant 0 : i32
    %c0_i32_0 = arith.constant 0 : i32
    %c0_i32_1 = arith.constant 0 : i32
    %c0_i32_2 = arith.constant 0 : i32
    return %arg0, %c0_i32, %c0_i32_0, %c0_i32_1 : i32, i32, i32, i32
  }
  func.func @transform_1(%arg0: i32) -> (i32, i32, i32, i32) {
    %c0_i32 = arith.constant 0 : i32
    %c0_i32_0 = arith.constant 0 : i32
    %c0_i32_1 = arith.constant 0 : i32
    %c0_i32_2 = arith.constant 0 : i32
    return %arg0, %c0_i32, %c0_i32_0, %c0_i32_1 : i32, i32, i32, i32
  }
  func.func @transform_2(%arg0: i32) -> (i32, i32, i32, i32) {
    %c0_i32 = arith.constant 0 : i32
    %c0_i32_0 = arith.constant 0 : i32
    %c0_i32_1 = arith.constant 0 : i32
    %c0_i32_2 = arith.constant 0 : i32
    return %arg0, %c0_i32, %c0_i32_0, %c0_i32_1 : i32, i32, i32, i32
  }
  func.func @transform_3(%arg0: i32) -> (i32, i32, i32) {
    %c0_i32 = arith.constant 0 : i32
    %c0_i32_0 = arith.constant 0 : i32
    %c0_i32_1 = arith.constant 0 : i32
    %c0_i32_2 = arith.constant 0 : i32
    return %c0_i32, %c0_i32_0, %c0_i32_1 : i32, i32, i32
  }
  func.func @transform_4(%arg0: i32) -> (i32, i32) {
    %c0_i32 = arith.constant 0 : i32
    %c0_i32_0 = arith.constant 0 : i32
    %c0_i32_1 = arith.constant 0 : i32
    return %c0_i32, %c0_i32_0 : i32, i32
  }
  func.func @transform_5(%arg0: i32) -> (i32, i32, i32) {
    %c0_i32 = arith.constant 0 : i32
    %c0_i32_0 = arith.constant 0 : i32
    %c0_i32_1 = arith.constant 0 : i32
    %c0_i32_2 = arith.constant 0 : i32
    return %c0_i32, %c0_i32_0, %c0_i32_1 : i32, i32, i32
  }
  func.func @transform_6(%arg0: i32) -> (i32, i32, i32, i32) {
    %c0_i32 = arith.constant 0 : i32
    %c0_i32_0 = arith.constant 0 : i32
    %c0_i32_1 = arith.constant 0 : i32
    %c0_i32_2 = arith.constant 0 : i32
    return %arg0, %c0_i32, %c0_i32_0, %c0_i32_1 : i32, i32, i32, i32
  }
}

</mosaic_0001>

<bundles_post_ra>
// kernel: tpu_custom_call.1
= control target key start
LH: loop header
LB: loop body
LE: loop exit
PB: predicated region body
PF: predicated region fallthrough
CT: control target
= control target key end

     0   :  { %s9362_s0 = inlined_call_operand.hbm [shape: f32[4,4,32,8], index: 0, kind: input, shape index: {}]   ;;  %s9363_s1 = inlined_call_operand.hbm [shape: f32[4,4,32,8], index: 1, kind: input, shape index: {}]   ;;  %s9364_s2 = inlined_call_operand.hbm [shape: f32[4,4,32,8], index: 2, kind: input, shape index: {}]   ;;  %s9365_s3 = inlined_call_operand.hbm [shape: f32[9,4,8], index: 3, kind: input, shape index: {}]   ;;  %s9366_s4 = inlined_call_operand.hbm [shape: f32[4,8], index: 4, kind: input, shape index: {}]   ;;  %s9367_s5 = inlined_call_operand.hbm [shape: f32[9,32,1], index: 5, kind: input, shape index: {}]   ;;  %s9368_s6 = inlined_call_operand.hbm [shape: f32[4,4,32,8], index: 6, kind: output, shape index: {}]  }
   0x1   :  { %9707 = sst [smem:[#allocation199_spill]] %s9363_s1 }
   0x2   :  { %9708 = sst [smem:[#allocation200_spill]] %s9365_s3 }
   0x3   :  { %9709 = sst [smem:[#allocation201_spill]] %s9368_s6 }
   0x4   :  { %11 = vsyncpa [#allocation4], 0 }
   0x5   :  { %13 = vsyncpa [#allocation4 + $0x1], 0 }
   0x6   :  { %14 = vsyncpa [#allocation7], 0 }
   0x7   :  { %16 = vsyncpa [#allocation7 + $0x1], 0 }
   0x8   :  { %17 = vsyncpa [#allocation10], 0 }
   0x9   :  { %18 = vsyncpa [#allocation13], 0 }
   0xa   :  { %19 = vsyncpa [#allocation5], 0 }
   0xb   :  { %21 = vsyncpa [#allocation5 + $0x1], 0  ;;  %s5293_s21 = smov 0   ;;  %s5295_s22 = smov 0  }
   0xc   :  { %s5297_s23 = smov 0   ;;  %s5299_s24 = smov 0  }
   0xd LB: > { %9710 = sst [smem:[#allocation20_spill]] %s5229_s21  ;;  %s5314_s25 = sadd.s32 4294967295, %s5241_s24   ;;  %s5241_s24 = sphi %s5299_s24, %s10755_s24   ;;  %s5237_s23 = sphi %s5297_s23, %s10759_s23   ;;  %s5233_s22 = sphi %s5295_s22, %s10758_s22   ;;  %s5229_s21 = sphi %s5293_s21, %s10757_s21  }
   0xe   : > { %9711 = sst [smem:[#allocation21_spill]] %s5241_s24  ;;  %s4426_s26 = sadd.s32 4294967294, %s5241_s24  }
   0xf   : > { %s5318_s27 = sadd.s32 1, %s5241_s24   ;;  %s34_s28 = sadd.s32 1, %s5237_s23 }
  0x10   : > { %9712 = sst [smem:[#allocation22_spill]] %s5318_s27  ;;  %s31_s29 = ssub.s32 %s5241_s24, %s5318_s27 }
  0x11   : > { %p41_p0 = scmp.ne.s32.totalorder %s5237_s23, %s5233_s22  ;;  %p32_p1 = scmp.eq.s32.totalorder %s31_s29, 0 }
  0x12   : > { %p42_p2 = scmp.eq.s32.totalorder %s5241_s24, 0  ;;  %p47_p3 = scmp.ne.s32.totalorder %s5233_s22, %s5229_s21 }
  0x13   : > { %p9369_p4 = scmp.eq.s32.totalorder %s5314_s25, 0  ;;  %p186_p7 = scmp.eq.s32.totalorder %s5314_s25, 1 }
  0x14   : > { %s5330_s30 = scalar_select %p32_p1, %s5237_s23, %s34_s28  }
  0x15   : > { %p5332_p5 = por %p42_p2, %p41_p0  ;;  %p5338_p6 = por %p9369_p4, %p47_p3 }
  0x16   : > { %9713 = sst [smem:[#allocation23_spill]] %s5330_s30  ;;  %p192_p8 = scmp.eq.s32.totalorder %s4426_s26, 1 }
  0x17   : > { %s9714_s7 = scalar_select %p5332_p5, 1, 0 }
  0x18   : > { %s9715_s8 = scalar_select %p5338_p6, 1, 0 }
  0x19   : > { %p4427_p9 = scmp.ge.s32.totalorder %s5241_s24, 1  ;;  %p199_p10 = scmp.lt.s32.totalorder %s5241_s24, 3 }
  0x1a   : > { %p5345_p11 = por %p186_p7, %p41_p0  ;;  %p5349_p12 = por %p192_p8, %p47_p3 }
  0x1b   : > { %p5353_p13 = pnand %p4427_p9, %p199_p10  ;;  %s5243_s12 = smov [#allocation9]  }
  0x1c   : > { %s9716_s9 = scalar_select %p5345_p11, 1, 0 }
  0x1d   : > { %s9718_s10 = scalar_select %p5349_p12, 1, 0 }
  0x1e   : > { %9717 = sst [smem:[#allocation24_spill]] %s9716_s9  ;;  %p4736_p1 = pneg %p5353_p13 }
  0x1f   : > { %9719 = sst [smem:[#allocation25_spill]] %s9718_s10  ;;  %s211_s13 = sshll.u32 %s5243_s12, 4  ;;  %s212_s13 = int_to_ptr.vmem [resolvable:$true] %s211_s13 }
  0x20   : > { %s9720_s11 = scalar_select %p5353_p13, 1, 0 }
  0x21   : > { %p5361_p2 = pnand %p4736_p1, %p9369_p4  ;;  %s9722_s3 = sld [smem:[#allocation200_spill]] }
  0x23   : > { %s9721_s14 = scalar_select %p5361_p2, 1, 0 }
  0x24   : > { %p5375_p8 = pneg %p5361_p2 }
  0x26   : > { %s9723_s20 = scalar_select %p5375_p8, 1, 0 }
  0x27   : > { %s4989_s17 = scalar_lea.hbm %s9722_s3, 576 }
  0x28   : > { %p4990_p7 = scmp.ne.s32.totalorder %s9722_s3, %s4989_s17  ;;  %p4996_p1 = scmp.lt.u32.totalorder %s4989_s17, %s9722_s3 }
  0x2a   : > { %p4992_p9 = pnand %p5375_p8, %p4990_p7 }
  0x2c   : > { %p4993_p10 = pneg %p4992_p9 }
  0x2e   : > { %p4998_p0 = pnand %p4996_p1, %p4993_p10 }
  0x30   : > { %5001 = shalt.err (!%p4998_p0)
}
  0x31   : > { %s5002_s29 = scalar_lea.vmem %s212_s13, 576  ;;  %p5010_p11 = scmp.lt.s32.totalorder %s212_s13, %s212_s13 }
  0x32   : > { %p5003_p4 = scmp.ne.s32.totalorder %s212_s13, %s5002_s29  ;;  %p5011_p6 = scmp.lt.s32.totalorder %s5002_s29, %s5002_s29 }
  0x34   : > { %p5005_p3 = pnand %p5003_p4, %p5375_p8  ;;  %p5012_p13 = por %p5011_p6, %p5010_p11 }
  0x36   : > { %p5006_p12 = pneg %p5005_p3 }
  0x38   : > { %p5013_p5 = pnand %p5012_p13, %p5006_p12 }
  0x3a   : > { %5016 = shalt.err (!%p5013_p5)
}
  0x3b   : > { %s5244_s12 = smov 64   ;;  %s5245_s15 = smov 4  }
  0x3c   : > { %4739 = dma.hbm_to_vmem [thread:$0]  (!%p5361_p2), %s9722_s3, 576, %s212_s13, [#allocation10], %s5244_s12, %s5244_s12, %s5245_s15  }
  0x3d   : > { %s9375_s18 = sand.u32 1, %s5237_s23   ;;  %s5393_s19 = sshll.u32 %s5241_s24, 12 }
  0x3e   : > { %s5397_s26 = sshll.u32 %s9375_s18, 8  ;;  %p9724_p4 = scmp.ne.s32.totalorder %s9714_s7, 0 }
  0x3f   : > { %p9725_p5 = scmp.lt.s32.totalorder %s5241_s24, 2  ;;  %s271_s29 = sand.u32 1, %s5241_s24  }
  0x40   : > { %s9727_s1 = sld [smem:[#allocation199_spill]]  ;;  %s275_s12 = scalar_lea.vmem [#allocation6], %s5397_s26 }
  0x41   : > { %p5403_p6 = pnand %p9725_p5, %p9724_p4  ;;  %s283_s15 = sshll.u32 %s275_s12, 4  ;;  %s5415_s15 = int_to_ptr.vmem [resolvable:$true] %s283_s15 }
  0x42   : > { %s5417_s7 = scalar_lea.sflag [#allocation7], %s271_s29 }
  0x43   : > { %s9726_s28 = scalar_select %p5403_p6, 1, 0 }
  0x44   : > { %p5423_p12 = pneg %p5403_p6 }
  0x46   : > { %s5412_s13 = scalar_lea.hbm %s9727_s1, %s5393_s19  ;;  %s5022_s18 = scalar_lea.hbm %s9727_s1, 8192 }
  0x47   : > { %s5017_s16 = scalar_lea.hbm %s5412_s13, 4096  ;;  %p5023_p3 = scmp.lt.u32.totalorder %s5412_s13, %s9727_s1 }
  0x48   : > { %p5018_p11 = scmp.ne.s32.totalorder %s5412_s13, %s5017_s16  ;;  %p5024_p7 = scmp.lt.u32.totalorder %s5022_s18, %s5017_s16 }
  0x49   : > { %s9728_s17 = scalar_select %p5423_p12, 1, 0 }
  0x4a   : > { %p5020_p13 = pnand %p5423_p12, %p5018_p11  ;;  %p5025_p9 = por %p5024_p7, %p5023_p3 }
  0x4b   : > { %p5026_p10 = scmp.lt.u32.totalorder %s5017_s16, %s5412_s13 }
  0x4c   : > { %p5021_p0 = pneg %p5020_p13 }
  0x4d   : > { %p5027_p1 = por %p5026_p10, %p5025_p9 }
  0x4f   : > { %p5028_p4 = pnand %p5027_p1, %p5021_p0 }
  0x51   : > { %5031 = shalt.err (!%p5028_p4)
}
  0x52   : > { %s5032_s29 = scalar_lea.vmem %s5415_s15, 4096  ;;  %s5246_s27 = smov [#allocation6]  }
  0x53   : > { %p5033_p5 = scmp.ne.s32.totalorder %s5415_s15, %s5032_s29  ;;  %s5037_s30 = sshll.u32 %s5246_s27, 4  ;;  %s5038_s30 = int_to_ptr.vmem [resolvable:$false] %s5037_s30 }
  0x54   : > { %s5039_s3 = scalar_lea.vmem %s5038_s30, 8192  ;;  %p5040_p2 = scmp.lt.s32.totalorder %s5415_s15, %s5038_s30 }
  0x55   : > { %p5035_p11 = pnand %p5033_p5, %p5423_p12  ;;  %p5041_p8 = scmp.lt.s32.totalorder %s5039_s3, %s5032_s29 }
  0x57   : > { %p5036_p13 = pneg %p5035_p11  ;;  %p5042_p3 = por %p5041_p8, %p5040_p2 }
  0x59   : > { %p5043_p7 = pnand %p5042_p3, %p5036_p13 }
  0x5b   : > { %5046 = shalt.err (!%p5043_p7)
}
  0x5c   : > { %s5247_s18 = smov 128   ;;  %s5248_s16 = smov 8  }
  0x5d   : > { %4752 = dma.hbm_to_vmem [thread:$0]  (!%p5403_p6), %s5412_s13, 4096, %s5415_s15, %s5417_s7, %s5247_s18, %s5247_s18, %s5248_s16  }
  0x5e   : > { %s5249_s12 = smov [#allocation11]   ;;  %s5250_s30 = smov [#allocation12]  }
  0x5f   : > { %s225_s27 = sshll.u32 %s5249_s12, 4  ;;  %s235_s29 = sshll.u32 %s5250_s30, 4  ;;  %s226_s27 = int_to_ptr.vmem [resolvable:$true] %s225_s27  ;;  %s236_s29 = int_to_ptr.vmem [resolvable:$true] %s235_s29 }
  0x60   : > { %s5047_s24 = scalar_lea.hbm %s9366_s4, 64  ;;  %p9729_p8 = scmp.ne.s32.totalorder %s9723_s20, 0 }
  0x61   : > { %p5048_p2 = scmp.ne.s32.totalorder %s9366_s4, %s5047_s24  ;;  %p5054_p10 = scmp.lt.u32.totalorder %s5047_s24, %s9366_s4 }
  0x63   : > { %p5050_p0 = pnand %p5048_p2, %p9729_p8 }
  0x65   : > { %p5051_p9 = pneg %p5050_p0 }
  0x67   : > { %p5056_p1 = pnand %p5054_p10, %p5051_p9 }
  0x69   : > { %5059 = shalt.err (!%p5056_p1)
}
  0x6a   : > { %s5060_s13 = scalar_lea.vmem %s226_s27, 64  ;;  %p5068_p13 = scmp.lt.s32.totalorder %s226_s27, %s226_s27 }
  0x6b   : > { %p5061_p4 = scmp.ne.s32.totalorder %s226_s27, %s5060_s13  ;;  %p5069_p3 = scmp.lt.s32.totalorder %s5060_s13, %s5060_s13 }
  0x6d   : > { %p5063_p5 = pnand %p5061_p4, %p9729_p8  ;;  %p5070_p7 = por %p5069_p3, %p5068_p13 }
  0x6f   : > { %p5064_p11 = pneg %p5063_p5 }
  0x71   : > { %p5071_p6 = pnand %p5070_p7, %p5064_p11 }
  0x73   : > { %5074 = shalt.err (!%p5071_p6)
}
  0x74   : > { %p9730_p2 = scmp.ne.s32.totalorder %s9721_s14, 0  ;;  %s5075_s9 = scalar_lea.hbm %s9367_s5, 4608 }
  0x75   : > { %p5076_p0 = scmp.ne.s32.totalorder %s9367_s5, %s5075_s9  ;;  %p5082_p6 = scmp.lt.u32.totalorder %s5075_s9, %s9367_s5 }
  0x76   : > { %4742 = dma.hbm_to_vmem [thread:$0]  (!%p9730_p2), %s9366_s4, 64, %s226_s27, [#allocation10]  }
  0x77   : > { %p5078_p9 = pnand %p5076_p0, %p9729_p8 }
  0x79   : > { %p5079_p10 = pneg %p5078_p9 }
  0x7b   : > { %p5084_p1 = pnand %p5082_p6, %p5079_p10 }
  0x7d   : > { %5087 = shalt.err (!%p5084_p1)
}
  0x7e   : > { %s5088_s3 = scalar_lea.vmem %s236_s29, 4608  ;;  %p5096_p13 = scmp.lt.s32.totalorder %s236_s29, %s236_s29 }
  0x7f   : > { %p5089_p4 = scmp.ne.s32.totalorder %s236_s29, %s5088_s3  ;;  %p5097_p3 = scmp.lt.s32.totalorder %s5088_s3, %s5088_s3 }
  0x81   : > { %p5091_p5 = pnand %p5089_p4, %p9729_p8  ;;  %p5098_p7 = por %p5097_p3, %p5096_p13 }
  0x83   : > { %p5092_p11 = pneg %p5091_p5 }
  0x85   : > { %p5099_p12 = pnand %p5098_p7, %p5092_p11 }
  0x87   : > { %5102 = shalt.err (!%p5099_p12)
}
  0x88   : > { %4745 = dma.hbm_to_vmem [thread:$0]  (!%p9730_p2), %s9367_s5, 4608, %s236_s29, [#allocation13], %s5247_s18, %s5247_s18, %s5248_s16  }
  0x89   : > { %s5493_s21 = scalar_lea.hbm %s9362_s0, %s5393_s19  ;;  %s253_s14 = scalar_lea.vmem [#allocation3], %s5397_s26 }
  0x8a   : > { %s261_s6 = sshll.u32 %s253_s14, 4  ;;  %s5502_s10 = scalar_lea.hbm %s9364_s2, %s5393_s19  ;;  %s5496_s6 = int_to_ptr.vmem [resolvable:$true] %s261_s6 }
  0x8b   : > { %s9731_s15 = sand.u32 1, %s5237_s23   ;;  %s5103_s12 = scalar_lea.hbm %s5493_s21, 4096 }
  0x8c   : > { %s5506_s29 = scalar_lea.sflag [#allocation4], %s9731_s15  ;;  %p5104_p12 = scmp.ne.s32.totalorder %s5493_s21, %s5103_s12 }
  0x8d   : > { %p9732_p8 = scmp.ne.s32.totalorder %s9728_s17, 0  ;;  %s5108_s27 = scalar_lea.hbm %s9362_s0, 8192 }
  0x8e   : > { %p5109_p9 = scmp.lt.u32.totalorder %s5493_s21, %s9362_s0  ;;  %p5110_p10 = scmp.lt.u32.totalorder %s5108_s27, %s5103_s12 }
  0x8f   : > { %p5106_p2 = pnand %p5104_p12, %p9732_p8  ;;  %p5112_p1 = scmp.lt.u32.totalorder %s5103_s12, %s5493_s21 }
  0x90   : > { %p5111_p6 = por %p5110_p10, %p5109_p9 }
  0x91   : > { %p5107_p0 = pneg %p5106_p2 }
  0x92   : > { %p5113_p4 = por %p5112_p1, %p5111_p6 }
  0x94   : > { %p5114_p5 = pnand %p5113_p4, %p5107_p0 }
  0x96   : > { %5117 = shalt.err (!%p5114_p5)
}
  0x97   : > { %s5118_s19 = scalar_lea.vmem %s5496_s6, 4096  ;;  %s5251_s1 = smov [#allocation3]  }
  0x98   : > { %p5119_p11 = scmp.ne.s32.totalorder %s5496_s6, %s5118_s19  ;;  %s5123_s14 = sshll.u32 %s5251_s1, 4  ;;  %s5124_s14 = int_to_ptr.vmem [resolvable:$false] %s5123_s14 }
  0x99   : > { %s5125_s24 = scalar_lea.vmem %s5124_s14, 8192  ;;  %p5126_p7 = scmp.lt.s32.totalorder %s5496_s6, %s5124_s14 }
  0x9a   : > { %p5121_p13 = pnand %p5119_p11, %p9732_p8  ;;  %p5127_p12 = scmp.lt.s32.totalorder %s5125_s24, %s5118_s19 }
  0x9c   : > { %p5122_p3 = pneg %p5121_p13  ;;  %p5128_p2 = por %p5127_p12, %p5126_p7 }
  0x9e   : > { %p5129_p9 = pnand %p5128_p2, %p5122_p3 }
  0xa0   : > { %5132 = shalt.err (!%p5129_p9)
}
  0xa1   : > { %p9733_p0 = scmp.ne.s32.totalorder %s9726_s28, 0  ;;  %s297_s9 = scalar_lea.vmem [#allocation8], %s5397_s26 }
  0xa2   : > { %s305_s15 = sshll.u32 %s297_s9, 4  ;;  %s5133_s12 = scalar_lea.hbm %s5502_s10, 4096  ;;  %s5534_s15 = int_to_ptr.vmem [resolvable:$true] %s305_s15 }
  0xa3   : > { %4749 = dma.hbm_to_vmem [thread:$0]  (!%p9733_p0), %s5493_s21, 4096, %s5496_s6, %s5506_s29, %s5247_s18, %s5247_s18, %s5248_s16  }
  0xa4   : > { %p5134_p10 = scmp.ne.s32.totalorder %s5502_s10, %s5133_s12  ;;  %s5138_s27 = scalar_lea.hbm %s9364_s2, 8192 }
  0xa5   : > { %p5139_p4 = scmp.lt.u32.totalorder %s5502_s10, %s9364_s2  ;;  %p5140_p5 = scmp.lt.u32.totalorder %s5138_s27, %s5133_s12 }
  0xa6   : > { %p5136_p6 = pnand %p5134_p10, %p9732_p8  ;;  %p5142_p13 = scmp.lt.u32.totalorder %s5133_s12, %s5502_s10 }
  0xa7   : > { %p5141_p11 = por %p5140_p5, %p5139_p4 }
  0xa8   : > { %p5137_p1 = pneg %p5136_p6 }
  0xa9   : > { %p5143_p3 = por %p5142_p13, %p5141_p11 }
  0xab   : > { %p5144_p7 = pnand %p5143_p3, %p5137_p1 }
  0xad   : > { %5147 = shalt.err (!%p5144_p7)
}
  0xae   : > { %s5148_s26 = scalar_lea.vmem %s5534_s15, 4096  ;;  %s5252_s21 = smov [#allocation8]  }
  0xaf   : > { %p5149_p12 = scmp.ne.s32.totalorder %s5534_s15, %s5148_s26  ;;  %s5153_s6 = sshll.u32 %s5252_s21, 4  ;;  %s5154_s6 = int_to_ptr.vmem [resolvable:$false] %s5153_s6 }
  0xb0   : > { %s5155_s29 = scalar_lea.vmem %s5154_s6, 8192  ;;  %p5156_p10 = scmp.lt.s32.totalorder %s5534_s15, %s5154_s6 }
  0xb1   : > { %p5151_p2 = pnand %p5149_p12, %p9732_p8  ;;  %p5157_p6 = scmp.lt.s32.totalorder %s5155_s29, %s5148_s26 }
  0xb3   : > { %p5152_p9 = pneg %p5151_p2  ;;  %p5158_p4 = por %p5157_p6, %p5156_p10 }
  0xb5   : > { %p5159_p5 = pnand %p5158_p4, %p5152_p9 }
  0xb7   : > { %5162 = shalt.err (!%p5159_p5)
}
  0xb8   : > { %4755 = dma.hbm_to_vmem [thread:$0]  (!%p9733_p0), %s5502_s10, 4096, %s5534_s15, %s5417_s7, %s5247_s18, %s5247_s18, %s5248_s16  }
  0xb9   : > { %p9734_p8 = scmp.ne.s32.totalorder %s9720_s11, 0 }
  0xbb   : > { %317 = sbr.rel (%p9734_p8) target bundleno = 1014 (0x3f6), region = 44 }
  0xc2   : > { %s5564_s17 = sand.u32 1, %s5233_s22   ;;  %p9735_p1 = scmp.ne.s32.totalorder %s9715_s8, 0 }
  0xc3   : > { %s5567_s19 = sshll.u32 %s5564_s17, 8  ;;  %s320_s28 = scalar_lea.sflag [#allocation4], %s5564_s17 }
  0xc4   : > { %s5571_s1 = scalar_lea.vmem [#allocation3], %s5567_s19 }
  0xc5   : > { %5208 = dma.done.wait (%p9735_p1), %s320_s28, 4096  }
  0xc6   : > { %5210 = vsyncadd (%p9735_p1), %s320_s28, 4294963200  ;;  %s328_s11 = sand.u32 1, %s5314_s25   ;;  %s5579_s18 = scalar_lea.vmem [#allocation6], %s5567_s19 }
  0xc7   : > { %s329_s7 = scalar_lea.sflag [#allocation7], %s328_s11 }
  0xc8   : > { %5212 = dma.done.wait (%p9735_p1), %s329_s7, 8192  }
  0xc9   : > { %5214 = vsyncadd (%p9735_p1), %s329_s7, 4294959104  ;;  %s5586_s16 = scalar_lea.vmem [#allocation8], %s5567_s19  ;;  %p9736_p0 = scmp.eq.s32.totalorder %s5314_s25, 0 }
  0xcb   : > { %5216 = dma.done.wait (%p9736_p0), [#allocation10], 640   ;;  %p9737_p11 = pmov %p9736_p0 }
  0xcc   : > { %p9738_p13 = pmov %p9736_p0 }
  0xcd   : > { %5218 = vsyncadd (%p9737_p11), [#allocation10], 4294966656 }
  0xce   : > { %5220 = dma.done.wait (%p9738_p13), [#allocation13], 4608   ;;  %p9739_p3 = pmov %p9736_p0 }
  0xcf   : > { %vm520_vm0 = vcmask 64512   ;;  %v2809_v0 = vld [vmem:[%s5579_s18] sm:$0xff]  ;;  %v2810_v1 = vld [vmem:[%s5579_s18 + $0x8] sm:$0xff]  ;;  %v2811_v5 = vld [vmem:[%s5579_s18 + $0x10] sm:$0xff]  ;;  %vm3345_vm1 = vcmask 261120   ;;  %s8842_s8 = scalar_lea.vmem [#allocation14], %s5567_s19 }
  0xd0   : > { %5222 = vsyncadd (%p9739_p3), [#allocation13], 4294962688  ;;  %v2813_v2 = vld [vmem:[%s5579_s18 + $0x20] sm:$0xff]  ;;  %v2841_v3 = vpack.c.bf16 %v2810_v1, %v2809_v0  ;;  %v2814_v4 = vld [vmem:[%s5579_s18 + $0x28] sm:$0xff]  ;;  %s4507_s10 = sshll.u32 %s5314_s25, 12  ;;  %s4281_s14 = sshll.u32 %s8842_s8, 4  ;;  %s9301_s14 = int_to_ptr.vmem [resolvable:$true] %s4281_s14 }
  0xd1   : > { %v2812_v6 = vld [vmem:[%s5579_s18 + $0x18] sm:$0xff]  ;;  %v2843_v7 = vpack.c.bf16 %v2814_v4, %v2813_v2  ;;  %v2815_v9 = vld [vmem:[%s5579_s18 + $0x30] sm:$0xff]  ;;  %v2761_v11 = vld [vmem:[%s5571_s1] sm:$0xff]  ;;  %s10747_s9 = sld [smem:[#allocation201_spill]]  ;;  %s10748_s15 = sld [smem:[#allocation24_spill]] }
  0xd2   : > { %v2842_v8 = vpack.c.bf16 %v2812_v6, %v2811_v5  ;;  %v2816_v10 = vld [vmem:[%s5579_s18 + $0x38] sm:$0xff]  ;;  %4700 = vmatprep.subr.msk.bf16.mxu0 %vm520_vm0, %v2841_v3  ;;  %v2864_v12 = vsel %vm520_vm0, %v2841_v3, 0  ;;  %v2762_v14 = vld [vmem:[%s5571_s1 + $0x8] sm:$0xff]  ;;  %v2765_v15 = vld [vmem:[%s5571_s1 + $0x20] sm:$0xff]  ;;  %s4267_s30 = scalar_lea.sflag [#allocation5], %s5564_s17  ;;  %s5163_s3 = scalar_lea.vmem %s9301_s14, 4096 }
  0xd3   : > { %v2844_v13 = vpack.c.bf16 %v2816_v10, %v2815_v9  ;;  %v2766_v16 = vld [vmem:[%s5571_s1 + $0x28] sm:$0xff]  ;;  %4702 = vmatprep.subr.msk.bf16.mxu1 %vm520_vm0, %v2843_v7  ;;  %4573 = vmatpush3.bf16.xpose.msra.mxu0 %v2864_v12  ;;  %v2925_v17 = vsel %vm520_vm0, %v2843_v7, 0  ;;  %v2793_v18 = vpack.c.bf16 %v2762_v14, %v2761_v11  ;;  %v2817_v20 = vld [vmem:[%s5579_s18 + $0x40] sm:$0xff]  ;;  %v2763_v28 = vld [vmem:[%s5571_s1 + $0x10] sm:$0xff]  ;;  %p5164_p7 = scmp.ne.s32.totalorder %s9301_s14, %s5163_s3  ;;  %s5255_s27 = smov [#allocation14]  }
  0xd4   : > { %v2795_v19 = vpack.c.bf16 %v2766_v16, %v2765_v15  ;;  %4581 = vmatpush3.bf16.xpose.msra.mxu1 %v2925_v17  ;;  %4701 = vmatprep.subr.msk.bf16.mxu0 %vm520_vm0, %v2842_v8  ;;  %v2818_v21 = vld [vmem:[%s5579_s18 + $0x48] sm:$0xff]  ;;  %v2821_v22 = vld [vmem:[%s5579_s18 + $0x60] sm:$0xff]  ;;  %v2867_v24 = vsel %vm520_vm0, %v2842_v8, 0  ;;  %v2764_v29 = vld [vmem:[%s5571_s1 + $0x18] sm:$0xff]  ;;  %s5167_s13 = sshll.u32 %s5255_s27, 4  ;;  %s5168_s13 = int_to_ptr.vmem [resolvable:$false] %s5167_s13 }
  0xd5   : > { %4703 = vmatprep.subr.msk.bf16.mxu1 %vm520_vm0, %v2844_v13  ;;  %4576 = vmatprep.mubr.msk.bf16.mxu0 %vm520_vm0, %v2793_v18  ;;  %v2822_v23 = vld [vmem:[%s5579_s18 + $0x68] sm:$0xff]  ;;  %v2845_v25 = vpack.c.bf16 %v2818_v21, %v2817_v20  ;;  %v2928_v26 = vsel %vm520_vm0, %v2844_v13, 0  ;;  %v2767_v30 = vld [vmem:[%s5571_s1 + $0x30] sm:$0xff]  ;;  %v2768_v31 = vld [vmem:[%s5571_s1 + $0x38] sm:$0xff]  ;;  %v2794_v35 = vpack.c.bf16 %v2764_v29, %v2763_v28  ;;  %s5169_s20 = scalar_lea.vmem %s5168_s13, 8192  ;;  %p5170_p10 = scmp.lt.s32.totalorder %s9301_s14, %s5168_s13 }
  0xd6   : > { %4584 = vmatprep.mubr.msk.bf16.mxu1 %vm520_vm0, %v2795_v19  ;;  %v2847_v27 = vpack.c.bf16 %v2822_v23, %v2821_v22  ;;  %v2819_v32 = vld [vmem:[%s5579_s18 + $0x50] sm:$0xff]  ;;  %v2820_v33 = vld [vmem:[%s5579_s18 + $0x58] sm:$0xff]  ;;  %v2769_v37 = vld [vmem:[%s5571_s1 + $0x40] sm:$0xff]  ;;  %v2796_v39 = vpack.c.bf16 %v2768_v31, %v2767_v30  ;;  %p5171_p6 = scmp.lt.s32.totalorder %s5169_s20, %s5163_s3 }
  0xd7   : > { %v2823_v34 = vld [vmem:[%s5579_s18 + $0x70] sm:$0xff]  ;;  %v2824_v36 = vld [vmem:[%s5579_s18 + $0x78] sm:$0xff]  ;;  %v2770_v38 = vld [vmem:[%s5571_s1 + $0x48] sm:$0xff]  ;;  %v2986_v42 = vsel %vm520_vm0, %v2845_v25, 0  ;;  %v2846_v43 = vpack.c.bf16 %v2820_v33, %v2819_v32  ;;  %s9299_s12 = scalar_lea.hbm %s10747_s9, %s4507_s10  ;;  %p10749_p12 = scmp.ne.s32.totalorder %s10748_s15, 0 }
  0xd8   : > { %v2773_v40 = vld [vmem:[%s5571_s1 + $0x60] sm:$0xff]  ;;  %v2774_v41 = vld [vmem:[%s5571_s1 + $0x68] sm:$0xff]  ;;  %v3047_v44 = vsel %vm520_vm0, %v2847_v27, 0  ;;  %v2848_v45 = vpack.c.bf16 %v2824_v36, %v2823_v34  ;;  %v2797_v46 = vpack.c.bf16 %v2770_v38, %v2769_v37  ;;  %v2771_v56 = vld [vmem:[%s5571_s1 + $0x50] sm:$0xff]  ;;  %p5172_p4 = por %p5171_p6, %p5170_p10 }
  0xd9   : > { %v2799_v47 = vpack.c.bf16 %v2774_v41, %v2773_v40  ;;  %v2825_v48 = vld [vmem:[%s5579_s18 + $0x80] sm:$0xff]  ;;  %v2826_v49 = vld [vmem:[%s5579_s18 + $0x88] sm:$0xff]  ;;  %v2989_v52 = vsel %vm520_vm0, %v2846_v43, 0  ;;  %v2772_v57 = vld [vmem:[%s5571_s1 + $0x58] sm:$0xff]  ;;  %p5165_p2 = pnand %p5164_p7, %p10749_p12 }
  0xda   : > { %v2829_v50 = vld [vmem:[%s5579_s18 + $0xa0] sm:$0xff]  ;;  %v2830_v51 = vld [vmem:[%s5579_s18 + $0xa8] sm:$0xff]  ;;  %v2849_v53 = vpack.c.bf16 %v2826_v49, %v2825_v48  ;;  %v3050_v54 = vsel %vm520_vm0, %v2848_v45, 0  ;;  %v2775_v58 = vld [vmem:[%s5571_s1 + $0x70] sm:$0xff]  ;;  %v2798_v63 = vpack.c.bf16 %v2772_v57, %v2771_v56  ;;  %v5253_v48 = vmov 0  }
  0xdb   : > { %4575 = vmatpush3.bf16.xpose.msra.mxu0 %v2867_v24  ;;  %v2851_v55 = vpack.c.bf16 %v2830_v51, %v2829_v50  ;;  %v2776_v59 = vld [vmem:[%s5571_s1 + $0x78] sm:$0xff]  ;;  %v2827_v60 = vld [vmem:[%s5579_s18 + $0x90] sm:$0xff]  ;;  %v2777_v1 = vld [vmem:[%s5571_s1 + $0x80] sm:$0xff]  ;;  %4812 = vset.pattern.permute.xlu1 %v5253_v48  ;;  %p5166_p9 = pneg %p5165_p2 }
  0xdc   : > { %4583 = vmatpush3.bf16.xpose.msra.mxu1 %v2928_v26  ;;  %4704 = vmatprep.subr.msk.bf16.mxu0 %vm520_vm0, %v2845_v25  ;;  %v2828_v61 = vld [vmem:[%s5579_s18 + $0x98] sm:$0xff]  ;;  %v2831_v62 = vld [vmem:[%s5579_s18 + $0xb0] sm:$0xff]  ;;  %v2778_v2 = vld [vmem:[%s5571_s1 + $0x88] sm:$0xff]  ;;  %v2800_v3 = vpack.c.bf16 %v2776_v59, %v2775_v58  ;;  %v3108_v6 = vsel %vm520_vm0, %v2849_v53, 0 }
  0xdd   : > { %4706 = vmatprep.subr.msk.bf16.mxu1 %vm520_vm0, %v2847_v27  ;;  %v2832_v0 = vld [vmem:[%s5579_s18 + $0xb8] sm:$0xff]  ;;  %v2781_v4 = vld [vmem:[%s5571_s1 + $0xa0] sm:$0xff]  ;;  %v2782_v5 = vld [vmem:[%s5571_s1 + $0xa8] sm:$0xff]  ;;  %v2850_v7 = vpack.c.bf16 %v2828_v61, %v2827_v60  ;;  %v3169_v8 = vsel %vm520_vm0, %v2851_v55, 0  ;;  %v2801_v10 = vpack.c.bf16 %v2778_v2, %v2777_v1  ;;  %4811 = vset.pattern.permute.xlu0 %v5253_v48  ;;  %p5173_p5 = pnand %p5172_p4, %p5166_p9 }
  0xde   : > { %v2852_v9 = vpack.c.bf16 %v2832_v0, %v2831_v62  ;;  %v2803_v11 = vpack.c.bf16 %v2782_v5, %v2781_v4  ;;  %v2833_v12 = vld [vmem:[%s5579_s18 + $0xc0] sm:$0xff]  ;;  %v2834_v13 = vld [vmem:[%s5579_s18 + $0xc8] sm:$0xff]  ;;  %v2779_v20 = vld [vmem:[%s5571_s1 + $0x90] sm:$0xff] }
  0xdf   : > { %v2837_v14 = vld [vmem:[%s5579_s18 + $0xe0] sm:$0xff]  ;;  %v2838_v15 = vld [vmem:[%s5579_s18 + $0xe8] sm:$0xff]  ;;  %v3111_v16 = vsel %vm520_vm0, %v2850_v7, 0  ;;  %v2853_v17 = vpack.c.bf16 %v2834_v13, %v2833_v12  ;;  %v2780_v21 = vld [vmem:[%s5571_s1 + $0x98] sm:$0xff] }
  0xe0   : > { %v3172_v18 = vsel %vm520_vm0, %v2852_v9, 0  ;;  %v2855_v19 = vpack.c.bf16 %v2838_v15, %v2837_v14  ;;  %v2783_v22 = vld [vmem:[%s5571_s1 + $0xb0] sm:$0xff]  ;;  %v2784_v23 = vld [vmem:[%s5571_s1 + $0xb8] sm:$0xff]  ;;  %v2802_v27 = vpack.c.bf16 %v2780_v21, %v2779_v20  ;;  %v2785_v29 = vld [vmem:[%s5571_s1 + $0xc0] sm:$0xff] }
  0xe1   : > { %v2835_v24 = vld [vmem:[%s5579_s18 + $0xd0] sm:$0xff]  ;;  %v2836_v25 = vld [vmem:[%s5579_s18 + $0xd8] sm:$0xff]  ;;  %v2786_v30 = vld [vmem:[%s5571_s1 + $0xc8] sm:$0xff]  ;;  %v2804_v31 = vpack.c.bf16 %v2784_v23, %v2783_v22  ;;  %v3230_v34 = vsel %vm520_vm0, %v2853_v17, 0 }
  0xe2   : > { %4577 = vmatmul.mubr.msk.bf16.vlgmr.msra.gmra.mrb[0].mxu0 %vm520_vm0, %v2794_v35  ;;  %v2839_v26 = vld [vmem:[%s5579_s18 + $0xf0] sm:$0xff]  ;;  %v2840_v28 = vld [vmem:[%s5579_s18 + $0xf8] sm:$0xff]  ;;  %v2789_v32 = vld [vmem:[%s5571_s1 + $0xe0] sm:$0xff]  ;;  %v2854_v35 = vpack.c.bf16 %v2836_v25, %v2835_v24  ;;  %v3291_v36 = vsel %vm520_vm0, %v2855_v19, 0  ;;  %v2805_v38 = vpack.c.bf16 %v2786_v30, %v2785_v29 }
  0xe3   : > { %4585 = vmatmul.mubr.msk.bf16.vlgmr.msra.gmra.mrb[0].mxu1 %vm520_vm0, %v2796_v39  ;;  %4589 = vmatpush3.bf16.xpose.msra.mxu0 %v2986_v42  ;;  %v2790_v33 = vld [vmem:[%s5571_s1 + $0xe8] sm:$0xff]  ;;  %v2856_v37 = vpack.c.bf16 %v2840_v28, %v2839_v26  ;;  %v2787_v42 = vld [vmem:[%s5571_s1 + $0xd0] sm:$0xff]  ;;  %v5795_v28 = vld [vmem:[%s5586_s16] sm:$0xff] }
  0xe4   : > { %4597 = vmatpush3.bf16.xpose.msra.mxu1 %v3047_v44  ;;  %4705 = vmatprep.subr.msk.bf16.mxu0 %vm520_vm0, %v2846_v43  ;;  %v2807_v39 = vpack.c.bf16 %v2790_v33, %v2789_v32  ;;  %v3233_v40 = vsel %vm520_vm0, %v2854_v35, 0  ;;  %v2788_v43 = vld [vmem:[%s5571_s1 + $0xd8] sm:$0xff]  ;;  %v2791_v44 = vld [vmem:[%s5571_s1 + $0xf0] sm:$0xff]  ;;  %9755 = vst [vmem:[#allocation41_spill] sm:$0xff] %v5795_v28  ;;  %v5798_v29 = vld [vmem:[%s5586_s16 + $0x8] sm:$0xff] }
  0xe5   : > { %4707 = vmatprep.subr.msk.bf16.mxu1 %vm520_vm0, %v2848_v45  ;;  %4592 = vmatprep.mubr.msk.bf16.mxu0 %vm520_vm0, %v2797_v46  ;;  %v3294_v41 = vsel %vm520_vm0, %v2856_v37, 0  ;;  %v2792_v45 = vld [vmem:[%s5571_s1 + $0xf8] sm:$0xff]  ;;  %v2806_v46 = vpack.c.bf16 %v2788_v43, %v2787_v42  ;;  %9756 = vst [vmem:[#allocation42_spill] sm:$0xff] %v5798_v29  ;;  %v3650_v30 = vpack.c.bf16 %v5798_v29, %v5795_v28  ;;  %v5806_v32 = vld [vmem:[%s5586_s16 + $0x28] sm:$0xff] }
  0xe6   : > { %4600 = vmatprep.mubr.msk.bf16.mxu1 %vm520_vm0, %v2799_v47  ;;  %v2808_v47 = vpack.c.bf16 %v2792_v45, %v2791_v44  ;;  %9758 = vst [vmem:[#allocation44_spill] sm:$0xff] %v5806_v32 }
  0xeb   : > { %4591 = vmatpush3.bf16.xpose.msra.mxu0 %v2989_v52 }
  0xec   : > { %4599 = vmatpush3.bf16.xpose.msra.mxu1 %v3050_v54  ;;  %4708 = vmatprep.subr.msk.bf16.mxu0 %vm520_vm0, %v2849_v53 }
  0xed   : > { %4710 = vmatprep.subr.msk.bf16.mxu1 %vm520_vm0, %v2851_v55 }
  0xf2   : > { %4593 = vmatmul.mubr.msk.bf16.vlgmr.msra.gmra.mrb[4].mxu0 %vm520_vm0, %v2798_v63 }
  0xf3   : > { %4601 = vmatmul.mubr.msk.bf16.vlgmr.msra.gmra.mrb[4].mxu1 %vm520_vm0, %v2800_v3  ;;  %4605 = vmatpush3.bf16.xpose.msra.mxu0 %v3108_v6 }
  0xf4   : > { %4613 = vmatpush3.bf16.xpose.msra.mxu1 %v3169_v8  ;;  %4709 = vmatprep.subr.msk.bf16.mxu0 %vm520_vm0, %v2850_v7 }
  0xf5   : > { %4711 = vmatprep.subr.msk.bf16.mxu1 %vm520_vm0, %v2852_v9  ;;  %4608 = vmatprep.mubr.msk.bf16.mxu0 %vm520_vm0, %v2801_v10 }
  0xf6   : > { %4616 = vmatprep.mubr.msk.bf16.mxu1 %vm520_vm0, %v2803_v11 }
  0xfb   : > { %4607 = vmatpush3.bf16.xpose.msra.mxu0 %v3111_v16 }
  0xfc   : > { %4615 = vmatpush3.bf16.xpose.msra.mxu1 %v3172_v18  ;;  %4712 = vmatprep.subr.msk.bf16.mxu0 %vm520_vm0, %v2853_v17 }
  0xfd   : > { %4714 = vmatprep.subr.msk.bf16.mxu1 %vm520_vm0, %v2855_v19 }
 0x102   : > { %4609 = vmatmul.mubr.msk.bf16.vlgmr.msra.gmra.mrb[8].mxu0 %vm520_vm0, %v2802_v27 }
 0x103   : > { %4617 = vmatmul.mubr.msk.bf16.vlgmr.msra.gmra.mrb[8].mxu1 %vm520_vm0, %v2804_v31  ;;  %4621 = vmatpush3.bf16.xpose.msra.mxu0 %v3230_v34  ;;  %v5803_v31 = vld [vmem:[%s5586_s16 + $0x20] sm:$0xff] }
 0x104   : > { %4629 = vmatpush3.bf16.xpose.msra.mxu1 %v3291_v36  ;;  %4713 = vmatprep.subr.msk.bf16.mxu0 %vm520_vm0, %v2854_v35  ;;  %9757 = vst [vmem:[#allocation43_spill] sm:$0xff] %v5803_v31  ;;  %v3652_v33 = vpack.c.bf16 %v5806_v32, %v5803_v31  ;;  %v5813_v35 = vld [vmem:[%s5586_s16 + $0x10] sm:$0xff]  ;;  %v5816_v36 = vld [vmem:[%s5586_s16 + $0x18] sm:$0xff] }
 0x105   : > { %4715 = vmatprep.subr.msk.bf16.mxu1 %vm520_vm0, %v2856_v37  ;;  %4624 = vmatprep.mubr.msk.bf16.mxu0 %vm520_vm0, %v2805_v38  ;;  %9759 = vst [vmem:[#allocation45_spill] sm:$0xff] %v5816_v36  ;;  %v3651_v38 = vpack.c.bf16 %v5816_v36, %v5813_v35 }
 0x106   : > { %4632 = vmatprep.mubr.msk.bf16.mxu1 %vm520_vm0, %v2807_v39  ;;  %v5823_v39 = vld [vmem:[%s5586_s16 + $0x30] sm:$0xff] }
 0x107   : > { %9760 = vst [vmem:[#allocation46_spill] sm:$0xff] %v5823_v39 }
 0x10b   : > { %4623 = vmatpush3.bf16.xpose.msra.mxu0 %v3233_v40  ;;  %v5826_v40 = vld [vmem:[%s5586_s16 + $0x38] sm:$0xff] }
 0x10c   : > { %4631 = vmatpush3.bf16.xpose.msra.mxu1 %v3294_v41  ;;  %4636 = vmatprep.subr.bf16.mxu0 %v3650_v30  ;;  %9761 = vst [vmem:[#allocation47_spill] sm:$0xff] %v5826_v40  ;;  %v3653_v41 = vpack.c.bf16 %v5826_v40, %v5823_v39 }
 0x10d   : > { %4644 = vmatprep.subr.bf16.mxu1 %v3652_v33 }
 0x112   : > { %4625 = vmatmul.mubr.msk.bf16.vlgmr.msra.gmra.mrb[12].mxu0 %vm520_vm0, %v2806_v46 }
 0x113   : > { %4633 = vmatmul.mubr.msk.bf16.vlgmr.msra.gmra.mrb[12].mxu1 %vm520_vm0, %v2808_v47  ;;  %4637 = vmatpush3.bf16.msra.mxu0 %v3650_v30 }
 0x114   : > { %4645 = vmatpush3.bf16.msra.mxu1 %v3652_v33  ;;  %4638 = vmatprep.subr.bf16.mxu0 %v3651_v38  ;;  %v487_v33 = vlaneseq }
 0x115   : > { %4646 = vmatprep.subr.bf16.mxu1 %v3653_v41 }
 0x117   : > { %4639 = vmatpush3.bf16.msra.mxu0 %v3651_v38  ;;  %v4452_v38 = vld.sshfl [vmem:[#allocation11] sm:$0x33 pattern:$0x75316420] }
 0x118   : > { %4647 = vmatpush3.bf16.msra.mxu1 %v3653_v41 }
 0x1b5   : > { %v5708_v49 = vpop.f32.mrb[0].mxu0 }
 0x1b6   : > { %v5710_v50 = vpop.f32.mrb[0].mxu1  ;;  %v5712_v51 = vpop.f32.mrb[1].mxu0  ;;  %v3352_v52 = vsel %vm3345_vm1, %v5708_v49, -inf }
 0x1b7   : > { %v5716_v53 = vpop.f32.mrb[1].mxu1  ;;  %3353 = vmax.xlane.f32.xlu0 %v3352_v52  ;;  %v5718_v54 = vpop.f32.mrb[2].mxu0  ;;  %v3364_v59 = vsel %vm3345_vm1, %v5710_v50, -inf  ;;  %v3346_v61 = vsel %vm3345_vm1, %v5712_v51, -inf }
 0x1b8   : > { %v5720_v55 = vpop.f32.mrb[2].mxu1  ;;  %v3358_v56 = vsel %vm3345_vm1, %v5716_v53, -inf  ;;  %v5724_v57 = vpop.f32.mrb[3].mxu0  ;;  %v3355_v60 = vsel %vm3345_vm1, %v5718_v54, -inf }
 0x1b9   : > { %3359 = vmax.xlane.f32.xlu1 %v3358_v56  ;;  %v5726_v58 = vpop.f32.mrb[3].mxu1  ;;  %v3367_v62 = vsel %vm3345_vm1, %v5720_v55, -inf  ;;  %v3349_v63 = vsel %vm3345_vm1, %v5724_v57, -inf }
 0x1ba   : > { %v3361_v0 = vsel %vm3345_vm1, %v5726_v58, -inf }
 0x1bb   : > { %3365 = vmax.xlane.f32.xlu0 %v3364_v59  ;;  %v5849_v59 = vld [vmem:[%s5586_s16 + $0x40] sm:$0xff] }
 0x1bc   : > { %9767 = vst [vmem:[#allocation53_spill] sm:$0xff] %v5849_v59 }
 0x1bd   : > { %3356 = vmax.xlane.f32.xlu1 %v3355_v60  ;;  %v5852_v60 = vld [vmem:[%s5586_s16 + $0x48] sm:$0xff] }
 0x1be   : > { %9768 = vst [vmem:[#allocation54_spill] sm:$0xff] %v5852_v60 }
 0x1bf   : > { %3347 = vmax.xlane.f32.xlu0 %v3346_v61 }
 0x1c1   : > { %3368 = vmax.xlane.f32.xlu1 %v3367_v62 }
 0x1c3   : > { %3350 = vmax.xlane.f32.xlu0 %v3349_v63 }
 0x1c5   : > { %3362 = vmax.xlane.f32.xlu1 %v3361_v0  ;;  %v5740_v1 = vpop.f32.mrb[4].mxu0  ;;  %v5862_v0 = vpack.c.bf16 %v5852_v60, %v5849_v59 }
 0x1c6   : > { %v5742_v2 = vpop.f32.mrb[5].mxu0  ;;  %v5744_v3 = vpop.f32.mrb[4].mxu1  ;;  %v3376_v4 = vsel %vm3345_vm1, %v5740_v1, -inf }
 0x1c7   : > { %9740 = vst [vmem:[#allocation26_spill] sm:$0xff] %v5742_v2  ;;  %9741 = vst [vmem:[#allocation27_spill] sm:$0xff] %v5744_v3  ;;  %v5748_v5 = vpop.f32.mrb[5].mxu1  ;;  %3377 = vmax.xlane.f32.xlu0 %v3376_v4  ;;  %v5750_v6 = vpop.f32.mrb[6].mxu0  ;;  %v3388_v10 = vsel %vm3345_vm1, %v5744_v3, -inf  ;;  %v3370_v13 = vsel %vm3345_vm1, %v5742_v2, -inf  ;;  %4652 = vmatprep.subr.bf16.mxu0 %v5862_v0 }
 0x1c8   : > { %9742 = vst [vmem:[#allocation28_spill] sm:$0xff] %v5748_v5  ;;  %9743 = vst [vmem:[#allocation29_spill] sm:$0xff] %v5750_v6  ;;  %v5752_v7 = vpop.f32.mrb[7].mxu0  ;;  %v5754_v8 = vpop.f32.mrb[6].mxu1  ;;  %v3379_v9 = vsel %vm3345_vm1, %v5750_v6, -inf  ;;  %v3382_v15 = vsel %vm3345_vm1, %v5748_v5, -inf }
 0x1c9   : > { %9744 = vst [vmem:[#allocation30_spill] sm:$0xff] %v5752_v7  ;;  %9745 = vst [vmem:[#allocation31_spill] sm:$0xff] %v5754_v8  ;;  %v5760_v11 = vpop.f32.mrb[7].mxu1  ;;  %3380 = vmax.xlane.f32.xlu1 %v3379_v9  ;;  %v3391_v12 = vsel %vm3345_vm1, %v5754_v8, -inf  ;;  %v3373_v14 = vsel %vm3345_vm1, %v5752_v7, -inf  ;;  %v6058_v2 = vld [vmem:[%s5586_s16 + $0xf8] sm:$0xff] }
 0x1ca   : > { %9746 = vst [vmem:[#allocation32_spill] sm:$0xff] %v5760_v11  ;;  %v3385_v16 = vsel %vm3345_vm1, %v5760_v11, -inf  ;;  %9771 = vst [vmem:[#allocation57_spill] sm:$0xff] %v5862_v0  ;;  %v9818_v3 = vrot.slane %v5816_v36, 3 }
 0x1cb   : > { %3389 = vmax.xlane.f32.xlu0 %v3388_v10  ;;  %v5870_v10 = vld [vmem:[%s5586_s16 + $0x60] sm:$0xff] }
 0x1cc   : > { %9773 = vst [vmem:[#allocation59_spill] sm:$0xff] %v5870_v10  ;;  %v9804_v11 = vrot.slane %v5870_v10, 3 }
 0x1cd   : > { %3392 = vmax.xlane.f32.xlu1 %v3391_v12 }
 0x1cf   : > { %3371 = vmax.xlane.f32.xlu0 %v3370_v13 }
 0x1d1   : > { %3374 = vmax.xlane.f32.xlu1 %v3373_v14  ;;  %v5877_v14 = vld [vmem:[%s5586_s16 + $0x68] sm:$0xff] }
 0x1d2   : > { %9774 = vst [vmem:[#allocation60_spill] sm:$0xff] %v5877_v14 }
 0x1d3   : > { %3383 = vmax.xlane.f32.xlu0 %v3382_v15  ;;  %v5881_v15 = vpack.c.bf16 %v5877_v14, %v5870_v10 }
 0x1d5   : > { %3386 = vmax.xlane.f32.xlu1 %v3385_v16  ;;  %v5772_v17 = vpop.f32.mrb[8].mxu0  ;;  %9775 = vst [vmem:[#allocation61_spill] sm:$0xff] %v5881_v15  ;;  %4660 = vmatprep.subr.bf16.mxu1 %v5881_v15  ;;  %v6012_v15 = vld [vmem:[%s5586_s16 + $0xe0] sm:$0xff] }
 0x1d6   : > { %9747 = vst [vmem:[#allocation33_spill] sm:$0xff] %v5772_v17  ;;  %v5774_v18 = vpop.f32.mrb[9].mxu0  ;;  %v5776_v19 = vpop.f32.mrb[8].mxu1  ;;  %v3400_v20 = vsel %vm3345_vm1, %v5772_v17, -inf  ;;  %9793 = vst [vmem:[#allocation79_spill] sm:$0xff] %v6012_v15 }
 0x1d7   : > { %9748 = vst [vmem:[#allocation34_spill] sm:$0xff] %v5774_v18  ;;  %9749 = vst [vmem:[#allocation35_spill] sm:$0xff] %v5776_v19  ;;  %v5780_v21 = vpop.f32.mrb[9].mxu1  ;;  %3401 = vmax.xlane.f32.xlu0 %v3400_v20  ;;  %v5782_v22 = vpop.f32.mrb[10].mxu0  ;;  %v3412_v26 = vsel %vm3345_vm1, %v5776_v19, -inf  ;;  %v3394_v37 = vsel %vm3345_vm1, %v5774_v18, -inf }
 0x1d8   : > { %9750 = vst [vmem:[#allocation36_spill] sm:$0xff] %v5780_v21  ;;  %9751 = vst [vmem:[#allocation37_spill] sm:$0xff] %v5782_v22  ;;  %v5784_v23 = vpop.f32.mrb[11].mxu0  ;;  %v5786_v24 = vpop.f32.mrb[10].mxu1  ;;  %v3403_v25 = vsel %vm3345_vm1, %v5782_v22, -inf  ;;  %v3406_v43 = vsel %vm3345_vm1, %v5780_v21, -inf }
 0x1d9   : > { %9752 = vst [vmem:[#allocation38_spill] sm:$0xff] %v5784_v23  ;;  %9753 = vst [vmem:[#allocation39_spill] sm:$0xff] %v5786_v24  ;;  %v5792_v27 = vpop.f32.mrb[11].mxu1  ;;  %3404 = vmax.xlane.f32.xlu1 %v3403_v25  ;;  %v3415_v34 = vsel %vm3345_vm1, %v5786_v24, -inf  ;;  %v3397_v42 = vsel %vm3345_vm1, %v5784_v23, -inf  ;;  %v555_v21 = vrot.slane %v5849_v59, 3 }
 0x1da   : > { %9754 = vst [vmem:[#allocation40_spill] sm:$0xff] %v5792_v27  ;;  %v3409_v44 = vsel %vm3345_vm1, %v5792_v27, -inf  ;;  %v554_v27 = vrot.slane %v5803_v31, 3  ;;  %v5998_v23 = vld [vmem:[%s5586_s16 + $0xc0] sm:$0xff]  ;;  %v6001_v18 = vld [vmem:[%s5586_s16 + $0xc8] sm:$0xff]  ;;  %v9797_v24 = vrot.slane %v5798_v29, 3 }
 0x1db   : > { %3413 = vmax.xlane.f32.xlu0 %v3412_v26  ;;  %v5254_v26 = vmov 1966171168   ;;  %9791 = vst [vmem:[#allocation77_spill] sm:$0xff] %v5998_v23  ;;  %9792 = vst [vmem:[#allocation78_spill] sm:$0xff] %v6001_v18  ;;  %v447_v19 = vld [vmem:[#allocation12 + $0x40] sm:$0xff] }
 0x1dc   : > { %v485_v30 = vunpack.c.l.s4 %v5254_v26 }
 0x1dd   : > { %3416 = vmax.xlane.f32.xlu1 %v3415_v34 }
 0x1de   : > { %v486_v34 = vunpack.c.0.s8 %v485_v30 }
 0x1df   : > { %3395 = vmax.xlane.f32.xlu0 %v3394_v37  ;;  %v5890_v37 = vshrl.u32 %v487_v33, 7  ;;  %v448_v33 = vld [vmem:[#allocation12 + $0x48] sm:$0xff] }
 0x1e1   : > { %3398 = vmax.xlane.f32.xlu1 %v3397_v42  ;;  %v5893_v41 = vsub.s32 %v486_v34, %v5890_v37  ;;  %v483_v42 = vcombine.high %v4452_v38, %v4452_v38  ;;  %v442_v34 = vld [vmem:[#allocation12 + $0x18] sm:$0xff]  ;;  %vm587_vm2 = vcmp.lt.s32.totalorder %v5890_v37, 5  ;;  %vm1135_vm3 = vcmp.lt.s32.totalorder %v5890_v37, 3 }
 0x1e2   : > { %vm861_vm4 = vcmp.lt.s32.totalorder %v5890_v37, 4  ;;  %vm1409_vm5 = vcmp.lt.s32.totalorder %v5890_v37, 1  ;;  %vm1892_vm6 = vcmp.lt.s32.totalorder %v5890_v37, 7 }
 0x1e3   : > { %3407 = vmax.xlane.f32.xlu0 %v3406_v43  ;;  %9776 = vst [vmem:[#allocation62_spill] sm:$0xff] %v5893_v41  ;;  %v440_v43 = vld [vmem:[#allocation12 + $0x8] sm:$0xff] }
 0x1e5   : > { %3410 = vmax.xlane.f32.xlu1 %v3409_v44  ;;  %v5836_v45 = vpop.f32.mrb[12].mxu0  ;;  %v490_v44 = vrot.slane %v4452_v38, %v5893_v41  ;;  %v450_v38 = vld [vmem:[#allocation12 + $0x58] sm:$0xff] }
 0x1e6   : > { %9762 = vst [vmem:[#allocation48_spill] sm:$0xff] %v5836_v45  ;;  %v5838_v46 = vpop.f32.mrb[13].mxu0  ;;  %v3424_v47 = vsel %vm3345_vm1, %v5836_v45, -inf  ;;  %v5842_v48 = vpop.f32.mrb[12].mxu1  ;;  %v553_v45 = vrot.slane %v5795_v28, 3 }
 0x1e7   : > { %9763 = vst [vmem:[#allocation49_spill] sm:$0xff] %v5838_v46  ;;  %9764 = vst [vmem:[#allocation50_spill] sm:$0xff] %v5842_v48  ;;  %3425 = vmax.xlane.f32.xlu0 %v3424_v47  ;;  %v5844_v52 = vpop.f32.mrb[14].mxu0  ;;  %v5846_v56 = vpop.f32.mrb[13].mxu1  ;;  %v3418_v9 = vsel %vm3345_vm1, %v5838_v46, -inf  ;;  %v3436_v20 = vsel %vm3345_vm1, %v5842_v48, -inf  ;;  %v497_v47 = vrot.slane %v483_v42, %v5893_v41 }
 0x1e8   : > { %9765 = vst [vmem:[#allocation51_spill] sm:$0xff] %v5844_v52  ;;  %9766 = vst [vmem:[#allocation52_spill] sm:$0xff] %v5846_v56  ;;  %v5854_v61 = vpop.f32.mrb[15].mxu0  ;;  %v3427_v62 = vsel %vm3345_vm1, %v5844_v52, -inf  ;;  %v5858_v63 = vpop.f32.mrb[14].mxu1  ;;  %v3430_v13 = vsel %vm3345_vm1, %v5846_v56, -inf }
 0x1e9   : > { %9769 = vst [vmem:[#allocation55_spill] sm:$0xff] %v5854_v61  ;;  %9770 = vst [vmem:[#allocation56_spill] sm:$0xff] %v5858_v63  ;;  %3428 = vmax.xlane.f32.xlu1 %v3427_v62  ;;  %v5864_v4 = vpop.f32.mrb[15].mxu1  ;;  %v3421_v12 = vsel %vm3345_vm1, %v5854_v61, -inf  ;;  %v3439_v25 = vsel %vm3345_vm1, %v5858_v63, -inf  ;;  %v439_v62 = vld [vmem:[#allocation12] sm:$0xff] }
 0x1ea   : > { %9772 = vst [vmem:[#allocation58_spill] sm:$0xff] %v5864_v4  ;;  %v3433_v16 = vsel %vm3345_vm1, %v5864_v4, -inf  ;;  %v443_v42 = vld [vmem:[#allocation12 + $0x20] sm:$0xff]  ;;  %v458_v4 = vld [vmem:[#allocation12 + $0x98] sm:$0xff]  ;;  %v5988_v46 = vld [vmem:[%s5586_s16 + $0xb0] sm:$0xff] }
 0x1eb   : > { %3419 = vmax.xlane.f32.xlu0 %v3418_v9  ;;  %v5898_v9 = vsub.s32 0, %v5890_v37  ;;  %9790 = vst [vmem:[#allocation76_spill] sm:$0xff] %v5988_v46  ;;  %v5991_v52 = vld [vmem:[%s5586_s16 + $0xb8] sm:$0xff] }
 0x1ec   : > { %v6023_v0 = vpack.c.bf16 %v5991_v52, %v5988_v46 }
 0x1ed   : > { %3422 = vmax.xlane.f32.xlu1 %v3421_v12  ;;  %9777 = vst [vmem:[#allocation63_spill] sm:$0xff] %v5898_v9  ;;  %v498_v12 = vcombine.high %v490_v44, %v490_v44 }
 0x1ee   : > { %9795 = vst [vmem:[#allocation81_spill] sm:$0xff] %v6023_v0 }
 0x1ef   : > { %3431 = vmax.xlane.f32.xlu0 %v3430_v13  ;;  %v499_v13 = vcombine.high %v497_v47, %v497_v47  ;;  %v511_v26 = vrot.slane %v498_v12, %v5898_v9  ;;  %v5937_v12 = vld [vmem:[%s5586_s16 + $0x50] sm:$0xff] }
 0x1f0   : > { %9778 = vst [vmem:[#allocation64_spill] sm:$0xff] %v5937_v12 }
 0x1f1   : > { %3434 = vmax.xlane.f32.xlu1 %v3433_v16  ;;  %v441_v16 = vld [vmem:[#allocation12 + $0x10] sm:$0xff]  ;;  %v515_v30 = vrot.slane %v499_v13, %v5898_v9  ;;  %530 = vst.msk [vmem:[#allocation2 + $0x48] sm:$0xff] %vm520_vm0, %v511_v26  ;;  %546 = vst.msk [vmem:[#allocation2 + $0xc8] sm:$0xff] %vm520_vm0, %v511_v26 }
 0x1f2   : > { %529 = vst.msk [vmem:[#allocation2 + $0x40] sm:$0xff] %vm520_vm0, %v511_v26  ;;  %531 = vst.msk [vmem:[#allocation2 + $0x50] sm:$0xff] %vm520_vm0, %v511_v26  ;;  %v5940_v13 = vld [vmem:[%s5586_s16 + $0x58] sm:$0xff] }
 0x1f3   : > { %3437 = vmax.xlane.f32.xlu0 %v3436_v20  ;;  %v503_v20 = vrot.slane %v490_v44, %v5898_v9  ;;  %534 = vst.msk [vmem:[#allocation2 + $0x68] sm:$0xff] %vm520_vm0, %v515_v30  ;;  %550 = vst.msk [vmem:[#allocation2 + $0xe8] sm:$0xff] %vm520_vm0, %v515_v30  ;;  %v444_v44 = vld [vmem:[#allocation12 + $0x28] sm:$0xff]  ;;  %v5968_v63 = vpack.c.bf16 %v5940_v13, %v5937_v12 }
 0x1f4   : > { %532 = vst.msk [vmem:[#allocation2 + $0x58] sm:$0xff] %vm520_vm0, %v511_v26  ;;  %533 = vst.msk [vmem:[#allocation2 + $0x60] sm:$0xff] %vm520_vm0, %v515_v30 }
 0x1f5   : > { %3440 = vmax.xlane.f32.xlu1 %v3439_v25  ;;  %v507_v25 = vrot.slane %v497_v47, %v5898_v9  ;;  %522 = vst.msk [vmem:[#allocation2 + $0x8] sm:$0xff] %vm520_vm0, %v503_v20  ;;  %538 = vst.msk [vmem:[#allocation2 + $0x88] sm:$0xff] %vm520_vm0, %v503_v20  ;;  %v454_v47 = vld [vmem:[#allocation12 + $0x78] sm:$0xff] }
 0x1f6   : > { %521 = vst.msk [vmem:[#allocation2] sm:$0xff] %vm520_vm0, %v503_v20  ;;  %523 = vst.msk [vmem:[#allocation2 + $0x10] sm:$0xff] %vm520_vm0, %v503_v20 }
 0x1f7   : > { %526 = vst.msk [vmem:[#allocation2 + $0x28] sm:$0xff] %vm520_vm0, %v507_v25  ;;  %542 = vst.msk [vmem:[#allocation2 + $0xa8] sm:$0xff] %vm520_vm0, %v507_v25 }
 0x1f8   : > { %524 = vst.msk [vmem:[#allocation2 + $0x18] sm:$0xff] %vm520_vm0, %v503_v20  ;;  %525 = vst.msk [vmem:[#allocation2 + $0x20] sm:$0xff] %vm520_vm0, %v507_v25 }
 0x1f9   : > { %527 = vst.msk [vmem:[#allocation2 + $0x30] sm:$0xff] %vm520_vm0, %v507_v25  ;;  %528 = vst.msk [vmem:[#allocation2 + $0x38] sm:$0xff] %vm520_vm0, %v507_v25 }
 0x1fa   : > { %535 = vst.msk [vmem:[#allocation2 + $0x70] sm:$0xff] %vm520_vm0, %v515_v30  ;;  %536 = vst.msk [vmem:[#allocation2 + $0x78] sm:$0xff] %vm520_vm0, %v515_v30 }
 0x1fb   : > { %537 = vst.msk [vmem:[#allocation2 + $0x80] sm:$0xff] %vm520_vm0, %v503_v20  ;;  %539 = vst.msk [vmem:[#allocation2 + $0x90] sm:$0xff] %vm520_vm0, %v503_v20 }
 0x1fc   : > { %540 = vst.msk [vmem:[#allocation2 + $0x98] sm:$0xff] %vm520_vm0, %v503_v20  ;;  %541 = vst.msk [vmem:[#allocation2 + $0xa0] sm:$0xff] %vm520_vm0, %v507_v25  ;;  %v5946_v20 = vld [vmem:[%s5586_s16 + $0x78] sm:$0xff] }
 0x1fd   : > { %543 = vst.msk [vmem:[#allocation2 + $0xb0] sm:$0xff] %vm520_vm0, %v507_v25  ;;  %544 = vst.msk [vmem:[#allocation2 + $0xb8] sm:$0xff] %vm520_vm0, %v507_v25  ;;  %v5949_v25 = vld [vmem:[%s5586_s16 + $0x80] sm:$0xff] }
 0x1fe   : > { %545 = vst.msk [vmem:[#allocation2 + $0xc0] sm:$0xff] %vm520_vm0, %v511_v26  ;;  %547 = vst.msk [vmem:[#allocation2 + $0xd0] sm:$0xff] %vm520_vm0, %v511_v26 }
 0x1ff   : > { %548 = vst.msk [vmem:[#allocation2 + $0xd8] sm:$0xff] %vm520_vm0, %v511_v26  ;;  %549 = vst.msk [vmem:[#allocation2 + $0xe0] sm:$0xff] %vm520_vm0, %v515_v30  ;;  %v5952_v26 = vld [vmem:[%s5586_s16 + $0x88] sm:$0xff] }
 0x200   : > { %551 = vst.msk [vmem:[#allocation2 + $0xf0] sm:$0xff] %vm520_vm0, %v515_v30  ;;  %552 = vst.msk [vmem:[#allocation2 + $0xf8] sm:$0xff] %vm520_vm0, %v515_v30  ;;  %v5955_v30 = vld [vmem:[%s5586_s16 + $0x90] sm:$0xff]  ;;  %v5976_v56 = vpack.c.bf16 %v5952_v26, %v5949_v25 }
 0x201   : > { %9780 = vst [vmem:[#allocation66_spill] sm:$0xff] %v5949_v25  ;;  %9781 = vst [vmem:[#allocation67_spill] sm:$0xff] %v5952_v26 }
 0x202   : > { %9782 = vst [vmem:[#allocation68_spill] sm:$0xff] %v5955_v30  ;;  %9785 = vst [vmem:[#allocation71_spill] sm:$0xff] %v5968_v63  ;;  %v6015_v63 = vld [vmem:[%s5586_s16 + $0xe8] sm:$0xff] }
 0x203   : > { %9787 = vst [vmem:[#allocation73_spill] sm:$0xff] %v5976_v56  ;;  %9794 = vst [vmem:[#allocation80_spill] sm:$0xff] %v6015_v63  ;;  %v9799_v56 = vrot.slane %v5806_v32, 3  ;;  %v9812_v6 = vrot.slane %v6015_v63, 3 }
 0x205   : > { %v6041_v0 = vsel %vm587_vm2, %v554_v27, %v9799_v56  ;;  %v6081_v56 = vld [vmem:[%s5586_s16 + $0xd8] sm:$0xff] }
 0x206   : > { %652 = vperm.xlu1 %4812, %v440_v43   ;;  %v452_v43 = vld [vmem:[#allocation12 + $0x68] sm:$0xff]  ;;  %9800 = vst [vmem:[#allocation84_spill] sm:$0xff] %v6041_v0 }
 0x209   : > { %647 = vperm.xlu0 %4811, %v439_v62   ;;  %v445_v62 = vld [vmem:[#allocation12 + $0x30] sm:$0xff] }
 0x20a   : > { %657 = vperm.xlu1 %4812, %v441_v16   ;;  %v5943_v16 = vld [vmem:[%s5586_s16 + $0x70] sm:$0xff] }
 0x20b   : > { %9779 = vst [vmem:[#allocation65_spill] sm:$0xff] %v5943_v16  ;;  %v5972_v48 = vpack.c.bf16 %v5946_v20, %v5943_v16 }
 0x20d   : > { %1200 = vperm.xlu0 %4811, %v448_v33   ;;  %v4453_v33 = vld.sshfl [vmem:[#allocation9] sm:$0x33 pattern:$0x75316420]  ;;  %9786 = vst [vmem:[#allocation72_spill] sm:$0xff] %v5972_v48  ;;  %v557_v48 = vrot.slane %v5949_v25, 3 }
 0x20e   : > { %662 = vperm.xlu1 %4812, %v442_v34   ;;  %v5958_v34 = vld [vmem:[%s5586_s16 + $0x98] sm:$0xff] }
 0x211   : > { %1210 = vperm.xlu0 %4811, %v450_v38   ;;  %v5961_v38 = vld [vmem:[%s5586_s16 + $0xa0] sm:$0xff] }
 0x212   : > { %921 = vperm.xlu1 %4812, %v443_v42   ;;  %9783 = vst [vmem:[#allocation69_spill] sm:$0xff] %v5961_v38  ;;  %v5964_v42 = vld [vmem:[%s5586_s16 + $0xa8] sm:$0xff]  ;;  %v558_v22 = vrot.slane %v5961_v38, 3 }
 0x213   : > { %9784 = vst [vmem:[#allocation70_spill] sm:$0xff] %v5964_v42  ;;  %v5984_v61 = vpack.c.bf16 %v5964_v42, %v5961_v38  ;;  %v9808_v8 = vrot.slane %v5964_v42, 3 }
 0x215   : > { %1474 = vperm.xlu0 %4811, %v452_v43   ;;  %v456_v43 = vld [vmem:[#allocation12 + $0x88] sm:$0xff]  ;;  %9789 = vst [vmem:[#allocation75_spill] sm:$0xff] %v5984_v61 }
 0x216   : > { %926 = vperm.xlu1 %4812, %v444_v44   ;;  %v446_v44 = vld [vmem:[#allocation12 + $0x38] sm:$0xff]  ;;  %v460_v61 = vld [vmem:[#allocation12 + $0xa8] sm:$0xff] }
 0x219   : > { %1484 = vperm.xlu0 %4811, %v454_v47   ;;  %v628_v47 = vcombine.high %v4453_v33, %v4453_v33 }
 0x21a   : > { %931 = vperm.xlu1 %4812, %v445_v62   ;;  %v5980_v62 = vpack.c.bf16 %v5958_v34, %v5955_v30 }
 0x21c   : > { %9788 = vst [vmem:[#allocation74_spill] sm:$0xff] %v5980_v62  ;;  %v635_v62 = vrot.slane %v4453_v33, %v5893_v41  ;;  %v6027_v33 = vpack.c.bf16 %v6001_v18, %v5998_v23 }
 0x21d   : > { %1683 = vperm.xlu0 %4811, %v456_v43   ;;  %v559_v43 = vrot.slane %v5998_v23, 3 }
 0x21e   : > { %936 = vperm.xlu1 %4812, %v446_v44   ;;  %v642_v44 = vrot.slane %v628_v47, %v5893_v41  ;;  %9796 = vst [vmem:[#allocation82_spill] sm:$0xff] %v6027_v33  ;;  %v560_v47 = vrot.slane %v6012_v15, 3  ;;  %v9801_v33 = vrot.slane %v5852_v60, 3  ;;  %v643_v5 = vcombine.high %v635_v62, %v635_v62 }
 0x21f   : > { %v6095_v0 = vrot.slane %v635_v62, %v5898_v9  ;;  %v9820_v62 = vrot.slane %v5826_v40, 3 }
 0x220   : > { %v6047_v17 = vsel %vm587_vm2, %v555_v21, %v9801_v33  ;;  %v644_v7 = vcombine.high %v642_v44, %v642_v44  ;;  %v9806_v33 = vrot.slane %v5952_v26, 3 }
 0x221   : > { %1693 = vperm.xlu0 %4811, %v458_v4   ;;  %v6035_v4 = vsel %vm587_vm2, %v553_v45, %v9797_v24  ;;  %9802 = vst [vmem:[#allocation85_spill] sm:$0xff] %v6047_v17  ;;  %9814 = vst [vmem:[#allocation91_spill] sm:$0xff] %v6095_v0 }
 0x222   : > { %1195 = vperm.xlu1 %4812, %v447_v19   ;;  %9798 = vst [vmem:[#allocation83_spill] sm:$0xff] %v6035_v4  ;;  %v9803_v19 = vrot.slane %v5877_v14, 3  ;;  %v449_v4 = vld [vmem:[#allocation12 + $0x50] sm:$0xff]  ;;  %v6066_v17 = vsel %vm587_vm2, %v557_v48, %v9806_v33  ;;  %v451_v33 = vld [vmem:[#allocation12 + $0x60] sm:$0xff] }
 0x223   : > { %9807 = vst [vmem:[#allocation87_spill] sm:$0xff] %v6066_v17  ;;  %v6120_v17 = vld [vmem:[%s5586_s16 + $0xd0] sm:$0xff] }
 0x224   : > { %v6055_v24 = vsel %vm587_vm2, %v9804_v11, %v9803_v19  ;;  %v6072_v11 = vsel %vm587_vm2, %v558_v22, %v9808_v8  ;;  %v9810_v19 = vrot.slane %v6001_v18, 3  ;;  %v6102_v8 = vrot.slane %v643_v5, %v5898_v9  ;;  %9822 = vst [vmem:[#allocation97_spill] sm:$0xff] %v6120_v17 }
 0x225   : > { %9805 = vst [vmem:[#allocation86_spill] sm:$0xff] %v6055_v24  ;;  %9809 = vst [vmem:[#allocation88_spill] sm:$0xff] %v6072_v11  ;;  %1957 = vperm.xlu0 %4811, %v460_v61   ;;  %v462_v11 = vld [vmem:[#allocation12 + $0xb8] sm:$0xff]  ;;  %v6098_v61 = vrot.slane %v642_v44, %v5898_v9  ;;  %v6117_v44 = vsel %vm587_vm2, %v9820_v62, %v554_v27  ;;  %v9823_v5 = vrot.slane %v5940_v13, 3  ;;  %v9826_v27 = vrot.slane %v5946_v20, 3 }
 0x226   : > { %v6078_v24 = vsel %vm587_vm2, %v559_v43, %v9810_v19  ;;  %1205 = vperm.xlu1 %4812, %v449_v4   ;;  %v6092_v19 = vsel %vm587_vm2, %v560_v47, %v9812_v6  ;;  %9816 = vst [vmem:[#allocation93_spill] sm:$0xff] %v6102_v8  ;;  %v6105_v4 = vrot.slane %v644_v7, %v5898_v9  ;;  %9821 = vst [vmem:[#allocation96_spill] sm:$0xff] %v6117_v44 }
 0x227   : > { %9811 = vst [vmem:[#allocation89_spill] sm:$0xff] %v6078_v24  ;;  %9813 = vst [vmem:[#allocation90_spill] sm:$0xff] %v6092_v19  ;;  %v6111_v6 = vsel %vm587_vm2, %v9818_v3, %v553_v45  ;;  %v6126_v7 = vsel %vm587_vm2, %v9823_v5, %v555_v21  ;;  %v464_v45 = vld [vmem:[#allocation12 + $0xc8] sm:$0xff]  ;;  %v9828_v44 = vrot.slane %v5958_v34, 3  ;;  %v9830_v5 = vrot.slane %v5991_v52, 3 }
 0x228   : > { %9815 = vst [vmem:[#allocation92_spill] sm:$0xff] %v6098_v61  ;;  %9817 = vst [vmem:[#allocation94_spill] sm:$0xff] %v6105_v4  ;;  %v9832_v3 = vrot.slane %v6081_v56, 3  ;;  %v9845_v4 = vrot.slane %v5937_v12, 3  ;;  %v9846_v8 = vrot.slane %v5852_v60, 3 }
 0x229   : > { %9819 = vst [vmem:[#allocation95_spill] sm:$0xff] %v6111_v6  ;;  %9824 = vst [vmem:[#allocation98_spill] sm:$0xff] %v6126_v7  ;;  %1967 = vperm.xlu0 %4811, %v462_v11   ;;  %v9825_v6 = vrot.slane %v5870_v10, 3  ;;  %v6143_v21 = vsel %vm587_vm2, %v9828_v44, %v557_v48  ;;  %v6149_v11 = vsel %vm587_vm2, %v9830_v5, %v558_v22  ;;  %v572_v22 = vrot.slane %v5943_v16, 3 }
 0x22a   : > { %9829 = vst [vmem:[#allocation100_spill] sm:$0xff] %v6143_v21  ;;  %9831 = vst [vmem:[#allocation101_spill] sm:$0xff] %v6149_v11  ;;  %v6155_v24 = vsel %vm587_vm2, %v9832_v3, %v559_v43  ;;  %1469 = vperm.xlu1 %4812, %v451_v33   ;;  %v6168_v44 = vpack.c.bf16 %v6081_v56, %v6120_v17  ;;  %v573_v5 = vrot.slane %v5955_v30, 3  ;;  %v453_v43 = vld [vmem:[#allocation12 + $0x70] sm:$0xff]  ;;  %v574_v3 = vrot.slane %v5988_v46, 3 }
 0x22b   : > { %v6137_v62 = vsel %vm587_vm2, %v9826_v27, %v9825_v6  ;;  %9833 = vst [vmem:[#allocation102_spill] sm:$0xff] %v6155_v24  ;;  %v6158_v6 = vld [vmem:[%s5586_s16 + $0xf0] sm:$0xff]  ;;  %v9835_v27 = vrot.slane %v6058_v2, 3  ;;  %v575_v33 = vrot.slane %v6120_v17, 3  ;;  %v9842_v21 = vrot.slane %v5823_v39, 3 }
 0x22c   : > { %9827 = vst [vmem:[#allocation99_spill] sm:$0xff] %v6137_v62  ;;  %9834 = vst [vmem:[#allocation103_spill] sm:$0xff] %v6158_v6  ;;  %v4455_v19 = vld.sshfl [vmem:[#allocation9 + $0x8] sm:$0x33 pattern:$0x75316420]  ;;  %v6201_v61 = vsel %vm587_vm2, %v9846_v8, %v9845_v4 }
 0x22d   : > { %v6164_v48 = vsel %vm587_vm2, %v9835_v27, %v560_v47  ;;  %9837 = vst [vmem:[#allocation105_spill] sm:$0xff] %v6168_v44  ;;  %v576_v24 = vrot.slane %v6158_v6, 3  ;;  %v6177_v47 = vpack.c.bf16 %v6015_v63, %v6012_v15  ;;  %v9839_v27 = vrot.slane %v5813_v35, 3  ;;  %9847 = vst [vmem:[#allocation109_spill] sm:$0xff] %v6201_v61  ;;  %2166 = vperm.xlu0 %4811, %v464_v45   ;;  %v455_v4 = vld [vmem:[#allocation12 + $0x80] sm:$0xff] }
 0x22e   : > { %9836 = vst [vmem:[#allocation104_spill] sm:$0xff] %v6164_v48  ;;  %v9840_v48 = vrot.slane %v5798_v29, 3  ;;  %v9843_v62 = vrot.slane %v5806_v32, 3  ;;  %v1176_v0 = vcombine.high %v4455_v19, %v4455_v19  ;;  %1479 = vperm.xlu1 %4812, %v453_v43   ;;  %v9451_v45 = vrot.slane %v5798_v29, 5  ;;  %v468_v43 = vld [vmem:[#allocation12 + $0xe8] sm:$0xff] }
 0x22f   : > { %9838 = vst [vmem:[#allocation106_spill] sm:$0xff] %v6177_v47  ;;  %v9848_v8 = vrot.slane %v5877_v14, 3  ;;  %v9850_v61 = vrot.slane %v5952_v26, 3 }
 0x230   : > { %v6185_v11 = vsel %vm587_vm2, %v9840_v48, %v9839_v27  ;;  %v6193_v7 = vsel %vm587_vm2, %v9843_v62, %v9842_v21  ;;  %v466_v62 = vld [vmem:[#allocation12 + $0xd8] sm:$0xff]  ;;  %v9854_v48 = vrot.slane %v6001_v18, 3  ;;  %v9858_v21 = vrot.slane %v5795_v28, 5 }
 0x231   : > { %9841 = vst [vmem:[#allocation107_spill] sm:$0xff] %v6185_v11  ;;  %9844 = vst [vmem:[#allocation108_spill] sm:$0xff] %v6193_v7  ;;  %v1183_v7 = vrot.slane %v4455_v19, %v5893_v41  ;;  %2176 = vperm.xlu0 %4811, %v466_v62   ;;  %v6223_v44 = vsel %vm587_vm2, %v9848_v8, %v572_v22  ;;  %v1190_v11 = vrot.slane %v1176_v0, %v5893_v41 }
 0x232   : > { %9849 = vst [vmem:[#allocation110_spill] sm:$0xff] %v6223_v44  ;;  %1678 = vperm.xlu1 %4812, %v455_v4   ;;  %v6232_v19 = vsel %vm587_vm2, %v9850_v61, %v573_v5  ;;  %v9852_v62 = vrot.slane %v5964_v42, 3  ;;  %v6244_v27 = vsel %vm587_vm2, %v9854_v48, %v575_v33  ;;  %v9856_v0 = vrot.slane %v6015_v63, 3  ;;  %v457_v61 = vld [vmem:[#allocation12 + $0x90] sm:$0xff] }
 0x233   : > { %9851 = vst [vmem:[#allocation111_spill] sm:$0xff] %v6232_v19  ;;  %9855 = vst [vmem:[#allocation113_spill] sm:$0xff] %v6244_v27  ;;  %v9861_v48 = vrot.slane %v5803_v31, 5  ;;  %v9866_v44 = vrot.slane %v5877_v14, 5 }
 0x234   : > { %v6238_v8 = vsel %vm587_vm2, %v9852_v62, %v574_v3  ;;  %v6250_v4 = vsel %vm587_vm2, %v9856_v0, %v576_v24  ;;  %v6258_v62 = vsel %vm1135_vm3, %v9858_v21, %v9451_v45  ;;  %v9863_v0 = vrot.slane %v5852_v60, 5 }
 0x235   : > { %9853 = vst [vmem:[#allocation112_spill] sm:$0xff] %v6238_v8  ;;  %9857 = vst [vmem:[#allocation114_spill] sm:$0xff] %v6250_v4  ;;  %v9860_v8 = vrot.slane %v5806_v32, 5  ;;  %v9864_v4 = vrot.slane %v5849_v59, 5  ;;  %v9867_v21 = vrot.slane %v5870_v10, 5  ;;  %2375 = vperm.xlu0 %4811, %v468_v43   ;;  %v9885_v43 = vrot.slane %v5823_v39, 3 }
 0x236   : > { %9859 = vst [vmem:[#allocation115_spill] sm:$0xff] %v6258_v62  ;;  %v9869_v62 = vrot.slane %v5952_v26, 5  ;;  %1688 = vperm.xlu1 %4812, %v457_v61   ;;  %v9893_v61 = vrot.slane %v5958_v34, 3 }
 0x237   : > { %v6266_v27 = vsel %vm1135_vm3, %v9861_v48, %v9860_v8  ;;  %v6274_v19 = vsel %vm1135_vm3, %v9864_v4, %v9863_v0  ;;  %v6282_v45 = vsel %vm1135_vm3, %v9867_v21, %v9866_v44  ;;  %v9870_v8 = vrot.slane %v5949_v25, 5 }
 0x238   : > { %9862 = vst [vmem:[#allocation116_spill] sm:$0xff] %v6266_v27  ;;  %9865 = vst [vmem:[#allocation117_spill] sm:$0xff] %v6274_v19  ;;  %v9872_v27 = vrot.slane %v5964_v42, 5  ;;  %v9873_v4 = vrot.slane %v5961_v38, 5  ;;  %v9875_v19 = vrot.slane %v6001_v18, 5  ;;  %v9876_v44 = vrot.slane %v5998_v23, 5 }
 0x239   : > { %9868 = vst [vmem:[#allocation118_spill] sm:$0xff] %v6282_v45  ;;  %v6290_v48 = vsel %vm1135_vm3, %v9870_v8, %v9869_v62  ;;  %v1191_v45 = vcombine.high %v1183_v7, %v1183_v7  ;;  %v9878_v62 = vrot.slane %v6015_v63, 5  ;;  %v9879_v8 = vrot.slane %v6012_v15, 5 }
 0x23a   : > { %9871 = vst [vmem:[#allocation119_spill] sm:$0xff] %v6290_v48  ;;  %v6298_v0 = vsel %vm1135_vm3, %v9873_v4, %v9872_v27  ;;  %v6306_v21 = vsel %vm1135_vm3, %v9876_v44, %v9875_v19  ;;  %v1192_v27 = vcombine.high %v1190_v11, %v1190_v11  ;;  %v9881_v4 = vrot.slane %v5816_v36, 3 }
 0x23b   : > { %9874 = vst [vmem:[#allocation120_spill] sm:$0xff] %v6298_v0  ;;  %9877 = vst [vmem:[#allocation121_spill] sm:$0xff] %v6306_v21  ;;  %v6314_v48 = vsel %vm1135_vm3, %v9879_v8, %v9878_v62  ;;  %v9882_v0 = vrot.slane %v5813_v35, 3  ;;  %v9884_v19 = vrot.slane %v5826_v40, 3  ;;  %v470_v62 = vld [vmem:[#allocation12 + $0xf8] sm:$0xff]  ;;  %v6333_v8 = vrot.slane %v1183_v7, %v5898_v9 }
 0x23c   : > { %9880 = vst [vmem:[#allocation122_spill] sm:$0xff] %v6314_v48  ;;  %v9888_v48 = vrot.slane %v5940_v13, 3  ;;  %v9889_v21 = vrot.slane %v5937_v12, 3  ;;  %v6353_v7 = vsel %vm587_vm2, %v573_v5, %v9893_v61  ;;  %v6375_v5 = vpack.c.bf16 %v6058_v2, %v6158_v6  ;;  %2385 = vperm.xlu0 %4811, %v470_v62   ;;  %v463_v62 = vld [vmem:[#allocation12 + $0xc0] sm:$0xff] }
 0x23d   : > { %v6322_v47 = vsel %vm587_vm2, %v9882_v0, %v9881_v4  ;;  %v6330_v44 = vsel %vm587_vm2, %v9885_v43, %v9884_v19  ;;  %9887 = vst [vmem:[#allocation125_spill] sm:$0xff] %v6333_v8  ;;  %v9891_v4 = vrot.slane %v5946_v20, 3  ;;  %9894 = vst [vmem:[#allocation128_spill] sm:$0xff] %v6353_v7  ;;  %v459_v19 = vld [vmem:[#allocation12 + $0xa0] sm:$0xff]  ;;  %v9895_v43 = vrot.slane %v5991_v52, 3 }
 0x23e   : > { %9883 = vst [vmem:[#allocation123_spill] sm:$0xff] %v6322_v47  ;;  %9886 = vst [vmem:[#allocation124_spill] sm:$0xff] %v6330_v44  ;;  %v6341_v0 = vsel %vm587_vm2, %v9889_v21, %v9888_v48  ;;  %v9897_v48 = vrot.slane %v6081_v56, 3  ;;  %v6378_v61 = vrot.slane %v1190_v11, %v5898_v9  ;;  %1952 = vperm.xlu1 %4812, %v459_v19   ;;  %v471_v11 = vld [vmem:[#allocation12 + $0x100] sm:$0xff]  ;;  %v9942_v7 = vrot.slane %v5849_v59, 7 }
 0x23f   : > { %9890 = vst [vmem:[#allocation126_spill] sm:$0xff] %v6341_v0  ;;  %v6347_v47 = vsel %vm587_vm2, %v572_v22, %v9891_v4  ;;  %v6359_v8 = vsel %vm587_vm2, %v574_v3, %v9895_v43  ;;  %v9899_v22 = vrot.slane %v6058_v2, 3  ;;  %v6381_v3 = vrot.slane %v1191_v45, %v5898_v9 }
 0x240   : > { %9892 = vst [vmem:[#allocation127_spill] sm:$0xff] %v6347_v47  ;;  %9896 = vst [vmem:[#allocation129_spill] sm:$0xff] %v6359_v8  ;;  %v6365_v21 = vsel %vm587_vm2, %v575_v33, %v9897_v48  ;;  %v9470_v43 = vrot.slane %v5813_v35, 5  ;;  %v9469_v33 = vrot.slane %v5816_v36, 5  ;;  %v6386_v47 = vrot.slane %v1192_v27, %v5898_v9  ;;  %2579 = vperm.xlu0 %4811, %v471_v11  }
 0x241   : > { %9898 = vst [vmem:[#allocation130_spill] sm:$0xff] %v6365_v21  ;;  %v6371_v4 = vsel %vm587_vm2, %v576_v24, %v9899_v22  ;;  %9901 = vst [vmem:[#allocation132_spill] sm:$0xff] %v6378_v61  ;;  %v4454_v48 = vld.sshfl [vmem:[#allocation9 + $0x4] sm:$0x33 pattern:$0x75316420] }
 0x242   : > { %9900 = vst [vmem:[#allocation131_spill] sm:$0xff] %v6371_v4  ;;  %9902 = vst [vmem:[#allocation133_spill] sm:$0xff] %v6381_v3  ;;  %v6397_v45 = vsel %vm1135_vm3, %v9470_v43, %v9469_v33  ;;  %v461_v61 = vld [vmem:[#allocation12 + $0xb0] sm:$0xff]  ;;  %v902_v3 = vcombine.high %v4454_v48, %v4454_v48  ;;  %v9905_v27 = vrot.slane %v5826_v40, 5  ;;  %v9906_v24 = vrot.slane %v5823_v39, 5 }
 0x243   : > { %9903 = vst [vmem:[#allocation134_spill] sm:$0xff] %v6386_v47  ;;  %9904 = vst [vmem:[#allocation135_spill] sm:$0xff] %v6397_v45  ;;  %v9474_v47 = vrot.slane %v5870_v10, 4  ;;  %1962 = vperm.xlu1 %4812, %v461_v61   ;;  %v909_v21 = vrot.slane %v4454_v48, %v5893_v41  ;;  %v9908_v45 = vrot.slane %v5795_v28, 4  ;;  %v9911_v4 = vrot.slane %v5803_v31, 4 }
 0x244   : > { %v6415_v22 = vsel %vm1135_vm3, %v9906_v24, %v9905_v27  ;;  %v9909_v24 = vrot.slane %v5816_v36, 4  ;;  %v9912_v61 = vrot.slane %v5826_v40, 4  ;;  %v9914_v11 = vrot.slane %v5849_v59, 4  ;;  %v3354_v8 = vpop.xlane.xlu0 %3353 }
 0x245   : > { %9907 = vst [vmem:[#allocation136_spill] sm:$0xff] %v6415_v22  ;;  %v9915_v48 = vrot.slane %v5940_v13, 4  ;;  %v916_v19 = vrot.slane %v902_v3, %v5893_v41  ;;  %v9923_v3 = vrot.slane %v5991_v52, 4  ;;  %v9961_v0 = vrot.slane %v5795_v28, 4 }
 0x246   : > { %v6430_v27 = vsel %vm861_vm4, %v9909_v24, %v9908_v45  ;;  %v6438_v43 = vsel %vm861_vm4, %v9912_v61, %v9911_v4  ;;  %v9917_v45 = vrot.slane %v5946_v20, 4  ;;  %v9919_v4 = vrot.slane %v5949_v25, 4 }
 0x247   : > { %9910 = vst [vmem:[#allocation137_spill] sm:$0xff] %v6430_v27  ;;  %9913 = vst [vmem:[#allocation138_spill] sm:$0xff] %v6438_v43  ;;  %v6446_v33 = vsel %vm861_vm4, %v9915_v48, %v9914_v11  ;;  %v9920_v61 = vrot.slane %v5958_v34, 4  ;;  %v9922_v11 = vrot.slane %v5961_v38, 4  ;;  %2161 = vperm.xlu1 %4812, %v463_v62   ;;  %v465_v43 = vld [vmem:[#allocation12 + $0xd0] sm:$0xff]  ;;  %v918_v27 = vcombine.high %v916_v19, %v916_v19 }
 0x248   : > { %9916 = vst [vmem:[#allocation139_spill] sm:$0xff] %v6446_v33  ;;  %v6455_v24 = vsel %vm861_vm4, %v9917_v45, %v9474_v47  ;;  %v9925_v33 = vrot.slane %v5998_v23, 4  ;;  %v9926_v45 = vrot.slane %v6081_v56, 4  ;;  %v6511_v62 = vrot.slane %v916_v19, %v5898_v9 }
 0x249   : > { %9918 = vst [vmem:[#allocation140_spill] sm:$0xff] %v6455_v24  ;;  %v6463_v22 = vsel %vm861_vm4, %v9920_v61, %v9919_v4  ;;  %v6471_v48 = vsel %vm861_vm4, %v9923_v3, %v9922_v11  ;;  %v9928_v24 = vrot.slane %v6012_v15, 4  ;;  %v9929_v4 = vrot.slane %v6058_v2, 4 }
 0x24a   : > { %9921 = vst [vmem:[#allocation141_spill] sm:$0xff] %v6463_v22  ;;  %9924 = vst [vmem:[#allocation142_spill] sm:$0xff] %v6471_v48  ;;  %v6479_v47 = vsel %vm861_vm4, %v9926_v45, %v9925_v33  ;;  %v4456_v11 = vld.sshfl [vmem:[#allocation9 + $0xc] sm:$0x33 pattern:$0x75316420]  ;;  %v917_v22 = vcombine.high %v909_v21, %v909_v21  ;;  %v6508_v3 = vrot.slane %v909_v21, %v5898_v9 }
 0x24b   : > { %9927 = vst [vmem:[#allocation143_spill] sm:$0xff] %v6479_v47  ;;  %v6487_v61 = vsel %vm861_vm4, %v9929_v4, %v9928_v24  ;;  %v3444_v4 = vsub.f32 %v5708_v49, %v3354_v8  ;;  %2171 = vperm.xlu1 %4812, %v465_v43   ;;  %9932 = vst [vmem:[#allocation146_spill] sm:$0xff] %v6511_v62  ;;  %v1450_v48 = vcombine.high %v4456_v11, %v4456_v11  ;;  %v467_v33 = vld [vmem:[#allocation12 + $0xe0] sm:$0xff] }
 0x24c   : > { %9930 = vst [vmem:[#allocation144_spill] sm:$0xff] %v6487_v61  ;;  %v3360_v61 = vpop.xlane.xlu1 %3359  ;;  %9931 = vst [vmem:[#allocation145_spill] sm:$0xff] %v6508_v3  ;;  %v6514_v45 = vrot.slane %v917_v22, %v5898_v9  ;;  %v6517_v47 = vrot.slane %v918_v27, %v5898_v9  ;;  %v9935_v24 = vrot.slane %v5798_v29, 7  ;;  %v9936_v49 = vrot.slane %v5795_v28, 7  ;;  %v3366_v22 = vpop.xlane.xlu0 %3365 }
 0x24d   : > { %v9938_v21 = vrot.slane %v5806_v32, 7  ;;  %v9939_v43 = vrot.slane %v5803_v31, 7  ;;  %v9941_v27 = vrot.slane %v5852_v60, 7  ;;  %v1464_v62 = vrot.slane %v1450_v48, %v5893_v41 }
 0x24e   : > { %9933 = vst [vmem:[#allocation147_spill] sm:$0xff] %v6514_v45  ;;  %9934 = vst [vmem:[#allocation148_spill] sm:$0xff] %v6517_v47  ;;  %v6525_v8 = vsel %vm1409_vm5, %v9936_v49, %v9935_v24  ;;  %v9944_v24 = vrot.slane %v5877_v14, 7  ;;  %v9945_v49 = vrot.slane %v5870_v10, 7  ;;  %v1457_v45 = vrot.slane %v4456_v11, %v5893_v41 }
 0x24f   : > { %9937 = vst [vmem:[#allocation149_spill] sm:$0xff] %v6525_v8  ;;  %v6533_v19 = vsel %vm1409_vm5, %v9939_v43, %v9938_v21  ;;  %v6541_v47 = vsel %vm1409_vm5, %v9942_v7, %v9941_v27  ;;  %v9947_v21 = vrot.slane %v5952_v26, 7  ;;  %v9948_v43 = vrot.slane %v5949_v25, 7  ;;  %2370 = vperm.xlu1 %4812, %v467_v33  }
 0x250   : > { %9940 = vst [vmem:[#allocation150_spill] sm:$0xff] %v6533_v19  ;;  %9943 = vst [vmem:[#allocation151_spill] sm:$0xff] %v6541_v47  ;;  %v6549_v8 = vsel %vm1409_vm5, %v9945_v49, %v9944_v24  ;;  %v9950_v7 = vrot.slane %v5964_v42, 7  ;;  %v9951_v27 = vrot.slane %v5961_v38, 7  ;;  %v9953_v24 = vrot.slane %v6001_v18, 7 }
 0x251   : > { %9946 = vst [vmem:[#allocation152_spill] sm:$0xff] %v6549_v8  ;;  %v6557_v19 = vsel %vm1409_vm5, %v9948_v43, %v9947_v21  ;;  %v9954_v49 = vrot.slane %v5998_v23, 7  ;;  %v9956_v21 = vrot.slane %v6015_v63, 7  ;;  %v9957_v11 = vrot.slane %v6012_v15, 7 }
 0x252   : > { %9949 = vst [vmem:[#allocation153_spill] sm:$0xff] %v6557_v19  ;;  %v6566_v47 = vsel %vm1409_vm5, %v9951_v27, %v9950_v7  ;;  %v3478_v7 = vmul.f32 1.442695, %v3444_v4  ;;  %v3448_v27 = vsub.f32 %v5710_v50, %v3366_v22  ;;  %v1465_v19 = vcombine.high %v1457_v45, %v1457_v45 }
 0x253   : > { %9952 = vst [vmem:[#allocation154_spill] sm:$0xff] %v6566_v47  ;;  %v6574_v8 = vsel %vm1409_vm5, %v9954_v49, %v9953_v24  ;;  %v6582_v43 = vsel %vm1409_vm5, %v9957_v11, %v9956_v21  ;;  %v3357_v47 = vpop.xlane.xlu1 %3356  ;;  %v9489_v24 = vrot.slane %v5806_v32, 4  ;;  %v3348_v11 = vpop.xlane.xlu0 %3347  ;;  %v6593_v4 = vrot.slane %v1457_v45, %v5898_v9 }
 0x254   : > { %9955 = vst [vmem:[#allocation155_spill] sm:$0xff] %v6574_v8  ;;  %9958 = vst [vmem:[#allocation156_spill] sm:$0xff] %v6582_v43  ;;  %v3445_v49 = vsub.f32 %v5718_v54, %v3357_v47  ;;  %v469_v8 = vld [vmem:[#allocation12 + $0xf0] sm:$0xff]  ;;  %v3442_v22 = vsub.f32 %v5712_v51, %v3348_v11  ;;  %v9960_v47 = vrot.slane %v5798_v29, 4  ;;  %4813 = vpow2.f32 %v3478_v7 }
 0x255   : > { %9959 = vst [vmem:[#allocation157_spill] sm:$0xff] %v6593_v4  ;;  %v3446_v45 = vsub.f32 %v5716_v53, %v3360_v61  ;;  %v3486_v3 = vmul.f32 1.442695, %v3448_v27  ;;  %2380 = vperm.xlu1 %4812, %v469_v8   ;;  %v1466_v48 = vcombine.high %v1464_v62, %v1464_v62  ;;  %v6610_v11 = vrot.slane %v1464_v62, %v5898_v9 }
 0x256   : > { %v3480_v33 = vmul.f32 1.442695, %v3445_v49  ;;  %v6605_v21 = vsel %vm861_vm4, %v9961_v0, %v9960_v47  ;;  %v472_v49 = vld [vmem:[#allocation12 + $0x108] sm:$0xff]  ;;  %v9964_v54 = vrot.slane %v5803_v31, 4  ;;  %v3474_v53 = vmul.f32 1.442695, %v3442_v22 }
 0x257   : > { %9962 = vst [vmem:[#allocation158_spill] sm:$0xff] %v6605_v21  ;;  %v3369_v50 = vpop.xlane.xlu1 %3368  ;;  %9963 = vst [vmem:[#allocation159_spill] sm:$0xff] %v6610_v11  ;;  %v3351_v61 = vpop.xlane.xlu0 %3350  ;;  %v6621_v8 = vrot.slane %v1465_v19, %v5898_v9  ;;  %v9967_v7 = vrot.slane %v5852_v60, 4  ;;  %v9970_v27 = vrot.slane %v5877_v14, 4  ;;  %v9974_v47 = vrot.slane %v5949_v25, 4 }
 0x258   : > { %4815 = vpow2.f32 %v3480_v33  ;;  %v3449_v51 = vsub.f32 %v5720_v55, %v3369_v50  ;;  %v6618_v0 = vsel %vm861_vm4, %v9964_v54, %v9489_v24  ;;  %v9968_v55 = vrot.slane %v5849_v59, 4  ;;  %v4457_v25 = vld.sshfl [vmem:[#allocation9 + $0x10] sm:$0x33 pattern:$0x75316420] }
 0x259   : > { %9965 = vst [vmem:[#allocation160_spill] sm:$0xff] %v6618_v0  ;;  %9966 = vst [vmem:[#allocation161_spill] sm:$0xff] %v6621_v8  ;;  %v9971_v50 = vrot.slane %v5870_v10, 4  ;;  %v3443_v19 = vsub.f32 %v5724_v57, %v3351_v61  ;;  %v9973_v54 = vrot.slane %v5952_v26, 4  ;;  %4817 = vpow2.f32 %v3486_v3  ;;  %2584 = vperm.xlu1 %4812, %v472_v49   ;;  %v10154_v0 = vld [vmem:[#allocation90_spill] sm:$0xff] }
 0x25a   : > { %v6629_v62 = vsel %vm861_vm4, %v9968_v55, %v9967_v7  ;;  %v3488_v22 = vmul.f32 1.442695, %v3449_v51  ;;  %v9976_v7 = vrot.slane %v5964_v42, 4  ;;  %v9977_v55 = vrot.slane %v5961_v38, 4 }
 0x25b   : > { %9969 = vst [vmem:[#allocation162_spill] sm:$0xff] %v6629_v62  ;;  %v6637_v33 = vsel %vm861_vm4, %v9971_v50, %v9970_v27  ;;  %v6646_v24 = vsel %vm861_vm4, %v9974_v47, %v9973_v54  ;;  %v3482_v27 = vmul.f32 1.442695, %v3446_v45  ;;  %v3363_v51 = vpop.xlane.xlu1 %3362  ;;  %v6657_v57 = vrot.slane %v1466_v48, %v5898_v9  ;;  %v3378_v49 = vpop.xlane.xlu0 %3377 }
 0x25c   : > { %9972 = vst [vmem:[#allocation163_spill] sm:$0xff] %v6637_v33  ;;  %9975 = vst [vmem:[#allocation164_spill] sm:$0xff] %v6646_v24  ;;  %v6654_v10 = vsel %vm861_vm4, %v9977_v55, %v9976_v7  ;;  %v9980_v61 = vrot.slane %v6001_v18, 4  ;;  %v9981_v50 = vrot.slane %v5998_v23, 4  ;;  %4819 = vpow2.f32 %v3488_v22  ;;  %v9986_v55 = vld [vmem:[#allocation29_spill] sm:$0xff] }
 0x25d   : > { %9978 = vst [vmem:[#allocation165_spill] sm:$0xff] %v6654_v10  ;;  %9979 = vst [vmem:[#allocation166_spill] sm:$0xff] %v6657_v57  ;;  %v3476_v47 = vmul.f32 1.442695, %v3443_v19  ;;  %v3447_v7 = vsub.f32 %v5726_v58, %v3363_v51  ;;  %v9983_v45 = vrot.slane %v6015_v63, 4  ;;  %v9984_v3 = vrot.slane %v6012_v15, 4 }
 0x25e   : > { %v6665_v54 = vsel %vm861_vm4, %v9981_v50, %v9980_v61  ;;  %4821 = vpow2.f32 %v3474_v53  ;;  %v3452_v58 = vsub.f32 %v5740_v1, %v3378_v49  ;;  %v9499_v53 = vrot.slane %v5826_v40, 7  ;;  %v9991_v50 = vld [vmem:[#allocation27_spill] sm:$0xff]  ;;  %v10006_v57 = vld [vmem:[#allocation30_spill] sm:$0xff]  ;;  %v10153_v10 = vld [vmem:[#allocation89_spill] sm:$0xff] }
 0x25f   : > { %9982 = vst [vmem:[#allocation167_spill] sm:$0xff] %v6665_v54  ;;  %v6674_v48 = vsel %vm861_vm4, %v9984_v3, %v9983_v45  ;;  %4823 = vpow2.f32 %v3476_v47  ;;  %v3484_v22 = vmul.f32 1.442695, %v3447_v7  ;;  %v3381_v51 = vpop.xlane.xlu1 %3380  ;;  %v9494_v45 = vrot.slane %v5816_v36, 7  ;;  %v6686_v47 = vpop.eup %4813 }
 0x260   : > { %9985 = vst [vmem:[#allocation168_spill] sm:$0xff] %v6674_v48  ;;  %4825 = vpow2.f32 %v3482_v27  ;;  %v3494_v3 = vmul.f32 1.442695, %v3452_v58  ;;  %v3453_v23 = vsub.f32 %v9986_v55, %v3381_v51  ;;  %v3390_v7 = vpop.xlane.xlu0 %3389  ;;  %v9987_v1 = vrot.slane %v5813_v35, 7 }
 0x261   : > { %4827 = vpow2.f32 %v3484_v22  ;;  %v9989_v49 = vrot.slane %v5823_v39, 7  ;;  %v845_v22 = vrot.slane %v5813_v35, 4  ;;  %v846_v58 = vrot.slane %v5823_v39, 4 }
 0x262   : > { %v6694_v27 = vsel %vm1409_vm5, %v9987_v1, %v9494_v45  ;;  %v6706_v51 = vpop.eup %4815  ;;  %v3496_v61 = vmul.f32 1.442695, %v3453_v23  ;;  %v3456_v19 = vsub.f32 %v9991_v50, %v3390_v7  ;;  %4829 = vpow2.f32 %v3494_v3 }
 0x263   : > { %9988 = vst [vmem:[#allocation29_spill] sm:$0xff] %v6694_v27  ;;  %v6702_v55 = vsel %vm1409_vm5, %v9989_v49, %v9499_v53  ;;  %v3393_v15 = vpop.xlane.xlu1 %3392  ;;  %v3635_v38 = vpack.c.bf16 %v6706_v51, %v6686_v47  ;;  %v849_v49 = vrot.slane %v5955_v30, 4  ;;  %v3544_v50 = vsel %vm3345_vm1, %v6686_v47, 0.0  ;;  %v4818_v7 = vpop.eup %4817 }
 0x264   : > { %9990 = vst [vmem:[#allocation169_spill] sm:$0xff] %v6702_v55  ;;  %4831 = vpow2.f32 %v3496_v61  ;;  %v3502_v59 = vmul.f32 1.442695, %v3456_v19  ;;  %v9992_v55 = vld [vmem:[#allocation31_spill] sm:$0xff]  ;;  %v3372_v1 = vpop.xlane.xlu0 %3371  ;;  %3545 = vadd.xlane.f32.xlu0 %v3544_v50  ;;  %v9993_v27 = vrot.slane %v5798_v29, 4  ;;  %v9995_v61 = vrot.slane %v5806_v32, 4 }
 0x265   : > { %v3457_v23 = vsub.f32 %v9992_v55, %v3393_v15  ;;  %v9997_v55 = vld [vmem:[#allocation26_spill] sm:$0xff]  ;;  %v9998_v3 = vrot.slane %v5937_v12, 4  ;;  %v9999_v45 = vrot.slane %v5852_v60, 4  ;;  %v10007_v4 = vrot.slane %v5988_v46, 4 }
 0x266   : > { %v6724_v53 = vsel %vm861_vm4, %v9993_v27, %v845_v22  ;;  %v6730_v15 = vsel %vm861_vm4, %v9995_v61, %v846_v58  ;;  %v6732_v19 = vpop.eup %4819  ;;  %v3450_v50 = vsub.f32 %v9997_v55, %v3372_v1  ;;  %v10001_v27 = vrot.slane %v5943_v16, 4 }
 0x267   : > { %9994 = vst [vmem:[#allocation27_spill] sm:$0xff] %v6724_v53  ;;  %9996 = vst [vmem:[#allocation31_spill] sm:$0xff] %v6730_v15  ;;  %v3504_v47 = vmul.f32 1.442695, %v3457_v23  ;;  %v6741_v43 = vsel %vm861_vm4, %v9999_v45, %v9998_v3  ;;  %v10002_v53 = vrot.slane %v5877_v14, 4  ;;  %4833 = vpow2.f32 %v3502_v59  ;;  %v3375_v1 = vpop.xlane.xlu1 %3374 }
 0x268   : > { %10000 = vst [vmem:[#allocation26_spill] sm:$0xff] %v6741_v43  ;;  %v6751_v15 = vpop.eup %4821  ;;  %v3637_v23 = vpack.c.bf16 %v6732_v19, %v4818_v7  ;;  %v10004_v55 = vrot.slane %v5952_v26, 4  ;;  %v1659_v3 = vcombine.high %v4457_v25, %v4457_v25  ;;  %v3490_v11 = vmul.f32 1.442695, %v3450_v50 }
 0x269   : > { %v6749_v61 = vsel %vm861_vm4, %v10002_v53, %v10001_v27  ;;  %v4824_v43 = vpop.eup %4823  ;;  %4835 = vpow2.f32 %v3504_v47  ;;  %v3451_v8 = vsub.f32 %v10006_v57, %v3375_v1  ;;  %v3556_v53 = vsel %vm3345_vm1, %v4818_v7, 0.0 }
 0x26a   : > { %10003 = vst [vmem:[#allocation170_spill] sm:$0xff] %v6749_v61  ;;  %v6758_v45 = vsel %vm861_vm4, %v10004_v55, %v849_v49  ;;  %v4826_v27 = vpop.eup %4825  ;;  %v3384_v61 = vpop.xlane.xlu0 %3383  ;;  %3557 = vadd.xlane.f32.xlu0 %v3556_v53  ;;  %v3634_v59 = vpack.c.bf16 %v4824_v43, %v6751_v15  ;;  %v10008_v48 = vrot.slane %v5964_v42, 4  ;;  %v10010_v47 = vrot.slane %v6120_v17, 4 }
 0x26b   : > { %10005 = vst [vmem:[#allocation171_spill] sm:$0xff] %v6758_v45  ;;  %v10011_v50 = vrot.slane %v6001_v18, 4  ;;  %v10013_v7 = vrot.slane %v6158_v6, 4  ;;  %v10014_v1 = vrot.slane %v6015_v63, 4  ;;  %v6787_v45 = vpop.eup %4827  ;;  %v1666_v54 = vrot.slane %v4457_v25, %v5893_v41 }
 0x26c   : > { %v6769_v55 = vsel %vm861_vm4, %v10008_v48, %v10007_v4  ;;  %v3492_v4 = vmul.f32 1.442695, %v3451_v8  ;;  %v10016_v48 = vld [vmem:[#allocation28_spill] sm:$0xff]  ;;  %v10017_v33 = vrot.slane %v5816_v36, 4  ;;  %4837 = vpow2.f32 %v3490_v11  ;;  %4640 = vmatprep.mubr.msk.bf16.mxu0 %vm3345_vm1, %v3634_v59 }
 0x26d   : > { %10009 = vst [vmem:[#allocation30_spill] sm:$0xff] %v6769_v55  ;;  %v6777_v57 = vsel %vm861_vm4, %v10011_v50, %v10010_v47  ;;  %v6785_v53 = vsel %vm861_vm4, %v10014_v1, %v10013_v7  ;;  %v3454_v55 = vsub.f32 %v10016_v48, %v3384_v61  ;;  %v3387_v50 = vpop.xlane.xlu1 %3386  ;;  %v3636_v7 = vpack.c.bf16 %v6787_v45, %v4826_v27  ;;  %v10021_v48 = vld [vmem:[#allocation32_spill] sm:$0xff] }
 0x26e   : > { %10012 = vst [vmem:[#allocation172_spill] sm:$0xff] %v6777_v57  ;;  %10015 = vst [vmem:[#allocation173_spill] sm:$0xff] %v6785_v53  ;;  %v6795_v47 = vsel %vm861_vm4, %v845_v22, %v10017_v33  ;;  %v1673_v1 = vrot.slane %v1659_v3, %v5893_v41  ;;  %v10019_v8 = vrot.slane %v5826_v40, 4  ;;  %4839 = vpow2.f32 %v3492_v4  ;;  %4641 = vmatmul.mubr.msk.bf16.vlgmr.msra.gmra.mrb[16].mxu0 %vm3345_vm1, %v3635_v38  ;;  %v6809_v33 = vpop.eup %4829  ;;  %v3402_v22 = vpop.xlane.xlu0 %3401  ;;  %v10039_v3 = vld [vmem:[#allocation72_spill] sm:$0xff] }
 0x26f   : > { %10018 = vst [vmem:[#allocation28_spill] sm:$0xff] %v6795_v47  ;;  %v3498_v25 = vmul.f32 1.442695, %v3454_v55  ;;  %v3455_v53 = vsub.f32 %v10021_v48, %v3387_v50  ;;  %v3550_v11 = vsel %vm3345_vm1, %v4826_v27, 0.0  ;;  %4648 = vmatprep.mubr.msk.bf16.mxu1 %vm3345_vm1, %v3636_v7  ;;  %v10022_v59 = vrot.slane %v5940_v13, 4  ;;  %v6835_v13 = vpop.eup %4831  ;;  %v10030_v48 = vld [vmem:[#allocation33_spill] sm:$0xff] }
 0x270   : > { %v6804_v61 = vsel %vm861_vm4, %v846_v58, %v10019_v8  ;;  %3551 = vadd.xlane.f32.xlu0 %v3550_v11  ;;  %v10023_v58 = vrot.slane %v5937_v12, 4  ;;  %v10025_v38 = vrot.slane %v5946_v20, 4  ;;  %v10026_v27 = vrot.slane %v5943_v16, 4  ;;  %4649 = vmatmul.mubr.msk.bf16.vlgmr.msra.gmra.mrb[16].mxu1 %vm3345_vm1, %v3637_v23  ;;  %v10031_v20 = vld [vmem:[#allocation57_spill] sm:$0xff] }
 0x271   : > { %10020 = vst [vmem:[#allocation174_spill] sm:$0xff] %v6804_v61  ;;  %v10028_v50 = vrot.slane %v5958_v34, 4  ;;  %v3500_v8 = vmul.f32 1.442695, %v3455_v53  ;;  %v3460_v11 = vsub.f32 %v10030_v48, %v3402_v22  ;;  %4653 = vmatpush3.bf16.msra.mxu0 %v10031_v20  ;;  %4841 = vpow2.f32 %v3498_v25  ;;  %v10033_v34 = vld [vmem:[#allocation71_spill] sm:$0xff]  ;;  %v10038_v25 = vld [vmem:[#allocation37_spill] sm:$0xff] }
 0x272   : > { %v6819_v55 = vsel %vm861_vm4, %v10023_v58, %v10022_v59  ;;  %v6827_v4 = vsel %vm861_vm4, %v10026_v27, %v10025_v38  ;;  %v1674_v59 = vcombine.high %v1666_v54, %v1666_v54  ;;  %v6841_v58 = vrot.slane %v1666_v54, %v5898_v9  ;;  %v3405_v38 = vpop.xlane.xlu1 %3404  ;;  %4654 = vmatprep.subr.bf16.mxu0 %v10033_v34  ;;  %v10034_v27 = vld [vmem:[#allocation61_spill] sm:$0xff] }
 0x273   : > { %10024 = vst [vmem:[#allocation32_spill] sm:$0xff] %v6819_v55  ;;  %10027 = vst [vmem:[#allocation175_spill] sm:$0xff] %v6827_v4  ;;  %v6833_v7 = vsel %vm861_vm4, %v849_v49, %v10028_v50  ;;  %4661 = vmatpush3.bf16.msra.mxu1 %v10034_v27  ;;  %v1675_v53 = vcombine.high %v1673_v1, %v1673_v1  ;;  %v10035_v22 = vrot.slane %v5991_v52, 4  ;;  %v10036_v23 = vrot.slane %v5988_v46, 4  ;;  %v6858_v27 = vpop.eup %4833  ;;  %v3414_v49 = vpop.xlane.xlu0 %3413 }
 0x274   : > { %10029 = vst [vmem:[#allocation176_spill] sm:$0xff] %v6833_v7  ;;  %10032 = vst [vmem:[#allocation33_spill] sm:$0xff] %v6841_v58  ;;  %4843 = vpow2.f32 %v3500_v8  ;;  %v3510_v54 = vmul.f32 1.442695, %v3460_v11  ;;  %v3461_v48 = vsub.f32 %v10038_v25, %v3405_v38  ;;  %v3541_v20 = vsel %vm3345_vm1, %v4824_v43, 0.0  ;;  %4662 = vmatprep.subr.bf16.mxu1 %v10039_v3  ;;  %v6878_v25 = vpop.eup %4835 }
 0x275   : > { %v6853_v50 = vsel %vm861_vm4, %v10036_v23, %v10035_v22  ;;  %3542 = vadd.xlane.f32.xlu0 %v3541_v20  ;;  %v10040_v52 = vrot.slane %v6081_v56, 4  ;;  %v10041_v4 = vrot.slane %v6120_v17, 4  ;;  %v10043_v8 = vrot.slane %v6058_v2, 4  ;;  %v10046_v20 = vld [vmem:[#allocation35_spill] sm:$0xff]  ;;  %4655 = vmatpush3.bf16.msra.mxu0 %v10033_v34  ;;  %v10049_v23 = vld [vmem:[#allocation73_spill] sm:$0xff] }
 0x276   : > { %10037 = vst [vmem:[#allocation57_spill] sm:$0xff] %v6853_v50  ;;  %v10044_v11 = vrot.slane %v6158_v6, 4  ;;  %v3512_v56 = vmul.f32 1.442695, %v3461_v48  ;;  %v3464_v50 = vsub.f32 %v10046_v20, %v3414_v49  ;;  %v6886_v2 = vrot.slane %v1674_v59, %v5898_v9  ;;  %4668 = vmatprep.subr.bf16.mxu0 %v10049_v23  ;;  %v10051_v48 = vld [vmem:[#allocation39_spill] sm:$0xff] }
 0x277   : > { %v6866_v22 = vsel %vm861_vm4, %v10041_v4, %v10040_v52  ;;  %v6883_v4 = vrot.slane %v1673_v1, %v5898_v9  ;;  %v4458_v52 = vld.sshfl [vmem:[#allocation9 + $0x14] sm:$0x33 pattern:$0x75316420]  ;;  %4845 = vpow2.f32 %v3510_v54  ;;  %4663 = vmatpush3.bf16.msra.mxu1 %v10039_v3  ;;  %v6893_v49 = vrot.slane %v1675_v53, %v5898_v9  ;;  %v4838_v3 = vpop.eup %4837  ;;  %v3396_v38 = vpop.xlane.xlu0 %3395 }
 0x278   : > { %10042 = vst [vmem:[#allocation71_spill] sm:$0xff] %v6866_v22  ;;  %v6874_v43 = vsel %vm861_vm4, %v10044_v11, %v10043_v8  ;;  %10048 = vst [vmem:[#allocation72_spill] sm:$0xff] %v6886_v2  ;;  %v3417_v8 = vpop.xlane.xlu1 %3416  ;;  %4847 = vpow2.f32 %v3512_v56  ;;  %v3518_v1 = vmul.f32 1.442695, %v3464_v50  ;;  %v3568_v54 = vsel %vm3345_vm1, %v6809_v33, 0.0  ;;  %v10052_v20 = vld [vmem:[#allocation75_spill] sm:$0xff]  ;;  %v6903_v34 = vpop.eup %4839 }
 0x279   : > { %10045 = vst [vmem:[#allocation61_spill] sm:$0xff] %v6874_v43  ;;  %10047 = vst [vmem:[#allocation37_spill] sm:$0xff] %v6883_v4  ;;  %v3465_v59 = vsub.f32 %v10051_v48, %v3417_v8  ;;  %4676 = vmatprep.subr.bf16.mxu1 %v10052_v20  ;;  %3569 = vadd.xlane.f32.xlu0 %v3568_v54  ;;  %v1933_v11 = vcombine.high %v4458_v52, %v4458_v52  ;;  %v10053_v56 = vld [vmem:[#allocation34_spill] sm:$0xff]  ;;  %v10054_v22 = vrot.slane %v5813_v35, 5  ;;  %v10106_v4 = vld [vmem:[#allocation52_spill] sm:$0xff] }
 0x27a   : > { %10050 = vst [vmem:[#allocation35_spill] sm:$0xff] %v6893_v49  ;;  %v3458_v8 = vsub.f32 %v10053_v56, %v3396_v38  ;;  %v1940_v48 = vrot.slane %v4458_v52, %v5893_v41  ;;  %v10055_v55 = vrot.slane %v5798_v29, 5  ;;  %4849 = vpow2.f32 %v3518_v1  ;;  %v10063_v1 = vld [vmem:[#allocation38_spill] sm:$0xff] }
 0x27b   : > { %v3520_v50 = vmul.f32 1.442695, %v3465_v59  ;;  %v3638_v53 = vpack.c.bf16 %v6903_v34, %v4838_v3  ;;  %v10057_v49 = vrot.slane %v5823_v39, 5  ;;  %v10058_v59 = vrot.slane %v5806_v32, 5  ;;  %v4842_v2 = vpop.eup %4841  ;;  %v3408_v7 = vpop.xlane.xlu0 %3407 }
 0x27c   : > { %v6913_v54 = vsel %vm1135_vm3, %v10055_v55, %v10054_v22  ;;  %v3399_v43 = vpop.xlane.xlu1 %3398  ;;  %v10060_v52 = vrot.slane %v5937_v12, 5  ;;  %v10061_v56 = vrot.slane %v5852_v60, 5  ;;  %v3506_v22 = vmul.f32 1.442695, %v3458_v8 }
 0x27d   : > { %10056 = vst [vmem:[#allocation73_spill] sm:$0xff] %v6913_v54  ;;  %v6922_v38 = vsel %vm1135_vm3, %v10058_v59, %v10057_v49  ;;  %4851 = vpow2.f32 %v3520_v50  ;;  %v3459_v54 = vsub.f32 %v10063_v1, %v3399_v43  ;;  %v3580_v61 = vsel %vm3345_vm1, %v6858_v27, 0.0  ;;  %4656 = vmatprep.mubr.msk.bf16.mxu0 %vm3345_vm1, %v3638_v53  ;;  %v10070_v1 = vld [vmem:[#allocation36_spill] sm:$0xff] }
 0x27e   : > { %10059 = vst [vmem:[#allocation39_spill] sm:$0xff] %v6922_v38  ;;  %v6930_v55 = vsel %vm1135_vm3, %v10061_v56, %v10060_v52  ;;  %3581 = vadd.xlane.f32.xlu0 %v3580_v61  ;;  %v6938_v59 = vrot.slane %v1933_v11, %v5893_v41  ;;  %v10064_v52 = vrot.slane %v5943_v16, 5  ;;  %v10065_v50 = vrot.slane %v5877_v14, 5  ;;  %v6956_v53 = vpop.eup %4843  ;;  %v7085_v14 = vld [vmem:[%s5586_s16 + $0x90] sm:$0xff] }
 0x27f   : > { %10062 = vst [vmem:[#allocation75_spill] sm:$0xff] %v6930_v55  ;;  %v10067_v8 = vrot.slane %v5955_v30, 5  ;;  %v10068_v56 = vrot.slane %v5952_v26, 5  ;;  %v3508_v11 = vmul.f32 1.442695, %v3459_v54  ;;  %v3462_v49 = vsub.f32 %v10070_v1, %v3408_v7  ;;  %v7081_v30 = vld [vmem:[%s5586_s16 + $0x70] sm:$0xff] }
 0x280   : > { %v6946_v43 = vsel %vm1135_vm3, %v10065_v50, %v10064_v52  ;;  %v10071_v55 = vpack.c.bf16 %v6835_v13, %v6809_v33  ;;  %v1948_v52 = vcombine.high %v1940_v48, %v1940_v48  ;;  %v10072_v50 = vrot.slane %v5988_v46, 5  ;;  %v10082_v46 = vld [vmem:[#allocation74_spill] sm:$0xff] }
 0x281   : > { %10066 = vst [vmem:[#allocation34_spill] sm:$0xff] %v6946_v43  ;;  %v6954_v61 = vsel %vm1135_vm3, %v10068_v56, %v10067_v8  ;;  %v10073_v43 = vrot.slane %v5964_v42, 5  ;;  %4853 = vpow2.f32 %v3506_v22  ;;  %v3411_v8 = vpop.xlane.xlu1 %3410  ;;  %v3640_v54 = vpack.c.bf16 %v6956_v53, %v4842_v2 }
 0x282   : > { %10069 = vst [vmem:[#allocation38_spill] sm:$0xff] %v6954_v61  ;;  %4657 = vmatmul.mubr.msk.bf16.vlgmr.msra.gmra.mrb[20].mxu0 %vm3345_vm1, %v10071_v55  ;;  %v10075_v7 = vrot.slane %v6120_v17, 5  ;;  %v10076_v33 = vrot.slane %v6001_v18, 5  ;;  %v10078_v56 = vrot.slane %v6158_v6, 5  ;;  %v10079_v1 = vrot.slane %v6015_v63, 5 }
 0x283   : > { %v6969_v38 = vsel %vm1135_vm3, %v10073_v43, %v10072_v50  ;;  %4669 = vmatpush3.bf16.msra.mxu0 %v10049_v23  ;;  %4855 = vpow2.f32 %v3508_v11  ;;  %v3514_v43 = vmul.f32 1.442695, %v3462_v49  ;;  %v10081_v50 = vld [vmem:[#allocation40_spill] sm:$0xff]  ;;  %v3562_v42 = vsel %vm3345_vm1, %v4838_v3, 0.0  ;;  %4664 = vmatprep.mubr.msk.bf16.mxu1 %vm3345_vm1, %v3640_v54  ;;  %v10091_v49 = vld [vmem:[#allocation81_spill] sm:$0xff] }
 0x284   : > { %10074 = vst [vmem:[#allocation36_spill] sm:$0xff] %v6969_v38  ;;  %v6979_v55 = vsel %vm1135_vm3, %v10076_v33, %v10075_v7  ;;  %v6987_v22 = vsel %vm1135_vm3, %v10079_v1, %v10078_v56  ;;  %v3463_v23 = vsub.f32 %v10081_v50, %v3411_v8  ;;  %4670 = vmatprep.subr.bf16.mxu0 %v10082_v46  ;;  %v6992_v38 = vpop.eup %4845  ;;  %v3426_v7 = vpop.xlane.xlu0 %3425  ;;  %v3538_v33 = vsel %vm3345_vm1, %v6751_v15, 0.0  ;;  %v10084_v1 = vld [vmem:[#allocation48_spill] sm:$0xff] }
 0x285   : > { %10077 = vst [vmem:[#allocation177_spill] sm:$0xff] %v6979_v55  ;;  %10080 = vst [vmem:[#allocation178_spill] sm:$0xff] %v6987_v22  ;;  %3563 = vadd.xlane.f32.xlu0 %v3562_v42  ;;  %v3547_v11 = vsel %vm3345_vm1, %v6706_v51, 0.0  ;;  %v7002_v3 = vrot.slane %v1940_v48, %v5898_v9  ;;  %v7004_v8 = vpop.eup %4847  ;;  %v3468_v42 = vsub.f32 %v10084_v1, %v3426_v7  ;;  %4857 = vpow2.f32 %v3514_v43  ;;  %v3429_v48 = vpop.xlane.xlu1 %3428  ;;  %v10089_v43 = vld [vmem:[#allocation51_spill] sm:$0xff]  ;;  %v7052_v22 = vld [vmem:[%s5586_s16 + $0x88] sm:$0xff] }
 0x286   : > { %v3516_v56 = vmul.f32 1.442695, %v3463_v23  ;;  %v10085_v54 = vpack.c.bf16 %v6878_v25, %v6858_v27  ;;  %v7013_v15 = vrot.slane %v6938_v59, %v5898_v9  ;;  %v7016_v51 = vrot.slane %v1948_v52, %v5898_v9  ;;  %3539 = vadd.xlane.f32.xlu1 %v3538_v33  ;;  %v7024_v23 = vld [vmem:[%s5586_s16 + $0x8] sm:$0xff]  ;;  %10095 = vst [vmem:[#allocation180_spill] sm:$0xff] %v7052_v22 }
 0x287   : > { %10083 = vst [vmem:[#allocation40_spill] sm:$0xff] %v7002_v3  ;;  %v3559_v50 = vsel %vm3345_vm1, %v6732_v19, 0.0  ;;  %4671 = vmatpush3.bf16.msra.mxu0 %v10082_v46  ;;  %10088 = vst [vmem:[#allocation179_spill] sm:$0xff] %v7024_v23  ;;  %v3526_v52 = vmul.f32 1.442695, %v3468_v42  ;;  %v3469_v1 = vsub.f32 %v10089_v43, %v3429_v48  ;;  %v3574_v33 = vsel %vm3345_vm1, %v4842_v2, 0.0  ;;  %v7031_v46 = vpop.eup %4849 }
 0x288   : > { %4665 = vmatmul.mubr.msk.bf16.vlgmr.msra.gmra.mrb[20].mxu1 %vm3345_vm1, %v10085_v54  ;;  %10086 = vst [vmem:[#allocation74_spill] sm:$0xff] %v7013_v15  ;;  %10087 = vst [vmem:[#allocation48_spill] sm:$0xff] %v7016_v51  ;;  %4859 = vpow2.f32 %v3516_v56  ;;  %v10090_v19 = vld [vmem:[#allocation82_spill] sm:$0xff]  ;;  %v3420_v54 = vpop.xlane.xlu0 %3419  ;;  %v7047_v27 = vpop.eup %4851  ;;  %v3553_v7 = vsel %vm3345_vm1, %v6787_v45, 0.0  ;;  %v7063_v51 = vld [vmem:[%s5586_s16 + $0x10] sm:$0xff]  ;;  %v3592_v42 = vsel %vm3345_vm1, %v6992_v38, 0.0 }
 0x289   : > { %4677 = vmatpush3.bf16.msra.mxu1 %v10052_v20  ;;  %4684 = vmatprep.subr.bf16.mxu0 %v10090_v19  ;;  %v7036_v56 = vld [vmem:[%s5586_s16 + $0x28] sm:$0xff]  ;;  %4861 = vpow2.f32 %v3526_v52  ;;  %v3423_v61 = vpop.xlane.xlu1 %3422  ;;  %10097 = vst [vmem:[#allocation182_spill] sm:$0xff] %v7063_v51  ;;  %v7070_v52 = vld [vmem:[%s5586_s16 + $0x30] sm:$0xff]  ;;  %v10100_v15 = vld [vmem:[#allocation49_spill] sm:$0xff]  ;;  %v10107_v62 = vrot.slane %v7063_v51, 1  ;;  %v3604_v26 = vsel %vm3345_vm1, %v7031_v46, 0.0  ;;  %v10141_v51 = vpack.c.bf16 %v7047_v27, %v7031_v46 }
 0x28a   : > { %3575 = vadd.xlane.f32.xlu0 %v3574_v33  ;;  %4678 = vmatprep.subr.bf16.mxu1 %v10091_v49  ;;  %10092 = vst [vmem:[#allocation51_spill] sm:$0xff] %v7036_v56  ;;  %v7040_v48 = vld [vmem:[%s5586_s16 + $0x48] sm:$0xff]  ;;  %v3528_v33 = vmul.f32 1.442695, %v3469_v1  ;;  %10098 = vst [vmem:[#allocation183_spill] sm:$0xff] %v7070_v52  ;;  %v7074_v43 = vld [vmem:[%s5586_s16 + $0x50] sm:$0xff]  ;;  %v3466_v3 = vsub.f32 %v10100_v15, %v3420_v54 }
 0x28b   : > { %10093 = vst [vmem:[#allocation82_spill] sm:$0xff] %v7040_v48  ;;  %v7044_v20 = vld [vmem:[%s5586_s16 + $0x68] sm:$0xff]  ;;  %3548 = vadd.xlane.f32.xlu1 %v3547_v11  ;;  %10099 = vst [vmem:[#allocation184_spill] sm:$0xff] %v7074_v43  ;;  %v4854_v2 = vpop.eup %4853  ;;  %v10104_v1 = vld [vmem:[#allocation55_spill] sm:$0xff]  ;;  %v3571_v15 = vsel %vm3345_vm1, %v6835_v13, 0.0  ;;  %v10114_v11 = vrot.slane %v7074_v43, 1 }
 0x28c   : > { %10094 = vst [vmem:[#allocation81_spill] sm:$0xff] %v7044_v20  ;;  %v7056_v55 = vld [vmem:[%s5586_s16 + $0xa8] sm:$0xff]  ;;  %4863 = vpow2.f32 %v3528_v33  ;;  %v3432_v45 = vpop.xlane.xlu0 %3431  ;;  %10102 = vst [vmem:[#allocation49_spill] sm:$0xff] %v7081_v30  ;;  %v3467_v47 = vsub.f32 %v10104_v1, %v3423_v61  ;;  %v7094_v54 = vld [vmem:[%s5586_s16 + $0xb0] sm:$0xff]  ;;  %v10108_v61 = vrot.slane %v7024_v23, 1  ;;  %v10115_v23 = vrot.slane %v7040_v48, 1 }
 0x28d   : > { %10096 = vst [vmem:[#allocation181_spill] sm:$0xff] %v7056_v55  ;;  %4679 = vmatpush3.bf16.msra.mxu1 %v10091_v49  ;;  %v10101_v33 = vld [vmem:[#allocation106_spill] sm:$0xff]  ;;  %v7088_v16 = vpop.eup %4855  ;;  %10105 = vst [vmem:[#allocation55_spill] sm:$0xff] %v7094_v54  ;;  %v3470_v58 = vsub.f32 %v10106_v4, %v3432_v45  ;;  %v3435_v49 = vpop.xlane.xlu1 %3434  ;;  %v10111_v4 = vrot.slane %v7070_v52, 1  ;;  %v10138_v52 = vld [vmem:[#allocation56_spill] sm:$0xff] }
 0x28e   : > { %3593 = vadd.xlane.f32.xlu0 %v3592_v42  ;;  %4692 = vmatprep.subr.bf16.mxu1 %v10101_v33  ;;  %10103 = vst [vmem:[#allocation106_spill] sm:$0xff] %v7085_v14  ;;  %v3642_v57 = vpack.c.bf16 %v7088_v16, %v4854_v2  ;;  %v7107_v13 = vsel %vm1892_vm6, %v10108_v61, %v10107_v62  ;;  %v10110_v1 = vld [vmem:[#allocation58_spill] sm:$0xff]  ;;  %v3522_v61 = vmul.f32 1.442695, %v3466_v3  ;;  %v10121_v3 = vrot.slane %v7052_v22, 1 }
 0x28f   : > { %3560 = vadd.xlane.f32.xlu1 %v3559_v50  ;;  %10109 = vst [vmem:[#allocation52_spill] sm:$0xff] %v7107_v13  ;;  %v3471_v42 = vsub.f32 %v10110_v1, %v3435_v49  ;;  %v10112_v50 = vrot.slane %v7036_v56, 1  ;;  %v7126_v62 = vsel %vm1892_vm6, %v10115_v23, %v10114_v11  ;;  %v4858_v49 = vpop.eup %4857  ;;  %v7131_v56 = vsel %vm3345_vm1, %v6878_v25, 0.0  ;;  %v10123_v11 = vld [vmem:[#allocation50_spill] sm:$0xff]  ;;  %v10152_v13 = vld [vmem:[#allocation88_spill] sm:$0xff] }
 0x290   : > { %10116 = vst [vmem:[#allocation185_spill] sm:$0xff] %v7126_v62  ;;  %v3438_v1 = vpop.xlane.xlu0 %3437  ;;  %4672 = vmatprep.mubr.msk.bf16.mxu0 %vm3345_vm1, %v3642_v57  ;;  %v10120_v23 = vrot.slane %v7085_v14, 1  ;;  %v3524_v25 = vmul.f32 1.442695, %v3467_v47  ;;  %v10129_v47 = vrot.slane %v6001_v18, 1  ;;  %v7195_v14 = vld [vmem:[%s5586_s16 + $0x20] sm:$0xff]  ;;  %4865 = vpow2.f32 %v3522_v61 }
 0x291   : > { %v7118_v45 = vsel %vm1892_vm6, %v10112_v50, %v10111_v4  ;;  %v10117_v4 = vrot.slane %v7081_v30, 1  ;;  %v10118_v50 = vrot.slane %v7044_v20, 1  ;;  %v3472_v30 = vsub.f32 %v10123_v11, %v3438_v1  ;;  %v7221_v61 = vld [vmem:[%s5586_s16 + $0x38] sm:$0xff]  ;;  %v718_v18 = vld [vmem:[#allocation2 + $0x88] sm:$0xff] }
 0x292   : > { %10113 = vst [vmem:[#allocation58_spill] sm:$0xff] %v7118_v45  ;;  %3605 = vadd.xlane.f32.xlu0 %v3604_v26  ;;  %v7147_v26 = vsel %vm1892_vm6, %v10121_v3, %v10120_v23  ;;  %v7149_v57 = vpop.eup %4859  ;;  %v10124_v20 = vpack.c.bf16 %v7004_v8, %v6992_v38  ;;  %v10128_v23 = vrot.slane %v6120_v17, 1  ;;  %v7172_v38 = vld.sshfl [vmem:[#allocation9 + $0x18] sm:$0x33 pattern:$0x75316420]  ;;  %v3441_v3 = vpop.xlane.xlu1 %3440  ;;  %4867 = vpow2.f32 %v3524_v25 }
 0x293   : > { %v7139_v48 = vsel %vm1892_vm6, %v10118_v50, %v10117_v4  ;;  %10122 = vst [vmem:[#allocation187_spill] sm:$0xff] %v7147_v26  ;;  %v10125_v4 = vrot.slane %v7094_v54, 1  ;;  %v10126_v50 = vrot.slane %v7056_v55, 1  ;;  %3554 = vadd.xlane.f32.xlu1 %v3553_v7  ;;  %v3644_v11 = vpack.c.bf16 %v7149_v57, %v4858_v49  ;;  %v10135_v54 = vld [vmem:[#allocation105_spill] sm:$0xff]  ;;  %10142 = vst [vmem:[#allocation193_spill] sm:$0xff] %v7221_v61  ;;  %v726_v17 = vld [vmem:[#allocation2 + $0xc8] sm:$0xff] }
 0x294   : > { %10119 = vst [vmem:[#allocation186_spill] sm:$0xff] %v7139_v48  ;;  %4673 = vmatmul.mubr.msk.bf16.vlgmr.msra.gmra.mrb[24].mxu0 %vm3345_vm1, %v10124_v20  ;;  %v7170_v1 = vsel %vm1892_vm6, %v10129_v47, %v10128_v23  ;;  %v3530_v20 = vmul.f32 1.442695, %v3470_v58  ;;  %v7185_v23 = vld [vmem:[%s5586_s16] sm:$0xff]  ;;  %v3532_v58 = vmul.f32 1.442695, %v3471_v42  ;;  %v3473_v47 = vsub.f32 %v10138_v52, %v3441_v3 }
 0x295   : > { %v7162_v22 = vsel %vm1892_vm6, %v10126_v50, %v10125_v4  ;;  %10130 = vst [vmem:[#allocation188_spill] sm:$0xff] %v7170_v1  ;;  %4685 = vmatpush3.bf16.msra.mxu0 %v10090_v19  ;;  %v10131_v4 = vrot.slane %v6158_v6, 1  ;;  %v10132_v50 = vrot.slane %v6015_v63, 1  ;;  %10134 = vst [vmem:[#allocation190_spill] sm:$0xff] %v7185_v23  ;;  %v3586_v7 = vsel %vm3345_vm1, %v4854_v2, 0.0  ;;  %4680 = vmatprep.mubr.msk.bf16.mxu1 %vm3345_vm1, %v3644_v11  ;;  %v7203_v2 = vld [vmem:[%s5586_s16 + $0x18] sm:$0xff] }
 0x296   : > { %10127 = vst [vmem:[#allocation50_spill] sm:$0xff] %v7162_v22  ;;  %4686 = vmatprep.subr.bf16.mxu0 %v10135_v54  ;;  %v7192_v19 = vsel %vm3345_vm1, %v6903_v34, 0.0  ;;  %10136 = vst [vmem:[#allocation105_spill] sm:$0xff] %v7195_v14  ;;  %3587 = vadd.xlane.f32.xlu0 %v3586_v7  ;;  %v7218_v52 = vsel %vm3345_vm1, %v7004_v8, 0.0  ;;  %4869 = vpow2.f32 %v3530_v20  ;;  %v653_v25 = vpop.permute.xlu1 %652  ;;  %v3598_v11 = vsel %vm3345_vm1, %v4858_v49, 0.0  ;;  %v10143_v8 = vld [vmem:[#allocation91_spill] sm:$0xff] }
 0x297   : > { %v7182_v55 = vsel %vm1892_vm6, %v10132_v50, %v10131_v4  ;;  %v7198_v4 = vpop.eup %4861  ;;  %v3534_v50 = vmul.f32 1.442695, %v3472_v30  ;;  %10139 = vst [vmem:[#allocation56_spill] sm:$0xff] %v7203_v2  ;;  %4681 = vmatmul.mubr.msk.bf16.vlgmr.msra.gmra.mrb[24].mxu1 %vm3345_vm1, %v10141_v51  ;;  %v7214_v30 = vsel %vm3345_vm1, %v6956_v53, 0.0  ;;  %3572 = vadd.xlane.f32.xlu1 %v3571_v15  ;;  %4871 = vpow2.f32 %v3532_v58  ;;  %v10144_v7 = vld [vmem:[#allocation92_spill] sm:$0xff]  ;;  %v10145_v42 = vld [vmem:[#allocation93_spill] sm:$0xff] }
 0x298   : > { %10133 = vst [vmem:[#allocation189_spill] sm:$0xff] %v7182_v55  ;;  %10137 = vst [vmem:[#allocation191_spill] sm:$0xff] %v7198_v4  ;;  %v7206_v34 = vpop.eup %4863  ;;  %v686_v46 = vmul.f32 %v10143_v8, %v653_v25  ;;  %v690_v43 = vmul.f32 %v10144_v7, %v653_v25  ;;  %v694_v3 = vmul.f32 %v10145_v42, %v653_v25  ;;  %v702_v20 = vld [vmem:[#allocation2 + $0x8] sm:$0xff]  ;;  %4693 = vmatpush3.bf16.msra.mxu1 %v10101_v33  ;;  %v10147_v1 = vld [vmem:[#allocation83_spill] sm:$0xff] }
 0x299   : > { %10140 = vst [vmem:[#allocation192_spill] sm:$0xff] %v7206_v34  ;;  %4687 = vmatpush3.bf16.msra.mxu0 %v10135_v54  ;;  %v706_v15 = vld [vmem:[#allocation2 + $0x28] sm:$0xff]  ;;  %4873 = vpow2.f32 %v3534_v50  ;;  %v7234_v49 = vmul.f32 1.442695, %v3473_v47  ;;  %v3616_v58 = vsel %vm3345_vm1, %v7198_v4, 0.0  ;;  %4694 = vmatprep.subr.bf16.mxu1 %v6375_v5  ;;  %v10148_v33 = vld [vmem:[#allocation84_spill] sm:$0xff] }
 0x29a   : > { %v10146_v54 = vld [vmem:[#allocation94_spill] sm:$0xff]  ;;  %3599 = vadd.xlane.f32.xlu0 %v3598_v11  ;;  %v734_v22 = vmul.f32 %v686_v46, %v10147_v1  ;;  %v738_v50 = vmul.f32 %v690_v43, %v10148_v33  ;;  %v10149_v47 = vld [vmem:[#allocation85_spill] sm:$0xff]  ;;  %v10150_v26 = vld [vmem:[#allocation87_spill] sm:$0xff]  ;;  %v754_v11 = vmul.f32 %v690_v43, %v10152_v13  ;;  %v758_v24 = vmul.f32 %v694_v3, %v10153_v10 }
 0x29b   : > { %v698_v63 = vmul.f32 %v10146_v54, %v653_v25  ;;  %v710_v51 = vld [vmem:[#allocation2 + $0x48] sm:$0xff]  ;;  %v742_v48 = vmul.f32 %v694_v3, %v10149_v47  ;;  %v750_v25 = vmul.f32 %v686_v46, %v10150_v26  ;;  %3584 = vadd.xlane.f32.xlu1 %v7131_v56  ;;  %v648_v26 = vpop.permute.xlu0 %647  ;;  %v10156_v3 = vld [vmem:[#allocation95_spill] sm:$0xff]  ;;  %v10164_v10 = vld [vmem:[#allocation104_spill] sm:$0xff]  ;;  %4875 = vpow2.f32 %v7234_v49 }
 0x29c   : > { %v714_v6 = vld [vmem:[#allocation2 + $0x68] sm:$0xff]  ;;  %v766_v60 = vadd.f32 %v734_v22, %v702_v20  ;;  %v770_v12 = vadd.f32 %v738_v50, %v706_v15  ;;  %4695 = vmatpush3.bf16.msra.mxu1 %v6375_v5  ;;  %v790_v39 = vadd.f32 %v758_v24, %v726_v17  ;;  %v693_v5 = vmul.f32 %v10145_v42, %v648_v26  ;;  %v701_v17 = vld [vmem:[#allocation2] sm:$0xff]  ;;  %v703_v4 = vld [vmem:[#allocation2 + $0x10] sm:$0xff] }
 0x29d   : > { %v722_v53 = vld [vmem:[#allocation2 + $0xa8] sm:$0xff]  ;;  %v762_v21 = vmul.f32 %v698_v63, %v10154_v0  ;;  %v774_v32 = vadd.f32 %v742_v48, %v710_v51  ;;  %v782_v1 = vadd.f32 %v750_v25, %v718_v18  ;;  %v689_v18 = vmul.f32 %v10144_v7, %v648_v26  ;;  %v705_v24 = vld [vmem:[#allocation2 + $0x20] sm:$0xff]  ;;  %v10161_v25 = vld [vmem:[#allocation100_spill] sm:$0xff] }
 0x29e   : > { %v730_v55 = vld [vmem:[#allocation2 + $0xe8] sm:$0xff]  ;;  %v786_v47 = vadd.f32 %v754_v11, %v722_v53  ;;  %3617 = vadd.xlane.f32.xlu0 %v3616_v58  ;;  %798 = vst.msk [vmem:[#allocation2 + $0x8] sm:$0xff] %vm520_vm0, %v766_v60  ;;  %802 = vst.msk [vmem:[#allocation2 + $0x28] sm:$0xff] %vm520_vm0, %v770_v12  ;;  %v713_v60 = vld [vmem:[#allocation2 + $0x60] sm:$0xff] }
 0x29f   : > { %v10151_v62 = vld [vmem:[#allocation86_spill] sm:$0xff]  ;;  %v794_v46 = vadd.f32 %v762_v21, %v730_v55  ;;  %806 = vst.msk [vmem:[#allocation2 + $0x48] sm:$0xff] %vm520_vm0, %v774_v32  ;;  %814 = vst.msk [vmem:[#allocation2 + $0x88] sm:$0xff] %vm520_vm0, %v782_v1  ;;  %v658_v21 = vpop.permute.xlu1 %657  ;;  %v7258_v55 = vpop.eup %4865  ;;  %v709_v32 = vld [vmem:[#allocation2 + $0x40] sm:$0xff]  ;;  %3566 = vadd.xlane.f32.xlu1 %v7192_v19 }
 0x2a0   : > { %v746_v45 = vmul.f32 %v698_v63, %v10151_v62  ;;  %v685_v63 = vmul.f32 %v10143_v8, %v648_v26  ;;  %818 = vst.msk [vmem:[#allocation2 + $0xa8] sm:$0xff] %vm520_vm0, %v786_v47  ;;  %822 = vst.msk [vmem:[#allocation2 + $0xc8] sm:$0xff] %vm520_vm0, %v790_v39  ;;  %v717_v12 = vld [vmem:[#allocation2 + $0x80] sm:$0xff]  ;;  %v687_v22 = vmul.f32 %v10143_v8, %v658_v21  ;;  %v10157_v53 = vld [vmem:[#allocation96_spill] sm:$0xff] }
 0x2a1   : > { %826 = vst.msk [vmem:[#allocation2 + $0xe8] sm:$0xff] %vm520_vm0, %v794_v46  ;;  %v691_v56 = vmul.f32 %v10144_v7, %v658_v21  ;;  %v695_v48 = vmul.f32 %v10145_v42, %v658_v21  ;;  %v699_v43 = vmul.f32 %v10146_v54, %v658_v21  ;;  %v725_v1 = vld [vmem:[#allocation2 + $0xc0] sm:$0xff]  ;;  %v737_v20 = vmul.f32 %v689_v18, %v10157_v53  ;;  %v10158_v15 = vld [vmem:[#allocation98_spill] sm:$0xff] }
 0x2a2   : > { %v778_v33 = vadd.f32 %v746_v45, %v714_v6  ;;  %v697_v6 = vmul.f32 %v10146_v54, %v648_v26  ;;  %v7269_v45 = vpop.eup %4867  ;;  %v721_v26 = vld [vmem:[#allocation2 + $0xa0] sm:$0xff]  ;;  %v733_v51 = vmul.f32 %v685_v63, %v10156_v3  ;;  %v741_v58 = vmul.f32 %v693_v5, %v10158_v15  ;;  %v10163_v19 = vld [vmem:[#allocation102_spill] sm:$0xff]  ;;  %v707_v15 = vld [vmem:[#allocation2 + $0x30] sm:$0xff] }
 0x2a3   : > { %10155 = vst [vmem:[#allocation91_spill] sm:$0xff] %v7269_v45  ;;  %v729_v39 = vld [vmem:[#allocation2 + $0xe0] sm:$0xff]  ;;  %v7275_v47 = vpop.eup %4869  ;;  %v749_v11 = vmul.f32 %v685_v63, %v10161_v25  ;;  %v757_v0 = vmul.f32 %v693_v5, %v10163_v19  ;;  %v769_v3 = vadd.f32 %v737_v20, %v705_v24  ;;  %v711_v25 = vld [vmem:[#allocation2 + $0x50] sm:$0xff]  ;;  %3578 = vadd.xlane.f32.xlu1 %v7214_v30 }
 0x2a4   : > { %810 = vst.msk [vmem:[#allocation2 + $0x68] sm:$0xff] %vm520_vm0, %v778_v33  ;;  %v10159_v33 = vld [vmem:[#allocation99_spill] sm:$0xff]  ;;  %10160 = vst [vmem:[#allocation92_spill] sm:$0xff] %v7275_v47  ;;  %v10162_v46 = vld [vmem:[#allocation101_spill] sm:$0xff]  ;;  %v761_v13 = vmul.f32 %v697_v6, %v10164_v10  ;;  %v7281_v62 = vpop.eup %4871  ;;  %v765_v44 = vadd.f32 %v733_v51, %v701_v17  ;;  %v773_v54 = vadd.f32 %v741_v58, %v709_v32 }
 0x2a5   : > { %v745_v50 = vmul.f32 %v697_v6, %v10159_v33  ;;  %v753_v21 = vmul.f32 %v689_v18, %v10162_v46  ;;  %10165 = vst [vmem:[#allocation93_spill] sm:$0xff] %v7281_v62  ;;  %v7283_v34 = vpop.eup %4873  ;;  %v781_v33 = vadd.f32 %v749_v11, %v717_v12  ;;  %v789_v29 = vadd.f32 %v757_v0, %v725_v1  ;;  %v715_v18 = vld [vmem:[#allocation2 + $0x70] sm:$0xff]  ;;  %v10167_v0 = vld [vmem:[#allocation108_spill] sm:$0xff] }
 0x2a6   : > { %v793_v63 = vadd.f32 %v761_v13, %v729_v39  ;;  %v719_v46 = vld [vmem:[#allocation2 + $0x90] sm:$0xff]  ;;  %797 = vst.msk [vmem:[#allocation2] sm:$0xff] %vm520_vm0, %v765_v44  ;;  %801 = vst.msk [vmem:[#allocation2 + $0x20] sm:$0xff] %vm520_vm0, %v769_v3  ;;  %v739_v13 = vmul.f32 %v691_v56, %v10167_v0  ;;  %v10172_v3 = vld [vmem:[#allocation113_spill] sm:$0xff] }
 0x2a7   : > { %v777_v53 = vadd.f32 %v745_v50, %v713_v60  ;;  %v785_v47 = vadd.f32 %v753_v21, %v721_v26  ;;  %805 = vst.msk [vmem:[#allocation2 + $0x40] sm:$0xff] %vm520_vm0, %v773_v54  ;;  %v723_v5 = vld [vmem:[#allocation2 + $0xb0] sm:$0xff]  ;;  %v10168_v60 = vld [vmem:[#allocation109_spill] sm:$0xff]  ;;  %v10169_v26 = vld [vmem:[#allocation110_spill] sm:$0xff]  ;;  %v759_v51 = vmul.f32 %v695_v48, %v10172_v3  ;;  %3596 = vadd.xlane.f32.xlu1 %v7218_v52 }
 0x2a8   : > { %v727_v6 = vld [vmem:[#allocation2 + $0xd0] sm:$0xff]  ;;  %v743_v12 = vmul.f32 %v695_v48, %v10168_v60  ;;  %v747_v1 = vmul.f32 %v699_v43, %v10169_v26  ;;  %813 = vst.msk [vmem:[#allocation2 + $0x80] sm:$0xff] %vm520_vm0, %v781_v33  ;;  %821 = vst.msk [vmem:[#allocation2 + $0xc0] sm:$0xff] %vm520_vm0, %v789_v29  ;;  %v10171_v54 = vld [vmem:[#allocation112_spill] sm:$0xff]  ;;  %v771_v50 = vadd.f32 %v739_v13, %v707_v15  ;;  %v663_v29 = vpop.permute.xlu1 %662  ;;  %v10177_v48 = vrot.slane %v7203_v2, 1 }
 0x2a9   : > { %809 = vst.msk [vmem:[#allocation2 + $0x60] sm:$0xff] %vm520_vm0, %v777_v53  ;;  %v731_v17 = vld [vmem:[#allocation2 + $0xf0] sm:$0xff]  ;;  %817 = vst.msk [vmem:[#allocation2 + $0xa0] sm:$0xff] %vm520_vm0, %v785_v47  ;;  %v755_v39 = vmul.f32 %v691_v56, %v10171_v54  ;;  %v10173_v53 = vld [vmem:[#allocation114_spill] sm:$0xff]  ;;  %v791_v19 = vadd.f32 %v759_v51, %v727_v6  ;;  %v10176_v56 = vrot.slane %v7185_v23, 1  ;;  %v10180_v15 = vrot.slane %v7221_v61, 1 }
 0x2aa   : > { %v10166_v24 = vld [vmem:[#allocation107_spill] sm:$0xff]  ;;  %825 = vst.msk [vmem:[#allocation2 + $0xe0] sm:$0xff] %vm520_vm0, %v793_v63  ;;  %v763_v20 = vmul.f32 %v699_v43, %v10173_v53  ;;  %v775_v11 = vadd.f32 %v743_v12, %v711_v25  ;;  %v779_v21 = vadd.f32 %v747_v1, %v715_v18  ;;  %803 = vst.msk [vmem:[#allocation2 + $0x30] sm:$0xff] %vm520_vm0, %v771_v50  ;;  %v10179_v43 = vrot.slane %v7195_v14, 1  ;;  %v712_v12 = vld [vmem:[#allocation2 + $0x58] sm:$0xff] }
 0x2ab   : > { %v735_v32 = vmul.f32 %v687_v22, %v10166_v24  ;;  %v10170_v44 = vld [vmem:[#allocation111_spill] sm:$0xff]  ;;  %v787_v33 = vadd.f32 %v755_v39, %v723_v5  ;;  %v7319_v52 = vsel %vm1892_vm6, %v10177_v48, %v10176_v56  ;;  %823 = vst.msk [vmem:[#allocation2 + $0xd0] sm:$0xff] %vm520_vm0, %v791_v19  ;;  %v3646_v63 = vpack.c.bf16 %v7269_v45, %v7258_v55  ;;  %v10193_v50 = vld [vmem:[#allocation192_spill] sm:$0xff]  ;;  %v10221_v2 = vld [vmem:[#allocation142_spill] sm:$0xff] }
 0x2ac   : > { %v751_v30 = vmul.f32 %v687_v22, %v10170_v44  ;;  %v795_v47 = vadd.f32 %v763_v20, %v731_v17  ;;  %807 = vst.msk [vmem:[#allocation2 + $0x50] sm:$0xff] %vm520_vm0, %v775_v11  ;;  %811 = vst.msk [vmem:[#allocation2 + $0x70] sm:$0xff] %vm520_vm0, %v779_v21  ;;  %v7327_v25 = vsel %vm1892_vm6, %v10180_v15, %v10179_v43  ;;  %v3589_v17 = vsel %vm3345_vm1, %v7088_v16, 0.0  ;;  %v704_v16 = vld [vmem:[#allocation2 + $0x18] sm:$0xff]  ;;  %v10190_v20 = vld [vmem:[#allocation42_spill] sm:$0xff] }
 0x2ad   : > { %v767_v58 = vadd.f32 %v735_v32, %v703_v4  ;;  %v10174_v4 = vcombine.high %v6938_v59, %v6938_v59  ;;  %10178 = vst [vmem:[#allocation195_spill] sm:$0xff] %v7319_v52  ;;  %10181 = vst [vmem:[#allocation196_spill] sm:$0xff] %v7327_v25  ;;  %v7331_v59 = vrot.slane %v7172_v38, %v5893_v41  ;;  %v10182_v19 = vrot.slane %v5795_v28, 7  ;;  %v10194_v11 = vld [vmem:[#allocation191_spill] sm:$0xff]  ;;  %v10198_v43 = vld [vmem:[#allocation124_spill] sm:$0xff] }
 0x2ae   : > { %v783_v10 = vadd.f32 %v751_v30, %v719_v46  ;;  %819 = vst.msk [vmem:[#allocation2 + $0xb0] sm:$0xff] %vm520_vm0, %v787_v33  ;;  %827 = vst.msk [vmem:[#allocation2 + $0xf0] sm:$0xff] %vm520_vm0, %v795_v47  ;;  %v7337_v46 = vpop.permute.xlu0 %1200  ;;  %v688_v18 = vmul.f32 %v10143_v8, %v663_v29  ;;  %v692_v5 = vmul.f32 %v10144_v7, %v663_v29  ;;  %v10183_v32 = vrot.slane %v5816_v36, 7  ;;  %v720_v47 = vld [vmem:[#allocation2 + $0x98] sm:$0xff]  ;;  %v10197_v56 = vld [vmem:[#allocation123_spill] sm:$0xff] }
 0x2af   : > { %799 = vst.msk [vmem:[#allocation2 + $0x10] sm:$0xff] %vm520_vm0, %v767_v58  ;;  %v7311_v22 = vrot.slane %v10174_v4, %v5898_v9  ;;  %v696_v6 = vmul.f32 %v10145_v42, %v663_v29  ;;  %v10185_v8 = vrot.slane %v5803_v31, 7  ;;  %v10186_v7 = vrot.slane %v5826_v40, 7  ;;  %4688 = vmatprep.mubr.msk.bf16.mxu0 %vm3345_vm1, %v3646_v63  ;;  %v724_v4 = vld [vmem:[#allocation2 + $0xb8] sm:$0xff]  ;;  %v10199_v15 = vld [vmem:[#allocation126_spill] sm:$0xff]  ;;  %v10272_v45 = vld [vmem:[#allocation173_spill] sm:$0xff] }
 0x2b0   : > { %815 = vst.msk [vmem:[#allocation2 + $0x90] sm:$0xff] %vm520_vm0, %v783_v10  ;;  %v3607_v10 = vsel %vm3345_vm1, %v7047_v27, 0.0  ;;  %v7354_v13 = vsel %vm1409_vm5, %v10183_v32, %v10182_v19  ;;  %v708_v27 = vld [vmem:[#allocation2 + $0x38] sm:$0xff]  ;;  %v7368_v1 = vsel %vm3345_vm1, %v7149_v57, 0.0  ;;  %v10188_v30 = vcombine.high %v7172_v38, %v7172_v38  ;;  %v10196_v57 = vld [vmem:[#allocation94_spill] sm:$0xff] }
 0x2b1   : > { %10175 = vst [vmem:[#allocation194_spill] sm:$0xff] %v7311_v22  ;;  %10184 = vst [vmem:[#allocation197_spill] sm:$0xff] %v7354_v13  ;;  %v7362_v42 = vsel %vm1409_vm5, %v10186_v7, %v10185_v8  ;;  %v10189_v51 = vrot.slane %v5813_v35, 7  ;;  %v10191_v58 = vrot.slane %v10190_v20, 7  ;;  %v10195_v21 = vpack.c.bf16 %v10193_v50, %v10194_v11  ;;  %v728_v38 = vld [vmem:[#allocation2 + $0xd8] sm:$0xff]  ;;  %v10202_v20 = vld [vmem:[#allocation130_spill] sm:$0xff]  ;;  %3608 = vadd.xlane.f32.xlu1 %v3607_v10 }
 0x2b2   : > { %10187 = vst [vmem:[#allocation198_spill] sm:$0xff] %v7362_v42  ;;  %v7374_v39 = vrot.slane %v10188_v30, %v5893_v41  ;;  %v700_v33 = vmul.f32 %v10196_v57, %v663_v29  ;;  %v736_v48 = vmul.f32 %v688_v18, %v10197_v56  ;;  %v740_v35 = vmul.f32 %v692_v5, %v10198_v43  ;;  %v716_v19 = vld [vmem:[#allocation2 + $0x78] sm:$0xff]  ;;  %v10201_v30 = vld [vmem:[#allocation129_spill] sm:$0xff]  ;;  %v10203_v11 = vld [vmem:[#allocation127_spill] sm:$0xff]  ;;  %v7399_v43 = vpop.permute.xlu0 %1210 }
 0x2b3   : > { %v7382_v49 = vsel %vm1409_vm5, %v10191_v58, %v10189_v51  ;;  %4689 = vmatmul.mubr.msk.bf16.vlgmr.msra.gmra.mrb[28].mxu0 %vm3345_vm1, %v10195_v21  ;;  %v744_v63 = vmul.f32 %v696_v6, %v10199_v15  ;;  %v732_v32 = vld [vmem:[#allocation2 + $0xf8] sm:$0xff]  ;;  %v756_v51 = vmul.f32 %v692_v5, %v10201_v30  ;;  %v760_v58 = vmul.f32 %v696_v6, %v10202_v20  ;;  %v10204_v57 = vld [vmem:[#allocation131_spill] sm:$0xff]  ;;  %v10205_v6 = vld [vmem:[#allocation133_spill] sm:$0xff] }
 0x2b4   : > { %10192 = vst [vmem:[#allocation42_spill] sm:$0xff] %v7382_v49  ;;  %v10200_v8 = vld [vmem:[#allocation128_spill] sm:$0xff]  ;;  %v748_v21 = vmul.f32 %v700_v33, %v10203_v11  ;;  %v764_v14 = vmul.f32 %v700_v33, %v10204_v57  ;;  %v768_v23 = vadd.f32 %v736_v48, %v704_v16  ;;  %v772_v40 = vadd.f32 %v740_v35, %v708_v27  ;;  %v922_v33 = vpop.permute.xlu1 %921  ;;  %v10213_v35 = vld [vmem:[#allocation147_spill] sm:$0xff]  ;;  %v999_v16 = vld [vmem:[#allocation2 + $0xc0] sm:$0xff] }
 0x2b5   : > { %v752_v7 = vmul.f32 %v688_v18, %v10200_v8  ;;  %v776_v31 = vadd.f32 %v744_v63, %v712_v12  ;;  %v788_v28 = vadd.f32 %v756_v51, %v724_v4  ;;  %v792_v15 = vadd.f32 %v760_v58, %v728_v38  ;;  %3590 = vadd.xlane.f32.xlu1 %v3589_v17  ;;  %v10212_v38 = vld [vmem:[#allocation146_spill] sm:$0xff]  ;;  %v975_v63 = vld [vmem:[#allocation2] sm:$0xff]  ;;  %v10215_v51 = vld [vmem:[#allocation148_spill] sm:$0xff] }
 0x2b6   : > { %v780_v18 = vadd.f32 %v748_v21, %v716_v19  ;;  %v796_v5 = vadd.f32 %v764_v14, %v732_v32  ;;  %800 = vst.msk [vmem:[#allocation2 + $0x18] sm:$0xff] %vm520_vm0, %v768_v23  ;;  %804 = vst.msk [vmem:[#allocation2 + $0x38] sm:$0xff] %vm520_vm0, %v772_v40  ;;  %v7405_v10 = vmul.f32 %v10205_v6, %v7399_v43  ;;  %v10207_v14 = vld [vmem:[#allocation134_spill] sm:$0xff]  ;;  %v10209_v40 = vld [vmem:[#allocation92_spill] sm:$0xff]  ;;  %v3628_v12 = vsel %vm3345_vm1, %v7283_v34, 0.0 }
 0x2b7   : > { %v784_v36 = vadd.f32 %v752_v7, %v720_v47  ;;  %808 = vst.msk [vmem:[#allocation2 + $0x58] sm:$0xff] %vm520_vm0, %v776_v31  ;;  %820 = vst.msk [vmem:[#allocation2 + $0xb8] sm:$0xff] %vm520_vm0, %v788_v28  ;;  %v7415_v23 = vmul.f32 %v10207_v14, %v7399_v43  ;;  %v3648_v27 = vpack.c.bf16 %v7281_v62, %v10209_v40  ;;  %v3610_v31 = vsel %vm3345_vm1, %v7258_v55, 0.0  ;;  %v10211_v47 = vld [vmem:[#allocation145_spill] sm:$0xff]  ;;  %v10214_v55 = vld [vmem:[#allocation132_spill] sm:$0xff] }
 0x2b8   : > { %10206 = vst [vmem:[#allocation192_spill] sm:$0xff] %v7405_v10  ;;  %824 = vst.msk [vmem:[#allocation2 + $0xd8] sm:$0xff] %vm520_vm0, %v792_v15  ;;  %3629 = vadd.xlane.f32.xlu0 %v3628_v12  ;;  %v959_v4 = vmul.f32 %v10211_v47, %v922_v33  ;;  %v963_v48 = vmul.f32 %v10212_v38, %v922_v33  ;;  %v967_v15 = vmul.f32 %v10213_v35, %v922_v33  ;;  %v979_v19 = vld [vmem:[#allocation2 + $0x20] sm:$0xff]  ;;  %v10217_v57 = vld [vmem:[#allocation138_spill] sm:$0xff]  ;;  %v927_v54 = vpop.permute.xlu1 %926 }
 0x2b9   : > { %816 = vst.msk [vmem:[#allocation2 + $0x98] sm:$0xff] %vm520_vm0, %v784_v36  ;;  %10208 = vst [vmem:[#allocation191_spill] sm:$0xff] %v7415_v23  ;;  %v10210_v36 = vld [vmem:[#allocation125_spill] sm:$0xff]  ;;  %v7434_v17 = vmul.f32 %v10214_v55, %v7337_v46  ;;  %v7438_v32 = vmul.f32 %v10205_v6, %v7337_v46  ;;  %v7442_v7 = vmul.f32 %v10207_v14, %v7337_v46  ;;  %4696 = vmatprep.mubr.msk.bf16.mxu1 %vm3345_vm1, %v3648_v27  ;;  %v10218_v30 = vld [vmem:[#allocation139_spill] sm:$0xff] }
 0x2ba   : > { %v7425_v28 = vmul.f32 %v10210_v36, %v7337_v46  ;;  %812 = vst.msk [vmem:[#allocation2 + $0x78] sm:$0xff] %vm520_vm0, %v780_v18  ;;  %828 = vst.msk [vmem:[#allocation2 + $0xf8] sm:$0xff] %vm520_vm0, %v796_v5  ;;  %v971_v58 = vmul.f32 %v10215_v51, %v922_v33  ;;  %v983_v21 = vld [vmem:[#allocation2 + $0x40] sm:$0xff]  ;;  %v1011_v20 = vmul.f32 %v963_v48, %v10217_v57  ;;  %v7450_v46 = vpop.eup %4875  ;;  %v10220_v61 = vld [vmem:[#allocation140_spill] sm:$0xff]  ;;  %3602 = vadd.xlane.f32.xlu1 %v7368_v1 }
 0x2bb   : > { %v987_v18 = vld [vmem:[#allocation2 + $0x60] sm:$0xff]  ;;  %v1015_v8 = vmul.f32 %v967_v15, %v10218_v30  ;;  %v1027_v33 = vmul.f32 %v963_v48, %v10221_v2  ;;  %v10222_v41 = vld [vmem:[#allocation143_spill] sm:$0xff]  ;;  %v10223_v62 = vld [vmem:[#allocation144_spill] sm:$0xff]  ;;  %v3619_v1 = vsel %vm3345_vm1, %v10193_v50, 0.0  ;;  %v7483_v50 = vpop.permute.xlu0 %1474 }
 0x2bc   : > { %v991_v5 = vld [vmem:[#allocation2 + $0x80] sm:$0xff]  ;;  %v1019_v27 = vmul.f32 %v971_v58, %v10220_v61  ;;  %v1031_v25 = vmul.f32 %v967_v15, %v10222_v41  ;;  %v1035_v52 = vmul.f32 %v971_v58, %v10223_v62  ;;  %3611 = vadd.xlane.f32.xlu0 %v3610_v31  ;;  %v10240_v48 = vld [vmem:[#allocation115_spill] sm:$0xff]  ;;  %v976_v58 = vld [vmem:[#allocation2 + $0x8] sm:$0xff] }
 0x2bd   : > { %v995_v12 = vld [vmem:[#allocation2 + $0xa0] sm:$0xff]  ;;  %v1047_v53 = vadd.f32 %v1015_v8, %v983_v21  ;;  %v7509_v15 = vmul.f32 %v7425_v28, %v10240_v48  ;;  %v980_v21 = vld [vmem:[#allocation2 + $0x28] sm:$0xff]  ;;  %v10246_v62 = vld [vmem:[#allocation164_spill] sm:$0xff] }
 0x2be   : > { %v1003_v29 = vld [vmem:[#allocation2 + $0xe0] sm:$0xff]  ;;  %v1051_v30 = vadd.f32 %v1019_v27, %v987_v18  ;;  %v1059_v3 = vadd.f32 %v1027_v33, %v995_v12  ;;  %3620 = vadd.xlane.f32.xlu1 %v3619_v1  ;;  %v10243_v12 = vld [vmem:[#allocation118_spill] sm:$0xff]  ;;  %v968_v33 = vmul.f32 %v10213_v35, %v927_v54  ;;  %v10249_v48 = vld [vmem:[#allocation163_spill] sm:$0xff] }
 0x2bf   : > { %v10216_v23 = vld [vmem:[#allocation137_spill] sm:$0xff]  ;;  %1079 = vst.msk [vmem:[#allocation2 + $0x40] sm:$0xff] %vm520_vm0, %v1047_v53  ;;  %v7523_v27 = vmul.f32 %v7442_v7, %v10243_v12  ;;  %v984_v1 = vld [vmem:[#allocation2 + $0x48] sm:$0xff]  ;;  %v10250_v2 = vld [vmem:[#allocation167_spill] sm:$0xff]  ;;  %v7536_v24 = vpop.permute.xlu0 %1484 }
 0x2c0   : > { %v1007_v10 = vmul.f32 %v959_v4, %v10216_v23  ;;  %v10219_v11 = vld [vmem:[#allocation141_spill] sm:$0xff]  ;;  %v1043_v23 = vadd.f32 %v1011_v20, %v979_v19  ;;  %1083 = vst.msk [vmem:[#allocation2 + $0x60] sm:$0xff] %vm520_vm0, %v1051_v30  ;;  %1091 = vst.msk [vmem:[#allocation2 + $0xa0] sm:$0xff] %vm520_vm0, %v1059_v3  ;;  %v10233_v3 = vcombine.high %v7374_v39, %v7374_v39 }
 0x2c1   : > { %v1023_v56 = vmul.f32 %v959_v4, %v10219_v11  ;;  %v1063_v4 = vadd.f32 %v1031_v25, %v999_v16  ;;  %v1067_v11 = vadd.f32 %v1035_v52, %v1003_v29  ;;  %v7469_v25 = vrot.slane %v7374_v39, %v5898_v9  ;;  %v10226_v52 = vld [vmem:[#allocation46_spill] sm:$0xff]  ;;  %v10235_v16 = vld [vmem:[#allocation64_spill] sm:$0xff]  ;;  %v10242_v18 = vld [vmem:[#allocation117_spill] sm:$0xff] }
 0x2c2   : > { %v1039_v49 = vadd.f32 %v1007_v10, %v975_v63  ;;  %1075 = vst.msk [vmem:[#allocation2 + $0x20] sm:$0xff] %vm520_vm0, %v1043_v23  ;;  %v10227_v8 = vrot.slane %v10226_v52, 7  ;;  %v3649_v29 = vpack.c.bf16 %v7450_v46, %v7283_v34  ;;  %v7497_v30 = vrot.slane %v10233_v3, %v5898_v9  ;;  %v10237_v23 = vld [vmem:[#allocation54_spill] sm:$0xff]  ;;  %v10247_v12 = vld [vmem:[#allocation165_spill] sm:$0xff] }
 0x2c3   : > { %v1055_v57 = vadd.f32 %v1023_v56, %v991_v5  ;;  %v7465_v56 = vrot.slane %v7331_v59, %v5898_v9  ;;  %10225 = vst [vmem:[#allocation133_spill] sm:$0xff] %v7469_v25  ;;  %1095 = vst.msk [vmem:[#allocation2 + $0xc0] sm:$0xff] %vm520_vm0, %v1063_v4  ;;  %v10238_v31 = vrot.slane %v10237_v23, 7  ;;  %v960_v39 = vmul.f32 %v10211_v47, %v927_v54  ;;  %v992_v52 = vld [vmem:[#allocation2 + $0x88] sm:$0xff]  ;;  %v10245_v23 = vld [vmem:[#allocation160_spill] sm:$0xff]  ;;  %v7602_v25 = vpop.permute.xlu0 %1683 }
 0x2c4   : > { %1071 = vst.msk [vmem:[#allocation2] sm:$0xff] %vm520_vm0, %v1039_v49  ;;  %v10228_v49 = vld [vmem:[#allocation44_spill] sm:$0xff]  ;;  %1099 = vst.msk [vmem:[#allocation2 + $0xe0] sm:$0xff] %vm520_vm0, %v1067_v11  ;;  %v10236_v11 = vrot.slane %v10235_v16, 7  ;;  %v964_v19 = vmul.f32 %v10212_v38, %v927_v54  ;;  %v7519_v5 = vmul.f32 %v7438_v32, %v10242_v18  ;;  %4697 = vmatmul.mubr.msk.bf16.vlgmr.msra.gmra.mrb[28].mxu1 %vm3345_vm1, %v3649_v29  ;;  %v10244_v3 = vld [vmem:[#allocation158_spill] sm:$0xff] }
 0x2c5   : > { %1087 = vst.msk [vmem:[#allocation2 + $0x80] sm:$0xff] %vm520_vm0, %v1055_v57  ;;  %10224 = vst [vmem:[#allocation94_spill] sm:$0xff] %v7465_v56  ;;  %v10229_v20 = vrot.slane %v10228_v49, 7  ;;  %v10231_v57 = vcombine.high %v7331_v59, %v7331_v59  ;;  %v10241_v59 = vld [vmem:[#allocation116_spill] sm:$0xff]  ;;  %v972_v4 = vmul.f32 %v10215_v51, %v927_v54  ;;  %v988_v49 = vld [vmem:[#allocation2 + $0x68] sm:$0xff]  ;;  %v1024_v41 = vmul.f32 %v960_v39, %v10246_v62 }
 0x2c6   : > { %10234 = vst [vmem:[#allocation125_spill] sm:$0xff] %v7497_v30  ;;  %v7505_v34 = vsel %vm1409_vm5, %v10238_v31, %v10236_v11  ;;  %v7513_v63 = vmul.f32 %v7434_v17, %v10241_v59  ;;  %v1008_v11 = vmul.f32 %v960_v39, %v10244_v3  ;;  %v1012_v31 = vmul.f32 %v964_v19, %v10245_v23  ;;  %v10248_v59 = vld [vmem:[#allocation162_spill] sm:$0xff]  ;;  %v10251_v16 = vld [vmem:[#allocation168_spill] sm:$0xff]  ;;  %v10252_v39 = vld [vmem:[#allocation119_spill] sm:$0xff] }
 0x2c7   : > { %v7477_v53 = vsel %vm1409_vm5, %v10229_v20, %v10227_v8  ;;  %v7491_v10 = vrot.slane %v10231_v57, %v5898_v9  ;;  %10239 = vst [vmem:[#allocation145_spill] sm:$0xff] %v7505_v34  ;;  %v996_v8 = vld [vmem:[#allocation2 + $0xa8] sm:$0xff]  ;;  %v1028_v18 = vmul.f32 %v964_v19, %v10247_v12  ;;  %v1016_v29 = vmul.f32 %v968_v33, %v10248_v59  ;;  %v10253_v12 = vld [vmem:[#allocation157_spill] sm:$0xff] }
 0x2c8   : > { %10230 = vst [vmem:[#allocation134_spill] sm:$0xff] %v7477_v53  ;;  %v1000_v20 = vld [vmem:[#allocation2 + $0xc8] sm:$0xff]  ;;  %v1020_v61 = vmul.f32 %v972_v4, %v10249_v48  ;;  %v1032_v54 = vmul.f32 %v968_v33, %v10250_v2  ;;  %v1036_v9 = vmul.f32 %v972_v4, %v10251_v16  ;;  %v1040_v34 = vadd.f32 %v1008_v11, %v976_v58  ;;  %v10259_v33 = vld [vmem:[#allocation121_spill] sm:$0xff] }
 0x2c9   : > { %10232 = vst [vmem:[#allocation92_spill] sm:$0xff] %v7491_v10  ;;  %v1004_v57 = vld [vmem:[#allocation2 + $0xe8] sm:$0xff]  ;;  %v1044_v53 = vadd.f32 %v1012_v31, %v980_v21  ;;  %v1056_v44 = vadd.f32 %v1024_v41, %v992_v52  ;;  %v1060_v26 = vadd.f32 %v1028_v18, %v996_v8  ;;  %v1048_v60 = vadd.f32 %v1016_v29, %v984_v1  ;;  %v10254_v41 = vld [vmem:[#allocation161_spill] sm:$0xff]  ;;  %v10258_v21 = vld [vmem:[#allocation120_spill] sm:$0xff] }
 0x2ca   : > { %v1052_v3 = vadd.f32 %v1020_v61, %v988_v49  ;;  %v1064_v0 = vadd.f32 %v1032_v54, %v1000_v20  ;;  %v1068_v23 = vadd.f32 %v1036_v9, %v1004_v57  ;;  %v1298_v19 = vmul.f32 %v7425_v28, %v10252_v39  ;;  %1072 = vst.msk [vmem:[#allocation2 + $0x8] sm:$0xff] %vm520_vm0, %v1040_v34  ;;  %v10256_v61 = vld [vmem:[#allocation166_spill] sm:$0xff]  ;;  %v932_v28 = vpop.permute.xlu1 %931  ;;  %v981_v8 = vld [vmem:[#allocation2 + $0x30] sm:$0xff]  ;;  %v10265_v11 = vld [vmem:[#allocation149_spill] sm:$0xff] }
 0x2cb   : > { %v7542_v62 = vmul.f32 %v10253_v12, %v7483_v50  ;;  %1076 = vst.msk [vmem:[#allocation2 + $0x28] sm:$0xff] %vm520_vm0, %v1044_v53  ;;  %1088 = vst.msk [vmem:[#allocation2 + $0x88] sm:$0xff] %vm520_vm0, %v1056_v44  ;;  %v7550_v9 = vmul.f32 %v10254_v41, %v7536_v24  ;;  %v7554_v58 = vmul.f32 %v10256_v61, %v7536_v24  ;;  %v10260_v53 = vld [vmem:[#allocation122_spill] sm:$0xff]  ;;  %v993_v49 = vld [vmem:[#allocation2 + $0x90] sm:$0xff] }
 0x2cc   : > { %1092 = vst.msk [vmem:[#allocation2 + $0xa8] sm:$0xff] %vm520_vm0, %v1060_v26  ;;  %v1302_v18 = vmul.f32 %v7434_v17, %v10258_v21  ;;  %v7560_v34 = vmul.f32 %v7438_v32, %v10259_v33  ;;  %1080 = vst.msk [vmem:[#allocation2 + $0x48] sm:$0xff] %vm520_vm0, %v1048_v60  ;;  %v3622_v26 = vsel %vm3345_vm1, %v10209_v40, 0.0  ;;  %v961_v44 = vmul.f32 %v10211_v47, %v932_v28  ;;  %v10264_v20 = vld [vmem:[#allocation27_spill] sm:$0xff]  ;;  %v10268_v39 = vld [vmem:[#allocation26_spill] sm:$0xff] }
 0x2cd   : > { %10255 = vst [vmem:[#allocation146_spill] sm:$0xff] %v7550_v9  ;;  %10257 = vst [vmem:[#allocation147_spill] sm:$0xff] %v7554_v58  ;;  %v1310_v17 = vmul.f32 %v7442_v7, %v10260_v53  ;;  %v7573_v32 = vmul.f32 %v10210_v36, %v7399_v43  ;;  %v7577_v60 = vmul.f32 %v10214_v55, %v7399_v43  ;;  %3623 = vadd.xlane.f32.xlu0 %v3622_v26  ;;  %v977_v7 = vld [vmem:[#allocation2 + $0x10] sm:$0xff]  ;;  %v10269_v2 = vld [vmem:[#allocation170_spill] sm:$0xff] }
 0x2ce   : > { %1084 = vst.msk [vmem:[#allocation2 + $0x68] sm:$0xff] %vm520_vm0, %v1052_v3  ;;  %1096 = vst.msk [vmem:[#allocation2 + $0xc8] sm:$0xff] %vm520_vm0, %v1064_v0  ;;  %v10263_v0 = vld [vmem:[#allocation159_spill] sm:$0xff]  ;;  %v965_v40 = vmul.f32 %v10212_v38, %v932_v28  ;;  %v969_v1 = vmul.f32 %v10213_v35, %v932_v28  ;;  %v973_v52 = vmul.f32 %v10215_v51, %v932_v28  ;;  %v10270_v59 = vld [vmem:[#allocation30_spill] sm:$0xff] }
 0x2cf   : > { %1100 = vst.msk [vmem:[#allocation2 + $0xe8] sm:$0xff] %vm520_vm0, %v1068_v23  ;;  %10261 = vst [vmem:[#allocation132_spill] sm:$0xff] %v7573_v32  ;;  %v7581_v4 = vmul.f32 %v10263_v0, %v7483_v50  ;;  %v1009_v57 = vmul.f32 %v961_v44, %v10264_v20  ;;  %v1516_v43 = vmul.f32 %v10254_v41, %v7483_v50  ;;  %v985_v31 = vld [vmem:[#allocation2 + $0x50] sm:$0xff] }
 0x2d0   : > { %10262 = vst [vmem:[#allocation148_spill] sm:$0xff] %v7577_v60  ;;  %v1520_v3 = vmul.f32 %v10256_v61, %v7483_v50  ;;  %v7593_v23 = vmul.f32 %v7542_v62, %v10265_v11  ;;  %v989_v29 = vld [vmem:[#allocation2 + $0x70] sm:$0xff]  ;;  %v1017_v16 = vmul.f32 %v969_v1, %v10268_v39  ;;  %v1021_v48 = vmul.f32 %v973_v52, %v10269_v2  ;;  %v10271_v50 = vld [vmem:[#allocation172_spill] sm:$0xff] }
 0x2d1   : > { %v997_v54 = vld [vmem:[#allocation2 + $0xb0] sm:$0xff]  ;;  %v1029_v58 = vmul.f32 %v965_v40, %v10270_v59  ;;  %v1033_v20 = vmul.f32 %v969_v1, %v10271_v50  ;;  %v1037_v11 = vmul.f32 %v973_v52, %v10272_v45  ;;  %v1041_v30 = vadd.f32 %v1009_v57, %v977_v7  ;;  %v1250_v56 = vld [vmem:[#allocation2 + $0x8] sm:$0xff] }
 0x2d2   : > { %v10266_v26 = vld [vmem:[#allocation171_spill] sm:$0xff]  ;;  %v1053_v13 = vadd.f32 %v1021_v48, %v989_v29  ;;  %v994_v29 = vld [vmem:[#allocation2 + $0x98] sm:$0xff] }
 0x2d3   : > { %v1025_v28 = vmul.f32 %v961_v44, %v10266_v26  ;;  %v1001_v53 = vld [vmem:[#allocation2 + $0xd0] sm:$0xff]  ;;  %v1254_v44 = vld [vmem:[#allocation2 + $0x28] sm:$0xff]  ;;  %v1061_v39 = vadd.f32 %v1029_v58, %v997_v54  ;;  %1073 = vst.msk [vmem:[#allocation2 + $0x10] sm:$0xff] %vm520_vm0, %v1041_v30 }
 0x2d4   : > { %v10267_v33 = vld [vmem:[#allocation31_spill] sm:$0xff]  ;;  %v1266_v26 = vld [vmem:[#allocation2 + $0x88] sm:$0xff]  ;;  %v1318_v1 = vadd.f32 %v7513_v63, %v1254_v44  ;;  %v1065_v52 = vadd.f32 %v1033_v20, %v1001_v53  ;;  %1085 = vst.msk [vmem:[#allocation2 + $0x70] sm:$0xff] %vm520_vm0, %v1053_v13  ;;  %v10275_v13 = vld [vmem:[#allocation152_spill] sm:$0xff] }
 0x2d5   : > { %v1013_v21 = vmul.f32 %v965_v40, %v10267_v33  ;;  %v1005_v9 = vld [vmem:[#allocation2 + $0xf0] sm:$0xff]  ;;  %v1057_v10 = vadd.f32 %v1025_v28, %v993_v49  ;;  %v1049_v33 = vadd.f32 %v1017_v16, %v985_v31  ;;  %v1258_v61 = vld [vmem:[#allocation2 + $0x48] sm:$0xff]  ;;  %v1314_v40 = vadd.f32 %v7509_v15, %v1250_v56  ;;  %1093 = vst.msk [vmem:[#allocation2 + $0xb0] sm:$0xff] %vm520_vm0, %v1061_v39  ;;  %v937_v56 = vpop.permute.xlu1 %936  ;;  %v982_v31 = vld [vmem:[#allocation2 + $0x38] sm:$0xff] }
 0x2d6   : > { %v1262_v2 = vld [vmem:[#allocation2 + $0x68] sm:$0xff]  ;;  %v1330_v50 = vadd.f32 %v1298_v19, %v1266_v26  ;;  %v1069_v58 = vadd.f32 %v1037_v11, %v1005_v9  ;;  %v10274_v15 = vld [vmem:[#allocation151_spill] sm:$0xff]  ;;  %1350 = vst.msk [vmem:[#allocation2 + $0x28] sm:$0xff] %vm520_vm0, %v1318_v1  ;;  %1097 = vst.msk [vmem:[#allocation2 + $0xd0] sm:$0xff] %vm520_vm0, %v1065_v52  ;;  %v962_v53 = vmul.f32 %v10211_v47, %v937_v56 }
 0x2d7   : > { %v1045_v42 = vadd.f32 %v1013_v21, %v981_v8  ;;  %v1270_v41 = vld [vmem:[#allocation2 + $0xa8] sm:$0xff]  ;;  %1089 = vst.msk [vmem:[#allocation2 + $0x90] sm:$0xff] %vm520_vm0, %v1057_v10  ;;  %v1322_v21 = vadd.f32 %v7519_v5, %v1258_v61  ;;  %v1326_v16 = vadd.f32 %v7523_v27, %v1262_v2  ;;  %1081 = vst.msk [vmem:[#allocation2 + $0x50] sm:$0xff] %vm520_vm0, %v1049_v33  ;;  %v10276_v27 = vld [vmem:[#allocation153_spill] sm:$0xff] }
 0x2d8   : > { %v1274_v7 = vld [vmem:[#allocation2 + $0xc8] sm:$0xff]  ;;  %v1334_v48 = vadd.f32 %v1302_v18, %v1270_v41  ;;  %v7617_v63 = vmul.f32 %v1516_v43, %v10274_v15  ;;  %1346 = vst.msk [vmem:[#allocation2 + $0x8] sm:$0xff] %vm520_vm0, %v1314_v40  ;;  %1362 = vst.msk [vmem:[#allocation2 + $0x88] sm:$0xff] %vm520_vm0, %v1330_v50  ;;  %v1572_v39 = vmul.f32 %v7542_v62, %v10276_v27  ;;  %v10278_v9 = vld [vmem:[#allocation155_spill] sm:$0xff] }
 0x2d9   : > { %v1278_v49 = vld [vmem:[#allocation2 + $0xe8] sm:$0xff]  ;;  %1077 = vst.msk [vmem:[#allocation2 + $0x30] sm:$0xff] %vm520_vm0, %v1045_v42  ;;  %v1338_v5 = vadd.f32 %v7560_v34, %v1274_v7  ;;  %v1568_v42 = vmul.f32 %v1520_v3, %v10275_v13  ;;  %v7630_v61 = vmul.f32 %v1516_v43, %v10278_v9  ;;  %1354 = vst.msk [vmem:[#allocation2 + $0x48] sm:$0xff] %vm520_vm0, %v1322_v21  ;;  %v10279_v18 = vld [vmem:[#allocation156_spill] sm:$0xff] }
 0x2da   : > { %v10273_v30 = vld [vmem:[#allocation150_spill] sm:$0xff]  ;;  %v1342_v2 = vadd.f32 %v1310_v17, %v1278_v49  ;;  %1358 = vst.msk [vmem:[#allocation2 + $0x68] sm:$0xff] %vm520_vm0, %v1326_v16  ;;  %1366 = vst.msk [vmem:[#allocation2 + $0xa8] sm:$0xff] %vm520_vm0, %v1334_v48  ;;  %v1584_v33 = vmul.f32 %v1520_v3, %v10279_v18  ;;  %v7641_v62 = vmul.f32 %v10253_v12, %v7536_v24  ;;  %v7648_v17 = vpop.permute.xlu0 %1693  ;;  %v978_v3 = vld [vmem:[#allocation2 + $0x18] sm:$0xff] }
 0x2db   : > { %v1560_v10 = vmul.f32 %v7581_v4, %v10273_v30  ;;  %v10277_v19 = vld [vmem:[#allocation154_spill] sm:$0xff]  ;;  %1101 = vst.msk [vmem:[#allocation2 + $0xf0] sm:$0xff] %vm520_vm0, %v1069_v58  ;;  %1370 = vst.msk [vmem:[#allocation2 + $0xc8] sm:$0xff] %vm520_vm0, %v1338_v5  ;;  %v7645_v34 = vmul.f32 %v10263_v0, %v7536_v24  ;;  %v966_v20 = vmul.f32 %v10212_v38, %v937_v56  ;;  %v10283_v24 = vld [vmem:[#allocation37_spill] sm:$0xff] }
 0x2dc   : > { %v1576_v41 = vmul.f32 %v7581_v4, %v10277_v19  ;;  %1374 = vst.msk [vmem:[#allocation2 + $0xe8] sm:$0xff] %vm520_vm0, %v1342_v2  ;;  %10280 = vst [vmem:[#allocation46_spill] sm:$0xff] %v7641_v62  ;;  %v10282_v4 = vld [vmem:[#allocation33_spill] sm:$0xff]  ;;  %v970_v57 = vmul.f32 %v10213_v35, %v937_v56  ;;  %v974_v43 = vmul.f32 %v10215_v51, %v937_v56  ;;  %v986_v47 = vld [vmem:[#allocation2 + $0x58] sm:$0xff]  ;;  %v1196_v19 = vpop.permute.xlu1 %1195 }
 0x2dd   : > { %10281 = vst [vmem:[#allocation44_spill] sm:$0xff] %v7645_v34  ;;  %v7652_v8 = vmul.f32 %v10282_v4, %v7602_v25  ;;  %v7659_v54 = vmul.f32 %v10283_v24, %v7602_v25  ;;  %v990_v26 = vld [vmem:[#allocation2 + $0x78] sm:$0xff]  ;;  %v10288_v51 = vld [vmem:[#allocation174_spill] sm:$0xff]  ;;  %v10290_v21 = vld [vmem:[#allocation175_spill] sm:$0xff] }
 0x2de   : > { %v998_v28 = vld [vmem:[#allocation2 + $0xb8] sm:$0xff]  ;;  %v1014_v52 = vmul.f32 %v966_v20, %v10288_v51  ;;  %v1022_v16 = vmul.f32 %v974_v43, %v10290_v21  ;;  %v10291_v48 = vld [vmem:[#allocation57_spill] sm:$0xff]  ;;  %v10292_v30 = vld [vmem:[#allocation71_spill] sm:$0xff] }
 0x2df   : > { %v10284_v50 = vld [vmem:[#allocation28_spill] sm:$0xff]  ;;  %v1030_v58 = vmul.f32 %v966_v20, %v10291_v48  ;;  %v1034_v15 = vmul.f32 %v970_v57, %v10292_v30  ;;  %v10293_v5 = vld [vmem:[#allocation61_spill] sm:$0xff]  ;;  %v1524_v9 = vld [vmem:[#allocation2 + $0x8] sm:$0xff] }
 0x2e0   : > { %v1010_v11 = vmul.f32 %v962_v53, %v10284_v50  ;;  %v10285_v44 = vld [vmem:[#allocation176_spill] sm:$0xff]  ;;  %v1038_v2 = vmul.f32 %v974_v43, %v10293_v5  ;;  %v1528_v18 = vld [vmem:[#allocation2 + $0x28] sm:$0xff]  ;;  %v1054_v51 = vadd.f32 %v1022_v16, %v990_v26  ;;  %v1588_v20 = vadd.f32 %v7593_v23, %v1524_v9  ;;  %v7676_v43 = vpop.permute.xlu0 %1957 }
 0x2e1   : > { %v1026_v40 = vmul.f32 %v962_v53, %v10285_v44  ;;  %v10286_v38 = vld [vmem:[#allocation72_spill] sm:$0xff]  ;;  %v1540_v53 = vld [vmem:[#allocation2 + $0x88] sm:$0xff]  ;;  %v1062_v50 = vadd.f32 %v1030_v58, %v998_v28  ;;  %v1592_v48 = vadd.f32 %v1560_v10, %v1528_v18  ;;  %v7739_v9 = vmul.f32 %v10205_v6, %v1196_v19 }
 0x2e2   : > { %v7665_v1 = vmul.f32 %v10286_v38, %v7648_v17  ;;  %v1002_v35 = vld [vmem:[#allocation2 + $0xd8] sm:$0xff]  ;;  %v1042_v13 = vadd.f32 %v1010_v11, %v978_v3  ;;  %v1536_v45 = vld [vmem:[#allocation2 + $0x68] sm:$0xff]  ;;  %v1604_v59 = vadd.f32 %v1572_v39, %v1540_v53  ;;  %1086 = vst.msk [vmem:[#allocation2 + $0x78] sm:$0xff] %vm520_vm0, %v1054_v51  ;;  %1620 = vst.msk [vmem:[#allocation2 + $0x8] sm:$0xff] %vm520_vm0, %v1588_v20 }
 0x2e3   : > { %v10289_v7 = vld [vmem:[#allocation32_spill] sm:$0xff]  ;;  %v1058_v27 = vadd.f32 %v1026_v40, %v994_v29  ;;  %v1544_v21 = vld [vmem:[#allocation2 + $0xa8] sm:$0xff]  ;;  %1094 = vst.msk [vmem:[#allocation2 + $0xb8] sm:$0xff] %vm520_vm0, %v1062_v50  ;;  %1624 = vst.msk [vmem:[#allocation2 + $0x28] sm:$0xff] %vm520_vm0, %v1592_v48  ;;  %v7742_v18 = vmul.f32 %v10207_v14, %v1196_v19 }
 0x2e4   : > { %10287 = vst [vmem:[#allocation54_spill] sm:$0xff] %v7665_v1  ;;  %v1018_v49 = vmul.f32 %v970_v57, %v10289_v7  ;;  %v1006_v56 = vld [vmem:[#allocation2 + $0xf8] sm:$0xff]  ;;  %v1046_v1 = vadd.f32 %v1014_v52, %v982_v31  ;;  %v1532_v7 = vld [vmem:[#allocation2 + $0x48] sm:$0xff]  ;;  %v1066_v57 = vadd.f32 %v1034_v15, %v1002_v35  ;;  %1074 = vst.msk [vmem:[#allocation2 + $0x18] sm:$0xff] %vm520_vm0, %v1042_v13  ;;  %v1206_v15 = vpop.permute.xlu1 %1205 }
 0x2e5   : > { %1090 = vst.msk [vmem:[#allocation2 + $0x98] sm:$0xff] %vm520_vm0, %v1058_v27  ;;  %v1548_v3 = vld [vmem:[#allocation2 + $0xc8] sm:$0xff]  ;;  %v1596_v31 = vadd.f32 %v7617_v63, %v1532_v7  ;;  %v1608_v26 = vadd.f32 %v1576_v41, %v1544_v21  ;;  %v1070_v28 = vadd.f32 %v1038_v2, %v1006_v56  ;;  %1636 = vst.msk [vmem:[#allocation2 + $0x88] sm:$0xff] %vm520_vm0, %v1604_v59  ;;  %v10294_v63 = vld [vmem:[#allocation35_spill] sm:$0xff] }
 0x2e6   : > { %v1050_v44 = vadd.f32 %v1018_v49, %v986_v47  ;;  %v1552_v29 = vld [vmem:[#allocation2 + $0xe8] sm:$0xff]  ;;  %v1600_v47 = vadd.f32 %v1568_v42, %v1536_v45  ;;  %1078 = vst.msk [vmem:[#allocation2 + $0x38] sm:$0xff] %vm520_vm0, %v1046_v1  ;;  %v1612_v23 = vadd.f32 %v7630_v61, %v1548_v3  ;;  %v1725_v45 = vmul.f32 %v10286_v38, %v7602_v25  ;;  %v10296_v39 = vld [vmem:[#allocation135_spill] sm:$0xff]  ;;  %v10297_v61 = vld [vmem:[#allocation65_spill] sm:$0xff] }
 0x2e7   : > { %v1616_v10 = vadd.f32 %v1584_v33, %v1552_v29  ;;  %1098 = vst.msk [vmem:[#allocation2 + $0xd8] sm:$0xff] %vm520_vm0, %v1066_v57  ;;  %v7692_v42 = vmul.f32 %v10294_v63, %v7648_v17  ;;  %v1284_v41 = vmul.f32 %v7573_v32, %v10296_v39  ;;  %1628 = vst.msk [vmem:[#allocation2 + $0x48] sm:$0xff] %vm520_vm0, %v1596_v31  ;;  %v10298_v33 = vrot.slane %v10297_v61, 7  ;;  %v10299_v50 = vld [vmem:[#allocation60_spill] sm:$0xff]  ;;  %v10303_v35 = vld [vmem:[#allocation67_spill] sm:$0xff] }
 0x2e8   : > { %1082 = vst.msk [vmem:[#allocation2 + $0x58] sm:$0xff] %vm520_vm0, %v1050_v44  ;;  %1632 = vst.msk [vmem:[#allocation2 + $0x68] sm:$0xff] %vm520_vm0, %v1600_v47  ;;  %v1729_v59 = vmul.f32 %v10294_v63, %v7602_v25  ;;  %v10300_v11 = vrot.slane %v10299_v50, 7  ;;  %v10301_v40 = vld [vmem:[#allocation68_spill] sm:$0xff]  ;;  %v10304_v51 = vrot.slane %v10303_v35, 7  ;;  %v474_v25 = vld [vmem:[#allocation12 + $0x118] sm:$0xff]  ;;  %v7731_v56 = vmul.f32 %v10210_v36, %v1196_v19 }
 0x2e9   : > { %10295 = vst [vmem:[#allocation157_spill] sm:$0xff] %v7692_v42  ;;  %1640 = vst.msk [vmem:[#allocation2 + $0xa8] sm:$0xff] %vm520_vm0, %v1608_v26  ;;  %v10302_v1 = vrot.slane %v10301_v40, 7  ;;  %v10305_v7 = vld [vmem:[#allocation136_spill] sm:$0xff]  ;;  %v10306_v21 = vld [vmem:[#allocation29_spill] sm:$0xff]  ;;  %v7736_v27 = vmul.f32 %v10214_v55, %v1196_v19  ;;  %2594 = vperm.xlu0 %4811, %v474_v25   ;;  %v1235_v35 = vmul.f32 %v10210_v36, %v1206_v15  ;;  %v7777_v42 = vpop.permute.xlu1 %1469 }
 0x2ea   : > { %1102 = vst.msk [vmem:[#allocation2 + $0xf8] sm:$0xff] %vm520_vm0, %v1070_v28  ;;  %v7708_v44 = vsel %vm1409_vm5, %v10300_v11, %v10298_v33  ;;  %v1288_v49 = vmul.f32 %v7577_v60, %v10305_v7  ;;  %v7722_v16 = vmul.f32 %v7641_v62, %v10306_v21  ;;  %v10307_v48 = vld [vmem:[#allocation169_spill] sm:$0xff]  ;;  %1644 = vst.msk [vmem:[#allocation2 + $0xc8] sm:$0xff] %vm520_vm0, %v1612_v23  ;;  %v4957_v2 = vld [vmem:[%s5586_s16 + $0x8] sm:$0xff]  ;;  %v7751_v28 = vpop.permute.xlu0 %1967 }
 0x2eb   : > { %v7716_v52 = vsel %vm1409_vm5, %v10304_v51, %v10302_v1  ;;  %v7726_v58 = vmul.f32 %v7645_v34, %v10307_v48  ;;  %1648 = vst.msk [vmem:[#allocation2 + $0xe8] sm:$0xff] %vm520_vm0, %v1616_v10  ;;  %10308 = vst [vmem:[#allocation159_spill] sm:$0xff] %v7731_v56  ;;  %v1765_v13 = vmul.f32 %v4957_v2, %v7652_v8  ;;  %v4958_v53 = vld [vmem:[%s5586_s16 + $0x28] sm:$0xff]  ;;  %v1252_v1 = vld [vmem:[#allocation2 + $0x18] sm:$0xff] }
 0x2ec   : > { %10309 = vst [vmem:[#allocation149_spill] sm:$0xff] %v7736_v27  ;;  %10310 = vst [vmem:[#allocation150_spill] sm:$0xff] %v7739_v9  ;;  %v1769_v20 = vmul.f32 %v4958_v53, %v7659_v54  ;;  %v4959_v57 = vld [vmem:[%s5586_s16 + $0x48] sm:$0xff]  ;;  %v1316_v21 = vadd.f32 %v1284_v41, %v1252_v1  ;;  %v10313_v48 = vld [vmem:[#allocation40_spill] sm:$0xff]  ;;  %v1243_v2 = vmul.f32 %v10205_v6, %v1206_v15 }
 0x2ed   : > { %10311 = vst [vmem:[#allocation151_spill] sm:$0xff] %v7742_v18  ;;  %v1773_v3 = vmul.f32 %v4959_v57, %v1725_v45  ;;  %v4960_v29 = vld [vmem:[%s5586_s16 + $0x88] sm:$0xff]  ;;  %10312 = vst [vmem:[#allocation152_spill] sm:$0xff] %v7751_v28  ;;  %v1256_v51 = vld [vmem:[#allocation2 + $0x38] sm:$0xff]  ;;  %v7773_v41 = vmul.f32 %v7311_v22, %v7676_v43 }
 0x2ee   : > { %v1781_v31 = vmul.f32 %v4960_v29, %v7652_v8  ;;  %v4961_v47 = vld [vmem:[%s5586_s16 + $0xa8] sm:$0xff]  ;;  %v7759_v8 = vmul.f32 %v10313_v48, %v7676_v43  ;;  %v1320_v29 = vadd.f32 %v1288_v49, %v1256_v51  ;;  %v10315_v36 = vld [vmem:[#allocation48_spill] sm:$0xff]  ;;  %1348 = vst.msk [vmem:[#allocation2 + $0x18] sm:$0xff] %vm520_vm0, %v1316_v21  ;;  %v1247_v51 = vmul.f32 %v10207_v14, %v1206_v15  ;;  %v1267_v39 = vld [vmem:[#allocation2 + $0x90] sm:$0xff] }
 0x2ef   : > { %v1785_v26 = vmul.f32 %v4961_v47, %v7659_v54  ;;  %v4962_v23 = vld [vmem:[%s5586_s16 + $0x68] sm:$0xff]  ;;  %v1239_v54 = vmul.f32 %v10214_v55, %v1206_v15  ;;  %v7769_v47 = vmul.f32 %v10315_v36, %v7676_v43  ;;  %v1255_v55 = vld [vmem:[#allocation2 + $0x30] sm:$0xff]  ;;  %v10316_v9 = vld [vmem:[#allocation73_spill] sm:$0xff] }
 0x2f0   : > { %v1777_v10 = vmul.f32 %v4962_v23, %v1729_v59  ;;  %v4963_v33 = vld [vmem:[%s5586_s16 + $0xc8] sm:$0xff]  ;;  %v1251_v23 = vld [vmem:[#allocation2 + $0x10] sm:$0xff]  ;;  %1352 = vst.msk [vmem:[#allocation2 + $0x38] sm:$0xff] %vm520_vm0, %v1320_v29  ;;  %v1283_v27 = vmul.f32 %v1235_v35, %v10316_v9  ;;  %v10322_v29 = vld [vmem:[#allocation177_spill] sm:$0xff] }
 0x2f1   : > { %v1789_v50 = vmul.f32 %v4963_v33, %v1725_v45  ;;  %v4964_v19 = vld [vmem:[%s5586_s16 + $0xe8] sm:$0xff]  ;;  %v1259_v18 = vld [vmem:[#allocation2 + $0x50] sm:$0xff]  ;;  %v10374_v61 = vld [vmem:[#allocation145_spill] sm:$0xff] }
 0x2f2   : > { %v1793_v11 = vmul.f32 %v4964_v19, %v1729_v59  ;;  %v1733_v25 = vld [vmem:[#allocation2 + $0x8] sm:$0xff]  ;;  %v1263_v14 = vld [vmem:[#allocation2 + $0x70] sm:$0xff] }
 0x2f3   : > { %v1737_v53 = vld [vmem:[#allocation2 + $0x28] sm:$0xff]  ;;  %v1797_v1 = vadd.f32 %v1765_v13, %v1733_v25  ;;  %v1271_v15 = vld [vmem:[#allocation2 + $0xb0] sm:$0xff]  ;;  %v7786_v25 = vpop.permute.xlu0 %2166 }
 0x2f4   : > { %v1749_v57 = vld [vmem:[#allocation2 + $0x88] sm:$0xff]  ;;  %v1801_v7 = vadd.f32 %v1769_v20, %v1737_v53  ;;  %v10317_v21 = vld [vmem:[#allocation39_spill] sm:$0xff]  ;;  %v10321_v53 = vld [vmem:[#allocation36_spill] sm:$0xff] }
 0x2f5   : > { %v10314_v45 = vld [vmem:[#allocation74_spill] sm:$0xff]  ;;  %v1813_v49 = vadd.f32 %v1781_v31, %v1749_v57  ;;  %1829 = vst.msk [vmem:[#allocation2 + $0x8] sm:$0xff] %vm520_vm0, %v1797_v1  ;;  %v1275_v31 = vld [vmem:[#allocation2 + $0xd0] sm:$0xff]  ;;  %v1303_v57 = vmul.f32 %v1239_v54, %v10321_v53 }
 0x2f6   : > { %v7765_v59 = vmul.f32 %v10314_v45, %v7676_v43  ;;  %v1741_v33 = vld [vmem:[#allocation2 + $0x48] sm:$0xff]  ;;  %1833 = vst.msk [vmem:[#allocation2 + $0x28] sm:$0xff] %vm520_vm0, %v1801_v7 }
 0x2f7   : > { %v1745_v6 = vld [vmem:[#allocation2 + $0x68] sm:$0xff]  ;;  %v1805_v34 = vadd.f32 %v1773_v3, %v1741_v33  ;;  %1845 = vst.msk [vmem:[#allocation2 + $0x88] sm:$0xff] %vm520_vm0, %v1813_v49  ;;  %v1287_v3 = vmul.f32 %v1239_v54, %v10317_v21  ;;  %v1307_v33 = vmul.f32 %v1243_v2, %v10322_v29  ;;  %v1335_v56 = vadd.f32 %v1303_v57, %v1271_v15 }
 0x2f8   : > { %v1753_v19 = vld [vmem:[#allocation2 + $0xa8] sm:$0xff]  ;;  %v1809_v43 = vadd.f32 %v1777_v10, %v1745_v6  ;;  %v10318_v10 = vld [vmem:[#allocation75_spill] sm:$0xff]  ;;  %v7804_v54 = vmul.f32 %v10283_v24, %v7648_v17 }
 0x2f9   : > { %v1757_v60 = vld [vmem:[#allocation2 + $0xc8] sm:$0xff]  ;;  %v1817_v62 = vadd.f32 %v1785_v26, %v1753_v19  ;;  %v1291_v26 = vmul.f32 %v1243_v2, %v10318_v10  ;;  %1837 = vst.msk [vmem:[#allocation2 + $0x48] sm:$0xff] %vm520_vm0, %v1805_v34  ;;  %v1315_v34 = vadd.f32 %v1283_v27, %v1251_v23  ;;  %v1319_v1 = vadd.f32 %v1287_v3, %v1255_v55  ;;  %v7813_v27 = vpop.permute.xlu1 %1479  ;;  %v10327_v23 = vld [vmem:[#allocation52_spill] sm:$0xff] }
 0x2fa   : > { %v1761_v32 = vld [vmem:[#allocation2 + $0xe8] sm:$0xff]  ;;  %v1821_v13 = vadd.f32 %v1789_v50, %v1757_v60  ;;  %1841 = vst.msk [vmem:[#allocation2 + $0x68] sm:$0xff] %vm520_vm0, %v1809_v43  ;;  %v1339_v10 = vadd.f32 %v1307_v33, %v1275_v31  ;;  %10325 = vst [vmem:[#allocation154_spill] sm:$0xff] %v7804_v54  ;;  %v2039_v55 = vmul.f32 %v7759_v8, %v10327_v23 }
 0x2fb   : > { %v1825_v20 = vadd.f32 %v1793_v11, %v1761_v32  ;;  %1849 = vst.msk [vmem:[#allocation2 + $0xa8] sm:$0xff] %vm520_vm0, %v1817_v62  ;;  %v1279_v32 = vld [vmem:[#allocation2 + $0xf0] sm:$0xff]  ;;  %v10319_v60 = vld [vmem:[#allocation34_spill] sm:$0xff]  ;;  %v1323_v49 = vadd.f32 %v1291_v26, %v1259_v18  ;;  %1347 = vst.msk [vmem:[#allocation2 + $0x10] sm:$0xff] %vm520_vm0, %v1315_v34  ;;  %v7839_v26 = vpop.permute.xlu0 %2176 }
 0x2fc   : > { %v1295_v7 = vmul.f32 %v1247_v51, %v10319_v60  ;;  %v10320_v50 = vld [vmem:[#allocation38_spill] sm:$0xff]  ;;  %1853 = vst.msk [vmem:[#allocation2 + $0xc8] sm:$0xff] %vm520_vm0, %v1821_v13  ;;  %1351 = vst.msk [vmem:[#allocation2 + $0x30] sm:$0xff] %vm520_vm0, %v1319_v1  ;;  %v1526_v18 = vld [vmem:[#allocation2 + $0x18] sm:$0xff]  ;;  %v7829_v13 = vmul.f32 %v10263_v0, %v7777_v42 }
 0x2fd   : > { %v1299_v11 = vmul.f32 %v1235_v35, %v10320_v50  ;;  %1857 = vst.msk [vmem:[#allocation2 + $0xe8] sm:$0xff] %vm520_vm0, %v1825_v20  ;;  %v10323_v6 = vld [vmem:[#allocation178_spill] sm:$0xff]  ;;  %v7800_v35 = vmul.f32 %v10282_v4, %v7648_v17  ;;  %1355 = vst.msk [vmem:[#allocation2 + $0x50] sm:$0xff] %vm520_vm0, %v1323_v49  ;;  %v3631_v17 = vsel %vm3345_vm1, %v7450_v46, 0.0  ;;  %v1530_v20 = vld [vmem:[#allocation2 + $0x38] sm:$0xff] }
 0x2fe   : > { %v1311_v19 = vmul.f32 %v1247_v51, %v10323_v6  ;;  %v1327_v43 = vadd.f32 %v1295_v7, %v1263_v14  ;;  %1367 = vst.msk [vmem:[#allocation2 + $0xb0] sm:$0xff] %vm520_vm0, %v1335_v56  ;;  %1371 = vst.msk [vmem:[#allocation2 + $0xd0] sm:$0xff] %vm520_vm0, %v1339_v10  ;;  %v7825_v51 = vmul.f32 %v10253_v12, %v7777_v42  ;;  %v10330_v15 = vld [vmem:[#allocation58_spill] sm:$0xff]  ;;  %v10331_v56 = vld [vmem:[#allocation185_spill] sm:$0xff]  ;;  %3632 = vadd.xlane.f32.xlu1 %v3631_v17 }
 0x2ff   : > { %v1331_v62 = vadd.f32 %v1299_v11, %v1267_v39  ;;  %10324 = vst [vmem:[#allocation153_spill] sm:$0xff] %v7800_v35  ;;  %v7811_v39 = vmul.f32 %v10315_v36, %v7751_v28  ;;  %10329 = vst [vmem:[#allocation33_spill] sm:$0xff] %v7829_v13  ;;  %v1590_v14 = vadd.f32 %v7722_v16, %v1526_v18  ;;  %v10332_v10 = vld [vmem:[#allocation187_spill] sm:$0xff]  ;;  %v2007_v7 = vld [vmem:[#allocation2 + $0x8] sm:$0xff] }
 0x300   : > { %v1343_v2 = vadd.f32 %v1311_v19, %v1279_v32  ;;  %1359 = vst.msk [vmem:[#allocation2 + $0x70] sm:$0xff] %vm520_vm0, %v1327_v43  ;;  %10328 = vst [vmem:[#allocation156_spill] sm:$0xff] %v7825_v51  ;;  %v2043_v31 = vmul.f32 %v7765_v59, %v10330_v15  ;;  %v2047_v3 = vmul.f32 %v7769_v47, %v10331_v56  ;;  %v2011_v11 = vld [vmem:[#allocation2 + $0x28] sm:$0xff]  ;;  %v10335_v1 = vld [vmem:[#allocation188_spill] sm:$0xff] }
 0x301   : > { %10326 = vst [vmem:[#allocation155_spill] sm:$0xff] %v7811_v39  ;;  %1363 = vst.msk [vmem:[#allocation2 + $0x90] sm:$0xff] %vm520_vm0, %v1331_v62  ;;  %v2055_v46 = vmul.f32 %v7759_v8, %v10332_v10  ;;  %v1594_v32 = vadd.f32 %v7726_v58, %v1530_v20  ;;  %v2023_v57 = vld [vmem:[#allocation2 + $0x88] sm:$0xff]  ;;  %v2063_v49 = vmul.f32 %v7769_v47, %v10335_v1  ;;  %v10369_v6 = vld [vmem:[#allocation112_spill] sm:$0xff] }
 0x302   : > { %1375 = vst.msk [vmem:[#allocation2 + $0xf0] sm:$0xff] %vm520_vm0, %v1343_v2  ;;  %v10333_v16 = vld [vmem:[#allocation186_spill] sm:$0xff]  ;;  %1622 = vst.msk [vmem:[#allocation2 + $0x18] sm:$0xff] %vm520_vm0, %v1590_v14  ;;  %v10336_v2 = vld [vmem:[#allocation189_spill] sm:$0xff]  ;;  %v2071_v18 = vadd.f32 %v2039_v55, %v2007_v7  ;;  %v2075_v23 = vadd.f32 %v2043_v31, %v2011_v11  ;;  %v7871_v7 = vpop.permute.xlu1 %1678 }
 0x303   : > { %v2051_v33 = vmul.f32 %v7773_v41, %v10333_v16  ;;  %v10334_v19 = vld [vmem:[#allocation50_spill] sm:$0xff]  ;;  %v2067_v58 = vmul.f32 %v7773_v41, %v10336_v2  ;;  %v2087_v17 = vadd.f32 %v2055_v46, %v2023_v57  ;;  %1626 = vst.msk [vmem:[#allocation2 + $0x38] sm:$0xff] %vm520_vm0, %v1594_v32  ;;  %v10337_v16 = vld [vmem:[#allocation76_spill] sm:$0xff]  ;;  %v10341_v31 = vld [vmem:[#allocation161_spill] sm:$0xff] }
 0x304   : > { %v2059_v34 = vmul.f32 %v7765_v59, %v10334_v19  ;;  %v2015_v8 = vld [vmem:[#allocation2 + $0x48] sm:$0xff]  ;;  %v10338_v47 = vrot.slane %v10337_v16, 7  ;;  %2103 = vst.msk [vmem:[#allocation2 + $0x8] sm:$0xff] %vm520_vm0, %v2071_v18  ;;  %2107 = vst.msk [vmem:[#allocation2 + $0x28] sm:$0xff] %vm520_vm0, %v2075_v23  ;;  %v10345_v11 = vld [vmem:[#allocation197_spill] sm:$0xff] }
 0x305   : > { %v2019_v43 = vld [vmem:[#allocation2 + $0x68] sm:$0xff]  ;;  %v2079_v56 = vadd.f32 %v2047_v3, %v2015_v8  ;;  %2119 = vst.msk [vmem:[#allocation2 + $0x88] sm:$0xff] %vm520_vm0, %v2087_v17  ;;  %v7865_v3 = vmul.f32 %v10341_v31, %v7777_v42  ;;  %v7878_v57 = vmul.f32 %v7825_v51, %v10345_v11  ;;  %v10353_v2 = vld [vmem:[#allocation103_spill] sm:$0xff]  ;;  %v10355_v18 = vld [vmem:[#allocation80_spill] sm:$0xff] }
 0x306   : > { %v2027_v62 = vld [vmem:[#allocation2 + $0xa8] sm:$0xff]  ;;  %v2083_v59 = vadd.f32 %v2051_v33, %v2019_v43  ;;  %v10356_v23 = vrot.slane %v10355_v18, 7  ;;  %v1513_v18 = vmul.f32 %v10263_v0, %v7813_v27  ;;  %v10370_v0 = vld [vmem:[#allocation113_spill] sm:$0xff]  ;;  %v1525_v50 = vld [vmem:[#allocation2 + $0x10] sm:$0xff] }
 0x307   : > { %v2031_v20 = vld [vmem:[#allocation2 + $0xc8] sm:$0xff]  ;;  %v2091_v10 = vadd.f32 %v2059_v34, %v2027_v62  ;;  %10342 = vst [vmem:[#allocation37_spill] sm:$0xff] %v7865_v3  ;;  %2111 = vst.msk [vmem:[#allocation2 + $0x48] sm:$0xff] %vm520_vm0, %v2079_v56  ;;  %v4966_v56 = vld [vmem:[%s5586_s16 + $0x38] sm:$0xff] }
 0x308   : > { %v2035_v15 = vld [vmem:[#allocation2 + $0xe8] sm:$0xff]  ;;  %v2095_v41 = vadd.f32 %v2063_v49, %v2031_v20  ;;  %2115 = vst.msk [vmem:[#allocation2 + $0x68] sm:$0xff] %vm520_vm0, %v2083_v59  ;;  %10346 = vst [vmem:[#allocation35_spill] sm:$0xff] %v7878_v57  ;;  %v10349_v49 = vld [vmem:[#allocation97_spill] sm:$0xff]  ;;  %v1771_v59 = vmul.f32 %v4966_v56, %v7804_v54  ;;  %v1509_v56 = vmul.f32 %v10253_v12, %v7813_v27 }
 0x309   : > { %v10339_v19 = vld [vmem:[#allocation70_spill] sm:$0xff]  ;;  %v2099_v55 = vadd.f32 %v2067_v58, %v2035_v15  ;;  %2123 = vst.msk [vmem:[#allocation2 + $0xa8] sm:$0xff] %vm520_vm0, %v2091_v10  ;;  %v10350_v8 = vrot.slane %v10349_v49, 7  ;;  %v10354_v58 = vrot.slane %v10353_v2, 7  ;;  %v4965_v20 = vld [vmem:[%s5586_s16 + $0x18] sm:$0xff]  ;;  %v7908_v10 = vmul.f32 %v10313_v48, %v7751_v28  ;;  %v10364_v54 = vld [vmem:[#allocation107_spill] sm:$0xff] }
 0x30a   : > { %v10340_v14 = vrot.slane %v10339_v19, 7  ;;  %v10343_v46 = vld [vmem:[#allocation166_spill] sm:$0xff]  ;;  %v1767_v15 = vmul.f32 %v4965_v20, %v7800_v35  ;;  %2127 = vst.msk [vmem:[#allocation2 + $0xc8] sm:$0xff] %vm520_vm0, %v2095_v41  ;;  %v7914_v19 = vpop.permute.xlu0 %2375  ;;  %v10361_v41 = vld [vmem:[#allocation92_spill] sm:$0xff]  ;;  %v10366_v57 = vld [vmem:[#allocation109_spill] sm:$0xff] }
 0x30b   : > { %v7869_v32 = vmul.f32 %v10343_v46, %v7777_v42  ;;  %v10347_v33 = vld [vmem:[#allocation198_spill] sm:$0xff]  ;;  %v7898_v17 = vsel %vm1409_vm5, %v10356_v23, %v10354_v58  ;;  %2131 = vst.msk [vmem:[#allocation2 + $0xe8] sm:$0xff] %vm520_vm0, %v2099_v55  ;;  %10357 = vst [vmem:[#allocation67_spill] sm:$0xff] %v7908_v10  ;;  %v10362_v55 = vld [vmem:[#allocation125_spill] sm:$0xff] }
 0x30c   : > { %v7858_v1 = vsel %vm1409_vm5, %v10340_v14, %v10338_v47  ;;  %v7882_v34 = vmul.f32 %v7829_v13, %v10347_v33  ;;  %v10351_v42 = vld [vmem:[#allocation78_spill] sm:$0xff]  ;;  %v7912_v47 = vmul.f32 %v10314_v45, %v7751_v28  ;;  %v10360_v33 = vld [vmem:[#allocation133_spill] sm:$0xff]  ;;  %v2212_v58 = vmul.f32 %v10362_v55, %v7786_v25  ;;  %v10363_v23 = vld [vmem:[#allocation91_spill] sm:$0xff] }
 0x30d   : > { %10344 = vst [vmem:[#allocation72_spill] sm:$0xff] %v7869_v32  ;;  %v10352_v43 = vrot.slane %v10351_v42, 7  ;;  %v10359_v14 = vld [vmem:[#allocation94_spill] sm:$0xff]  ;;  %v3613_v20 = vsel %vm3345_vm1, %v10363_v23, 0.0  ;;  %v1517_v42 = vmul.f32 %v10341_v31, %v7813_v27  ;;  %v1735_v39 = vld [vmem:[#allocation2 + $0x18] sm:$0xff]  ;;  %v10368_v3 = vld [vmem:[#allocation111_spill] sm:$0xff]  ;;  %v7939_v31 = vpop.permute.xlu1 %1688 }
 0x30e   : > { %10348 = vst [vmem:[#allocation60_spill] sm:$0xff] %v7882_v34  ;;  %10358 = vst [vmem:[#allocation29_spill] sm:$0xff] %v7912_v47  ;;  %v2200_v11 = vmul.f32 %v10359_v14, %v7786_v25  ;;  %v10365_v28 = vld [vmem:[#allocation108_spill] sm:$0xff]  ;;  %3614 = vadd.xlane.f32.xlu1 %v3613_v20  ;;  %v1799_v32 = vadd.f32 %v1767_v15, %v1735_v39  ;;  %v2220_v21 = vld [vmem:[#allocation2 + $0x28] sm:$0xff]  ;;  %v1521_v20 = vmul.f32 %v10343_v46, %v7813_v27  ;;  %v7947_v16 = vpop.permute.xlu0 %2385 }
 0x30f   : > { %v7890_v62 = vsel %vm1409_vm5, %v10352_v43, %v10350_v8  ;;  %v2204_v8 = vmul.f32 %v10360_v33, %v7786_v25  ;;  %v2208_v43 = vmul.f32 %v10361_v41, %v7786_v25  ;;  %v10367_v25 = vld [vmem:[#allocation110_spill] sm:$0xff]  ;;  %v1739_v23 = vld [vmem:[#allocation2 + $0x38] sm:$0xff]  ;;  %v1533_v39 = vld [vmem:[#allocation2 + $0x50] sm:$0xff] }
 0x310   : > { %v2248_v35 = vmul.f32 %v2200_v11, %v10364_v54  ;;  %v2260_v51 = vmul.f32 %v2212_v58, %v10367_v25  ;;  %v2264_v12 = vmul.f32 %v2200_v11, %v10368_v3  ;;  %v1803_v60 = vadd.f32 %v1771_v59, %v1739_v23  ;;  %v2216_v54 = vld [vmem:[#allocation2 + $0x8] sm:$0xff]  ;;  %v1529_v25 = vld [vmem:[#allocation2 + $0x30] sm:$0xff]  ;;  %1831 = vst.msk [vmem:[#allocation2 + $0x18] sm:$0xff] %vm520_vm0, %v1799_v32 }
 0x311   : > { %v2252_v34 = vmul.f32 %v2204_v8, %v10365_v28  ;;  %v2256_v13 = vmul.f32 %v2208_v43, %v10366_v57  ;;  %v2268_v29 = vmul.f32 %v2204_v8, %v10369_v6  ;;  %v2272_v53 = vmul.f32 %v2208_v43, %v10370_v0  ;;  %v2232_v28 = vld [vmem:[#allocation2 + $0x88] sm:$0xff]  ;;  %v1537_v15 = vld [vmem:[#allocation2 + $0x70] sm:$0xff] }
 0x312   : > { %v10371_v9 = vld [vmem:[#allocation114_spill] sm:$0xff]  ;;  %v2280_v0 = vadd.f32 %v2248_v35, %v2216_v54  ;;  %v2296_v23 = vadd.f32 %v2264_v12, %v2232_v28  ;;  %1835 = vst.msk [vmem:[#allocation2 + $0x38] sm:$0xff] %vm520_vm0, %v1803_v60  ;;  %v1565_v32 = vmul.f32 %v1517_v42, %v10374_v61  ;;  %v1553_v35 = vld [vmem:[#allocation2 + $0xf0] sm:$0xff]  ;;  %v1569_v60 = vmul.f32 %v1521_v20, %v7708_v44  ;;  %v7964_v12 = vpop.permute.xlu1 %1952 }
 0x313   : > { %v2276_v57 = vmul.f32 %v2212_v58, %v10371_v9  ;;  %v10372_v3 = vld [vmem:[#allocation42_spill] sm:$0xff]  ;;  %v2284_v59 = vadd.f32 %v2252_v34, %v2220_v21  ;;  %v1549_v21 = vld [vmem:[#allocation2 + $0xd0] sm:$0xff]  ;;  %v1577_v61 = vmul.f32 %v1513_v18, %v7858_v1  ;;  %10375 = vst [vmem:[#allocation169_spill] sm:$0xff] %v7964_v12 }
 0x314   : > { %v1557_v11 = vmul.f32 %v1509_v56, %v10372_v3  ;;  %v2224_v6 = vld [vmem:[#allocation2 + $0x48] sm:$0xff]  ;;  %v1541_v3 = vld [vmem:[#allocation2 + $0x90] sm:$0xff]  ;;  %2312 = vst.msk [vmem:[#allocation2 + $0x8] sm:$0xff] %vm520_vm0, %v2280_v0  ;;  %2328 = vst.msk [vmem:[#allocation2 + $0x88] sm:$0xff] %vm520_vm0, %v2296_v23  ;;  %v1597_v34 = vadd.f32 %v1565_v32, %v1533_v39  ;;  %v8009_v0 = vmul.f32 %v10286_v38, %v7871_v7 }
 0x315   : > { %v2228_v8 = vld [vmem:[#allocation2 + $0x68] sm:$0xff]  ;;  %v2288_v46 = vadd.f32 %v2256_v13, %v2224_v6  ;;  %2316 = vst.msk [vmem:[#allocation2 + $0x28] sm:$0xff] %vm520_vm0, %v2284_v59  ;;  %v1573_v13 = vmul.f32 %v1509_v56, %v7716_v52  ;;  %v1601_v52 = vadd.f32 %v1569_v60, %v1537_v15  ;;  %v10376_v1 = vld [vmem:[#allocation195_spill] sm:$0xff]  ;;  %v8013_v59 = vmul.f32 %v10294_v63, %v7871_v7  ;;  %v10392_v60 = vld [vmem:[#allocation96_spill] sm:$0xff] }
 0x316   : > { %v2236_v43 = vld [vmem:[#allocation2 + $0xa8] sm:$0xff]  ;;  %v2292_v58 = vadd.f32 %v2260_v51, %v2228_v8  ;;  %v1589_v51 = vadd.f32 %v1557_v11, %v1525_v50  ;;  %1629 = vst.msk [vmem:[#allocation2 + $0x50] sm:$0xff] %vm520_vm0, %v1597_v34  ;;  %v10379_v50 = vld [vmem:[#allocation93_spill] sm:$0xff]  ;;  %v8000_v11 = vmul.f32 %v10359_v14, %v7839_v26  ;;  %10386 = vst [vmem:[#allocation186_spill] sm:$0xff] %v8009_v0  ;;  %v8015_v23 = vpop.permute.xlu1 %1962 }
 0x317   : > { %v10373_v5 = vld [vmem:[#allocation134_spill] sm:$0xff]  ;;  %v2300_v40 = vadd.f32 %v2268_v29, %v2236_v43  ;;  %2320 = vst.msk [vmem:[#allocation2 + $0x48] sm:$0xff] %vm520_vm0, %v2288_v46  ;;  %v1585_v29 = vmul.f32 %v1521_v20, %v7898_v17  ;;  %v1605_v56 = vadd.f32 %v1573_v13, %v1541_v3  ;;  %1633 = vst.msk [vmem:[#allocation2 + $0x70] sm:$0xff] %vm520_vm0, %v1601_v52  ;;  %v10381_v17 = vld [vmem:[#allocation196_spill] sm:$0xff] }
 0x318   : > { %v1561_v30 = vmul.f32 %v1513_v18, %v10373_v5  ;;  %v2240_v9 = vld [vmem:[#allocation2 + $0xc8] sm:$0xff]  ;;  %v1545_v5 = vld [vmem:[#allocation2 + $0xb0] sm:$0xff]  ;;  %2324 = vst.msk [vmem:[#allocation2 + $0x68] sm:$0xff] %vm520_vm0, %v2292_v58  ;;  %1621 = vst.msk [vmem:[#allocation2 + $0x10] sm:$0xff] %vm520_vm0, %v1589_v51  ;;  %v7992_v20 = vmul.f32 %v10282_v4, %v7871_v7  ;;  %v8005_v43 = vmul.f32 %v10360_v33, %v7839_v26 }
 0x319   : > { %v2244_v27 = vld [vmem:[#allocation2 + $0xe8] sm:$0xff]  ;;  %v2304_v22 = vadd.f32 %v2272_v53, %v2240_v9  ;;  %2332 = vst.msk [vmem:[#allocation2 + $0xa8] sm:$0xff] %vm520_vm0, %v2300_v40  ;;  %v1581_v53 = vmul.f32 %v1517_v42, %v7890_v62  ;;  %v1609_v54 = vadd.f32 %v1577_v61, %v1545_v5  ;;  %v1617_v40 = vadd.f32 %v1585_v29, %v1553_v35  ;;  %v2009_v18 = vld [vmem:[#allocation2 + $0x18] sm:$0xff]  ;;  %v10389_v3 = vld [vmem:[#allocation95_spill] sm:$0xff] }
 0x31a   : > { %v2308_v2 = vadd.f32 %v2276_v57, %v2244_v27  ;;  %v1593_v44 = vadd.f32 %v1561_v30, %v1529_v25  ;;  %v2041_v42 = vmul.f32 %v7908_v10, %v10376_v1  ;;  %1637 = vst.msk [vmem:[#allocation2 + $0x90] sm:$0xff] %vm520_vm0, %v1605_v56  ;;  %v7979_v30 = vmul.f32 %v10362_v55, %v7839_v26  ;;  %v2013_v39 = vld [vmem:[#allocation2 + $0x38] sm:$0xff]  ;;  %v10388_v46 = vld [vmem:[#allocation62_spill] sm:$0xff]  ;;  %v4967_v56 = vld [vmem:[%s5586_s16 + $0x10] sm:$0xff] }
 0x31b   : > { %2336 = vst.msk [vmem:[#allocation2 + $0xc8] sm:$0xff] %vm520_vm0, %v2304_v22  ;;  %v1613_v28 = vadd.f32 %v1581_v53, %v1549_v21  ;;  %v7975_v22 = vmul.f32 %v10361_v41, %v7839_v26  ;;  %v3625_v62 = vsel %vm3345_vm1, %v10379_v50, 0.0  ;;  %v2045_v57 = vmul.f32 %v7912_v47, %v10381_v17  ;;  %1641 = vst.msk [vmem:[#allocation2 + $0xb0] sm:$0xff] %vm520_vm0, %v1609_v54  ;;  %v10390_v21 = vld [vmem:[#allocation63_spill] sm:$0xff] }
 0x31c   : > { %2340 = vst.msk [vmem:[#allocation2 + $0xe8] sm:$0xff] %vm520_vm0, %v2308_v2  ;;  %1625 = vst.msk [vmem:[#allocation2 + $0x30] sm:$0xff] %vm520_vm0, %v1593_v44  ;;  %v7983_v2 = vpop.permute.xlu0 %2579  ;;  %3626 = vadd.xlane.f32.xlu1 %v3625_v62  ;;  %v7996_v25 = vmul.f32 %v10283_v24, %v7871_v7  ;;  %v2073_v15 = vadd.f32 %v2041_v42, %v2009_v18  ;;  %v4460_v6 = vld.sshfl [vmem:[#allocation9 + $0x1c] sm:$0x33 pattern:$0x75316420]  ;;  %v2250_v26 = vmul.f32 %v8000_v11, %v10389_v3  ;;  %v8065_v42 = vpop.permute.xlu1 %2161 }
 0x31d   : > { %10377 = vst [vmem:[#allocation40_spill] sm:$0xff] %v7975_v22  ;;  %10378 = vst [vmem:[#allocation74_spill] sm:$0xff] %v7979_v30  ;;  %v2077_v8 = vadd.f32 %v2045_v57, %v2013_v39  ;;  %v2351_v27 = vcombine.high %v4460_v6, %v4460_v6  ;;  %v2358_v58 = vrot.slane %v4460_v6, %v10388_v46  ;;  %v4968_v54 = vld [vmem:[%s5586_s16 + $0x30] sm:$0xff]  ;;  %v2429_v57 = vld [vmem:[#allocation2 + $0x28] sm:$0xff] }
 0x31e   : > { %10380 = vst [vmem:[#allocation48_spill] sm:$0xff] %v7983_v2  ;;  %1645 = vst.msk [vmem:[#allocation2 + $0xd0] sm:$0xff] %vm520_vm0, %v1613_v28  ;;  %v1718_v35 = vmul.f32 %v10282_v4, %v7939_v31  ;;  %v2254_v13 = vmul.f32 %v8005_v43, %v10392_v60  ;;  %v1722_v61 = vmul.f32 %v10283_v24, %v7939_v31  ;;  %v2425_v24 = vld [vmem:[#allocation2 + $0x8] sm:$0xff]  ;;  %v4971_v60 = vld [vmem:[%s5586_s16 + $0x90] sm:$0xff] }
 0x31f   : > { %1649 = vst.msk [vmem:[#allocation2 + $0xf0] sm:$0xff] %vm520_vm0, %v1617_v40  ;;  %10382 = vst [vmem:[#allocation52_spill] sm:$0xff] %v7992_v20  ;;  %v2365_v32 = vrot.slane %v2351_v27, %v10388_v46  ;;  %v2366_v5 = vcombine.high %v2358_v58, %v2358_v58  ;;  %v8025_v7 = vrot.slane %v2358_v58, %v10390_v21  ;;  %v4970_v40 = vld [vmem:[%s5586_s16 + $0x70] sm:$0xff]  ;;  %v2441_v39 = vld [vmem:[#allocation2 + $0x88] sm:$0xff] }
 0x320   : > { %10383 = vst [vmem:[#allocation58_spill] sm:$0xff] %v7996_v25  ;;  %10384 = vst [vmem:[#allocation185_spill] sm:$0xff] %v8000_v11  ;;  %v8017_v9 = vpop.xlane.xlu0 %3545  ;;  %v8035_v53 = vmul.f32 %v10286_v38, %v7939_v31  ;;  %v8039_v29 = vmul.f32 %v10294_v63, %v7939_v31  ;;  %v8052_v38 = vmul.f32 %v4967_v56, %v1718_v35  ;;  %v4969_v63 = vld [vmem:[%s5586_s16 + $0x50] sm:$0xff]  ;;  %v2433_v58 = vld [vmem:[#allocation2 + $0x48] sm:$0xff] }
 0x321   : > { %2105 = vst.msk [vmem:[#allocation2 + $0x18] sm:$0xff] %vm520_vm0, %v2073_v15  ;;  %10385 = vst [vmem:[#allocation187_spill] sm:$0xff] %v8005_v43  ;;  %v2367_v51 = vcombine.high %v2365_v32, %v2365_v32  ;;  %v8042_v44 = vrot.slane %v2365_v32, %v10390_v21  ;;  %v8045_v4 = vrot.slane %v2366_v5, %v10390_v21  ;;  %v10397_v15 = vld [vmem:[#allocation27_spill] sm:$0xff]  ;;  %v2437_v3 = vld [vmem:[#allocation2 + $0x68] sm:$0xff]  ;;  %4877 = vrcp.f32 %v8017_v9 }
 0x322   : > { %10387 = vst [vmem:[#allocation50_spill] sm:$0xff] %v8013_v59  ;;  %2109 = vst.msk [vmem:[#allocation2 + $0x38] sm:$0xff] %vm520_vm0, %v2077_v8  ;;  %v2409_v34 = vmul.f32 %v8025_v7, %v7914_v19  ;;  %v8055_v28 = vmul.f32 %v4968_v54, %v1722_v61  ;;  %v8059_v31 = vmul.f32 %v4969_v63, %v8035_v53  ;;  %v10398_v32 = vld [vmem:[#allocation171_spill] sm:$0xff]  ;;  %v2445_v2 = vld [vmem:[#allocation2 + $0xa8] sm:$0xff] }
 0x323   : > { %10391 = vst [vmem:[#allocation188_spill] sm:$0xff] %v8025_v7  ;;  %10393 = vst [vmem:[#allocation189_spill] sm:$0xff] %v8042_v44  ;;  %v8063_v1 = vmul.f32 %v4970_v40, %v8039_v29  ;;  %v8068_v62 = vrot.slane %v2367_v51, %v10390_v21  ;;  %v2413_v18 = vmul.f32 %v8042_v44, %v7914_v19  ;;  %v4972_v51 = vld [vmem:[%s5586_s16 + $0xb0] sm:$0xff]  ;;  %v2449_v43 = vld [vmem:[#allocation2 + $0xc8] sm:$0xff] }
 0x324   : > { %10394 = vst [vmem:[#allocation70_spill] sm:$0xff] %v8045_v4  ;;  %v8049_v52 = vpop.xlane.xlu0 %3557  ;;  %10395 = vst [vmem:[#allocation161_spill] sm:$0xff] %v8065_v42  ;;  %v2417_v17 = vmul.f32 %v8045_v4, %v7914_v19  ;;  %v2457_v6 = vmul.f32 %v2409_v34, %v10397_v15  ;;  %v2473_v5 = vmul.f32 %v2409_v34, %v10398_v32  ;;  %v2453_v30 = vld [vmem:[#allocation2 + $0xe8] sm:$0xff]  ;;  %v10399_v22 = vld [vmem:[#allocation31_spill] sm:$0xff] }
 0x325   : > { %10396 = vst [vmem:[#allocation166_spill] sm:$0xff] %v8068_v62  ;;  %v1782_v56 = vmul.f32 %v4971_v60, %v1718_v35  ;;  %v1786_v54 = vmul.f32 %v4972_v51, %v1722_v61  ;;  %v2421_v40 = vmul.f32 %v8068_v62, %v7914_v19  ;;  %v2461_v11 = vmul.f32 %v2413_v18, %v10399_v22  ;;  %v10400_v15 = vld [vmem:[#allocation26_spill] sm:$0xff]  ;;  %v10402_v32 = vld [vmem:[#allocation172_spill] sm:$0xff]  ;;  %v1742_v51 = vld [vmem:[#allocation2 + $0x50] sm:$0xff] }
 0x326   : > { %v2465_v42 = vmul.f32 %v2417_v17, %v10400_v15  ;;  %v2481_v35 = vmul.f32 %v2417_v17, %v10402_v32  ;;  %v2489_v60 = vadd.f32 %v2457_v6, %v2425_v24  ;;  %v2505_v61 = vadd.f32 %v2473_v5, %v2441_v39  ;;  %v10403_v19 = vld [vmem:[#allocation170_spill] sm:$0xff]  ;;  %v10404_v22 = vld [vmem:[#allocation173_spill] sm:$0xff]  ;;  %v1750_v0 = vld [vmem:[#allocation2 + $0x90] sm:$0xff] }
 0x327   : > { %v2469_v47 = vmul.f32 %v2421_v40, %v10403_v19  ;;  %v2485_v15 = vmul.f32 %v2421_v40, %v10404_v22  ;;  %v2493_v10 = vadd.f32 %v2461_v11, %v2429_v57  ;;  %v1758_v39 = vld [vmem:[#allocation2 + $0xd0] sm:$0xff]  ;;  %v1814_v40 = vadd.f32 %v1782_v56, %v1750_v0  ;;  %v8159_v22 = vld [vmem:[%s5586_s16 + $0x58] sm:$0xff] }
 0x328   : > { %v2218_v50 = vld [vmem:[#allocation2 + $0x18] sm:$0xff]  ;;  %v2497_v59 = vadd.f32 %v2465_v42, %v2433_v58  ;;  %v2513_v17 = vadd.f32 %v2481_v35, %v2449_v43  ;;  %2521 = vst.msk [vmem:[#allocation2 + $0x8] sm:$0xff] %vm520_vm0, %v2489_v60  ;;  %2537 = vst.msk [vmem:[#allocation2 + $0x88] sm:$0xff] %vm520_vm0, %v2505_v61  ;;  %v1762_v6 = vld [vmem:[#allocation2 + $0xf0] sm:$0xff]  ;;  %v8096_v42 = vpop.permute.xlu1 %2171  ;;  %v8124_v0 = vmul.f32 %v8045_v4, %v7947_v16  ;;  %4879 = vrcp.f32 %v8049_v52 }
 0x329   : > { %v2222_v8 = vld [vmem:[#allocation2 + $0x38] sm:$0xff]  ;;  %v2282_v27 = vadd.f32 %v2250_v26, %v2218_v50  ;;  %v10401_v50 = vld [vmem:[#allocation30_spill] sm:$0xff]  ;;  %v4973_v5 = vld [vmem:[%s5586_s16 + $0xd0] sm:$0xff]  ;;  %v2501_v57 = vadd.f32 %v2469_v47, %v2437_v3  ;;  %v2517_v58 = vadd.f32 %v2485_v15, %v2453_v30  ;;  %2525 = vst.msk [vmem:[#allocation2 + $0x28] sm:$0xff] %vm520_vm0, %v2493_v10  ;;  %v8112_v30 = vmul.f32 %v8025_v7, %v7947_v16 }
 0x32a   : > { %v2286_v63 = vadd.f32 %v2254_v13, %v2222_v8  ;;  %v473_v26 = vld [vmem:[#allocation12 + $0x110] sm:$0xff]  ;;  %v2477_v34 = vmul.f32 %v2413_v18, %v10401_v50  ;;  %v1734_v13 = vld [vmem:[#allocation2 + $0x10] sm:$0xff]  ;;  %v8088_v50 = vpop.xlane.xlu0 %3551  ;;  %2529 = vst.msk [vmem:[#allocation2 + $0x48] sm:$0xff] %vm520_vm0, %v2497_v59  ;;  %2545 = vst.msk [vmem:[#allocation2 + $0xc8] sm:$0xff] %vm520_vm0, %v2513_v17  ;;  %v8116_v59 = vmul.f32 %v8042_v44, %v7947_v16  ;;  %v9657_v15 = vrot.slane %v8159_v22, 7 }
 0x32b   : > { %2314 = vst.msk [vmem:[#allocation2 + $0x18] sm:$0xff] %vm520_vm0, %v2282_v27  ;;  %v1738_v8 = vld [vmem:[#allocation2 + $0x30] sm:$0xff]  ;;  %10405 = vst [vmem:[#allocation197_spill] sm:$0xff] %v8088_v50  ;;  %v10411_v3 = vld [vmem:[#allocation138_spill] sm:$0xff]  ;;  %v8142_v61 = vmul.f32 %v10313_v48, %v7964_v12 }
 0x32c   : > { %2318 = vst.msk [vmem:[#allocation2 + $0x38] sm:$0xff] %vm520_vm0, %v2286_v63  ;;  %v1746_v27 = vld [vmem:[#allocation2 + $0x70] sm:$0xff]  ;;  %v2509_v24 = vadd.f32 %v2477_v34, %v2445_v2  ;;  %v1790_v63 = vmul.f32 %v4973_v5, %v8035_v53  ;;  %v1798_v2 = vadd.f32 %v8052_v38, %v1734_v13  ;;  %v1802_v43 = vadd.f32 %v8055_v28, %v1738_v8  ;;  %v8138_v35 = vpop.permute.xlu1 %2370  ;;  %v8175_v5 = vld [vmem:[%s5586_s16 + $0xd8] sm:$0xff]  ;;  %v10440_v17 = vld [vmem:[#allocation194_spill] sm:$0xff] }
 0x32d   : > { %v1754_v18 = vld [vmem:[#allocation2 + $0xb0] sm:$0xff]  ;;  %v1806_v53 = vadd.f32 %v8059_v31, %v1742_v51  ;;  %2589 = vperm.xlu1 %4812, %v473_v26   ;;  %2533 = vst.msk [vmem:[#allocation2 + $0x68] sm:$0xff] %vm520_vm0, %v2501_v57  ;;  %2549 = vst.msk [vmem:[#allocation2 + $0xe8] sm:$0xff] %vm520_vm0, %v2517_v58  ;;  %v8128_v38 = vmul.f32 %v8068_v62, %v7947_v16  ;;  %v10410_v31 = vld [vmem:[#allocation137_spill] sm:$0xff]  ;;  %v2463_v56 = vmul.f32 %v8116_v59, %v10411_v3 }
 0x32e   : > { %v4974_v32 = vld [vmem:[%s5586_s16 + $0xf0] sm:$0xff]  ;;  %2541 = vst.msk [vmem:[#allocation2 + $0xa8] sm:$0xff] %vm520_vm0, %v2509_v24  ;;  %v1818_v34 = vadd.f32 %v1786_v54, %v1754_v18  ;;  %v1822_v10 = vadd.f32 %v1790_v63, %v1758_v39  ;;  %1830 = vst.msk [vmem:[#allocation2 + $0x10] sm:$0xff] %vm520_vm0, %v1798_v2  ;;  %v8136_v54 = vpop.xlane.xlu0 %3542  ;;  %v8148_v13 = vmul.f32 %v10314_v45, %v7964_v12  ;;  %v8167_v24 = vld [vmem:[%s5586_s16 + $0x98] sm:$0xff]  ;;  %v9646_v2 = vrot.slane %v8175_v5, 1 }
 0x32f   : > { %v1794_v11 = vmul.f32 %v4974_v32, %v8039_v29  ;;  %v1810_v29 = vadd.f32 %v8063_v1, %v1746_v27  ;;  %1834 = vst.msk [vmem:[#allocation2 + $0x30] sm:$0xff] %vm520_vm0, %v1802_v43  ;;  %10406 = vst [vmem:[#allocation198_spill] sm:$0xff] %v8112_v30  ;;  %v2459_v1 = vmul.f32 %v8112_v30, %v10410_v31  ;;  %v8163_v27 = vld [vmem:[%s5586_s16 + $0x78] sm:$0xff]  ;;  %v9644_v32 = vrot.slane %v8159_v22, 1  ;;  %v10422_v31 = vld [vmem:[#allocation193_spill] sm:$0xff] }
 0x330   : > { %10407 = vst [vmem:[#allocation97_spill] sm:$0xff] %v8116_v59  ;;  %1838 = vst.msk [vmem:[#allocation2 + $0x50] sm:$0xff] %vm520_vm0, %v1806_v53  ;;  %v8152_v8 = vmul.f32 %v10315_v36, %v7964_v12  ;;  %v8156_v19 = vpop.permute.xlu1 %2380  ;;  %v8171_v39 = vld [vmem:[%s5586_s16 + $0xb8] sm:$0xff]  ;;  %v9642_v57 = vrot.slane %v8167_v24, 1  ;;  %v10424_v3 = vld [vmem:[#allocation183_spill] sm:$0xff]  ;;  %v2004_v18 = vmul.f32 %v10440_v17, %v8015_v23 }
 0x331   : > { %v1826_v47 = vadd.f32 %v1794_v11, %v1762_v6  ;;  %1842 = vst.msk [vmem:[#allocation2 + $0x70] sm:$0xff] %vm520_vm0, %v1810_v29  ;;  %1846 = vst.msk [vmem:[#allocation2 + $0x90] sm:$0xff] %vm520_vm0, %v1814_v40  ;;  %v9643_v11 = vrot.slane %v8163_v27, 1  ;;  %v9645_v58 = vrot.slane %v8171_v39, 1  ;;  %v8184_v43 = vld [vmem:[%s5586_s16 + $0xf8] sm:$0xff] }
 0x332   : > { %1850 = vst.msk [vmem:[#allocation2 + $0xb0] sm:$0xff] %vm520_vm0, %v1818_v34  ;;  %10408 = vst [vmem:[#allocation91_spill] sm:$0xff] %v8124_v0  ;;  %v2427_v28 = vld [vmem:[#allocation2 + $0x18] sm:$0xff]  ;;  %v8154_v51 = vpop.xlane.xlu0 %3569  ;;  %v9648_v53 = vrot.slane %v8184_v43, 1 }
 0x333   : > { %10409 = vst [vmem:[#allocation107_spill] sm:$0xff] %v8128_v38  ;;  %1854 = vst.msk [vmem:[#allocation2 + $0xd0] sm:$0xff] %vm520_vm0, %v1822_v10  ;;  %v2431_v26 = vld [vmem:[#allocation2 + $0x38] sm:$0xff]  ;;  %v2491_v16 = vadd.f32 %v2459_v1, %v2427_v28  ;;  %v10420_v10 = vld [vmem:[#allocation182_spill] sm:$0xff]  ;;  %v10423_v1 = vrot.slane %v10422_v31, 1  ;;  %v1996_v31 = vmul.f32 %v10314_v45, %v8015_v23  ;;  %v10435_v45 = vrot.slane %v10349_v49, 1 }
 0x334   : > { %1858 = vst.msk [vmem:[#allocation2 + $0xf0] sm:$0xff] %vm520_vm0, %v1826_v47  ;;  %10412 = vst [vmem:[#allocation108_spill] sm:$0xff] %v8136_v54  ;;  %v2495_v60 = vadd.f32 %v2463_v56, %v2431_v26  ;;  %v4461_v29 = vld.sshfl [vmem:[#allocation9 + $0x20] sm:$0x33 pattern:$0x75316420] }
 0x335   : > { %10413 = vst [vmem:[#allocation109_spill] sm:$0xff] %v8138_v35  ;;  %10414 = vst [vmem:[#allocation110_spill] sm:$0xff] %v8142_v61  ;;  %v10418_v40 = vld [vmem:[#allocation56_spill] sm:$0xff]  ;;  %v10421_v47 = vrot.slane %v10420_v10, 1  ;;  %v10425_v56 = vrot.slane %v10424_v3, 1  ;;  %v10431_v3 = vld [vmem:[#allocation49_spill] sm:$0xff] }
 0x336   : > { %2523 = vst.msk [vmem:[#allocation2 + $0x18] sm:$0xff] %vm520_vm0, %v2491_v16  ;;  %2527 = vst.msk [vmem:[#allocation2 + $0x38] sm:$0xff] %vm520_vm0, %v2495_v60  ;;  %v10419_v34 = vrot.slane %v10418_v40, 1  ;;  %v1992_v16 = vmul.f32 %v10313_v48, %v8015_v23  ;;  %v10426_v60 = vld [vmem:[#allocation184_spill] sm:$0xff]  ;;  %v2000_v48 = vmul.f32 %v10315_v36, %v8015_v23  ;;  %v1899_v36 = vsel %vm1892_vm6, %v10435_v45, %v9646_v2 }
 0x337   : > { %10415 = vst [vmem:[#allocation111_spill] sm:$0xff] %v8148_v13  ;;  %10416 = vst [vmem:[#allocation112_spill] sm:$0xff] %v8152_v8  ;;  %v1894_v26 = vsel %vm1892_vm6, %v10425_v56, %v10423_v1  ;;  %v10427_v63 = vrot.slane %v10426_v60, 1  ;;  %v8217_v1 = vpop.xlane.xlu0 %3581  ;;  %v10432_v56 = vrot.slane %v10431_v3, 1  ;;  %v10433_v60 = vld [vmem:[#allocation55_spill] sm:$0xff]  ;;  %v2560_v2 = vcombine.high %v4461_v29, %v4461_v29 }
 0x338   : > { %10417 = vst [vmem:[#allocation113_spill] sm:$0xff] %v8154_v51  ;;  %v1893_v28 = vsel %vm1892_vm6, %v10421_v47, %v10419_v34  ;;  %v10428_v34 = vld [vmem:[#allocation106_spill] sm:$0xff]  ;;  %10430 = vst [vmem:[#allocation114_spill] sm:$0xff] %v8217_v1  ;;  %v10436_v3 = vld [vmem:[#allocation103_spill] sm:$0xff] }
 0x339   : > { %v1895_v40 = vsel %vm1892_vm6, %v10427_v63, %v9644_v32  ;;  %v10429_v10 = vrot.slane %v10428_v34, 1  ;;  %v1896_v63 = vsel %vm1892_vm6, %v10432_v56, %v9643_v11  ;;  %v10434_v34 = vrot.slane %v10433_v60, 1  ;;  %v2008_v11 = vld [vmem:[#allocation2 + $0x10] sm:$0xff]  ;;  %v8243_v60 = vpop.permute.xlu1 %2584 }
 0x33a   : > { %v2012_v32 = vld [vmem:[#allocation2 + $0x30] sm:$0xff]  ;;  %v2040_v35 = vmul.f32 %v1992_v16, %v1893_v28  ;;  %v2048_v8 = vmul.f32 %v2000_v48, %v1895_v40  ;;  %v2052_v61 = vmul.f32 %v2004_v18, %v1896_v63  ;;  %v10444_v40 = vld [vmem:[#allocation65_spill] sm:$0xff]  ;;  %v10460_v63 = vrot.slane %v10436_v3, 7 }
 0x33b   : > { %v1897_v47 = vsel %vm1892_vm6, %v10429_v10, %v9642_v57  ;;  %v1898_v10 = vsel %vm1892_vm6, %v10434_v34, %v9645_v58  ;;  %v10437_v57 = vrot.slane %v10436_v3, 1  ;;  %v10438_v58 = vld [vmem:[#allocation64_spill] sm:$0xff]  ;;  %v2016_v38 = vld [vmem:[#allocation2 + $0x50] sm:$0xff]  ;;  %v2044_v34 = vmul.f32 %v1996_v31, %v1894_v26  ;;  %v8258_v26 = vpop.xlane.xlu0 %3563 }
 0x33c   : > { %v10439_v6 = vrot.slane %v10438_v58, 7  ;;  %v2028_v59 = vld [vmem:[#allocation2 + $0xb0] sm:$0xff]  ;;  %v2056_v13 = vmul.f32 %v1992_v16, %v1897_v47  ;;  %v2060_v12 = vmul.f32 %v1996_v31, %v1898_v10  ;;  %v2072_v1 = vadd.f32 %v2040_v35, %v2008_v11  ;;  %10442 = vst [vmem:[#allocation134_spill] sm:$0xff] %v8258_v26  ;;  %v8269_v35 = vld [vmem:[%s5586_s16 + $0x40] sm:$0xff] }
 0x33d   : > { %v1900_v56 = vsel %vm1892_vm6, %v10437_v57, %v9648_v53  ;;  %v2020_v57 = vld [vmem:[#allocation2 + $0x70] sm:$0xff]  ;;  %v2076_v51 = vadd.f32 %v2044_v34, %v2012_v32  ;;  %v2080_v23 = vadd.f32 %v2048_v8, %v2016_v38  ;;  %v8256_v20 = vpop.xlane.xlu1 %3539  ;;  %v10443_v16 = vrot.slane %v8163_v27, 7  ;;  %10447 = vst [vmem:[#allocation195_spill] sm:$0xff] %v8269_v35  ;;  %v10454_v32 = vld [vmem:[#allocation76_spill] sm:$0xff] }
 0x33e   : > { %v8252_v45 = vsel %vm1409_vm5, %v10439_v6, %v9657_v15  ;;  %v2024_v53 = vld [vmem:[#allocation2 + $0x90] sm:$0xff]  ;;  %v2064_v6 = vmul.f32 %v2000_v48, %v1899_v36  ;;  %v2068_v15 = vmul.f32 %v2004_v18, %v1900_v56  ;;  %10441 = vst [vmem:[#allocation42_spill] sm:$0xff] %v8256_v20  ;;  %v2084_v17 = vadd.f32 %v2052_v61, %v2020_v57  ;;  %v8335_v36 = vld [vmem:[%s5586_s16 + $0xa0] sm:$0xff] }
 0x33f   : > { %v2032_v30 = vld [vmem:[#allocation2 + $0xd0] sm:$0xff]  ;;  %v2088_v25 = vadd.f32 %v2056_v13, %v2024_v53  ;;  %v2092_v54 = vadd.f32 %v2060_v12, %v2028_v59  ;;  %v10445_v47 = vrot.slane %v10444_v40, 7  ;;  %v9661_v38 = vrot.slane %v8269_v35, 1  ;;  %v8273_v13 = vld [vmem:[%s5586_s16 + $0x60] sm:$0xff]  ;;  %2104 = vst.msk [vmem:[#allocation2 + $0x10] sm:$0xff] %vm520_vm0, %v2072_v1  ;;  %2108 = vst.msk [vmem:[#allocation2 + $0x30] sm:$0xff] %vm520_vm0, %v2076_v51 }
 0x340   : > { %v2036_v0 = vld [vmem:[#allocation2 + $0xf0] sm:$0xff]  ;;  %v2096_v50 = vadd.f32 %v2064_v6, %v2032_v30  ;;  %10448 = vst [vmem:[#allocation93_spill] sm:$0xff] %v8273_v13  ;;  %v9660_v12 = vrot.slane %v8273_v13, 1  ;;  %v8277_v30 = vld [vmem:[%s5586_s16 + $0x80] sm:$0xff]  ;;  %2112 = vst.msk [vmem:[#allocation2 + $0x50] sm:$0xff] %vm520_vm0, %v2080_v23  ;;  %v8288_v61 = vrot.slane %v2560_v2, %v10388_v46  ;;  %v2201_v8 = vmul.f32 %v10359_v14, %v8096_v42 }
 0x341   : > { %v2100_v28 = vadd.f32 %v2068_v15, %v2036_v0  ;;  %v8266_v18 = vsel %vm1409_vm5, %v10445_v47, %v10443_v16  ;;  %10449 = vst [vmem:[#allocation196_spill] sm:$0xff] %v8277_v30  ;;  %v9662_v59 = vrot.slane %v8277_v30, 1  ;;  %2120 = vst.msk [vmem:[#allocation2 + $0x90] sm:$0xff] %vm520_vm0, %v2088_v25  ;;  %v8285_v0 = vrot.slane %v4461_v29, %v10388_v46  ;;  %v10451_v15 = vld [vmem:[#allocation68_spill] sm:$0xff]  ;;  %v8339_v56 = vld [vmem:[%s5586_s16 + $0xc0] sm:$0xff] }
 0x342   : > { %10446 = vst [vmem:[#allocation145_spill] sm:$0xff] %v8266_v18  ;;  %2116 = vst.msk [vmem:[#allocation2 + $0x70] sm:$0xff] %vm520_vm0, %v2084_v17  ;;  %v2205_v25 = vmul.f32 %v10360_v33, %v8096_v42  ;;  %v10450_v51 = vrot.slane %v8167_v24, 7  ;;  %v10452_v46 = vrot.slane %v10451_v15, 7  ;;  %v2209_v2 = vmul.f32 %v10361_v41, %v8096_v42  ;;  %v8343_v57 = vld [vmem:[%s5586_s16 + $0xe0] sm:$0xff]  ;;  %v10476_v6 = vld [vmem:[#allocation127_spill] sm:$0xff] }
 0x343   : > { %2124 = vst.msk [vmem:[#allocation2 + $0xb0] sm:$0xff] %vm520_vm0, %v2092_v54  ;;  %2128 = vst.msk [vmem:[#allocation2 + $0xd0] sm:$0xff] %vm520_vm0, %v2096_v50  ;;  %v10453_v54 = vrot.slane %v8171_v39, 7  ;;  %v10455_v50 = vrot.slane %v10454_v32, 7  ;;  %v2213_v53 = vmul.f32 %v10362_v55, %v8096_v42  ;;  %v10456_v29 = vrot.slane %v8175_v5, 7  ;;  %v10478_v42 = vld [vmem:[#allocation129_spill] sm:$0xff] }
 0x344   : > { %2132 = vst.msk [vmem:[#allocation2 + $0xf0] sm:$0xff] %vm520_vm0, %v2100_v28  ;;  %v8304_v17 = vsel %vm1409_vm5, %v10452_v46, %v10450_v51  ;;  %v10457_v31 = vrot.slane %v10349_v49, 7  ;;  %v10459_v1 = vrot.slane %v8184_v43, 7  ;;  %10462 = vst [vmem:[#allocation63_spill] sm:$0xff] %v8335_v36  ;;  %v10465_v23 = vrot.slane %v8159_v22, 1  ;;  %v10479_v14 = vld [vmem:[#allocation130_spill] sm:$0xff] }
 0x345   : > { %v8312_v11 = vsel %vm1409_vm5, %v10455_v50, %v10453_v54  ;;  %10463 = vst [vmem:[#allocation96_spill] sm:$0xff] %v8339_v56  ;;  %10464 = vst [vmem:[#allocation27_spill] sm:$0xff] %v8343_v57  ;;  %v10467_v16 = vrot.slane %v8163_v27, 1  ;;  %v10469_v51 = vrot.slane %v8167_v24, 1  ;;  %v8370_v54 = vpop.xlane.xlu1 %3548  ;;  %v2575_v50 = vcombine.high %v8285_v0, %v8285_v0 }
 0x346   : > { %v8324_v48 = vsel %vm1409_vm5, %v10457_v31, %v10456_v29  ;;  %v8332_v10 = vsel %vm1409_vm5, %v10460_v63, %v10459_v1  ;;  %v8352_v28 = vsel %vm1892_vm6, %v10465_v23, %v9661_v38  ;;  %10471 = vst [vmem:[#allocation30_spill] sm:$0xff] %v8370_v54  ;;  %v2576_v29 = vcombine.high %v8288_v61, %v8288_v61  ;;  %v10472_v31 = vld [vmem:[#allocation123_spill] sm:$0xff]  ;;  %v10473_v63 = vld [vmem:[#allocation124_spill] sm:$0xff] }
 0x347   : > { %10458 = vst [vmem:[#allocation62_spill] sm:$0xff] %v8324_v48  ;;  %10461 = vst [vmem:[#allocation95_spill] sm:$0xff] %v8332_v10  ;;  %v8360_v47 = vsel %vm1892_vm6, %v10467_v16, %v9660_v12  ;;  %v8368_v46 = vsel %vm1892_vm6, %v10469_v51, %v9662_v59  ;;  %v2249_v1 = vmul.f32 %v2201_v8, %v10472_v31  ;;  %v8378_v16 = vpop.xlane.xlu0 %3575  ;;  %v10475_v12 = vld [vmem:[#allocation126_spill] sm:$0xff]  ;;  %v10477_v51 = vld [vmem:[#allocation128_spill] sm:$0xff] }
 0x348   : > { %10466 = vst [vmem:[#allocation171_spill] sm:$0xff] %v8352_v28  ;;  %10468 = vst [vmem:[#allocation31_spill] sm:$0xff] %v8360_v47  ;;  %v2253_v23 = vmul.f32 %v2205_v25, %v10473_v63  ;;  %v2257_v38 = vmul.f32 %v2209_v2, %v10475_v12  ;;  %v2261_v34 = vmul.f32 %v2213_v53, %v10476_v6  ;;  %v2217_v55 = vld [vmem:[#allocation2 + $0x10] sm:$0xff] }
 0x349   : > { %10470 = vst [vmem:[#allocation26_spill] sm:$0xff] %v8368_v46  ;;  %10474 = vst [vmem:[#allocation172_spill] sm:$0xff] %v8378_v16  ;;  %v2265_v59 = vmul.f32 %v2201_v8, %v10477_v51  ;;  %v2269_v20 = vmul.f32 %v2205_v25, %v10478_v42  ;;  %v2221_v41 = vld [vmem:[#allocation2 + $0x30] sm:$0xff]  ;;  %v2273_v54 = vmul.f32 %v2209_v2, %v10479_v14 }
 0x34a   : > { %v2225_v33 = vld [vmem:[#allocation2 + $0x50] sm:$0xff]  ;;  %v2410_v31 = vmul.f32 %v8025_v7, %v8156_v19  ;;  %v2414_v63 = vmul.f32 %v8042_v44, %v8156_v19  ;;  %v2281_v13 = vadd.f32 %v2249_v1, %v2217_v55  ;;  %v2285_v8 = vadd.f32 %v2253_v23, %v2221_v41  ;;  %v10497_v23 = vld [vmem:[#allocation174_spill] sm:$0xff] }
 0x34b   : > { %v10480_v46 = vld [vmem:[#allocation131_spill] sm:$0xff]  ;;  %v2289_v51 = vadd.f32 %v2257_v38, %v2225_v33  ;;  %v2418_v25 = vmul.f32 %v8045_v4, %v8156_v19  ;;  %v10481_v7 = vrot.slane %v8335_v36, 1  ;;  %v10482_v44 = vrot.slane %v8171_v39, 1 }
 0x34c   : > { %v2277_v26 = vmul.f32 %v2213_v53, %v10480_v46  ;;  %v2229_v12 = vld [vmem:[#allocation2 + $0x70] sm:$0xff]  ;;  %v2422_v46 = vmul.f32 %v8068_v62, %v8156_v19  ;;  %v10484_v33 = vrot.slane %v8339_v56, 1  ;;  %v10485_v41 = vrot.slane %v8175_v5, 1  ;;  %2313 = vst.msk [vmem:[#allocation2 + $0x10] sm:$0xff] %vm520_vm0, %v2281_v13  ;;  %2317 = vst.msk [vmem:[#allocation2 + $0x30] sm:$0xff] %vm520_vm0, %v2285_v8  ;;  %v8413_v19 = vpop.xlane.xlu1 %3560  ;;  %v10512_v56 = vld [vmem:[#allocation178_spill] sm:$0xff] }
 0x34d   : > { %v2233_v16 = vld [vmem:[#allocation2 + $0x90] sm:$0xff]  ;;  %v2293_v14 = vadd.f32 %v2261_v34, %v2229_v12  ;;  %v8400_v55 = vsel %vm1892_vm6, %v10482_v44, %v10481_v7  ;;  %2321 = vst.msk [vmem:[#allocation2 + $0x50] sm:$0xff] %vm520_vm0, %v2289_v51  ;;  %10487 = vst [vmem:[#allocation137_spill] sm:$0xff] %v8413_v19  ;;  %v10488_v7 = vrot.slane %v8343_v57, 1  ;;  %v10489_v44 = vrot.slane %v8184_v43, 1  ;;  %v10500_v51 = vld [vmem:[#allocation176_spill] sm:$0xff] }
 0x34e   : > { %v2237_v6 = vld [vmem:[#allocation2 + $0xb0] sm:$0xff]  ;;  %v2297_v2 = vadd.f32 %v2265_v59, %v2233_v16  ;;  %10483 = vst [vmem:[#allocation170_spill] sm:$0xff] %v8400_v55  ;;  %v8408_v38 = vsel %vm1892_vm6, %v10485_v41, %v10484_v33  ;;  %v8432_v13 = vrot.slane %v2575_v50, %v10390_v21  ;;  %v8440_v1 = vrot.slane %v2576_v29, %v10390_v21  ;;  %v10498_v16 = vld [vmem:[#allocation32_spill] sm:$0xff]  ;;  %v10511_v55 = vld [vmem:[#allocation177_spill] sm:$0xff] }
 0x34f   : > { %v2241_v42 = vld [vmem:[#allocation2 + $0xd0] sm:$0xff]  ;;  %v2301_v53 = vadd.f32 %v2269_v20, %v2237_v6  ;;  %10486 = vst [vmem:[#allocation173_spill] sm:$0xff] %v8408_v38  ;;  %v8421_v34 = vsel %vm1892_vm6, %v10489_v44, %v10488_v7  ;;  %2325 = vst.msk [vmem:[#allocation2 + $0x70] sm:$0xff] %vm520_vm0, %v2293_v14  ;;  %v2462_v50 = vmul.f32 %v2414_v63, %v10497_v23  ;;  %v10501_v14 = vld [vmem:[#allocation57_spill] sm:$0xff] }
 0x350   : > { %v2245_v30 = vld [vmem:[#allocation2 + $0xf0] sm:$0xff]  ;;  %v2305_v20 = vadd.f32 %v2273_v54, %v2241_v42  ;;  %10490 = vst [vmem:[#allocation138_spill] sm:$0xff] %v8421_v34  ;;  %v8425_v54 = vrot.slane %v8285_v0, %v10390_v21  ;;  %10493 = vst [vmem:[#allocation193_spill] sm:$0xff] %v8432_v13  ;;  %v10496_v0 = vld [vmem:[#allocation28_spill] sm:$0xff]  ;;  %v2466_v12 = vmul.f32 %v2418_v25, %v10498_v16 }
 0x351   : > { %v2309_v59 = vadd.f32 %v2277_v26, %v2245_v30  ;;  %v8429_v26 = vrot.slane %v8288_v61, %v10390_v21  ;;  %2329 = vst.msk [vmem:[#allocation2 + $0x90] sm:$0xff] %vm520_vm0, %v2297_v2  ;;  %2333 = vst.msk [vmem:[#allocation2 + $0xb0] sm:$0xff] %vm520_vm0, %v2301_v53  ;;  %v8437_v30 = vpop.xlane.xlu0 %3593  ;;  %v2458_v61 = vmul.f32 %v2410_v31, %v10496_v0  ;;  %v10499_v6 = vld [vmem:[#allocation175_spill] sm:$0xff]  ;;  %v2634_v44 = vld [vmem:[#allocation2 + $0x8] sm:$0xff] }
 0x352   : > { %10491 = vst [vmem:[#allocation56_spill] sm:$0xff] %v8425_v54  ;;  %10494 = vst [vmem:[#allocation183_spill] sm:$0xff] %v8437_v30  ;;  %v2470_v8 = vmul.f32 %v2422_v46, %v10499_v6  ;;  %v2474_v42 = vmul.f32 %v2410_v31, %v10500_v51  ;;  %v2478_v2 = vmul.f32 %v2414_v63, %v10501_v14  ;;  %v10502_v53 = vld [vmem:[#allocation71_spill] sm:$0xff]  ;;  %v2638_v31 = vld [vmem:[#allocation2 + $0x28] sm:$0xff]  ;;  %v8467_v30 = vpop.xlane.xlu1 %3554 }
 0x353   : > { %10492 = vst [vmem:[#allocation182_spill] sm:$0xff] %v8429_v26  ;;  %10495 = vst [vmem:[#allocation184_spill] sm:$0xff] %v8440_v1  ;;  %v2482_v33 = vmul.f32 %v2418_v25, %v10502_v53  ;;  %v2618_v21 = vmul.f32 %v8425_v54, %v8243_v60  ;;  %v2622_v29 = vmul.f32 %v8429_v26, %v8243_v60  ;;  %v2642_v0 = vld [vmem:[#allocation2 + $0x48] sm:$0xff]  ;;  %v10505_v4 = vld [vmem:[#allocation39_spill] sm:$0xff] }
 0x354   : > { %2337 = vst.msk [vmem:[#allocation2 + $0xd0] sm:$0xff] %vm520_vm0, %v2305_v20  ;;  %2341 = vst.msk [vmem:[#allocation2 + $0xf0] sm:$0xff] %vm520_vm0, %v2309_v59  ;;  %v2626_v41 = vmul.f32 %v8432_v13, %v8243_v60  ;;  %v2630_v20 = vmul.f32 %v8440_v1, %v8243_v60  ;;  %v10503_v59 = vld [vmem:[#allocation61_spill] sm:$0xff]  ;;  %v2646_v16 = vld [vmem:[#allocation2 + $0x68] sm:$0xff] }
 0x355   : > { %v2486_v7 = vmul.f32 %v2422_v46, %v10503_v59  ;;  %v2650_v6 = vld [vmem:[#allocation2 + $0x88] sm:$0xff]  ;;  %v10504_v13 = vld [vmem:[#allocation73_spill] sm:$0xff]  ;;  %v2670_v60 = vmul.f32 %v2622_v29, %v10505_v4  ;;  %v10506_v1 = vld [vmem:[#allocation75_spill] sm:$0xff]  ;;  %10508 = vst [vmem:[#allocation106_spill] sm:$0xff] %v8467_v30 }
 0x356   : > { %v2654_v51 = vld [vmem:[#allocation2 + $0xa8] sm:$0xff]  ;;  %v2666_v62 = vmul.f32 %v2618_v21, %v10504_v13  ;;  %v2674_v46 = vmul.f32 %v2626_v41, %v10506_v1  ;;  %v2426_v63 = vld [vmem:[#allocation2 + $0x10] sm:$0xff]  ;;  %v10510_v19 = vld [vmem:[#allocation36_spill] sm:$0xff]  ;;  %v2690_v57 = vmul.f32 %v2626_v41, %v10511_v55  ;;  %v2694_v36 = vmul.f32 %v2630_v20, %v10512_v56  ;;  %v8473_v13 = vpop.xlane.xlu0 %3605 }
 0x357   : > { %v2658_v14 = vld [vmem:[#allocation2 + $0xc8] sm:$0xff]  ;;  %v2430_v26 = vld [vmem:[#allocation2 + $0x30] sm:$0xff]  ;;  %v2686_v38 = vmul.f32 %v2622_v29, %v10510_v19  ;;  %v2490_v47 = vadd.f32 %v2458_v61, %v2426_v63  ;;  %v10518_v61 = vrot.slane %v8163_v27, 7 }
 0x358   : > { %v2662_v53 = vld [vmem:[#allocation2 + $0xe8] sm:$0xff]  ;;  %v2434_v25 = vld [vmem:[#allocation2 + $0x50] sm:$0xff]  ;;  %v2698_v10 = vadd.f32 %v2666_v62, %v2634_v44  ;;  %v2706_v56 = vadd.f32 %v2674_v46, %v2642_v0 }
 0x359   : > { %v10507_v59 = vld [vmem:[#allocation34_spill] sm:$0xff]  ;;  %v2438_v4 = vld [vmem:[#allocation2 + $0x70] sm:$0xff]  ;;  %v2498_v28 = vadd.f32 %v2466_v12, %v2434_v25  ;;  %2522 = vst.msk [vmem:[#allocation2 + $0x10] sm:$0xff] %vm520_vm0, %v2490_v47  ;;  %v10513_v47 = vld [vmem:[#allocation53_spill] sm:$0xff]  ;;  %v10528_v25 = vrot.slane %v8159_v22, 5 }
 0x35a   : > { %v2678_v34 = vmul.f32 %v2630_v20, %v10507_v59  ;;  %v10509_v54 = vld [vmem:[#allocation38_spill] sm:$0xff]  ;;  %v2442_v35 = vld [vmem:[#allocation2 + $0x90] sm:$0xff]  ;;  %v2494_v59 = vadd.f32 %v2462_v50, %v2430_v26  ;;  %v2502_v18 = vadd.f32 %v2470_v8, %v2438_v4  ;;  %2730 = vst.msk [vmem:[#allocation2 + $0x8] sm:$0xff] %vm520_vm0, %v2698_v10  ;;  %v2726_v26 = vadd.f32 %v2694_v36, %v2662_v53  ;;  %v8512_v12 = vpop.xlane.xlu0 %3587  ;;  %v10519_v8 = vld [vmem:[#allocation41_spill] sm:$0xff] }
 0x35b   : > { %v2682_v23 = vmul.f32 %v2618_v21, %v10509_v54  ;;  %v2446_v1 = vld [vmem:[#allocation2 + $0xb0] sm:$0xff]  ;;  %v2506_v3 = vadd.f32 %v2474_v42, %v2442_v35  ;;  %v2702_v21 = vadd.f32 %v2670_v60, %v2638_v31  ;;  %2530 = vst.msk [vmem:[#allocation2 + $0x50] sm:$0xff] %vm520_vm0, %v2498_v28  ;;  %v2718_v35 = vadd.f32 %v2686_v38, %v2654_v51 }
 0x35c   : > { %v2450_v48 = vld [vmem:[#allocation2 + $0xd0] sm:$0xff]  ;;  %v2510_v54 = vadd.f32 %v2478_v2, %v2446_v1  ;;  %2526 = vst.msk [vmem:[#allocation2 + $0x30] sm:$0xff] %vm520_vm0, %v2494_v59  ;;  %v2710_v55 = vadd.f32 %v2678_v34, %v2646_v16  ;;  %2534 = vst.msk [vmem:[#allocation2 + $0x70] sm:$0xff] %vm520_vm0, %v2502_v18  ;;  %v10515_v28 = vrot.slane %v8159_v22, 7  ;;  %v9694_v18 = vrot.slane %v8171_v39, 5  ;;  %v10521_v2 = vld [vmem:[#allocation45_spill] sm:$0xff] }
 0x35d   : > { %v2454_v30 = vld [vmem:[#allocation2 + $0xf0] sm:$0xff]  ;;  %v2514_v19 = vadd.f32 %v2482_v33, %v2450_v48  ;;  %2538 = vst.msk [vmem:[#allocation2 + $0x90] sm:$0xff] %vm520_vm0, %v2506_v3  ;;  %v2714_v62 = vadd.f32 %v2682_v23, %v2650_v6  ;;  %v2722_v48 = vadd.f32 %v2690_v57, %v2658_v14  ;;  %2734 = vst.msk [vmem:[#allocation2 + $0x28] sm:$0xff] %vm520_vm0, %v2702_v21  ;;  %v8495_v3 = vpop.xlane.xlu1 %3572  ;;  %v9693_v10 = vrot.slane %v8175_v5, 5  ;;  %v10530_v16 = vld [vmem:[#allocation66_spill] sm:$0xff] }
 0x35e   : > { %v2518_v29 = vadd.f32 %v2486_v7, %v2454_v30  ;;  %2542 = vst.msk [vmem:[#allocation2 + $0xb0] sm:$0xff] %vm520_vm0, %v2510_v54  ;;  %v10514_v30 = vrot.slane %v10513_v47, 7  ;;  %2738 = vst.msk [vmem:[#allocation2 + $0x48] sm:$0xff] %vm520_vm0, %v2706_v56  ;;  %v9692_v36 = vrot.slane %v8184_v43, 5  ;;  %v10516_v57 = vld [vmem:[#allocation59_spill] sm:$0xff]  ;;  %v10520_v42 = vrot.slane %v10519_v8, 5 }
 0x35f   : > { %2546 = vst.msk [vmem:[#allocation2 + $0xd0] sm:$0xff] %vm520_vm0, %v2514_v19  ;;  %2742 = vst.msk [vmem:[#allocation2 + $0x68] sm:$0xff] %vm520_vm0, %v2710_v55  ;;  %v10517_v38 = vrot.slane %v10516_v57, 7  ;;  %v10522_v33 = vrot.slane %v10521_v2, 5  ;;  %v10523_v20 = vld [vmem:[#allocation43_spill] sm:$0xff]  ;;  %v10527_v63 = vrot.slane %v10513_v47, 5 }
 0x360   : > { %v8489_v34 = vsel %vm1409_vm5, %v10515_v28, %v10514_v30  ;;  %2550 = vst.msk [vmem:[#allocation2 + $0xf0] sm:$0xff] %vm520_vm0, %v2518_v29  ;;  %2746 = vst.msk [vmem:[#allocation2 + $0x88] sm:$0xff] %vm520_vm0, %v2714_v62  ;;  %v10524_v7 = vrot.slane %v10523_v20, 5  ;;  %v10525_v44 = vld [vmem:[#allocation47_spill] sm:$0xff]  ;;  %v10531_v6 = vrot.slane %v10530_v16, 7  ;;  %v10532_v51 = vrot.slane %v8167_v24, 7 }
 0x361   : > { %v8506_v50 = vsel %vm1409_vm5, %v10518_v61, %v10517_v38  ;;  %2750 = vst.msk [vmem:[#allocation2 + $0xa8] sm:$0xff] %vm520_vm0, %v2718_v35  ;;  %2754 = vst.msk [vmem:[#allocation2 + $0xc8] sm:$0xff] %vm520_vm0, %v2722_v48  ;;  %v8520_v41 = vsel %vm1135_vm3, %v10522_v33, %v10520_v42  ;;  %v10526_v31 = vrot.slane %v10525_v44, 5  ;;  %v8536_v23 = vsel %vm1135_vm3, %v10528_v25, %v10527_v63  ;;  %v10539_v54 = vld [vmem:[#allocation69_spill] sm:$0xff]  ;;  %v10550_v38 = vld [vmem:[#allocation159_spill] sm:$0xff] }
 0x362   : > { %2758 = vst.msk [vmem:[#allocation2 + $0xe8] sm:$0xff] %vm520_vm0, %v2726_v26  ;;  %10529 = vst [vmem:[#allocation49_spill] sm:$0xff] %v8536_v23  ;;  %v8544_v14 = vsel %vm1409_vm5, %v10532_v51, %v10531_v6  ;;  %v10533_v53 = vrot.slane %v10516_v57, 5  ;;  %v10534_v60 = vrot.slane %v8163_v27, 5  ;;  %v10536_v4 = vrot.slane %v10530_v16, 5  ;;  %v10544_v62 = vld [vmem:[#allocation77_spill] sm:$0xff] }
 0x363   : > { %v8528_v0 = vsel %vm1135_vm3, %v10526_v31, %v10524_v7  ;;  %v10537_v1 = vrot.slane %v8167_v24, 5  ;;  %v10540_v21 = vrot.slane %v10539_v54, 5  ;;  %v10542_v29 = vrot.slane %v10539_v54, 7  ;;  %v10547_v26 = vld [vmem:[#allocation79_spill] sm:$0xff]  ;;  %v1249_v28 = vld [vmem:[#allocation2] sm:$0xff]  ;;  %v10554_v63 = vld [vmem:[#allocation150_spill] sm:$0xff] }
 0x364   : > { %v8552_v46 = vsel %vm1135_vm3, %v10534_v60, %v10533_v53  ;;  %v10543_v56 = vrot.slane %v8171_v39, 7  ;;  %v10545_v35 = vrot.slane %v10544_v62, 5  ;;  %v10548_v47 = vrot.slane %v10547_v26, 5  ;;  %v1253_v57 = vld [vmem:[#allocation2 + $0x20] sm:$0xff]  ;;  %v10555_v16 = vld [vmem:[#allocation151_spill] sm:$0xff] }
 0x365   : > { %10535 = vst [vmem:[#allocation55_spill] sm:$0xff] %v8552_v46  ;;  %v8560_v59 = vsel %vm1135_vm3, %v10537_v1, %v10536_v4  ;;  %v8568_v19 = vsel %vm1135_vm3, %v9694_v18, %v10540_v21  ;;  %v1281_v61 = vmul.f32 %v10550_v38, %v8520_v41  ;;  %v10551_v8 = vrot.slane %v10544_v62, 7  ;;  %v1257_v33 = vld [vmem:[#allocation2 + $0x40] sm:$0xff]  ;;  %v10558_v62 = vld [vmem:[#allocation46_spill] sm:$0xff] }
 0x366   : > { %10538 = vst [vmem:[#allocation64_spill] sm:$0xff] %v8560_v59  ;;  %10541 = vst [vmem:[#allocation65_spill] sm:$0xff] %v8568_v19  ;;  %v8576_v55 = vsel %vm1409_vm5, %v10543_v56, %v10542_v29  ;;  %v8584_v48 = vsel %vm1135_vm3, %v9693_v10, %v10545_v35  ;;  %v8592_v30 = vsel %vm1135_vm3, %v9692_v36, %v10548_v47  ;;  %v10552_v42 = vrot.slane %v8175_v5, 7  ;;  %v1261_v20 = vld [vmem:[#allocation2 + $0x60] sm:$0xff]  ;;  %v10560_v10 = vld [vmem:[#allocation146_spill] sm:$0xff] }
 0x367   : > { %10546 = vst [vmem:[#allocation68_spill] sm:$0xff] %v8584_v48  ;;  %10549 = vst [vmem:[#allocation76_spill] sm:$0xff] %v8592_v30  ;;  %v1265_v7 = vld [vmem:[#allocation2 + $0x80] sm:$0xff]  ;;  %v1289_v25 = vmul.f32 %v10554_v63, %v8536_v23  ;;  %v1293_v6 = vmul.f32 %v10555_v16, %v8552_v46  ;;  %v10556_v51 = vrot.slane %v10547_v26, 7  ;;  %v10557_v53 = vrot.slane %v8184_v43, 7  ;;  %v8628_v26 = vpop.xlane.xlu1 %3584 }
 0x368   : > { %v8602_v2 = vsel %vm1409_vm5, %v10552_v42, %v10551_v8  ;;  %v10553_v44 = vld [vmem:[#allocation149_spill] sm:$0xff]  ;;  %v1297_v21 = vmul.f32 %v10550_v38, %v8560_v59  ;;  %v1305_v56 = vmul.f32 %v10554_v63, %v8584_v48  ;;  %v8626_v35 = vmul.f32 %v10558_v62, %v8304_v17 }
 0x369   : > { %v1285_v31 = vmul.f32 %v10553_v44, %v8528_v0  ;;  %v8616_v60 = vsel %vm1409_vm5, %v10557_v53, %v10556_v51  ;;  %v1269_v4 = vld [vmem:[#allocation2 + $0xa0] sm:$0xff]  ;;  %v1301_v29 = vmul.f32 %v10553_v44, %v8568_v19  ;;  %v1309_v47 = vmul.f32 %v10555_v16, %v8592_v30  ;;  %v10559_v51 = vld [vmem:[#allocation44_spill] sm:$0xff]  ;;  %v8636_v53 = vpop.xlane.xlu0 %3599 }
 0x36a   : > { %v1273_v1 = vld [vmem:[#allocation2 + $0xc0] sm:$0xff]  ;;  %v1313_v8 = vadd.f32 %v1281_v61, %v1249_v28  ;;  %v8634_v38 = vmul.f32 %v10559_v51, %v8312_v11  ;;  %v1321_v44 = vadd.f32 %v1289_v25, %v1257_v33  ;;  %v1325_v36 = vadd.f32 %v1293_v6, %v1261_v20  ;;  %v10577_v25 = vld [vmem:[#allocation103_spill] sm:$0xff]  ;;  %v1264_v6 = vld [vmem:[#allocation2 + $0x78] sm:$0xff] }
 0x36b   : > { %v1277_v54 = vld [vmem:[#allocation2 + $0xe0] sm:$0xff]  ;;  %v1317_v42 = vadd.f32 %v1285_v31, %v1253_v57  ;;  %v1329_v63 = vadd.f32 %v1297_v21, %v1265_v7  ;;  %v8640_v17 = vmul.f32 %v10560_v10, %v8252_v45  ;;  %v1333_v62 = vadd.f32 %v1301_v29, %v1269_v4  ;;  %v1268_v4 = vld [vmem:[#allocation2 + $0x98] sm:$0xff] }
 0x36c   : > { %v1337_v18 = vadd.f32 %v1305_v56, %v1273_v1  ;;  %v1341_v48 = vadd.f32 %v1309_v47, %v1277_v54  ;;  %1345 = vst.msk [vmem:[#allocation2] sm:$0xff] %vm520_vm0, %v1313_v8  ;;  %1353 = vst.msk [vmem:[#allocation2 + $0x40] sm:$0xff] %vm520_vm0, %v1321_v44  ;;  %v10561_v11 = vrot.slane %v8159_v22, 5  ;;  %v10562_v45 = vrot.slane %v10438_v58, 5  ;;  %v10580_v1 = vld [vmem:[#allocation197_spill] sm:$0xff]  ;;  %v1272_v54 = vld [vmem:[#allocation2 + $0xb8] sm:$0xff] }
 0x36d   : > { %1349 = vst.msk [vmem:[#allocation2 + $0x20] sm:$0xff] %vm520_vm0, %v1317_v42  ;;  %1357 = vst.msk [vmem:[#allocation2 + $0x60] sm:$0xff] %vm520_vm0, %v1325_v36  ;;  %v10564_v57 = vrot.slane %v8163_v27, 5  ;;  %v10565_v61 = vrot.slane %v10444_v40, 5  ;;  %v10567_v36 = vrot.slane %v8167_v24, 5  ;;  %v10568_v33 = vrot.slane %v10451_v15, 5 }
 0x36e   : > { %1361 = vst.msk [vmem:[#allocation2 + $0x80] sm:$0xff] %vm520_vm0, %v1329_v63  ;;  %v8654_v28 = vsel %vm1135_vm3, %v10562_v45, %v10561_v11  ;;  %1365 = vst.msk [vmem:[#allocation2 + $0xa0] sm:$0xff] %vm520_vm0, %v1333_v62  ;;  %v10570_v58 = vrot.slane %v8171_v39, 5  ;;  %v10571_v40 = vrot.slane %v10454_v32, 5  ;;  %v10573_v15 = vrot.slane %v8175_v5, 5  ;;  %v1260_v32 = vld [vmem:[#allocation2 + $0x58] sm:$0xff]  ;;  %v8708_v63 = vpop.xlane.xlu1 %3566 }
 0x36f   : > { %10563 = vst [vmem:[#allocation123_spill] sm:$0xff] %v8654_v28  ;;  %v8662_v9 = vsel %vm1135_vm3, %v10565_v61, %v10564_v57  ;;  %v8670_v20 = vsel %vm1135_vm3, %v10568_v33, %v10567_v36  ;;  %1369 = vst.msk [vmem:[#allocation2 + $0xc0] sm:$0xff] %vm520_vm0, %v1337_v18  ;;  %v10574_v31 = vrot.slane %v10349_v49, 5  ;;  %v10576_v18 = vrot.slane %v8184_v43, 5  ;;  %v1276_v21 = vld [vmem:[#allocation2 + $0xd8] sm:$0xff]  ;;  %v10582_v47 = vld [vmem:[#allocation191_spill] sm:$0xff] }
 0x370   : > { %10566 = vst [vmem:[#allocation124_spill] sm:$0xff] %v8662_v9  ;;  %10569 = vst [vmem:[#allocation126_spill] sm:$0xff] %v8670_v20  ;;  %v8682_v7 = vsel %vm1135_vm3, %v10571_v40, %v10570_v58  ;;  %4881 = vrcp.f32 %v10580_v1  ;;  %v1280_v49 = vld [vmem:[#allocation2 + $0xf8] sm:$0xff]  ;;  %v1296_v8 = vmul.f32 %v10582_v47, %v8662_v9  ;;  %v10586_v61 = vld [vmem:[#allocation145_spill] sm:$0xff]  ;;  %v8720_v58 = vpop.xlane.xlu0 %3617 }
 0x371   : > { %1373 = vst.msk [vmem:[#allocation2 + $0xe0] sm:$0xff] %vm520_vm0, %v1341_v48  ;;  %10572 = vst [vmem:[#allocation127_spill] sm:$0xff] %v8682_v7  ;;  %v8690_v52 = vsel %vm1135_vm3, %v10574_v31, %v10573_v15  ;;  %v10578_v48 = vrot.slane %v10577_v25, 5  ;;  %v10581_v29 = vld [vmem:[#allocation192_spill] sm:$0xff]  ;;  %v10587_v36 = vld [vmem:[#allocation147_spill] sm:$0xff] }
 0x372   : > { %10575 = vst [vmem:[#allocation128_spill] sm:$0xff] %v8690_v52  ;;  %v1292_v56 = vmul.f32 %v10581_v29, %v8654_v28  ;;  %v10583_v42 = vld [vmem:[#allocation132_spill] sm:$0xff]  ;;  %v1308_v45 = vmul.f32 %v10581_v29, %v8690_v52  ;;  %v8718_v33 = vmul.f32 %v10587_v36, %v10586_v61  ;;  %v1328_v15 = vadd.f32 %v1296_v8, %v1264_v6  ;;  %v10596_v8 = vld [vmem:[#allocation194_spill] sm:$0xff] }
 0x373   : > { %v8698_v16 = vsel %vm1135_vm3, %v10578_v48, %v10576_v18  ;;  %v1300_v51 = vmul.f32 %v10583_v42, %v8670_v20  ;;  %v10584_v44 = vld [vmem:[#allocation108_spill] sm:$0xff]  ;;  %v10588_v18 = vld [vmem:[#allocation106_spill] sm:$0xff]  ;;  %v10589_v42 = vld [vmem:[#allocation37_spill] sm:$0xff] }
 0x374   : > { %10579 = vst [vmem:[#allocation129_spill] sm:$0xff] %v8698_v16  ;;  %4883 = vrcp.f32 %v10584_v44  ;;  %v10585_v62 = vld [vmem:[#allocation148_spill] sm:$0xff]  ;;  %v1312_v57 = vmul.f32 %v10582_v47, %v8698_v16  ;;  %v1324_v40 = vadd.f32 %v1292_v56, %v1260_v32  ;;  %v1340_v48 = vadd.f32 %v1308_v45, %v1276_v21  ;;  %v10592_v16 = vld [vmem:[#allocation33_spill] sm:$0xff]  ;;  %1360 = vst.msk [vmem:[#allocation2 + $0x78] sm:$0xff] %vm520_vm0, %v1328_v15 }
 0x375   : > { %v1304_v11 = vmul.f32 %v10585_v62, %v8682_v7  ;;  %v1332_v31 = vadd.f32 %v1300_v51, %v1268_v4  ;;  %4885 = vrcp.f32 %v10588_v18  ;;  %v1563_v29 = vmul.f32 %v10589_v42, %v8489_v34  ;;  %v10590_v44 = vld [vmem:[#allocation72_spill] sm:$0xff]  ;;  %v1523_v32 = vld [vmem:[#allocation2] sm:$0xff]  ;;  %v10593_v21 = vld [vmem:[#allocation35_spill] sm:$0xff]  ;;  %v8751_v18 = vpop.xlane.xlu1 %3578 }
 0x376   : > { %v1344_v1 = vadd.f32 %v1312_v57, %v1280_v49  ;;  %v1567_v47 = vmul.f32 %v10590_v44, %v8506_v50  ;;  %v10591_v62 = vld [vmem:[#allocation156_spill] sm:$0xff]  ;;  %v1575_v52 = vmul.f32 %v10592_v16, %v8576_v55  ;;  %v1527_v6 = vld [vmem:[#allocation2 + $0x20] sm:$0xff]  ;;  %1356 = vst.msk [vmem:[#allocation2 + $0x58] sm:$0xff] %vm520_vm0, %v1324_v40  ;;  %v1579_v34 = vmul.f32 %v10589_v42, %v8602_v2  ;;  %v10597_v15 = vld [vmem:[#allocation62_spill] sm:$0xff] }
 0x377   : > { %v1336_v25 = vadd.f32 %v1304_v11, %v1272_v54  ;;  %v1571_v61 = vmul.f32 %v10591_v62, %v8544_v14  ;;  %1364 = vst.msk [vmem:[#allocation2 + $0x98] sm:$0xff] %vm520_vm0, %v1332_v31  ;;  %v1583_v50 = vmul.f32 %v10590_v44, %v8616_v60  ;;  %v1531_v4 = vld [vmem:[#allocation2 + $0x40] sm:$0xff]  ;;  %v1587_v49 = vadd.f32 %v10593_v21, %v1523_v32  ;;  %v10594_v55 = vld [vmem:[#allocation60_spill] sm:$0xff]  ;;  %v10598_v44 = vld [vmem:[#allocation95_spill] sm:$0xff] }
 0x378   : > { %v1535_v54 = vld [vmem:[#allocation2 + $0x60] sm:$0xff]  ;;  %v1591_v16 = vadd.f32 %v10594_v55, %v1527_v6  ;;  %1372 = vst.msk [vmem:[#allocation2 + $0xd8] sm:$0xff] %vm520_vm0, %v1340_v48  ;;  %1376 = vst.msk [vmem:[#allocation2 + $0xf8] sm:$0xff] %vm520_vm0, %v1344_v1  ;;  %v10595_v56 = vld [vmem:[#allocation152_spill] sm:$0xff]  ;;  %v1595_v45 = vadd.f32 %v1563_v29, %v1531_v4  ;;  %v8749_v31 = vmul.f32 %v10560_v10, %v10597_v15  ;;  %v4878_v1 = vpop.eup %4877  ;;  %v8771_v6 = vpop.xlane.xlu0 %3629 }
 0x379   : > { %v1539_v14 = vld [vmem:[#allocation2 + $0x80] sm:$0xff]  ;;  %1368 = vst.msk [vmem:[#allocation2 + $0xb8] sm:$0xff] %vm520_vm0, %v1336_v25  ;;  %v8745_v51 = vmul.f32 %v10596_v8, %v10595_v56  ;;  %v1599_v57 = vadd.f32 %v1567_v47, %v1535_v54  ;;  %1619 = vst.msk [vmem:[#allocation2] sm:$0xff] %vm520_vm0, %v1587_v49  ;;  %v8757_v62 = vmul.f32 %v10587_v36, %v10598_v44  ;;  %v10599_v29 = vld [vmem:[#allocation54_spill] sm:$0xff]  ;;  %v4880_v36 = vpop.eup %4879 }
 0x37a   : > { %v1543_v2 = vld [vmem:[#allocation2 + $0xa0] sm:$0xff]  ;;  %v1603_v40 = vadd.f32 %v1571_v61, %v1539_v14  ;;  %1623 = vst.msk [vmem:[#allocation2 + $0x20] sm:$0xff] %vm520_vm0, %v1591_v16  ;;  %v8761_v47 = vmul.f32 %v8159_v22, %v10599_v29  ;;  %10602 = vst [vmem:[#allocation130_spill] sm:$0xff] %v8771_v6  ;;  %v4642_v22 = vpop.f32.mrb[16].mxu0  ;;  %v10606_v14 = vld [vmem:[#allocation171_spill] sm:$0xff] }
 0x37b   : > { %v1547_v11 = vld [vmem:[#allocation2 + $0xc0] sm:$0xff]  ;;  %v1607_v25 = vadd.f32 %v1575_v52, %v1543_v2  ;;  %v10601_v52 = vld [vmem:[#allocation154_spill] sm:$0xff]  ;;  %1627 = vst.msk [vmem:[#allocation2 + $0x40] sm:$0xff] %vm520_vm0, %v1595_v45  ;;  %1631 = vst.msk [vmem:[#allocation2 + $0x60] sm:$0xff] %vm520_vm0, %v1599_v57  ;;  %v8791_v4 = vmul.f32 %v4878_v1, %v4642_v22  ;;  %v8793_v54 = vpop.f32.mrb[17].mxu0  ;;  %v4650_v45 = vpop.f32.mrb[16].mxu1 }
 0x37c   : > { %v1551_v60 = vld [vmem:[#allocation2 + $0xe0] sm:$0xff]  ;;  %v1611_v48 = vadd.f32 %v1579_v34, %v1547_v11  ;;  %v8769_v32 = vmul.f32 %v8171_v39, %v10601_v52  ;;  %1635 = vst.msk [vmem:[#allocation2 + $0x80] sm:$0xff] %vm520_vm0, %v1603_v40  ;;  %v8782_v39 = vmul.f32 %v8175_v5, %v10599_v29  ;;  %10605 = vst [vmem:[#allocation28_spill] sm:$0xff] %v8793_v54  ;;  %v10607_v21 = vld [vmem:[#allocation155_spill] sm:$0xff]  ;;  %v8807_v57 = vpop.f32.mrb[18].mxu0  ;;  %v3761_v52 = vpop.f32.mrb[17].mxu1 }
 0x37d   : > { %v1615_v42 = vadd.f32 %v1583_v50, %v1551_v60  ;;  %v10600_v10 = vld [vmem:[#allocation153_spill] sm:$0xff]  ;;  %1639 = vst.msk [vmem:[#allocation2 + $0xa0] sm:$0xff] %vm520_vm0, %v1607_v25  ;;  %10604 = vst [vmem:[#allocation131_spill] sm:$0xff] %v8791_v4  ;;  %v8797_v49 = vmul.f32 %v10607_v21, %v10606_v14  ;;  %v10608_v5 = vld [vmem:[#allocation31_spill] sm:$0xff]  ;;  %v3709_v22 = vpop.f32.mrb[19].mxu0  ;;  %v8820_v7 = vpop.f32.mrb[18].mxu1 }
 0x37e   : > { %v8765_v61 = vmul.f32 %v8167_v24, %v10600_v10  ;;  %v10603_v34 = vld [vmem:[#allocation157_spill] sm:$0xff]  ;;  %1643 = vst.msk [vmem:[#allocation2 + $0xc0] sm:$0xff] %vm520_vm0, %v1611_v48  ;;  %v8801_v55 = vmul.f32 %v8745_v51, %v10608_v5  ;;  %v10609_v16 = vld [vmem:[#allocation52_spill] sm:$0xff]  ;;  %v10610_v11 = vld [vmem:[#allocation58_spill] sm:$0xff]  ;;  %v8815_v10 = vmul.f32 %v4880_v36, %v4650_v45  ;;  %v3764_v30 = vpop.f32.mrb[19].mxu1 }
 0x37f   : > { %v8778_v24 = vmul.f32 %v8163_v27, %v10603_v34  ;;  %v8786_v50 = vmul.f32 %v8184_v43, %v10603_v34  ;;  %1647 = vst.msk [vmem:[#allocation2 + $0xe0] sm:$0xff] %vm520_vm0, %v1615_v42  ;;  %v4882_v27 = vpop.eup %4881  ;;  %v4987_v43 = vld [vmem:[%s5586_s16] sm:$0xff]  ;;  %v10611_v15 = vld [vmem:[#allocation186_spill] sm:$0xff]  ;;  %v10612_v25 = vld [vmem:[#allocation195_spill] sm:$0xff] }
 0x380   : > { %v1764_v56 = vmul.f32 %v4987_v43, %v10609_v16  ;;  %v4988_v2 = vld [vmem:[%s5586_s16 + $0x20] sm:$0xff]  ;;  %v4884_v40 = vpop.eup %4883  ;;  %v1772_v48 = vmul.f32 %v10612_v25, %v10611_v15  ;;  %v10613_v42 = vld [vmem:[#allocation196_spill] sm:$0xff]  ;;  %v10614_v44 = vld [vmem:[#allocation63_spill] sm:$0xff]  ;;  %10615 = vst [vmem:[#allocation174_spill] sm:$0xff] %v8815_v10 }
 0x381   : > { %v1768_v60 = vmul.f32 %v4988_v2, %v10610_v11  ;;  %v1780_v1 = vmul.f32 %v10613_v42, %v10609_v16  ;;  %v1784_v29 = vmul.f32 %v10614_v44, %v10610_v11  ;;  %v1534_v34 = vld [vmem:[#allocation2 + $0x58] sm:$0xff]  ;;  %v10616_v43 = vld [vmem:[#allocation113_spill] sm:$0xff]  ;;  %v8818_v2 = vmul.f32 %v4882_v27, %v3761_v52  ;;  %v4886_v28 = vpop.eup %4885  ;;  %v10618_v11 = vld [vmem:[#allocation50_spill] sm:$0xff] }
 0x382   : > { %v1538_v14 = vld [vmem:[#allocation2 + $0x78] sm:$0xff]  ;;  %4887 = vrcp.f32 %v10616_v43  ;;  %v4139_v4 = vmul.f32 %v4884_v40, %v3709_v22  ;;  %v1598_v16 = vadd.f32 %v8640_v17, %v1534_v34  ;;  %v10619_v36 = vld [vmem:[#allocation93_spill] sm:$0xff]  ;;  %v10620_v10 = vld [vmem:[#allocation134_spill] sm:$0xff]  ;;  %v8830_v22 = vpop.xlane.xlu0 %3611  ;;  %v4143_v59 = vmul.f32 %v4886_v28, %v3764_v30 }
 0x383   : > { %v1542_v5 = vld [vmem:[#allocation2 + $0x98] sm:$0xff]  ;;  %10617 = vst [vmem:[#allocation32_spill] sm:$0xff] %v8818_v2  ;;  %v1776_v45 = vmul.f32 %v10619_v36, %v10618_v11  ;;  %4889 = vrcp.f32 %v10620_v10  ;;  %v4171_v6 = vld [vmem:[#allocation2 + $0x8] sm:$0xff]  ;;  %v1602_v43 = vadd.f32 %v8718_v33, %v1538_v14  ;;  %10622 = vst [vmem:[#allocation175_spill] sm:$0xff] %v8830_v22  ;;  %v8832_v2 = vpop.xlane.xlu1 %3596 }
 0x384   : > { %v1546_v20 = vld [vmem:[#allocation2 + $0xb8] sm:$0xff]  ;;  %v4175_v54 = vld [vmem:[#allocation2 + $0x28] sm:$0xff]  ;;  %v1606_v27 = vadd.f32 %v8626_v35, %v1542_v5  ;;  %10623 = vst [vmem:[#allocation176_spill] sm:$0xff] %v8832_v2  ;;  %v1732_v17 = vld [vmem:[#allocation2] sm:$0xff]  ;;  %v4203_v19 = vadd.f32 %v4171_v6, %v4139_v4 }
 0x385   : > { %v1550_v9 = vld [vmem:[#allocation2 + $0xd8] sm:$0xff]  ;;  %v1736_v34 = vld [vmem:[#allocation2 + $0x20] sm:$0xff]  ;;  %v1610_v10 = vadd.f32 %v8634_v38, %v1546_v20  ;;  %1630 = vst.msk [vmem:[#allocation2 + $0x58] sm:$0xff] %vm520_vm0, %v1598_v16  ;;  %v10624_v33 = vld [vmem:[#allocation27_spill] sm:$0xff]  ;;  %v1796_v23 = vadd.f32 %v1764_v56, %v1732_v17  ;;  %v4207_v56 = vadd.f32 %v4175_v54, %v4143_v59 }
 0x386   : > { %v10621_v40 = vld [vmem:[#allocation96_spill] sm:$0xff]  ;;  %v1792_v35 = vmul.f32 %v10624_v33, %v10618_v11  ;;  %v1740_v14 = vld [vmem:[#allocation2 + $0x40] sm:$0xff]  ;;  %v1800_v22 = vadd.f32 %v1768_v60, %v1736_v34  ;;  %v1614_v2 = vadd.f32 %v8749_v31, %v1550_v9  ;;  %1634 = vst.msk [vmem:[#allocation2 + $0x78] sm:$0xff] %vm520_vm0, %v1602_v43  ;;  %1638 = vst.msk [vmem:[#allocation2 + $0x98] sm:$0xff] %vm520_vm0, %v1606_v27 }
 0x387   : > { %v1788_v52 = vmul.f32 %v10621_v40, %v10611_v15  ;;  %v1554_v46 = vld [vmem:[#allocation2 + $0xf8] sm:$0xff]  ;;  %v1744_v5 = vld [vmem:[#allocation2 + $0x60] sm:$0xff]  ;;  %v1804_v20 = vadd.f32 %v1772_v48, %v1740_v14  ;;  %4235 = vst.msk [vmem:[%s8842_s8 + $0x8] sm:$0xff] %vm520_vm0, %v4203_v19  ;;  %1642 = vst.msk [vmem:[#allocation2 + $0xb8] sm:$0xff] %vm520_vm0, %v1610_v10 }
 0x388   : > { %v1748_v15 = vld [vmem:[#allocation2 + $0x80] sm:$0xff]  ;;  %v1808_v6 = vadd.f32 %v1776_v45, %v1744_v5  ;;  %v10625_v9 = vld [vmem:[#allocation114_spill] sm:$0xff]  ;;  %1828 = vst.msk [vmem:[#allocation2] sm:$0xff] %vm520_vm0, %v1796_v23  ;;  %1832 = vst.msk [vmem:[#allocation2 + $0x20] sm:$0xff] %vm520_vm0, %v1800_v22  ;;  %v1618_v23 = vadd.f32 %v8757_v62, %v1554_v46 }
 0x389   : > { %v1752_v30 = vld [vmem:[#allocation2 + $0xa0] sm:$0xff]  ;;  %v1812_v4 = vadd.f32 %v1780_v1, %v1748_v15  ;;  %4891 = vrcp.f32 %v10625_v9  ;;  %1646 = vst.msk [vmem:[#allocation2 + $0xd8] sm:$0xff] %vm520_vm0, %v1614_v2  ;;  %v10626_v48 = vld [vmem:[#allocation26_spill] sm:$0xff]  ;;  %v10627_v1 = vld [vmem:[#allocation67_spill] sm:$0xff]  ;;  %v10641_v15 = vrot.slane %v10613_v42, 1 }
 0x38a   : > { %v1756_v28 = vld [vmem:[#allocation2 + $0xc0] sm:$0xff]  ;;  %v1816_v31 = vadd.f32 %v1784_v29, %v1752_v30  ;;  %v8853_v11 = vmul.f32 %v10627_v1, %v10626_v48  ;;  %v10628_v19 = vld [vmem:[#allocation170_spill] sm:$0xff]  ;;  %v10630_v54 = vld [vmem:[#allocation172_spill] sm:$0xff]  ;;  %1836 = vst.msk [vmem:[#allocation2 + $0x40] sm:$0xff] %vm520_vm0, %v1804_v20  ;;  %v10645_v20 = vrot.slane %v10612_v25, 1  ;;  %v10652_v48 = vrot.slane %v10614_v44, 1 }
 0x38b   : > { %v1760_v38 = vld [vmem:[#allocation2 + $0xe0] sm:$0xff]  ;;  %v1820_v60 = vadd.f32 %v1788_v52, %v1756_v28  ;;  %4893 = vrcp.f32 %v10630_v54  ;;  %1840 = vst.msk [vmem:[#allocation2 + $0x60] sm:$0xff] %vm520_vm0, %v1808_v6  ;;  %1844 = vst.msk [vmem:[#allocation2 + $0x80] sm:$0xff] %vm520_vm0, %v1812_v4  ;;  %v10631_v29 = vld [vmem:[#allocation179_spill] sm:$0xff]  ;;  %v8901_v4 = vpop.xlane.xlu0 %3623 }
 0x38c   : > { %v1824_v16 = vadd.f32 %v1792_v35, %v1760_v38  ;;  %v10629_v45 = vld [vmem:[#allocation29_spill] sm:$0xff]  ;;  %4239 = vst.msk [vmem:[%s8842_s8 + $0x28] sm:$0xff] %vm520_vm0, %v4207_v56  ;;  %v10632_v2 = vrot.slane %v10631_v29, 1  ;;  %v10633_v43 = vld [vmem:[#allocation190_spill] sm:$0xff]  ;;  %v10635_v22 = vld [vmem:[#allocation51_spill] sm:$0xff]  ;;  %4895 = vrcp.f32 %v8708_v63  ;;  %v8903_v56 = vpop.xlane.xlu1 %3608 }
 0x38d   : > { %v8857_v59 = vmul.f32 %v10629_v45, %v10628_v19  ;;  %v10634_v27 = vrot.slane %v10633_v43, 1  ;;  %v10636_v17 = vrot.slane %v10635_v22, 1  ;;  %v10637_v34 = vld [vmem:[#allocation105_spill] sm:$0xff]  ;;  %v10639_v14 = vld [vmem:[#allocation180_spill] sm:$0xff]  ;;  %1848 = vst.msk [vmem:[#allocation2 + $0xa0] sm:$0xff] %vm520_vm0, %v1816_v31  ;;  %1852 = vst.msk [vmem:[#allocation2 + $0xc0] sm:$0xff] %vm520_vm0, %v1820_v60  ;;  %4897 = vrcp.f32 %v8751_v18  ;;  %v4888_v43 = vpop.eup %4887 }
 0x38e   : > { %v10638_v10 = vrot.slane %v10637_v34, 1  ;;  %v10640_v5 = vrot.slane %v10639_v14, 1  ;;  %1856 = vst.msk [vmem:[#allocation2 + $0xe0] sm:$0xff] %vm520_vm0, %v1824_v16  ;;  %v10642_v62 = vld [vmem:[#allocation173_spill] sm:$0xff]  ;;  %v10643_v28 = vld [vmem:[#allocation82_spill] sm:$0xff]  ;;  %1650 = vst.msk [vmem:[#allocation2 + $0xf8] sm:$0xff] %vm520_vm0, %v1618_v23 }
 0x38f   : > { %v1909_v52 = vsel %vm1892_vm6, %v10634_v27, %v10632_v2  ;;  %v8890_v30 = vmul.f32 %v10607_v21, %v10642_v62  ;;  %v10644_v38 = vrot.slane %v10643_v28, 1  ;;  %v10646_v6 = vld [vmem:[#allocation169_spill] sm:$0xff]  ;;  %v10649_v31 = vrot.slane %v10619_v36, 1  ;;  %v10653_v18 = vld [vmem:[#allocation78_spill] sm:$0xff]  ;;  %v10656_v54 = vld [vmem:[#allocation80_spill] sm:$0xff] }
 0x390   : > { %v1910_v35 = vsel %vm1892_vm6, %v10638_v10, %v10636_v17  ;;  %v1913_v46 = vsel %vm1892_vm6, %v10641_v15, %v10640_v5  ;;  %v2002_v63 = vmul.f32 %v10596_v8, %v10646_v6  ;;  %v10647_v21 = vld [vmem:[#allocation81_spill] sm:$0xff]  ;;  %v10654_v1 = vrot.slane %v10653_v18, 1  ;;  %v1743_v2 = vld [vmem:[#allocation2 + $0x58] sm:$0xff]  ;;  %v10659_v44 = vld [vmem:[#allocation110_spill] sm:$0xff]  ;;  %v4658_v5 = vpop.f32.mrb[20].mxu0  ;;  %v4890_v15 = vpop.eup %4889 }
 0x391   : > { %v1911_v42 = vsel %vm1892_vm6, %v10645_v20, %v10644_v38  ;;  %v10648_v9 = vrot.slane %v10647_v21, 1  ;;  %v10650_v60 = vld [vmem:[#allocation181_spill] sm:$0xff]  ;;  %v10655_v19 = vrot.slane %v10621_v40, 1  ;;  %v10657_v23 = vrot.slane %v10656_v54, 1  ;;  %v10660_v22 = vld [vmem:[#allocation111_spill] sm:$0xff]  ;;  %v1747_v40 = vld [vmem:[#allocation2 + $0x78] sm:$0xff] }
 0x392   : > { %v10651_v16 = vrot.slane %v10650_v60, 1  ;;  %v10658_v36 = vrot.slane %v10624_v33, 1  ;;  %v2038_v27 = vmul.f32 %v10659_v44, %v1909_v52  ;;  %v2042_v17 = vmul.f32 %v10660_v22, %v1910_v35  ;;  %v1751_v10 = vld [vmem:[#allocation2 + $0x98] sm:$0xff]  ;;  %v3816_v52 = vpop.f32.mrb[21].mxu0  ;;  %v10662_v6 = vld [vmem:[#allocation137_spill] sm:$0xff]  ;;  %v10663_v60 = vld [vmem:[#allocation30_spill] sm:$0xff] }
 0x393   : > { %v1912_v25 = vsel %vm1892_vm6, %v10649_v31, %v10648_v9  ;;  %v1915_v45 = vsel %vm1892_vm6, %v10655_v19, %v10654_v1  ;;  %v8933_v34 = vmul.f32 %v10659_v44, %v1913_v46  ;;  %v1807_v14 = vadd.f32 %v8761_v47, %v1743_v2  ;;  %v10661_v62 = vld [vmem:[#allocation112_spill] sm:$0xff]  ;;  %v8942_v46 = vpop.permute.xlu0 %2594  ;;  %v2006_v21 = vld [vmem:[#allocation2] sm:$0xff]  ;;  %v3591_v19 = vpop.xlane.xlu1 %3590 }
 0x394   : > { %v1914_v8 = vsel %vm1892_vm6, %v10652_v48, %v10651_v16  ;;  %v1916_v29 = vsel %vm1892_vm6, %v10658_v36, %v10657_v23  ;;  %v2046_v33 = vmul.f32 %v10661_v62, %v1911_v42  ;;  %v1755_v28 = vld [vmem:[#allocation2 + $0xb8] sm:$0xff]  ;;  %v1811_v37 = vadd.f32 %v8778_v24, %v1747_v40  ;;  %v2010_v9 = vld [vmem:[#allocation2 + $0x20] sm:$0xff]  ;;  %v8948_v24 = vpop.f32.mrb[22].mxu0  ;;  %v10665_v48 = vld [vmem:[#allocation182_spill] sm:$0xff]  ;;  %v4666_v2 = vpop.f32.mrb[20].mxu1 }
 0x395   : > { %v1815_v38 = vadd.f32 %v8765_v61, %v1751_v10  ;;  %v8939_v20 = vmul.f32 %v4888_v43, %v4658_v5  ;;  %v2050_v35 = vmul.f32 %v2002_v63, %v1912_v25  ;;  %4899 = vrcp.f32 %v10662_v6  ;;  %v1759_v47 = vld [vmem:[#allocation2 + $0xd8] sm:$0xff]  ;;  %1839 = vst.msk [vmem:[#allocation2 + $0x58] sm:$0xff] %vm520_vm0, %v1807_v14  ;;  %v3819_v1 = vpop.f32.mrb[23].mxu0  ;;  %v4892_v43 = vpop.eup %4891 }
 0x396   : > { %v1819_v31 = vadd.f32 %v8769_v32, %v1755_v28  ;;  %v8946_v42 = vmul.f32 %v4890_v15, %v3816_v52  ;;  %v2058_v61 = vmul.f32 %v10660_v22, %v1914_v8  ;;  %4901 = vrcp.f32 %v10663_v60  ;;  %v10664_v25 = vld [vmem:[#allocation56_spill] sm:$0xff]  ;;  %1843 = vst.msk [vmem:[#allocation2 + $0x78] sm:$0xff] %vm520_vm0, %v1811_v37  ;;  %v2014_v32 = vld [vmem:[#allocation2 + $0x40] sm:$0xff]  ;;  %v4894_v15 = vpop.eup %4893  ;;  %v10667_v28 = vld [vmem:[#allocation94_spill] sm:$0xff] }
 0x397   : > { %v8954_v16 = vmul.f32 %v10664_v25, %v8942_v46  ;;  %v8958_v18 = vmul.f32 %v10665_v48, %v8942_v46  ;;  %1847 = vst.msk [vmem:[#allocation2 + $0x98] sm:$0xff] %vm520_vm0, %v1815_v38  ;;  %v2070_v54 = vadd.f32 %v2038_v27, %v2006_v21  ;;  %v2074_v23 = vadd.f32 %v2042_v17, %v2010_v9  ;;  %v2636_v40 = vld [vmem:[#allocation2 + $0x18] sm:$0xff]  ;;  %v2018_v27 = vld [vmem:[#allocation2 + $0x60] sm:$0xff]  ;;  %v3871_v17 = vpop.f32.mrb[21].mxu1  ;;  %v4896_v6 = vpop.eup %4895 }
 0x398   : > { %v1823_v8 = vadd.f32 %v8782_v39, %v1759_v47  ;;  %1851 = vst.msk [vmem:[#allocation2 + $0xb8] sm:$0xff] %vm520_vm0, %v1819_v31  ;;  %v2078_v36 = vadd.f32 %v2046_v33, %v2014_v32  ;;  %v2062_v44 = vmul.f32 %v10661_v62, %v1915_v45  ;;  %v2066_v22 = vmul.f32 %v2002_v63, %v1916_v29  ;;  %v1763_v5 = vld [vmem:[#allocation2 + $0xf8] sm:$0xff]  ;;  %v10666_v39 = vld [vmem:[#allocation161_spill] sm:$0xff] }
 0x399   : > { %v2668_v10 = vmul.f32 %v8954_v16, %v8520_v41  ;;  %v2672_v14 = vmul.f32 %v8958_v18, %v8528_v0  ;;  %v8971_v37 = vmul.f32 %v10667_v28, %v10666_v39  ;;  %v10668_v33 = vld [vmem:[#allocation133_spill] sm:$0xff]  ;;  %v10669_v63 = vld [vmem:[#allocation92_spill] sm:$0xff]  ;;  %v10670_v41 = vld [vmem:[#allocation183_spill] sm:$0xff]  ;;  %2102 = vst.msk [vmem:[#allocation2] sm:$0xff] %vm520_vm0, %v2070_v54  ;;  %v8986_v0 = vpop.f32.mrb[22].mxu1  ;;  %v1827_v47 = vadd.f32 %v8786_v50, %v1763_v5  ;;  %v4898_v54 = vpop.eup %4897 }
 0x39a   : > { %v8975_v38 = vmul.f32 %v10668_v33, %v10666_v39  ;;  %v8979_v45 = vmul.f32 %v10669_v63, %v10666_v39  ;;  %4903 = vrcp.f32 %v10670_v41  ;;  %v2640_v29 = vld [vmem:[#allocation2 + $0x38] sm:$0xff]  ;;  %2106 = vst.msk [vmem:[#allocation2 + $0x20] sm:$0xff] %vm520_vm0, %v2074_v23  ;;  %1855 = vst.msk [vmem:[#allocation2 + $0xd8] sm:$0xff] %vm520_vm0, %v1823_v8  ;;  %v2022_v62 = vld [vmem:[#allocation2 + $0x80] sm:$0xff]  ;;  %v3874_v31 = vpop.f32.mrb[23].mxu1  ;;  %v4147_v23 = vmul.f32 %v4896_v6, %v3819_v1  ;;  %v3603_v5 = vpop.xlane.xlu1 %3602 }
 0x39b   : > { %2110 = vst.msk [vmem:[#allocation2 + $0x40] sm:$0xff] %vm520_vm0, %v2078_v36  ;;  %v2026_v52 = vld [vmem:[#allocation2 + $0xa0] sm:$0xff]  ;;  %4905 = vrcp.f32 %v8473_v13  ;;  %v2700_v21 = vadd.f32 %v2668_v10, %v2636_v40  ;;  %v2704_v9 = vadd.f32 %v2672_v14, %v2640_v29  ;;  %v8990_v28 = vmul.f32 %v4892_v43, %v4666_v2  ;;  %1859 = vst.msk [vmem:[#allocation2 + $0xf8] sm:$0xff] %vm520_vm0, %v1827_v47  ;;  %v4179_v40 = vld [vmem:[#allocation2 + $0x48] sm:$0xff] }
 0x39c   : > { %v2030_v60 = vld [vmem:[#allocation2 + $0xc0] sm:$0xff]  ;;  %v2082_v8 = vadd.f32 %v2050_v35, %v2018_v27  ;;  %v8992_v36 = vmul.f32 %v4894_v15, %v3871_v17  ;;  %4907 = vrcp.f32 %v3591_v19  ;;  %v2017_v13 = vld [vmem:[#allocation2 + $0x58] sm:$0xff]  ;;  %v4151_v50 = vmul.f32 %v4898_v54, %v3874_v31  ;;  %v4183_v19 = vld [vmem:[#allocation2 + $0x68] sm:$0xff] }
 0x39d   : > { %v2034_v32 = vld [vmem:[#allocation2 + $0xe0] sm:$0xff]  ;;  %2732 = vst.msk [vmem:[#allocation2 + $0x18] sm:$0xff] %vm520_vm0, %v2700_v21  ;;  %2736 = vst.msk [vmem:[#allocation2 + $0x38] sm:$0xff] %vm520_vm0, %v2704_v9  ;;  %v2086_v10 = vadd.f32 %v8933_v34, %v2022_v62  ;;  %v2090_v14 = vadd.f32 %v2058_v61, %v2026_v52  ;;  %v2081_v1 = vadd.f32 %v8797_v49, %v2017_v13  ;;  %v2021_v35 = vld [vmem:[#allocation2 + $0x78] sm:$0xff]  ;;  %4909 = vrcp.f32 %v3603_v5 }
 0x39e   : > { %v4211_v2 = vadd.f32 %v4179_v40, %v4147_v23  ;;  %2114 = vst.msk [vmem:[#allocation2 + $0x60] sm:$0xff] %vm520_vm0, %v2082_v8  ;;  %v2025_v43 = vld [vmem:[#allocation2 + $0x98] sm:$0xff]  ;;  %v2094_v27 = vadd.f32 %v2062_v44, %v2030_v60  ;;  %v2098_v17 = vadd.f32 %v2066_v22, %v2034_v32  ;;  %v10671_v15 = vld [vmem:[#allocation125_spill] sm:$0xff]  ;;  %v2085_v63 = vadd.f32 %v8801_v55, %v2021_v35  ;;  %v10672_v29 = vld [vmem:[#allocation83_spill] sm:$0xff] }
 0x39f   : > { %v2211_v33 = vmul.f32 %v10671_v15, %v10666_v39  ;;  %v4215_v41 = vadd.f32 %v4183_v19, %v4151_v50  ;;  %2118 = vst.msk [vmem:[#allocation2 + $0x80] sm:$0xff] %vm520_vm0, %v2086_v10  ;;  %v2089_v34 = vadd.f32 %v8853_v11, %v2025_v43  ;;  %2122 = vst.msk [vmem:[#allocation2 + $0xa0] sm:$0xff] %vm520_vm0, %v2090_v14  ;;  %v2029_v49 = vld [vmem:[#allocation2 + $0xb8] sm:$0xff]  ;;  %v4900_v61 = vpop.eup %4899  ;;  %v10674_v22 = vld [vmem:[#allocation85_spill] sm:$0xff] }
 0x3a0   : > { %v2247_v62 = vmul.f32 %v8971_v37, %v10672_v29  ;;  %v10673_v52 = vld [vmem:[#allocation84_spill] sm:$0xff]  ;;  %v2255_v39 = vmul.f32 %v8979_v45, %v10674_v22  ;;  %2113 = vst.msk [vmem:[#allocation2 + $0x58] sm:$0xff] %vm520_vm0, %v2081_v1  ;;  %4243 = vst.msk [vmem:[%s8842_s8 + $0x48] sm:$0xff] %vm520_vm0, %v4211_v2  ;;  %v2093_v55 = vadd.f32 %v8857_v59, %v2029_v49  ;;  %v4902_v11 = vpop.eup %4901  ;;  %v10675_v6 = vld [vmem:[#allocation138_spill] sm:$0xff] }
 0x3a1   : > { %v2251_v44 = vmul.f32 %v8975_v38, %v10673_v52  ;;  %2126 = vst.msk [vmem:[#allocation2 + $0xc0] sm:$0xff] %vm520_vm0, %v2094_v27  ;;  %2130 = vst.msk [vmem:[#allocation2 + $0xe0] sm:$0xff] %vm520_vm0, %v2098_v17  ;;  %v2069_v21 = vmul.f32 %v8745_v51, %v10675_v6  ;;  %v10676_v9 = vld [vmem:[#allocation100_spill] sm:$0xff]  ;;  %v10677_v47 = vld [vmem:[#allocation185_spill] sm:$0xff]  ;;  %v4145_v54 = vmul.f32 %v4900_v61, %v8820_v7 }
 0x3a2   : > { %v9022_v31 = vmul.f32 %v10677_v47, %v10676_v9  ;;  %v2215_v60 = vld [vmem:[#allocation2] sm:$0xff]  ;;  %2117 = vst.msk [vmem:[#allocation2 + $0x78] sm:$0xff] %vm520_vm0, %v2085_v63  ;;  %4247 = vst.msk [vmem:[%s8842_s8 + $0x68] sm:$0xff] %vm520_vm0, %v4215_v41  ;;  %v10678_v59 = vld [vmem:[#allocation98_spill] sm:$0xff]  ;;  %v4141_v35 = vmul.f32 %v4902_v11, %v8807_v57 }
 0x3a3   : > { %v2219_v32 = vld [vmem:[#allocation2 + $0x20] sm:$0xff]  ;;  %2121 = vst.msk [vmem:[#allocation2 + $0x98] sm:$0xff] %vm520_vm0, %v2089_v34  ;;  %v10679_v8 = vld [vmem:[#allocation40_spill] sm:$0xff]  ;;  %v2279_v51 = vadd.f32 %v2247_v62, %v2215_v60  ;;  %2125 = vst.msk [vmem:[#allocation2 + $0xb8] sm:$0xff] %vm520_vm0, %v2093_v55 }
 0x3a4   : > { %v2223_v23 = vld [vmem:[#allocation2 + $0x40] sm:$0xff]  ;;  %v2258_v13 = vmul.f32 %v10679_v8, %v10678_v59  ;;  %v2283_v40 = vadd.f32 %v2251_v44, %v2219_v32  ;;  %v2033_v10 = vld [vmem:[#allocation2 + $0xd8] sm:$0xff]  ;;  %v10680_v14 = vld [vmem:[#allocation99_spill] sm:$0xff]  ;;  %v4904_v43 = vpop.eup %4903 }
 0x3a5   : > { %v2287_v50 = vadd.f32 %v2255_v39, %v2223_v23  ;;  %v10681_v5 = vld [vmem:[#allocation74_spill] sm:$0xff]  ;;  %v2097_v19 = vadd.f32 %v8890_v30, %v2033_v10  ;;  %v10683_v27 = vld [vmem:[#allocation87_spill] sm:$0xff]  ;;  %v10684_v15 = vld [vmem:[#allocation88_spill] sm:$0xff]  ;;  %2311 = vst.msk [vmem:[#allocation2] sm:$0xff] %vm520_vm0, %v2279_v51  ;;  %v4674_v30 = vpop.f32.mrb[24].mxu0  ;;  %v4906_v52 = vpop.eup %4905 }
 0x3a6   : > { %v2262_v1 = vmul.f32 %v10681_v5, %v10680_v14  ;;  %v10682_v7 = vld [vmem:[#allocation86_spill] sm:$0xff]  ;;  %v2263_v17 = vmul.f32 %v8971_v37, %v10683_v27  ;;  %v2267_v63 = vmul.f32 %v8975_v38, %v10684_v15  ;;  %v10685_v41 = vld [vmem:[#allocation89_spill] sm:$0xff]  ;;  %v10687_v61 = vld [vmem:[#allocation188_spill] sm:$0xff]  ;;  %2315 = vst.msk [vmem:[#allocation2 + $0x20] sm:$0xff] %vm520_vm0, %v2283_v40  ;;  %v9052_v39 = vpop.f32.mrb[25].mxu0  ;;  %v4908_v40 = vpop.eup %4907 }
 0x3a7   : > { %v2259_v2 = vmul.f32 %v2211_v33, %v10682_v7  ;;  %v2271_v34 = vmul.f32 %v8979_v45, %v10685_v41  ;;  %v10686_v49 = vld [vmem:[#allocation109_spill] sm:$0xff]  ;;  %v4173_v62 = vld [vmem:[#allocation2 + $0x18] sm:$0xff]  ;;  %2319 = vst.msk [vmem:[#allocation2 + $0x40] sm:$0xff] %vm520_vm0, %v2287_v50  ;;  %v9050_v45 = vmul.f32 %v4904_v43, %v4674_v30  ;;  %2129 = vst.msk [vmem:[#allocation2 + $0xd8] sm:$0xff] %vm520_vm0, %v2097_v19  ;;  %v9064_v59 = vpop.f32.mrb[26].mxu0 }
 0x3a8   : > { %v9045_v29 = vmul.f32 %v10687_v61, %v10686_v49  ;;  %v4177_v57 = vld [vmem:[#allocation2 + $0x38] sm:$0xff]  ;;  %v4205_v44 = vadd.f32 %v4173_v62, %v4141_v35  ;;  %v2227_v22 = vld [vmem:[#allocation2 + $0x60] sm:$0xff]  ;;  %v10688_v11 = vld [vmem:[#allocation90_spill] sm:$0xff]  ;;  %v3929_v19 = vpop.f32.mrb[27].mxu0 }
 0x3a9   : > { %v2037_v37 = vld [vmem:[#allocation2 + $0xf8] sm:$0xff]  ;;  %v4209_v38 = vadd.f32 %v4177_v57, %v4145_v54  ;;  %v2275_v6 = vmul.f32 %v2211_v33, %v10688_v11  ;;  %v10689_v9 = vld [vmem:[#allocation189_spill] sm:$0xff]  ;;  %v10690_v60 = vld [vmem:[#allocation70_spill] sm:$0xff]  ;;  %v2291_v54 = vadd.f32 %v2259_v2, %v2227_v22  ;;  %v4155_v62 = vmul.f32 %v4908_v40, %v3929_v19 }
 0x3aa   : > { %v2101_v55 = vadd.f32 %v2069_v21, %v2037_v37  ;;  %v9058_v47 = vmul.f32 %v10689_v9, %v10686_v49  ;;  %v9062_v32 = vmul.f32 %v10690_v60, %v10686_v49  ;;  %v2231_v23 = vld [vmem:[#allocation2 + $0x80] sm:$0xff]  ;;  %v10692_v10 = vld [vmem:[#allocation187_spill] sm:$0xff]  ;;  %v10693_v21 = vld [vmem:[#allocation166_spill] sm:$0xff]  ;;  %4237 = vst.msk [vmem:[%s8842_s8 + $0x18] sm:$0xff] %vm520_vm0, %v4205_v44 }
 0x3ab   : > { %v2235_v51 = vld [vmem:[#allocation2 + $0xa0] sm:$0xff]  ;;  %v9070_v33 = vmul.f32 %v10693_v21, %v10686_v49  ;;  %4241 = vst.msk [vmem:[%s8842_s8 + $0x38] sm:$0xff] %vm520_vm0, %v4209_v38  ;;  %v2226_v7 = vld [vmem:[#allocation2 + $0x58] sm:$0xff]  ;;  %v2295_v35 = vadd.f32 %v2263_v17, %v2231_v23  ;;  %2323 = vst.msk [vmem:[#allocation2 + $0x60] sm:$0xff] %vm520_vm0, %v2291_v54  ;;  %v4682_v49 = vpop.f32.mrb[24].mxu1 }
 0x3ac   : > { %v10691_v50 = vld [vmem:[#allocation101_spill] sm:$0xff]  ;;  %v2299_v2 = vadd.f32 %v2267_v63, %v2235_v51  ;;  %2133 = vst.msk [vmem:[#allocation2 + $0xf8] sm:$0xff] %vm520_vm0, %v2101_v55  ;;  %v2290_v15 = vadd.f32 %v2258_v13, %v2226_v7  ;;  %v2230_v41 = vld [vmem:[#allocation2 + $0x78] sm:$0xff]  ;;  %v10694_v37 = vld [vmem:[#allocation158_spill] sm:$0xff]  ;;  %v9082_v22 = vmul.f32 %v4906_v52, %v4682_v49  ;;  %v9085_v13 = vpop.f32.mrb[25].mxu1 }
 0x3ad   : > { %v2270_v14 = vmul.f32 %v10692_v10, %v10691_v50  ;;  %v2239_v43 = vld [vmem:[#allocation2 + $0xc0] sm:$0xff]  ;;  %v2234_v61 = vld [vmem:[#allocation2 + $0x98] sm:$0xff]  ;;  %v2456_v44 = vmul.f32 %v9045_v29, %v10694_v37  ;;  %v2294_v38 = vadd.f32 %v2262_v1, %v2230_v41  ;;  %2327 = vst.msk [vmem:[#allocation2 + $0x80] sm:$0xff] %vm520_vm0, %v2295_v35  ;;  %v4187_v63 = vld [vmem:[#allocation2 + $0x88] sm:$0xff]  ;;  %v9092_v54 = vpop.f32.mrb[26].mxu1 }
 0x3ae   : > { %v2243_v27 = vld [vmem:[#allocation2 + $0xe0] sm:$0xff]  ;;  %v2303_v57 = vadd.f32 %v2271_v34, %v2239_v43  ;;  %v2298_v17 = vadd.f32 %v9022_v31, %v2234_v61  ;;  %2331 = vst.msk [vmem:[#allocation2 + $0xa0] sm:$0xff] %vm520_vm0, %v2299_v2  ;;  %v2238_v55 = vld [vmem:[#allocation2 + $0xb8] sm:$0xff]  ;;  %2322 = vst.msk [vmem:[#allocation2 + $0x58] sm:$0xff] %vm520_vm0, %v2290_v15  ;;  %v4219_v1 = vadd.f32 %v4187_v63, %v4155_v62  ;;  %v4910_v31 = vpop.eup %4909  ;;  %v3984_v35 = vpop.f32.mrb[27].mxu1 }
 0x3af   : > { %v2307_v30 = vadd.f32 %v2275_v6, %v2243_v27  ;;  %v10695_v11 = vld [vmem:[#allocation160_spill] sm:$0xff]  ;;  %v10696_v6 = vld [vmem:[#allocation162_spill] sm:$0xff]  ;;  %v2302_v60 = vadd.f32 %v2270_v14, %v2238_v55  ;;  %v2424_v21 = vld [vmem:[#allocation2] sm:$0xff]  ;;  %2326 = vst.msk [vmem:[#allocation2 + $0x78] sm:$0xff] %vm520_vm0, %v2294_v38  ;;  %v9115_v38 = vpop.xlane.xlu1 %3620 }
 0x3b0   : > { %v2460_v34 = vmul.f32 %v9058_v47, %v10695_v11  ;;  %v2464_v9 = vmul.f32 %v9062_v32, %v10696_v6  ;;  %2335 = vst.msk [vmem:[#allocation2 + $0xc0] sm:$0xff] %vm520_vm0, %v2303_v57  ;;  %v10697_v52 = vld [vmem:[#allocation102_spill] sm:$0xff]  ;;  %v10698_v51 = vld [vmem:[#allocation104_spill] sm:$0xff]  ;;  %v2428_v14 = vld [vmem:[#allocation2 + $0x20] sm:$0xff]  ;;  %v2488_v19 = vadd.f32 %v2456_v44, %v2424_v21 }
 0x3b1   : > { %2339 = vst.msk [vmem:[#allocation2 + $0xe0] sm:$0xff] %vm520_vm0, %v2307_v30  ;;  %v2274_v23 = vmul.f32 %v10679_v8, %v10697_v52  ;;  %v2278_v40 = vmul.f32 %v10681_v5, %v10698_v51  ;;  %v10699_v50 = vld [vmem:[#allocation48_spill] sm:$0xff]  ;;  %v2432_v7 = vld [vmem:[#allocation2 + $0x40] sm:$0xff]  ;;  %2330 = vst.msk [vmem:[#allocation2 + $0x98] sm:$0xff] %vm520_vm0, %v2298_v17  ;;  %v4159_v8 = vmul.f32 %v4910_v31, %v3984_v35 }
 0x3b2   : > { %v9102_v10 = vmul.f32 %v10664_v25, %v10699_v50  ;;  %v2492_v2 = vadd.f32 %v2460_v34, %v2428_v14  ;;  %v2496_v43 = vadd.f32 %v2464_v9, %v2432_v7  ;;  %4251 = vst.msk [vmem:[%s8842_s8 + $0x88] sm:$0xff] %vm520_vm0, %v4219_v1  ;;  %2334 = vst.msk [vmem:[#allocation2 + $0xb8] sm:$0xff] %vm520_vm0, %v2302_v60  ;;  %v2242_v5 = vld [vmem:[#allocation2 + $0xd8] sm:$0xff]  ;;  %v10700_v27 = vld [vmem:[#allocation139_spill] sm:$0xff] }
 0x3b3   : > { %v10701_v15 = vld [vmem:[#allocation91_spill] sm:$0xff]  ;;  %v10702_v61 = vld [vmem:[#allocation141_spill] sm:$0xff]  ;;  %v10703_v62 = vld [vmem:[#allocation198_spill] sm:$0xff]  ;;  %v2306_v17 = vadd.f32 %v2274_v23, %v2242_v5  ;;  %v9121_v34 = vmul.f32 %v10665_v48, %v10699_v50  ;;  %2520 = vst.msk [vmem:[#allocation2] sm:$0xff] %vm520_vm0, %v2488_v19 }
 0x3b4   : > { %v2467_v41 = vmul.f32 %v10701_v15, %v10700_v27  ;;  %v2475_v49 = vmul.f32 %v10703_v62, %v10702_v61  ;;  %v10704_v57 = vld [vmem:[#allocation142_spill] sm:$0xff]  ;;  %v10705_v30 = vld [vmem:[#allocation97_spill] sm:$0xff]  ;;  %v10706_v63 = vld [vmem:[#allocation140_spill] sm:$0xff]  ;;  %2524 = vst.msk [vmem:[#allocation2 + $0x20] sm:$0xff] %vm520_vm0, %v2492_v2 }
 0x3b5   : > { %v2479_v37 = vmul.f32 %v10705_v30, %v10704_v57  ;;  %v4191_v44 = vld [vmem:[#allocation2 + $0xa8] sm:$0xff]  ;;  %v10707_v55 = vld [vmem:[#allocation107_spill] sm:$0xff]  ;;  %2528 = vst.msk [vmem:[#allocation2 + $0x40] sm:$0xff] %vm520_vm0, %v2496_v43  ;;  %v2246_v60 = vld [vmem:[#allocation2 + $0xf8] sm:$0xff] }
 0x3b6   : > { %v2471_v11 = vmul.f32 %v10707_v55, %v10706_v63  ;;  %v10708_v6 = vld [vmem:[#allocation163_spill] sm:$0xff]  ;;  %v4223_v1 = vadd.f32 %v4191_v44, %v4159_v8  ;;  %v10709_v31 = vld [vmem:[#allocation193_spill] sm:$0xff]  ;;  %v10710_v23 = vld [vmem:[#allocation164_spill] sm:$0xff]  ;;  %2338 = vst.msk [vmem:[#allocation2 + $0xd8] sm:$0xff] %vm520_vm0, %v2306_v17  ;;  %v2310_v35 = vadd.f32 %v2278_v40, %v2246_v60 }
 0x3b7   : > { %v2468_v9 = vmul.f32 %v9070_v33, %v10708_v6  ;;  %v9130_v52 = vmul.f32 %v10709_v31, %v10699_v50  ;;  %v2472_v51 = vmul.f32 %v9045_v29, %v10710_v23  ;;  %v10711_v21 = vld [vmem:[#allocation165_spill] sm:$0xff]  ;;  %v10712_v19 = vld [vmem:[#allocation115_spill] sm:$0xff]  ;;  %v10714_v5 = vld [vmem:[#allocation168_spill] sm:$0xff] }
 0x3b8   : > { %v2476_v14 = vmul.f32 %v9058_v47, %v10711_v21  ;;  %v2436_v7 = vld [vmem:[#allocation2 + $0x60] sm:$0xff]  ;;  %v2665_v2 = vmul.f32 %v9102_v10, %v10712_v19  ;;  %v10713_v43 = vld [vmem:[#allocation167_spill] sm:$0xff]  ;;  %v2484_v27 = vmul.f32 %v9070_v33, %v10714_v5  ;;  %4255 = vst.msk [vmem:[%s8842_s8 + $0xa8] sm:$0xff] %vm520_vm0, %v4223_v1  ;;  %v10715_v29 = vld [vmem:[#allocation184_spill] sm:$0xff] }
 0x3b9   : > { %v2480_v8 = vmul.f32 %v9062_v32, %v10713_v43  ;;  %v2500_v61 = vadd.f32 %v2468_v9, %v2436_v7  ;;  %v2440_v62 = vld [vmem:[#allocation2 + $0x80] sm:$0xff]  ;;  %v9147_v47 = vmul.f32 %v10715_v29, %v10699_v50  ;;  %v10716_v30 = vld [vmem:[#allocation42_spill] sm:$0xff]  ;;  %v2435_v40 = vld [vmem:[#allocation2 + $0x58] sm:$0xff]  ;;  %2342 = vst.msk [vmem:[#allocation2 + $0xf8] sm:$0xff] %vm520_vm0, %v2310_v35  ;;  %v2628_v35 = vmul.f32 %v10709_v31, %v8942_v46 }
 0x3ba   : > { %v2444_v57 = vld [vmem:[#allocation2 + $0xa0] sm:$0xff]  ;;  %4911 = vrcp.f32 %v10716_v30  ;;  %v2504_v44 = vadd.f32 %v2472_v51, %v2440_v62  ;;  %v2499_v32 = vadd.f32 %v2467_v41, %v2435_v40  ;;  %v2439_v33 = vld [vmem:[#allocation2 + $0x78] sm:$0xff]  ;;  %v9156_v51 = vpop.xlane.xlu1 %3632  ;;  %v10723_v30 = vld [vmem:[#allocation175_spill] sm:$0xff] }
 0x3bb   : > { %v2508_v17 = vadd.f32 %v2476_v14, %v2444_v57  ;;  %v2448_v63 = vld [vmem:[#allocation2 + $0xc0] sm:$0xff]  ;;  %4913 = vrcp.f32 %v8512_v12  ;;  %2532 = vst.msk [vmem:[#allocation2 + $0x60] sm:$0xff] %vm520_vm0, %v2500_v61  ;;  %v2443_v9 = vld [vmem:[#allocation2 + $0x98] sm:$0xff]  ;;  %v2503_v21 = vadd.f32 %v2471_v11, %v2439_v33  ;;  %v10719_v11 = vld [vmem:[#allocation143_spill] sm:$0xff] }
 0x3bc   : > { %v2452_v6 = vld [vmem:[#allocation2 + $0xe0] sm:$0xff]  ;;  %v2512_v1 = vadd.f32 %v2480_v8, %v2448_v63  ;;  %v10717_v50 = vld [vmem:[#allocation116_spill] sm:$0xff]  ;;  %4915 = vrcp.f32 %v8495_v3  ;;  %2536 = vst.msk [vmem:[#allocation2 + $0x80] sm:$0xff] %vm520_vm0, %v2504_v44  ;;  %v2507_v14 = vadd.f32 %v2475_v49, %v2443_v9  ;;  %2531 = vst.msk [vmem:[#allocation2 + $0x58] sm:$0xff] %vm520_vm0, %v2499_v32  ;;  %v2483_v49 = vmul.f32 %v10701_v15, %v10719_v11 }
 0x3bd   : > { %v2516_v60 = vadd.f32 %v2484_v27, %v2452_v6  ;;  %v2669_v23 = vmul.f32 %v9121_v34, %v10717_v50  ;;  %2540 = vst.msk [vmem:[#allocation2 + $0xa0] sm:$0xff] %vm520_vm0, %v2508_v17  ;;  %v2447_v12 = vld [vmem:[#allocation2 + $0xb8] sm:$0xff]  ;;  %v10718_v41 = vld [vmem:[#allocation117_spill] sm:$0xff]  ;;  %4917 = vrcp.f32 %v8720_v58  ;;  %v9175_v58 = vmul.f32 %v10715_v29, %v8942_v46  ;;  %2535 = vst.msk [vmem:[#allocation2 + $0x78] sm:$0xff] %vm520_vm0, %v2503_v21 }
 0x3be   : > { %v2673_v7 = vmul.f32 %v9130_v52, %v10718_v41  ;;  %v2511_v3 = vadd.f32 %v2479_v37, %v2447_v12  ;;  %2544 = vst.msk [vmem:[#allocation2 + $0xc0] sm:$0xff] %vm520_vm0, %v2512_v1  ;;  %v10720_v19 = vld [vmem:[#allocation144_spill] sm:$0xff]  ;;  %4919 = vrcp.f32 %v8636_v53  ;;  %v2633_v8 = vld [vmem:[#allocation2] sm:$0xff]  ;;  %2539 = vst.msk [vmem:[#allocation2 + $0x98] sm:$0xff] %vm520_vm0, %v2507_v14 }
 0x3bf   : > { %2548 = vst.msk [vmem:[#allocation2 + $0xe0] sm:$0xff] %vm520_vm0, %v2516_v60  ;;  %v2487_v43 = vmul.f32 %v10707_v55, %v10720_v19  ;;  %v2637_v5 = vld [vmem:[#allocation2 + $0x20] sm:$0xff]  ;;  %4921 = vrcp.f32 %v8628_v26  ;;  %v2697_v37 = vadd.f32 %v2665_v2, %v2633_v8  ;;  %v2451_v55 = vld [vmem:[#allocation2 + $0xd8] sm:$0xff]  ;;  %v10721_v53 = vld [vmem:[#allocation119_spill] sm:$0xff] }
 0x3c0   : > { %v2641_v27 = vld [vmem:[#allocation2 + $0x40] sm:$0xff]  ;;  %v2701_v15 = vadd.f32 %v2669_v23, %v2637_v5  ;;  %2543 = vst.msk [vmem:[#allocation2 + $0xb8] sm:$0xff] %vm520_vm0, %v2511_v3  ;;  %v2681_v62 = vmul.f32 %v9102_v10, %v10721_v53  ;;  %v10722_v46 = vld [vmem:[#allocation120_spill] sm:$0xff]  ;;  %4923 = vrcp.f32 %v10723_v30  ;;  %v2515_v40 = vadd.f32 %v2483_v49, %v2451_v55  ;;  %v10724_v44 = vld [vmem:[#allocation118_spill] sm:$0xff] }
 0x3c1   : > { %v2705_v61 = vadd.f32 %v2673_v7, %v2641_v27  ;;  %v2685_v57 = vmul.f32 %v9121_v34, %v10722_v46  ;;  %v2677_v17 = vmul.f32 %v9147_v47, %v10724_v44  ;;  %v10725_v63 = vld [vmem:[#allocation121_spill] sm:$0xff]  ;;  %v10726_v2 = vld [vmem:[#allocation176_spill] sm:$0xff]  ;;  %2729 = vst.msk [vmem:[#allocation2] sm:$0xff] %vm520_vm0, %v2697_v37  ;;  %v10728_v34 = vld [vmem:[#allocation55_spill] sm:$0xff] }
 0x3c2   : > { %v2689_v26 = vmul.f32 %v9130_v52, %v10725_v63  ;;  %4925 = vrcp.f32 %v10726_v2  ;;  %v10727_v6 = vld [vmem:[#allocation49_spill] sm:$0xff]  ;;  %2733 = vst.msk [vmem:[#allocation2 + $0x20] sm:$0xff] %vm520_vm0, %v2701_v15  ;;  %v2455_v10 = vld [vmem:[#allocation2 + $0xf8] sm:$0xff]  ;;  %v2680_v33 = vmul.f32 %v9175_v58, %v10728_v34  ;;  %v3615_v52 = vpop.xlane.xlu1 %3614  ;;  %2547 = vst.msk [vmem:[#allocation2 + $0xd8] sm:$0xff] %vm520_vm0, %v2515_v40 }
 0x3c3   : > { %v2676_v32 = vmul.f32 %v2628_v35, %v10727_v6  ;;  %2737 = vst.msk [vmem:[#allocation2 + $0x40] sm:$0xff] %vm520_vm0, %v2705_v61  ;;  %4927 = vrcp.f32 %v8903_v56  ;;  %v10729_v9 = vld [vmem:[#allocation64_spill] sm:$0xff]  ;;  %v2645_v60 = vld [vmem:[#allocation2 + $0x60] sm:$0xff]  ;;  %v2519_v50 = vadd.f32 %v2487_v43, %v2455_v10  ;;  %v10730_v23 = vld [vmem:[#allocation122_spill] sm:$0xff] }
 0x3c4   : > { %v2684_v1 = vmul.f32 %v8954_v16, %v10729_v9  ;;  %v2693_v21 = vmul.f32 %v9147_v47, %v10730_v23  ;;  %v10731_v14 = vld [vmem:[#allocation65_spill] sm:$0xff]  ;;  %4929 = vrcp.f32 %v3615_v52  ;;  %v2709_v41 = vadd.f32 %v2677_v17, %v2645_v60  ;;  %v4912_v3 = vpop.eup %4911  ;;  %v2644_v11 = vld [vmem:[#allocation2 + $0x58] sm:$0xff]  ;;  %v4690_v17 = vpop.f32.mrb[28].mxu0 }
 0x3c5   : > { %v2688_v12 = vmul.f32 %v8958_v18, %v10731_v14  ;;  %v2649_v56 = vld [vmem:[#allocation2 + $0x80] sm:$0xff]  ;;  %2551 = vst.msk [vmem:[#allocation2 + $0xf8] sm:$0xff] %vm520_vm0, %v2519_v50  ;;  %v4914_v5 = vpop.eup %4913  ;;  %v10732_v43 = vld [vmem:[#allocation28_spill] sm:$0xff]  ;;  %v2708_v37 = vadd.f32 %v2676_v32, %v2644_v11  ;;  %4931 = vrcp.f32 %v9115_v38  ;;  %v4036_v10 = vpop.f32.mrb[29].mxu0  ;;  %v10736_v11 = vld [vmem:[#allocation130_spill] sm:$0xff] }
 0x3c6   : > { %v2653_v7 = vld [vmem:[#allocation2 + $0xa0] sm:$0xff]  ;;  %v2713_v49 = vadd.f32 %v2681_v62, %v2649_v56  ;;  %v4138_v27 = vmul.f32 %v4912_v3, %v10732_v43  ;;  %2741 = vst.msk [vmem:[#allocation2 + $0x60] sm:$0xff] %vm520_vm0, %v2709_v41  ;;  %v2648_v47 = vld [vmem:[#allocation2 + $0x78] sm:$0xff]  ;;  %v4916_v55 = vpop.eup %4915  ;;  %v4691_v60 = vpop.f32.mrb[30].mxu0  ;;  %v4154_v23 = vmul.f32 %v4914_v5, %v9052_v39  ;;  %4933 = vrcp.f32 %v10736_v11 }
 0x3c7   : > { %v2717_v19 = vadd.f32 %v2685_v57, %v2653_v7  ;;  %v2657_v16 = vld [vmem:[#allocation2 + $0xc0] sm:$0xff]  ;;  %v2652_v18 = vld [vmem:[#allocation2 + $0x98] sm:$0xff]  ;;  %v2712_v30 = vadd.f32 %v2680_v33, %v2648_v47  ;;  %v4918_v40 = vpop.eup %4917  ;;  %2740 = vst.msk [vmem:[#allocation2 + $0x58] sm:$0xff] %vm520_vm0, %v2708_v37  ;;  %4935 = vrcp.f32 %v8901_v4 }
 0x3c8   : > { %v2661_v8 = vld [vmem:[#allocation2 + $0xe0] sm:$0xff]  ;;  %v2721_v15 = vadd.f32 %v2689_v26, %v2657_v16  ;;  %v10733_v53 = vld [vmem:[#allocation68_spill] sm:$0xff]  ;;  %2745 = vst.msk [vmem:[#allocation2 + $0x80] sm:$0xff] %vm520_vm0, %v2713_v49  ;;  %v2716_v62 = vadd.f32 %v2684_v1, %v2652_v18  ;;  %v4920_v63 = vpop.eup %4919  ;;  %v9219_v38 = vmul.f32 %v4918_v40, %v4690_v17  ;;  %v3627_v49 = vpop.xlane.xlu1 %3626  ;;  %4937 = vrcp.f32 %v9156_v51  ;;  %v4195_v51 = vld [vmem:[#allocation2 + $0xc8] sm:$0xff] }
 0x3c9   : > { %v2725_v61 = vadd.f32 %v2693_v21, %v2661_v8  ;;  %v2692_v46 = vmul.f32 %v2628_v35, %v10733_v53  ;;  %2749 = vst.msk [vmem:[#allocation2 + $0xa0] sm:$0xff] %vm520_vm0, %v2717_v19  ;;  %v2656_v57 = vld [vmem:[#allocation2 + $0xb8] sm:$0xff]  ;;  %v4170_v2 = vld [vmem:[#allocation2] sm:$0xff]  ;;  %2744 = vst.msk [vmem:[#allocation2 + $0x78] sm:$0xff] %vm520_vm0, %v2712_v30  ;;  %v4922_v34 = vpop.eup %4921  ;;  %v4158_v21 = vmul.f32 %v4920_v63, %v9085_v13  ;;  %4939 = vrcp.f32 %v3627_v49 }
 0x3ca   : > { %v2720_v44 = vadd.f32 %v2688_v12, %v2656_v57  ;;  %2753 = vst.msk [vmem:[#allocation2 + $0xc0] sm:$0xff] %vm520_vm0, %v2721_v15  ;;  %v10734_v35 = vld [vmem:[#allocation76_spill] sm:$0xff]  ;;  %v4174_v6 = vld [vmem:[#allocation2 + $0x20] sm:$0xff]  ;;  %2748 = vst.msk [vmem:[#allocation2 + $0x98] sm:$0xff] %vm520_vm0, %v2716_v62  ;;  %v4202_v33 = vadd.f32 %v4170_v2, %v4138_v27  ;;  %v4924_v50 = vpop.eup %4923  ;;  %v4039_v12 = vpop.f32.mrb[31].mxu0  ;;  %v4153_v13 = vmul.f32 %v4922_v34, %v8986_v0 }
 0x3cb   : > { %2757 = vst.msk [vmem:[#allocation2 + $0xe0] sm:$0xff] %vm520_vm0, %v2725_v61  ;;  %v2696_v26 = vmul.f32 %v9175_v58, %v10734_v35  ;;  %v4178_v32 = vld [vmem:[#allocation2 + $0x40] sm:$0xff]  ;;  %v10735_v9 = vld [vmem:[#allocation32_spill] sm:$0xff]  ;;  %v4162_v56 = vmul.f32 %v4924_v50, %v4036_v10  ;;  %v10742_v50 = vld [vmem:[#allocation127_spill] sm:$0xff] }
 0x3cc   : > { %v4206_v1 = vadd.f32 %v4174_v6, %v10735_v9  ;;  %v4210_v52 = vadd.f32 %v4178_v32, %v8946_v42  ;;  %2752 = vst.msk [vmem:[#allocation2 + $0xb8] sm:$0xff] %vm520_vm0, %v2720_v44  ;;  %v2660_v58 = vld [vmem:[#allocation2 + $0xd8] sm:$0xff]  ;;  %v4926_v41 = vpop.eup %4925  ;;  %4234 = vst.msk [vmem:[%s8842_s8] sm:$0xff] %vm520_vm0, %v4202_v33  ;;  %v4149_v42 = vmul.f32 %v4916_v55, %v8948_v24  ;;  %v2590_v61 = vpop.permute.xlu1 %2589  ;;  %v10739_v6 = vld [vmem:[#allocation123_spill] sm:$0xff] }
 0x3cd   : > { %v2724_v14 = vadd.f32 %v2692_v46, %v2660_v58  ;;  %v2664_v7 = vld [vmem:[#allocation2 + $0xf8] sm:$0xff]  ;;  %v4928_v3 = vpop.eup %4927  ;;  %v4182_v39 = vld [vmem:[#allocation2 + $0x60] sm:$0xff]  ;;  %v4157_v19 = vmul.f32 %v4926_v41, %v9064_v59  ;;  %v2619_v62 = vmul.f32 %v10664_v25, %v2590_v61  ;;  %v2623_v57 = vmul.f32 %v10665_v48, %v2590_v61  ;;  %v2635_v25 = vld [vmem:[#allocation2 + $0x10] sm:$0xff] }
 0x3ce   : > { %4238 = vst.msk [vmem:[%s8842_s8 + $0x20] sm:$0xff] %vm520_vm0, %v4206_v1  ;;  %4242 = vst.msk [vmem:[%s8842_s8 + $0x40] sm:$0xff] %vm520_vm0, %v4210_v52  ;;  %v2728_v16 = vadd.f32 %v2696_v26, %v2664_v7  ;;  %v4930_v8 = vpop.eup %4929  ;;  %v4214_v24 = vadd.f32 %v4182_v39, %v8992_v36  ;;  %v4161_v27 = vmul.f32 %v4928_v3, %v9092_v54  ;;  %v4181_v37 = vld [vmem:[#allocation2 + $0x58] sm:$0xff]  ;;  %v2639_v48 = vld [vmem:[#allocation2 + $0x30] sm:$0xff] }
 0x3cf   : > { %2756 = vst.msk [vmem:[#allocation2 + $0xd8] sm:$0xff] %vm520_vm0, %v2724_v14  ;;  %v4186_v5 = vld [vmem:[#allocation2 + $0x80] sm:$0xff]  ;;  %v4163_v18 = vmul.f32 %v4930_v8, %v4039_v12  ;;  %v4213_v15 = vadd.f32 %v4181_v37, %v4149_v42  ;;  %v4932_v30 = vpop.eup %4931  ;;  %v2627_v40 = vmul.f32 %v10709_v31, %v2590_v61  ;;  %v2631_v44 = vmul.f32 %v10715_v29, %v2590_v61  ;;  %v10737_v26 = vld [vmem:[#allocation135_spill] sm:$0xff]  ;;  %v10738_v2 = vld [vmem:[#allocation136_spill] sm:$0xff] }
 0x3d0   : > { %v4190_v43 = vld [vmem:[#allocation2 + $0xa0] sm:$0xff]  ;;  %v4218_v0 = vadd.f32 %v4186_v5, %v4154_v23  ;;  %2760 = vst.msk [vmem:[#allocation2 + $0xf8] sm:$0xff] %vm520_vm0, %v2728_v16  ;;  %4246 = vst.msk [vmem:[%s8842_s8 + $0x60] sm:$0xff] %vm520_vm0, %v4214_v24  ;;  %v4185_v4 = vld [vmem:[#allocation2 + $0x78] sm:$0xff]  ;;  %v4165_v35 = vmul.f32 %v4932_v30, %v4691_v60  ;;  %v2667_v31 = vmul.f32 %v2619_v62, %v10737_v26  ;;  %v4934_v39 = vpop.eup %4933  ;;  %v4698_v5 = vpop.f32.mrb[28].mxu1 }
 0x3d1   : > { %v4222_v59 = vadd.f32 %v4190_v43, %v4158_v21  ;;  %v4194_v47 = vld [vmem:[#allocation2 + $0xc0] sm:$0xff]  ;;  %v4189_v36 = vld [vmem:[#allocation2 + $0x98] sm:$0xff]  ;;  %v4217_v55 = vadd.f32 %v4185_v4, %v4153_v13  ;;  %v4227_v46 = vadd.f32 %v4195_v51, %v4163_v18  ;;  %4245 = vst.msk [vmem:[%s8842_s8 + $0x58] sm:$0xff] %vm520_vm0, %v4213_v15  ;;  %v2671_v29 = vmul.f32 %v2623_v57, %v10738_v2  ;;  %v2643_v33 = vld [vmem:[#allocation2 + $0x50] sm:$0xff]  ;;  %v4936_v43 = vpop.eup %4935 }
 0x3d2   : > { %v4226_v54 = vadd.f32 %v4194_v47, %v4162_v56  ;;  %4250 = vst.msk [vmem:[%s8842_s8 + $0x80] sm:$0xff] %vm520_vm0, %v4218_v0  ;;  %v4221_v53 = vadd.f32 %v4189_v36, %v4157_v19  ;;  %v2675_v32 = vmul.f32 %v2627_v40, %v10739_v6  ;;  %v10740_v10 = vld [vmem:[#allocation124_spill] sm:$0xff]  ;;  %v2647_v9 = vld [vmem:[#allocation2 + $0x70] sm:$0xff]  ;;  %v10741_v52 = vld [vmem:[#allocation126_spill] sm:$0xff]  ;;  %v2687_v23 = vmul.f32 %v2623_v57, %v10742_v50  ;;  %v4091_v0 = vpop.f32.mrb[29].mxu1 }
 0x3d3   : > { %4254 = vst.msk [vmem:[%s8842_s8 + $0xa0] sm:$0xff] %vm520_vm0, %v4222_v59  ;;  %v4193_v17 = vld [vmem:[#allocation2 + $0xb8] sm:$0xff]  ;;  %4249 = vst.msk [vmem:[%s8842_s8 + $0x78] sm:$0xff] %vm520_vm0, %v4217_v55  ;;  %v2679_v34 = vmul.f32 %v2631_v44, %v10740_v10  ;;  %v2651_v1 = vld [vmem:[#allocation2 + $0x90] sm:$0xff]  ;;  %v2683_v58 = vmul.f32 %v2619_v62, %v10741_v52  ;;  %v2699_v7 = vadd.f32 %v2667_v31, %v2635_v25  ;;  %v4938_v59 = vpop.eup %4937  ;;  %v4699_v18 = vpop.f32.mrb[30].mxu1 }
 0x3d4   : > { %4258 = vst.msk [vmem:[%s8842_s8 + $0xc0] sm:$0xff] %vm520_vm0, %v4226_v54  ;;  %4253 = vst.msk [vmem:[%s8842_s8 + $0x98] sm:$0xff] %vm520_vm0, %v4221_v53  ;;  %v4225_v63 = vadd.f32 %v4193_v17, %v4161_v27  ;;  %v10743_v60 = vld [vmem:[#allocation128_spill] sm:$0xff]  ;;  %v10744_v14 = vld [vmem:[#allocation129_spill] sm:$0xff]  ;;  %v2703_v3 = vadd.f32 %v2671_v29, %v2639_v48  ;;  %v2707_v11 = vadd.f32 %v2675_v32, %v2643_v33  ;;  %v4940_v15 = vpop.eup %4939  ;;  %v4094_v54 = vpop.f32.mrb[31].mxu1 }
 0x3d5   : > { %4259 = vst.msk [vmem:[%s8842_s8 + $0xc8] sm:$0xff] %vm520_vm0, %v4227_v46  ;;  %v2691_v21 = vmul.f32 %v2627_v40, %v10743_v60  ;;  %v2695_v12 = vmul.f32 %v2631_v44, %v10744_v14  ;;  %v2655_v41 = vld [vmem:[#allocation2 + $0xb0] sm:$0xff]  ;;  %v2711_v49 = vadd.f32 %v2679_v34, %v2647_v9  ;;  %v2715_v13 = vadd.f32 %v2683_v58, %v2651_v1  ;;  %v4198_v4 = vld [vmem:[#allocation2 + $0xe0] sm:$0xff]  ;;  %v4199_v46 = vld [vmem:[#allocation2 + $0xe8] sm:$0xff] }
 0x3d6   : > { %4257 = vst.msk [vmem:[%s8842_s8 + $0xb8] sm:$0xff] %vm520_vm0, %v4225_v63  ;;  %v2659_v42 = vld [vmem:[#allocation2 + $0xd0] sm:$0xff]  ;;  %v2719_v19 = vadd.f32 %v2687_v23, %v2655_v41  ;;  %v4197_v24 = vld [vmem:[#allocation2 + $0xd8] sm:$0xff]  ;;  %2731 = vst.msk [vmem:[#allocation2 + $0x10] sm:$0xff] %vm520_vm0, %v2699_v7  ;;  %v4168_v37 = vmul.f32 %v4934_v39, %v4698_v5  ;;  %v4166_v47 = vmul.f32 %v4936_v43, %v4091_v0 }
 0x3d7   : > { %v2663_v56 = vld [vmem:[#allocation2 + $0xf0] sm:$0xff]  ;;  %v2723_v16 = vadd.f32 %v2691_v21, %v2659_v42  ;;  %2735 = vst.msk [vmem:[#allocation2 + $0x30] sm:$0xff] %vm520_vm0, %v2703_v3  ;;  %2739 = vst.msk [vmem:[#allocation2 + $0x50] sm:$0xff] %vm520_vm0, %v2707_v11  ;;  %v4229_v27 = vadd.f32 %v4197_v24, %v4165_v35  ;;  %v4169_v36 = vmul.f32 %v4938_v59, %v4699_v18  ;;  %v4201_v61 = vld [vmem:[#allocation2 + $0xf8] sm:$0xff] }
 0x3d8   : > { %v2727_v8 = vadd.f32 %v2695_v12, %v2663_v56  ;;  %2743 = vst.msk [vmem:[#allocation2 + $0x70] sm:$0xff] %vm520_vm0, %v2711_v49  ;;  %2747 = vst.msk [vmem:[#allocation2 + $0x90] sm:$0xff] %vm520_vm0, %v2715_v13  ;;  %v4230_v51 = vadd.f32 %v4198_v4, %v4166_v47  ;;  %v4167_v55 = vmul.f32 %v4940_v15, %v4094_v54  ;;  %v10745_v44 = vld [vmem:[#allocation131_spill] sm:$0xff]  ;;  %v10746_v63 = vld [vmem:[#allocation174_spill] sm:$0xff] }
 0x3d9   : > { %2751 = vst.msk [vmem:[#allocation2 + $0xb0] sm:$0xff] %vm520_vm0, %v2719_v19  ;;  %2755 = vst.msk [vmem:[#allocation2 + $0xd0] sm:$0xff] %vm520_vm0, %v2723_v16  ;;  %v4233_v53 = vadd.f32 %v4201_v61, %v4169_v36 }
 0x3da   : > { %2759 = vst.msk [vmem:[#allocation2 + $0xf0] sm:$0xff] %vm520_vm0, %v2727_v8  ;;  %4261 = vst.msk [vmem:[%s8842_s8 + $0xd8] sm:$0xff] %vm520_vm0, %v4229_v27  ;;  %v4231_v30 = vadd.f32 %v4199_v46, %v4167_v55 }
 0x3db   : > { %4262 = vst.msk [vmem:[%s8842_s8 + $0xe0] sm:$0xff] %vm520_vm0, %v4230_v51  ;;  %4265 = vst.msk [vmem:[%s8842_s8 + $0xf8] sm:$0xff] %vm520_vm0, %v4233_v53 }
 0x3dc   : > { %4263 = vst.msk [vmem:[%s8842_s8 + $0xe8] sm:$0xff] %vm520_vm0, %v4231_v30 }
 0x3dd   : > { %v4172_v62 = vld [vmem:[#allocation2 + $0x10] sm:$0xff] }
 0x3de   : > { %v4176_v57 = vld [vmem:[#allocation2 + $0x30] sm:$0xff]  ;;  %v4204_v17 = vadd.f32 %v4172_v62, %v10745_v44 }
 0x3df   : > { %v4180_v40 = vld [vmem:[#allocation2 + $0x50] sm:$0xff]  ;;  %v4208_v35 = vadd.f32 %v4176_v57, %v10746_v63 }
 0x3e0   : > { %v4212_v25 = vadd.f32 %v4180_v40, %v8939_v20  ;;  %v4184_v48 = vld [vmem:[#allocation2 + $0x70] sm:$0xff]  ;;  %4236 = vst.msk [vmem:[%s8842_s8 + $0x10] sm:$0xff] %vm520_vm0, %v4204_v17 }
 0x3e1   : > { %v4188_v26 = vld [vmem:[#allocation2 + $0x90] sm:$0xff]  ;;  %v4216_v2 = vadd.f32 %v4184_v48, %v8990_v28  ;;  %4240 = vst.msk [vmem:[%s8842_s8 + $0x30] sm:$0xff] %vm520_vm0, %v4208_v35 }
 0x3e2   : > { %v4192_v31 = vld [vmem:[#allocation2 + $0xb0] sm:$0xff]  ;;  %v4220_v29 = vadd.f32 %v4188_v26, %v9050_v45  ;;  %4244 = vst.msk [vmem:[%s8842_s8 + $0x50] sm:$0xff] %vm520_vm0, %v4212_v25 }
 0x3e3   : > { %v4224_v6 = vadd.f32 %v4192_v31, %v9082_v22  ;;  %v4196_v32 = vld [vmem:[#allocation2 + $0xd0] sm:$0xff]  ;;  %4248 = vst.msk [vmem:[%s8842_s8 + $0x70] sm:$0xff] %vm520_vm0, %v4216_v2 }
 0x3e4   : > { %v4200_v10 = vld [vmem:[#allocation2 + $0xf0] sm:$0xff]  ;;  %v4228_v20 = vadd.f32 %v4196_v32, %v9219_v38  ;;  %4252 = vst.msk [vmem:[%s8842_s8 + $0x90] sm:$0xff] %vm520_vm0, %v4220_v29 }
 0x3e5   : > { %v4232_v28 = vadd.f32 %v4200_v10, %v4168_v37  ;;  %4256 = vst.msk [vmem:[%s8842_s8 + $0xb0] sm:$0xff] %vm520_vm0, %v4224_v6 }
 0x3e6   : > { %4260 = vst.msk [vmem:[%s8842_s8 + $0xd0] sm:$0xff] %vm520_vm0, %v4228_v20 }
 0x3e7   : > { %4264 = vst.msk [vmem:[%s8842_s8 + $0xf0] sm:$0xff] %vm520_vm0, %v4232_v28 }
 0x3e8   : > { %5176 = shalt.err (!%p5173_p5)
}
 0x3e9   : > { %s5177_s26 = scalar_lea.hbm %s9299_s12, 4096  ;;  %s5181_s29 = scalar_lea.hbm %s10747_s9, 8192 }
 0x3ea   : > { %p5178_p8 = scmp.ne.s32.totalorder %s9299_s12, %s5177_s26  ;;  %p5182_p11 = scmp.lt.u32.totalorder %s9299_s12, %s10747_s9 }
 0x3eb   : > { %p5183_p13 = scmp.lt.u32.totalorder %s5181_s29, %s5177_s26  ;;  %p5185_p7 = scmp.lt.u32.totalorder %s5177_s26, %s9299_s12 }
 0x3ec   : > { %p5179_p1 = pnand %p5178_p8, %p10749_p12 }
 0x3ed   : > { %p5184_p3 = por %p5183_p13, %p5182_p11 }
 0x3ee   : > { %p5180_p0 = pneg %p5179_p1 }
 0x3ef   : > { %p5186_p2 = por %p5185_p7, %p5184_p3 }
 0x3f1   : > { %p5187_p9 = pnand %p5186_p2, %p5180_p0 }
 0x3f3   : > { %5190 = shalt.err (!%p5187_p9)
}
 0x3f4   : > { %s5256_s1 = smov 128   ;;  %s5257_s11 = smov 8  }
 0x3f5   : > { %4734 = dma.vmem_to_hbm [thread:$0]  (%p10749_p12), %s9301_s14, 4096, %s9299_s12, %s4267_s30, %s5256_s1, %s5256_s1, %s5257_s11  }
 0x3f6 PF: > { %s10750_s7 = sld [smem:[#allocation20_spill]]  ;;  %s10751_s18 = sld [smem:[#allocation25_spill]] }
 0x3f7   : > { %s10752_s16 = sld [smem:[#allocation21_spill]] }
 0x3fc   : > { %s4296_s8 = sand.u32 1, %s10750_s7   ;;  %p10753_p10 = scmp.ne.s32.totalorder %s10751_s18, 0 }
 0x3fd   : > { %p10754_p6 = scmp.ge.s32.totalorder %s10752_s16, 2  ;;  %s4297_s10 = scalar_lea.sflag [#allocation5], %s4296_s8 }
 0x3ff   : > { %p4757_p4 = pnand %p10754_p6, %p10753_p10 }
 0x401   : > { %5224 = dma.done.wait (!%p4757_p4), %s4297_s10, 4096  }
 0x402   : > { %5226 = vsyncadd (!%p4757_p4), %s4297_s10, 4294963200  ;;  %s10755_s24 = sld [smem:[#allocation22_spill]]  ;;  %s10756_s25 = sld [smem:[#allocation23_spill]] }
 0x403   : > { %s10757_s21 = smov %s5233_s22  ;;  %s10758_s22 = smov %s5237_s23 }
 0x408   : > { %p24_p5 = scmp.ge.s32.totalorder %s10755_s24, 4   ;;  %s10759_s23 = smov %s10756_s25 }
 0x40a   :  { %26 = sbr.rel (!%p24_p5) target bundleno = 13 (0xd), region = 125 }
 0x411   :  { %4302 = vsyncpa [#allocation4], 1 }
 0x412   :  { %4304 = vsyncpa [#allocation4 + $0x1], 1 }
 0x413   :  { %4305 = vsyncpa [#allocation7], 1 }
 0x414   :  { %4307 = vsyncpa [#allocation7 + $0x1], 1 }
 0x415   :  { %4308 = vsyncpa [#allocation10], 1 }
 0x416   :  { %4309 = vsyncpa [#allocation13], 1 }
 0x417   :  { %4310 = vsyncpa [#allocation5], 1 }
 0x418   :  { %4312 = vsyncpa [#allocation5 + $0x1], 1 }

</bundles_post_ra>
